<compile_context>
chip_gen: v6e
topology: v6e:2x2x1
jax: 0.10.0
libtpu: 0.0.40
codegen_flags: <defaults>
</compile_context>

<pallas_src>
import functools

import jax
import jax.numpy as jnp
from jax.experimental import pallas as pl
from jax.experimental.pallas import tpu as pltpu

_VMEM_LIMIT = 32 * 1024 * 1024


def _round_up(x, m):
    return (x + m - 1) // m * m


# ----------------------------- Pallas kernels ------------------------------

def _conv_tap_kernel(x_ref, w_ref, b_ref, o_ref, acc_ref, *,
                     offsets, oh, ow, wrow, lacc_p):
    """Direct conv for one image: len(offsets) shifted contiguous matmuls
    accumulated in f32 VMEM scratch (bias folded into the first tap), then the
    valid rows are copied into the lane-dense NHWC output.

    x_ref : (1, Lbuf, Cbuf)     flattened (phase-split / tap-packed) input
    w_ref : (T, Cbuf, Cout_p)   prepacked weights (tap-major)
    b_ref : (1, Cout_p)
    o_ref : (1, OH, OW, Cout_p)
    acc   : (lacc_p, Cout_p) f32 scratch
    """
    acc_ref[...] = (jnp.dot(x_ref[0, pl.ds(offsets[0], lacc_p), :], w_ref[0],
                            preferred_element_type=jnp.float32)
                    + b_ref[...].astype(jnp.float32))
    for t in range(1, len(offsets)):
        acc_ref[...] += jnp.dot(x_ref[0, pl.ds(offsets[t], lacc_p), :], w_ref[t],
                                preferred_element_type=jnp.float32)
    for r in range(oh):
        o_ref[0, r, :, :] = acc_ref[pl.ds(r * wrow, ow), :].astype(o_ref.dtype)


def _pool_tap_kernel(x_ref, o_ref, acc_ref, *, offsets, oh, ow, wrow, lacc_p):
    """MaxPool for one image: running max over the 9 taps (pure VPU work)."""
    acc_ref[...] = x_ref[0, pl.ds(offsets[0], lacc_p), :]
    for t in range(1, len(offsets)):
        acc_ref[...] = jnp.maximum(acc_ref[...],
                                   x_ref[0, pl.ds(offsets[t], lacc_p), :])
    for r in range(oh):
        o_ref[0, r, :, :] = acc_ref[pl.ds(r * wrow, ow), :]


# ------------------------------- tap planning ------------------------------

def _tap_plan(x, k, stride, padding, pad_value):
    """Unpacked plan: flatten (and, for stride>1, phase-split) the NHWC input
    so every (kh, kw) tap becomes a contiguous row slice of one VMEM buffer.

    Output (oh_, ow_) lives at accumulator row oh_*wph + ow_; tap (i, j)
    contributes buffer rows [offset_t : offset_t + lacc).  Accumulator rows
    that wrap across image rows are junk and are simply never copied out.
    """
    if padding:
        x = jnp.pad(x, ((0, 0), (padding, padding), (padding, padding), (0, 0)))
    n, h, w, c = x.shape
    s = stride
    oh = (h - k) // s + 1
    ow = (w - k) // s + 1
    hph = -(-h // s)
    wph = -(-w // s)
    lph = hph * wph
    lacc = (oh - 1) * wph + ow
    lacc_p = _round_up(lacc, 8)
    if s == 1:
        buf = x.reshape(n, lph, c)
    else:  # space-to-depth phase split: strided taps become contiguous slices
        phases = []
        for p in range(s):
            for q in range(s):
                ph = x[:, p::s, q::s, :]
                ph = jnp.pad(ph, ((0, 0), (0, hph - ph.shape[1]),
                                  (0, wph - ph.shape[2]), (0, 0)),
                             constant_values=pad_value)
                phases.append(ph.reshape(n, lph, c))
        buf = jnp.concatenate(phases, axis=1)
    offsets = []
    for i in range(k):
        for j in range(k):
            offsets.append(((i % s) * s + (j % s)) * lph
                           + (i // s) * wph + (j // s))
    lbuf = _round_up(max(buf.shape[1], max(offsets) + lacc_p), 8)
    buf = jnp.pad(buf, ((0, 0), (0, lbuf - buf.shape[1]), (0, 0)),
                  constant_values=pad_value)
    return buf, tuple(offsets), oh, ow, wph, lacc_p


def _packed_tap_plan(x, k, stride, padding):
    """Packed plan (used when k*Cin <= 128): the kw taps are packed into the
    lane dim, so only kh shifted matmuls are needed.

    For phase p (row phase, stride s) and tap column j, lane block j at
    within-phase position (rp, cc) holds x[s*rp + p, s*cc + j].  Tap i then
    reads buffer rows offset_i + acc_row with offset_i = (i%s)*lph + (i//s)*wph
    and acc_row = oh_*wph + ow_ for output (oh_, ow_).
    """
    if padding:
        x = jnp.pad(x, ((0, 0), (padding, padding), (padding, padding), (0, 0)))
    n, h, w, c = x.shape
    s = stride
    oh = (h - k) // s + 1
    ow = (w - k) // s + 1
    hph = -(-h // s)
    wph = -(-w // s)
    lph = hph * wph
    phases = []
    for p in range(s):
        blocks = []
        for j in range(k):
            blk = x[:, p::s, j::s, :]
            blk = jnp.pad(blk, ((0, 0), (0, hph - blk.shape[1]),
                                (0, wph - blk.shape[2]), (0, 0)))
            blocks.append(blk)
        phases.append(jnp.concatenate(blocks, axis=-1).reshape(n, lph, k * c))
    buf = phases[0] if s == 1 else jnp.concatenate(phases, axis=1)
    kc_p = _round_up(k * c, 128)
    buf = jnp.pad(buf, ((0, 0), (0, 0), (0, kc_p - k * c)))
    offsets = tuple((i % s) * lph + (i // s) * wph for i in range(k))
    lacc = (oh - 1) * wph + ow
    lacc_p = _round_up(lacc, 8)
    lbuf = _round_up(max(buf.shape[1], max(offsets) + lacc_p), 8)
    buf = jnp.pad(buf, ((0, 0), (0, lbuf - buf.shape[1]), (0, 0)))
    return buf, offsets, oh, ow, wph, lacc_p


# ------------------------------- layer glue --------------------------------

def _run_conv(buf, w, b, offsets, oh, ow, wrow, lacc_p, out_dtype):
    n, lbuf, cbuf = buf.shape
    taps, cdim, cout_p = w.shape
    assert taps == len(offsets) and cdim == cbuf, (w.shape, buf.shape, offsets)
    kernel = functools.partial(_conv_tap_kernel, offsets=offsets, oh=oh, ow=ow,
                               wrow=wrow, lacc_p=lacc_p)
    return pl.pallas_call(
        kernel,
        out_shape=jax.ShapeDtypeStruct((n, oh, ow, cout_p), out_dtype),
        grid=(n,),
        in_specs=[
            pl.BlockSpec((1, lbuf, cbuf), lambda i: (i, 0, 0)),
            pl.BlockSpec((taps, cdim, cout_p), lambda i: (0, 0, 0)),
            pl.BlockSpec((1, cout_p), lambda i: (0, 0)),
        ],
        out_specs=pl.BlockSpec((1, oh, ow, cout_p), lambda i: (i, 0, 0, 0)),
        scratch_shapes=[pltpu.VMEM((lacc_p, cout_p), jnp.float32)],
        compiler_params=pltpu.CompilerParams(
            dimension_semantics=("parallel",),
            vmem_limit_bytes=_VMEM_LIMIT),
    )(buf, w, b)


def conv2d(x, w, b, *, cin_real, k, stride=1, padding=0, packed=False):
    """x: NHWC (lane-padded or raw); w: prepacked (T, Cbuf, Cout_p); b: (1, Cout_p)."""
    if packed:
        x = x[..., :cin_real]
        buf, offsets, oh, ow, wrow, lacc_p = _packed_tap_plan(x, k, stride, padding)
    else:
        assert x.shape[-1] == w.shape[1], (x.shape, w.shape)
        buf, offsets, oh, ow, wrow, lacc_p = _tap_plan(x, k, stride, padding, 0.0)
    return _run_conv(buf, w, b, offsets, oh, ow, wrow, lacc_p, x.dtype)


def maxpool2d(x, k=3, stride=2):
    """PyTorch MaxPool2d(k, stride, ceil_mode=True, padding=0) on NHWC input."""
    n, h, w, c = x.shape
    oh = -(-(h - k) // stride) + 1
    ow = -(-(w - k) // stride) + 1
    # PyTorch ceil_mode rule: the last window must start inside the input.
    if (oh - 1) * stride >= h:
        oh -= 1
    if (ow - 1) * stride >= w:
        ow -= 1
    hn = (oh - 1) * stride + k
    wn = (ow - 1) * stride + k
    if jnp.issubdtype(x.dtype, jnp.floating):
        neg = float(jnp.finfo(x.dtype).min)
    else:
        neg = int(jnp.iinfo(x.dtype).min)
    if hn > h or wn > w:
        x = jnp.pad(x, ((0, 0), (0, hn - h), (0, wn - w), (0, 0)),
                    constant_values=neg)
    buf, offsets, oh2, ow2, wrow, lacc_p = _tap_plan(x, k, stride, 0, neg)
    assert (oh2, ow2) == (oh, ow)
    n, lbuf, _ = buf.shape
    kernel = functools.partial(_pool_tap_kernel, offsets=offsets, oh=oh, ow=ow,
                               wrow=wrow, lacc_p=lacc_p)
    return pl.pallas_call(
        kernel,
        out_shape=jax.ShapeDtypeStruct((n, oh, ow, c), x.dtype),
        grid=(n,),
        in_specs=[pl.BlockSpec((1, lbuf, c), lambda i: (i, 0, 0))],
        out_specs=pl.BlockSpec((1, oh, ow, c), lambda i: (i, 0, 0, 0)),
        scratch_shapes=[pltpu.VMEM((lacc_p, c), x.dtype)],
        compiler_params=pltpu.CompilerParams(
            dimension_semantics=("parallel",),
            vmem_limit_bytes=_VMEM_LIMIT),
    )(buf)


# ------------------------------ model setup --------------------------------

_LAYER_CFG = [
    # (Cin, Cout, k, stride, padding)
    (3, 32, 3, 2, 0),     # conv1
    (32, 32, 3, 1, 0),    # conv2
    (32, 64, 3, 1, 1),    # conv3
    (64, 80, 3, 1, 0),    # conv4
    (80, 192, 3, 2, 0),   # conv5
    (192, 288, 3, 1, 1),  # conv6
]
_POOL_AFTER = 3  # maxpool1 follows conv3


def _is_packed(cin, k):
    return k * cin <= 128


def init_params(key):
    """PyTorch-shaped params (HWIO weights), Kaiming-uniform-like bounds."""
    params = []
    for idx, (cin, cout, k, _, _) in enumerate(_LAYER_CFG):
        kw_key, kb_key = jax.random.split(jax.random.fold_in(key, idx))
        bound = 1.0 / (cin * k * k) ** 0.5
        w = jax.random.uniform(kw_key, (k, k, cin, cout), jnp.float32, -bound, bound)
        b = jax.random.uniform(kb_key, (cout,), jnp.float32, -bound, bound)
        params.append((w, b))
    return params


def pack_params(params):
    """One-time prepack to lane-dense layouts.

    Packed layers (k*Cin <= 128): (k,k,Cin,Cout) -> (k, k*Cin -> 128, Cout_p)
    with the kw tap folded into the input-lane dim.
    Other layers: (k,k,Cin,Cout) -> (k*k, Cin_p, Cout_p).  Bias -> (1, Cout_p).
    """
    packed = []
    for (w, b), (cin, cout, k, _, _) in zip(params, _LAYER_CFG):
        cout_p = _round_up(cout, 128)
        if _is_packed(cin, k):
            kc_p = _round_up(k * cin, 128)
            wp = jnp.pad(w.reshape(k, k * cin, cout),
                         ((0, 0), (0, kc_p - k * cin), (0, cout_p - cout)))
        else:
            cin_p = _round_up(cin, 128)
            wp = jnp.pad(w.reshape(k * k, cin, cout),
                         ((0, 0), (0, cin_p - cin), (0, cout_p - cout)))
        bp = jnp.pad(b, (0, cout_p - cout)).reshape(1, cout_p)
        packed.append((wp, bp))
    return packed


def preconv_forward(x_nchw, packed_params):
    """NCHW in -> NCHW out (matches the PyTorch module)."""
    x = jnp.transpose(x_nchw, (0, 2, 3, 1))                       # NHWC
    for li, ((w, b), (cin, cout, k, stride, padding)) in enumerate(
            zip(packed_params, _LAYER_CFG)):
        packed = _is_packed(cin, k)
        if not packed and x.shape[-1] != w.shape[1]:
            x = jnp.pad(x, ((0, 0),) * 3 + ((0, w.shape[1] - x.shape[-1]),))
        x = conv2d(x, w, b, cin_real=cin, k=k, stride=stride,
                   padding=padding, packed=packed)
        if li == _POOL_AFTER - 1:
            x = maxpool2d(x, k=3, stride=2)
    x = x[..., :_LAYER_CFG[-1][1]]                                # unpad channels once
    return jnp.transpose(x, (0, 3, 1, 2))


# ------------------------------ XLA reference -------------------------------

def _reference_forward(x_nchw, params):
    x = jnp.transpose(x_nchw, (0, 2, 3, 1))
    for li, ((w, b), (_, _, _, stride, padding)) in enumerate(zip(params, _LAYER_CFG)):
        x = jax.lax.conv_general_dilated(
            x, w, window_strides=(stride, stride),
            padding=[(padding, padding)] * 2,
            dimension_numbers=("NHWC", "HWIO", "NHWC"),
            precision=jax.lax.Precision.HIGHEST) + b
        if li == _POOL_AFTER - 1:
            n, h, wdim, c = x.shape
            oh = -(-(h - 3) // 2) + 1
            ow = -(-(wdim - 3) // 2) + 1
            if (oh - 1) * 2 >= h:
                oh -= 1
            if (ow - 1) * 2 >= wdim:
                ow -= 1
            ph, pw = (oh - 1) * 2 + 3 - h, (ow - 1) * 2 + 3 - wdim
            x = jax.lax.reduce_window(
                x, -jnp.inf, jax.lax.max, (1, 3, 3, 1), (1, 2, 2, 1),
                [(0, 0), (0, max(ph, 0)), (0, max(pw, 0)), (0, 0)])
    return jnp.transpose(x, (0, 3, 1, 2))


if __name__ == "__main__":
    key = jax.random.PRNGKey(0)
    params = init_params(jax.random.fold_in(key, 1))
    packed = pack_params(params)   # prepacked once, outside the forward path
    # spatial=40 is the smallest "nice" size that survives all stride/pool stages
    x = jax.random.normal(jax.random.fold_in(key, 0), (2, 3, 40, 40), jnp.float32)

    fwd = jax.jit(preconv_forward)
    y = fwd(x, packed)
    jax.block_until_ready(y)

    assert y.shape == (2, 288, 2, 2), y.shape
    assert bool(jnp.all(jnp.isfinite(y)))

    y_ref = _reference_forward(x, params)
    err = float(jnp.max(jnp.abs(y - y_ref)))
    assert err < 1e-3, f"max |err| vs XLA reference = {err}"
    print("KERNEL_OK")
</pallas_src>

<mosaic_0001>
module attributes {stable_mosaic.version = 11 : i64} {
  func.func @_conv_tap_kernel(%arg0: i32, %arg1: memref<1x800x128xf32, #tpu.memory_space<vmem>>, %arg2: memref<3x128x128xf32, #tpu.memory_space<vmem>>, %arg3: memref<1x128xf32, #tpu.memory_space<vmem>>, %arg4: memref<1x19x19x128xf32, #tpu.memory_space<vmem>>, %arg5: memref<384x128xf32, #tpu.memory_space<vmem>>) attributes {dimension_semantics = [#tpu.dimension_semantics<parallel>], iteration_bounds = array<i64: 2>, scalar_prefetch = 0 : i64, scratch_operands = 1 : i64, tpu.core_type = #tpu.core_type<tc>, window_params = [{transform_indices = @transform_0, window_bounds = array<i64: 1, 800, 128>}, {pipeline_mode = #tpu.pipeline_mode<synchronous>, transform_indices = @transform_1, window_bounds = array<i64: 3, 128, 128>}, {pipeline_mode = #tpu.pipeline_mode<synchronous>, transform_indices = @transform_2, window_bounds = array<i64: 1, 128>}, {transform_indices = @transform_3, window_bounds = array<i64: 1, 19, 19, 128>}]} {
    %c0 = arith.constant 0 : index
    %c0_0 = arith.constant 0 : index
    %c0_1 = arith.constant 0 : index
    %0 = vector.load %arg1[%c0, %c0_0, %c0_1] : memref<1x800x128xf32, #tpu.memory_space<vmem>>, vector<1x384x128xf32>
    %1 = vector.shape_cast %0 : vector<1x384x128xf32> to vector<384x128xf32>
    %c0_2 = arith.constant 0 : index
    %c0_3 = arith.constant 0 : index
    %c0_4 = arith.constant 0 : index
    %2 = vector.load %arg2[%c0_2, %c0_3, %c0_4] : memref<3x128x128xf32, #tpu.memory_space<vmem>>, vector<1x128x128xf32>
    %3 = vector.shape_cast %2 : vector<1x128x128xf32> to vector<128x128xf32>
    %cst = arith.constant dense<0.000000e+00> : vector<384x128xf32>
    %4 = tpu.matmul %1, %3, %cst {dimension_numbers = #tpu.dot_dimension_numbers<[1], [0], [0], [1], [0, 0, 1, 1], [], []>} : vector<384x128xf32>, vector<128x128xf32>, vector<384x128xf32> -> vector<384x128xf32>
    %c0_5 = arith.constant 0 : index
    %c0_6 = arith.constant 0 : index
    %5 = vector.load %arg3[%c0_5, %c0_6] : memref<1x128xf32, #tpu.memory_space<vmem>>, vector<1x128xf32>
    %6 = vector.broadcast %5 : vector<1x128xf32> to vector<384x128xf32>
    %7 = arith.addf %4, %6 : vector<384x128xf32>
    %c0_7 = arith.constant 0 : index
    %c0_8 = arith.constant 0 : index
    %8 = vector.load %arg5[%c0_7, %c0_8] : memref<384x128xf32, #tpu.memory_space<vmem>>, vector<384x128xf32>
    tpu.vector_store %arg5[%c0_7, %c0_8], %7 {strides = array<i32>} : memref<384x128xf32, #tpu.memory_space<vmem>>, vector<384x128xf32>,
    %c0_9 = arith.constant 0 : index
    %c0_10 = arith.constant 0 : index
    %9 = vector.load %arg5[%c0_9, %c0_10] : memref<384x128xf32, #tpu.memory_space<vmem>>, vector<384x128xf32>
    %c0_11 = arith.constant 0 : index
    %c400 = arith.constant 400 : index
    %c0_12 = arith.constant 0 : index
    %10 = vector.load %arg1[%c0_11, %c400, %c0_12] : memref<1x800x128xf32, #tpu.memory_space<vmem>>, vector<1x384x128xf32>
    %11 = vector.shape_cast %10 : vector<1x384x128xf32> to vector<384x128xf32>
    %c1 = arith.constant 1 : index
    %c0_13 = arith.constant 0 : index
    %c0_14 = arith.constant 0 : index
    %12 = vector.load %arg2[%c1, %c0_13, %c0_14] : memref<3x128x128xf32, #tpu.memory_space<vmem>>, vector<1x128x128xf32>
    %13 = vector.shape_cast %12 : vector<1x128x128xf32> to vector<128x128xf32>
    %cst_15 = arith.constant dense<0.000000e+00> : vector<384x128xf32>
    %14 = tpu.matmul %11, %13, %cst_15 {dimension_numbers = #tpu.dot_dimension_numbers<[1], [0], [0], [1], [0, 0, 1, 1], [], []>} : vector<384x128xf32>, vector<128x128xf32>, vector<384x128xf32> -> vector<384x128xf32>
    %15 = arith.addf %9, %14 : vector<384x128xf32>
    %c0_16 = arith.constant 0 : index
    %c0_17 = arith.constant 0 : index
    %16 = vector.load %arg5[%c0_16, %c0_17] : memref<384x128xf32, #tpu.memory_space<vmem>>, vector<384x128xf32>
    tpu.vector_store %arg5[%c0_16, %c0_17], %15 {strides = array<i32>} : memref<384x128xf32, #tpu.memory_space<vmem>>, vector<384x128xf32>,
    %c0_18 = arith.constant 0 : index
    %c0_19 = arith.constant 0 : index
    %17 = vector.load %arg5[%c0_18, %c0_19] : memref<384x128xf32, #tpu.memory_space<vmem>>, vector<384x128xf32>
    %c0_20 = arith.constant 0 : index
    %c20 = arith.constant 20 : index
    %c0_21 = arith.constant 0 : index
    %18 = vector.load %arg1[%c0_20, %c20, %c0_21] : memref<1x800x128xf32, #tpu.memory_space<vmem>>, vector<1x384x128xf32>
    %19 = vector.shape_cast %18 : vector<1x384x128xf32> to vector<384x128xf32>
    %c2 = arith.constant 2 : index
    %c0_22 = arith.constant 0 : index
    %c0_23 = arith.constant 0 : index
    %20 = vector.load %arg2[%c2, %c0_22, %c0_23] : memref<3x128x128xf32, #tpu.memory_space<vmem>>, vector<1x128x128xf32>
    %21 = vector.shape_cast %20 : vector<1x128x128xf32> to vector<128x128xf32>
    %cst_24 = arith.constant dense<0.000000e+00> : vector<384x128xf32>
    %22 = tpu.matmul %19, %21, %cst_24 {dimension_numbers = #tpu.dot_dimension_numbers<[1], [0], [0], [1], [0, 0, 1, 1], [], []>} : vector<384x128xf32>, vector<128x128xf32>, vector<384x128xf32> -> vector<384x128xf32>
    %23 = arith.addf %17, %22 : vector<384x128xf32>
    %c0_25 = arith.constant 0 : index
    %c0_26 = arith.constant 0 : index
    %24 = vector.load %arg5[%c0_25, %c0_26] : memref<384x128xf32, #tpu.memory_space<vmem>>, vector<384x128xf32>
    tpu.vector_store %arg5[%c0_25, %c0_26], %23 {strides = array<i32>} : memref<384x128xf32, #tpu.memory_space<vmem>>, vector<384x128xf32>,
    %c0_27 = arith.constant 0 : index
    %c0_28 = arith.constant 0 : index
    %25 = vector.load %arg5[%c0_27, %c0_28] : memref<384x128xf32, #tpu.memory_space<vmem>>, vector<19x128xf32>
    %c0_29 = arith.constant 0 : index
    %c0_30 = arith.constant 0 : index
    %c0_31 = arith.constant 0 : index
    %c0_32 = arith.constant 0 : index
    %26 = vector.load %arg4[%c0_29, %c0_30, %c0_31, %c0_32] : memref<1x19x19x128xf32, #tpu.memory_space<vmem>>, vector<1x1x19x128xf32>
    %27 = vector.shape_cast %26 : vector<1x1x19x128xf32> to vector<19x128xf32>
    %28 = vector.shape_cast %25 : vector<19x128xf32> to vector<1x1x19x128xf32>
    tpu.vector_store %arg4[%c0_29, %c0_30, %c0_31, %c0_32], %28 {strides = array<i32>} : memref<1x19x19x128xf32, #tpu.memory_space<vmem>>, vector<1x1x19x128xf32>,
    %c20_33 = arith.constant 20 : index
    %c0_34 = arith.constant 0 : index
    %29 = vector.load %arg5[%c20_33, %c0_34] : memref<384x128xf32, #tpu.memory_space<vmem>>, vector<19x128xf32>
    %c0_35 = arith.constant 0 : index
    %c1_36 = arith.constant 1 : index
    %c0_37 = arith.constant 0 : index
    %c0_38 = arith.constant 0 : index
    %30 = vector.load %arg4[%c0_35, %c1_36, %c0_37, %c0_38] : memref<1x19x19x128xf32, #tpu.memory_space<vmem>>, vector<1x1x19x128xf32>
    %31 = vector.shape_cast %30 : vector<1x1x19x128xf32> to vector<19x128xf32>
    %32 = vector.shape_cast %29 : vector<19x128xf32> to vector<1x1x19x128xf32>
    tpu.vector_store %arg4[%c0_35, %c1_36, %c0_37, %c0_38], %32 {strides = array<i32>} : memref<1x19x19x128xf32, #tpu.memory_space<vmem>>, vector<1x1x19x128xf32>,
    %c40 = arith.constant 40 : index
    %c0_39 = arith.constant 0 : index
    %33 = vector.load %arg5[%c40, %c0_39] : memref<384x128xf32, #tpu.memory_space<vmem>>, vector<19x128xf32>
    %c0_40 = arith.constant 0 : index
    %c2_41 = arith.constant 2 : index
    %c0_42 = arith.constant 0 : index
    %c0_43 = arith.constant 0 : index
    %34 = vector.load %arg4[%c0_40, %c2_41, %c0_42, %c0_43] : memref<1x19x19x128xf32, #tpu.memory_space<vmem>>, vector<1x1x19x128xf32>
    %35 = vector.shape_cast %34 : vector<1x1x19x128xf32> to vector<19x128xf32>
    %36 = vector.shape_cast %33 : vector<19x128xf32> to vector<1x1x19x128xf32>
    tpu.vector_store %arg4[%c0_40, %c2_41, %c0_42, %c0_43], %36 {strides = array<i32>} : memref<1x19x19x128xf32, #tpu.memory_space<vmem>>, vector<1x1x19x128xf32>,
    %c60 = arith.constant 60 : index
    %c0_44 = arith.constant 0 : index
    %37 = vector.load %arg5[%c60, %c0_44] : memref<384x128xf32, #tpu.memory_space<vmem>>, vector<19x128xf32>
    %c0_45 = arith.constant 0 : index
    %c3 = arith.constant 3 : index
    %c0_46 = arith.constant 0 : index
    %c0_47 = arith.constant 0 : index
    %38 = vector.load %arg4[%c0_45, %c3, %c0_46, %c0_47] : memref<1x19x19x128xf32, #tpu.memory_space<vmem>>, vector<1x1x19x128xf32>
    %39 = vector.shape_cast %38 : vector<1x1x19x128xf32> to vector<19x128xf32>
    %40 = vector.shape_cast %37 : vector<19x128xf32> to vector<1x1x19x128xf32>
    tpu.vector_store %arg4[%c0_45, %c3, %c0_46, %c0_47], %40 {strides = array<i32>} : memref<1x19x19x128xf32, #tpu.memory_space<vmem>>, vector<1x1x19x128xf32>,
    %c80 = arith.constant 80 : index
    %c0_48 = arith.constant 0 : index
    %41 = vector.load %arg5[%c80, %c0_48] : memref<384x128xf32, #tpu.memory_space<vmem>>, vector<19x128xf32>
    %c0_49 = arith.constant 0 : index
    %c4 = arith.constant 4 : index
    %c0_50 = arith.constant 0 : index
    %c0_51 = arith.constant 0 : index
    %42 = vector.load %arg4[%c0_49, %c4, %c0_50, %c0_51] : memref<1x19x19x128xf32, #tpu.memory_space<vmem>>, vector<1x1x19x128xf32>
    %43 = vector.shape_cast %42 : vector<1x1x19x128xf32> to vector<19x128xf32>
    %44 = vector.shape_cast %41 : vector<19x128xf32> to vector<1x1x19x128xf32>
    tpu.vector_store %arg4[%c0_49, %c4, %c0_50, %c0_51], %44 {strides = array<i32>} : memref<1x19x19x128xf32, #tpu.memory_space<vmem>>, vector<1x1x19x128xf32>,
    %c100 = arith.constant 100 : index
    %c0_52 = arith.constant 0 : index
    %45 = vector.load %arg5[%c100, %c0_52] : memref<384x128xf32, #tpu.memory_space<vmem>>, vector<19x128xf32>
    %c0_53 = arith.constant 0 : index
    %c5 = arith.constant 5 : index
    %c0_54 = arith.constant 0 : index
    %c0_55 = arith.constant 0 : index
    %46 = vector.load %arg4[%c0_53, %c5, %c0_54, %c0_55] : memref<1x19x19x128xf32, #tpu.memory_space<vmem>>, vector<1x1x19x128xf32>
    %47 = vector.shape_cast %46 : vector<1x1x19x128xf32> to vector<19x128xf32>
    %48 = vector.shape_cast %45 : vector<19x128xf32> to vector<1x1x19x128xf32>
    tpu.vector_store %arg4[%c0_53, %c5, %c0_54, %c0_55], %48 {strides = array<i32>} : memref<1x19x19x128xf32, #tpu.memory_space<vmem>>, vector<1x1x19x128xf32>,
    %c120 = arith.constant 120 : index
    %c0_56 = arith.constant 0 : index
    %49 = vector.load %arg5[%c120, %c0_56] : memref<384x128xf32, #tpu.memory_space<vmem>>, vector<19x128xf32>
    %c0_57 = arith.constant 0 : index
    %c6 = arith.constant 6 : index
    %c0_58 = arith.constant 0 : index
    %c0_59 = arith.constant 0 : index
    %50 = vector.load %arg4[%c0_57, %c6, %c0_58, %c0_59] : memref<1x19x19x128xf32, #tpu.memory_space<vmem>>, vector<1x1x19x128xf32>
    %51 = vector.shape_cast %50 : vector<1x1x19x128xf32> to vector<19x128xf32>
    %52 = vector.shape_cast %49 : vector<19x128xf32> to vector<1x1x19x128xf32>
    tpu.vector_store %arg4[%c0_57, %c6, %c0_58, %c0_59], %52 {strides = array<i32>} : memref<1x19x19x128xf32, #tpu.memory_space<vmem>>, vector<1x1x19x128xf32>,
    %c140 = arith.constant 140 : index
    %c0_60 = arith.constant 0 : index
    %53 = vector.load %arg5[%c140, %c0_60] : memref<384x128xf32, #tpu.memory_space<vmem>>, vector<19x128xf32>
    %c0_61 = arith.constant 0 : index
    %c7 = arith.constant 7 : index
    %c0_62 = arith.constant 0 : index
    %c0_63 = arith.constant 0 : index
    %54 = vector.load %arg4[%c0_61, %c7, %c0_62, %c0_63] : memref<1x19x19x128xf32, #tpu.memory_space<vmem>>, vector<1x1x19x128xf32>
    %55 = vector.shape_cast %54 : vector<1x1x19x128xf32> to vector<19x128xf32>
    %56 = vector.shape_cast %53 : vector<19x128xf32> to vector<1x1x19x128xf32>
    tpu.vector_store %arg4[%c0_61, %c7, %c0_62, %c0_63], %56 {strides = array<i32>} : memref<1x19x19x128xf32, #tpu.memory_space<vmem>>, vector<1x1x19x128xf32>,
    %c160 = arith.constant 160 : index
    %c0_64 = arith.constant 0 : index
    %57 = vector.load %arg5[%c160, %c0_64] : memref<384x128xf32, #tpu.memory_space<vmem>>, vector<19x128xf32>
    %c0_65 = arith.constant 0 : index
    %c8 = arith.constant 8 : index
    %c0_66 = arith.constant 0 : index
    %c0_67 = arith.constant 0 : index
    %58 = vector.load %arg4[%c0_65, %c8, %c0_66, %c0_67] : memref<1x19x19x128xf32, #tpu.memory_space<vmem>>, vector<1x1x19x128xf32>
    %59 = vector.shape_cast %58 : vector<1x1x19x128xf32> to vector<19x128xf32>
    %60 = vector.shape_cast %57 : vector<19x128xf32> to vector<1x1x19x128xf32>
    tpu.vector_store %arg4[%c0_65, %c8, %c0_66, %c0_67], %60 {strides = array<i32>} : memref<1x19x19x128xf32, #tpu.memory_space<vmem>>, vector<1x1x19x128xf32>,
    %c180 = arith.constant 180 : index
    %c0_68 = arith.constant 0 : index
    %61 = vector.load %arg5[%c180, %c0_68] : memref<384x128xf32, #tpu.memory_space<vmem>>, vector<19x128xf32>
    %c0_69 = arith.constant 0 : index
    %c9 = arith.constant 9 : index
    %c0_70 = arith.constant 0 : index
    %c0_71 = arith.constant 0 : index
    %62 = vector.load %arg4[%c0_69, %c9, %c0_70, %c0_71] : memref<1x19x19x128xf32, #tpu.memory_space<vmem>>, vector<1x1x19x128xf32>
    %63 = vector.shape_cast %62 : vector<1x1x19x128xf32> to vector<19x128xf32>
    %64 = vector.shape_cast %61 : vector<19x128xf32> to vector<1x1x19x128xf32>
    tpu.vector_store %arg4[%c0_69, %c9, %c0_70, %c0_71], %64 {strides = array<i32>} : memref<1x19x19x128xf32, #tpu.memory_space<vmem>>, vector<1x1x19x128xf32>,
    %c200 = arith.constant 200 : index
    %c0_72 = arith.constant 0 : index
    %65 = vector.load %arg5[%c200, %c0_72] : memref<384x128xf32, #tpu.memory_space<vmem>>, vector<19x128xf32>
    %c0_73 = arith.constant 0 : index
    %c10 = arith.constant 10 : index
    %c0_74 = arith.constant 0 : index
    %c0_75 = arith.constant 0 : index
    %66 = vector.load %arg4[%c0_73, %c10, %c0_74, %c0_75] : memref<1x19x19x128xf32, #tpu.memory_space<vmem>>, vector<1x1x19x128xf32>
    %67 = vector.shape_cast %66 : vector<1x1x19x128xf32> to vector<19x128xf32>
    %68 = vector.shape_cast %65 : vector<19x128xf32> to vector<1x1x19x128xf32>
    tpu.vector_store %arg4[%c0_73, %c10, %c0_74, %c0_75], %68 {strides = array<i32>} : memref<1x19x19x128xf32, #tpu.memory_space<vmem>>, vector<1x1x19x128xf32>,
    %c220 = arith.constant 220 : index
    %c0_76 = arith.constant 0 : index
    %69 = vector.load %arg5[%c220, %c0_76] : memref<384x128xf32, #tpu.memory_space<vmem>>, vector<19x128xf32>
    %c0_77 = arith.constant 0 : index
    %c11 = arith.constant 11 : index
    %c0_78 = arith.constant 0 : index
    %c0_79 = arith.constant 0 : index
    %70 = vector.load %arg4[%c0_77, %c11, %c0_78, %c0_79] : memref<1x19x19x128xf32, #tpu.memory_space<vmem>>, vector<1x1x19x128xf32>
    %71 = vector.shape_cast %70 : vector<1x1x19x128xf32> to vector<19x128xf32>
    %72 = vector.shape_cast %69 : vector<19x128xf32> to vector<1x1x19x128xf32>
    tpu.vector_store %arg4[%c0_77, %c11, %c0_78, %c0_79], %72 {strides = array<i32>} : memref<1x19x19x128xf32, #tpu.memory_space<vmem>>, vector<1x1x19x128xf32>,
    %c240 = arith.constant 240 : index
    %c0_80 = arith.constant 0 : index
    %73 = vector.load %arg5[%c240, %c0_80] : memref<384x128xf32, #tpu.memory_space<vmem>>, vector<19x128xf32>
    %c0_81 = arith.constant 0 : index
    %c12 = arith.constant 12 : index
    %c0_82 = arith.constant 0 : index
    %c0_83 = arith.constant 0 : index
    %74 = vector.load %arg4[%c0_81, %c12, %c0_82, %c0_83] : memref<1x19x19x128xf32, #tpu.memory_space<vmem>>, vector<1x1x19x128xf32>
    %75 = vector.shape_cast %74 : vector<1x1x19x128xf32> to vector<19x128xf32>
    %76 = vector.shape_cast %73 : vector<19x128xf32> to vector<1x1x19x128xf32>
    tpu.vector_store %arg4[%c0_81, %c12, %c0_82, %c0_83], %76 {strides = array<i32>} : memref<1x19x19x128xf32, #tpu.memory_space<vmem>>, vector<1x1x19x128xf32>,
    %c260 = arith.constant 260 : index
    %c0_84 = arith.constant 0 : index
    %77 = vector.load %arg5[%c260, %c0_84] : memref<384x128xf32, #tpu.memory_space<vmem>>, vector<19x128xf32>
    %c0_85 = arith.constant 0 : index
    %c13 = arith.constant 13 : index
    %c0_86 = arith.constant 0 : index
    %c0_87 = arith.constant 0 : index
    %78 = vector.load %arg4[%c0_85, %c13, %c0_86, %c0_87] : memref<1x19x19x128xf32, #tpu.memory_space<vmem>>, vector<1x1x19x128xf32>
    %79 = vector.shape_cast %78 : vector<1x1x19x128xf32> to vector<19x128xf32>
    %80 = vector.shape_cast %77 : vector<19x128xf32> to vector<1x1x19x128xf32>
    tpu.vector_store %arg4[%c0_85, %c13, %c0_86, %c0_87], %80 {strides = array<i32>} : memref<1x19x19x128xf32, #tpu.memory_space<vmem>>, vector<1x1x19x128xf32>,
    %c280 = arith.constant 280 : index
    %c0_88 = arith.constant 0 : index
    %81 = vector.load %arg5[%c280, %c0_88] : memref<384x128xf32, #tpu.memory_space<vmem>>, vector<19x128xf32>
    %c0_89 = arith.constant 0 : index
    %c14 = arith.constant 14 : index
    %c0_90 = arith.constant 0 : index
    %c0_91 = arith.constant 0 : index
    %82 = vector.load %arg4[%c0_89, %c14, %c0_90, %c0_91] : memref<1x19x19x128xf32, #tpu.memory_space<vmem>>, vector<1x1x19x128xf32>
    %83 = vector.shape_cast %82 : vector<1x1x19x128xf32> to vector<19x128xf32>
    %84 = vector.shape_cast %81 : vector<19x128xf32> to vector<1x1x19x128xf32>
    tpu.vector_store %arg4[%c0_89, %c14, %c0_90, %c0_91], %84 {strides = array<i32>} : memref<1x19x19x128xf32, #tpu.memory_space<vmem>>, vector<1x1x19x128xf32>,
    %c300 = arith.constant 300 : index
    %c0_92 = arith.constant 0 : index
    %85 = vector.load %arg5[%c300, %c0_92] : memref<384x128xf32, #tpu.memory_space<vmem>>, vector<19x128xf32>
    %c0_93 = arith.constant 0 : index
    %c15 = arith.constant 15 : index
    %c0_94 = arith.constant 0 : index
    %c0_95 = arith.constant 0 : index
    %86 = vector.load %arg4[%c0_93, %c15, %c0_94, %c0_95] : memref<1x19x19x128xf32, #tpu.memory_space<vmem>>, vector<1x1x19x128xf32>
    %87 = vector.shape_cast %86 : vector<1x1x19x128xf32> to vector<19x128xf32>
    %88 = vector.shape_cast %85 : vector<19x128xf32> to vector<1x1x19x128xf32>
    tpu.vector_store %arg4[%c0_93, %c15, %c0_94, %c0_95], %88 {strides = array<i32>} : memref<1x19x19x128xf32, #tpu.memory_space<vmem>>, vector<1x1x19x128xf32>,
    %c320 = arith.constant 320 : index
    %c0_96 = arith.constant 0 : index
    %89 = vector.load %arg5[%c320, %c0_96] : memref<384x128xf32, #tpu.memory_space<vmem>>, vector<19x128xf32>
    %c0_97 = arith.constant 0 : index
    %c16 = arith.constant 16 : index
    %c0_98 = arith.constant 0 : index
    %c0_99 = arith.constant 0 : index
    %90 = vector.load %arg4[%c0_97, %c16, %c0_98, %c0_99] : memref<1x19x19x128xf32, #tpu.memory_space<vmem>>, vector<1x1x19x128xf32>
    %91 = vector.shape_cast %90 : vector<1x1x19x128xf32> to vector<19x128xf32>
    %92 = vector.shape_cast %89 : vector<19x128xf32> to vector<1x1x19x128xf32>
    tpu.vector_store %arg4[%c0_97, %c16, %c0_98, %c0_99], %92 {strides = array<i32>} : memref<1x19x19x128xf32, #tpu.memory_space<vmem>>, vector<1x1x19x128xf32>,
    %c340 = arith.constant 340 : index
    %c0_100 = arith.constant 0 : index
    %93 = vector.load %arg5[%c340, %c0_100] : memref<384x128xf32, #tpu.memory_space<vmem>>, vector<19x128xf32>
    %c0_101 = arith.constant 0 : index
    %c17 = arith.constant 17 : index
    %c0_102 = arith.constant 0 : index
    %c0_103 = arith.constant 0 : index
    %94 = vector.load %arg4[%c0_101, %c17, %c0_102, %c0_103] : memref<1x19x19x128xf32, #tpu.memory_space<vmem>>, vector<1x1x19x128xf32>
    %95 = vector.shape_cast %94 : vector<1x1x19x128xf32> to vector<19x128xf32>
    %96 = vector.shape_cast %93 : vector<19x128xf32> to vector<1x1x19x128xf32>
    tpu.vector_store %arg4[%c0_101, %c17, %c0_102, %c0_103], %96 {strides = array<i32>} : memref<1x19x19x128xf32, #tpu.memory_space<vmem>>, vector<1x1x19x128xf32>,
    %c360 = arith.constant 360 : index
    %c0_104 = arith.constant 0 : index
    %97 = vector.load %arg5[%c360, %c0_104] : memref<384x128xf32, #tpu.memory_space<vmem>>, vector<19x128xf32>
    %c0_105 = arith.constant 0 : index
    %c18 = arith.constant 18 : index
    %c0_106 = arith.constant 0 : index
    %c0_107 = arith.constant 0 : index
    %98 = vector.load %arg4[%c0_105, %c18, %c0_106, %c0_107] : memref<1x19x19x128xf32, #tpu.memory_space<vmem>>, vector<1x1x19x128xf32>
    %99 = vector.shape_cast %98 : vector<1x1x19x128xf32> to vector<19x128xf32>
    %100 = vector.shape_cast %97 : vector<19x128xf32> to vector<1x1x19x128xf32>
    tpu.vector_store %arg4[%c0_105, %c18, %c0_106, %c0_107], %100 {strides = array<i32>} : memref<1x19x19x128xf32, #tpu.memory_space<vmem>>, vector<1x1x19x128xf32>,
    return
  }
  func.func @transform_0(%arg0: i32) -> (i32, i32, i32) {
    %c0_i32 = arith.constant 0 : i32
    %c0_i32_0 = arith.constant 0 : i32
    %c0_i32_1 = arith.constant 0 : i32
    return %arg0, %c0_i32, %c0_i32_0 : i32, i32, i32
  }
  func.func @transform_1(%arg0: i32) -> (i32, i32, i32) {
    %c0_i32 = arith.constant 0 : i32
    %c0_i32_0 = arith.constant 0 : i32
    %c0_i32_1 = arith.constant 0 : i32
    %c0_i32_2 = arith.constant 0 : i32
    return %c0_i32, %c0_i32_0, %c0_i32_1 : i32, i32, i32
  }
  func.func @transform_2(%arg0: i32) -> (i32, i32) {
    %c0_i32 = arith.constant 0 : i32
    %c0_i32_0 = arith.constant 0 : i32
    %c0_i32_1 = arith.constant 0 : i32
    return %c0_i32, %c0_i32_0 : i32, i32
  }
  func.func @transform_3(%arg0: i32) -> (i32, i32, i32, i32) {
    %c0_i32 = arith.constant 0 : i32
    %c0_i32_0 = arith.constant 0 : i32
    %c0_i32_1 = arith.constant 0 : i32
    %c0_i32_2 = arith.constant 0 : i32
    return %arg0, %c0_i32, %c0_i32_0, %c0_i32_1 : i32, i32, i32, i32
  }
}

module attributes {stable_mosaic.version = 11 : i64} {
  func.func @_conv_tap_kernel(%arg0: i32, %arg1: memref<1x368x128xf32, #tpu.memory_space<vmem>>, %arg2: memref<3x128x128xf32, #tpu.memory_space<vmem>>, %arg3: memref<1x128xf32, #tpu.memory_space<vmem>>, %arg4: memref<1x17x17x128xf32, #tpu.memory_space<vmem>>, %arg5: memref<328x128xf32, #tpu.memory_space<vmem>>) attributes {dimension_semantics = [#tpu.dimension_semantics<parallel>], iteration_bounds = array<i64: 2>, scalar_prefetch = 0 : i64, scratch_operands = 1 : i64, tpu.core_type = #tpu.core_type<tc>, window_params = [{transform_indices = @transform_0, window_bounds = array<i64: 1, 368, 128>}, {pipeline_mode = #tpu.pipeline_mode<synchronous>, transform_indices = @transform_1, window_bounds = array<i64: 3, 128, 128>}, {pipeline_mode = #tpu.pipeline_mode<synchronous>, transform_indices = @transform_2, window_bounds = array<i64: 1, 128>}, {transform_indices = @transform_3, window_bounds = array<i64: 1, 17, 17, 128>}]} {
    %c0 = arith.constant 0 : index
    %c0_0 = arith.constant 0 : index
    %c0_1 = arith.constant 0 : index
    %0 = vector.load %arg1[%c0, %c0_0, %c0_1] : memref<1x368x128xf32, #tpu.memory_space<vmem>>, vector<1x328x128xf32>
    %1 = vector.shape_cast %0 : vector<1x328x128xf32> to vector<328x128xf32>
    %c0_2 = arith.constant 0 : index
    %c0_3 = arith.constant 0 : index
    %c0_4 = arith.constant 0 : index
    %2 = vector.load %arg2[%c0_2, %c0_3, %c0_4] : memref<3x128x128xf32, #tpu.memory_space<vmem>>, vector<1x128x128xf32>
    %3 = vector.shape_cast %2 : vector<1x128x128xf32> to vector<128x128xf32>
    %cst = arith.constant dense<0.000000e+00> : vector<328x128xf32>
    %4 = tpu.matmul %1, %3, %cst {dimension_numbers = #tpu.dot_dimension_numbers<[1], [0], [0], [1], [0, 0, 1, 1], [], []>} : vector<328x128xf32>, vector<128x128xf32>, vector<328x128xf32> -> vector<328x128xf32>
    %c0_5 = arith.constant 0 : index
    %c0_6 = arith.constant 0 : index
    %5 = vector.load %arg3[%c0_5, %c0_6] : memref<1x128xf32, #tpu.memory_space<vmem>>, vector<1x128xf32>
    %6 = vector.broadcast %5 : vector<1x128xf32> to vector<328x128xf32>
    %7 = arith.addf %4, %6 : vector<328x128xf32>
    %c0_7 = arith.constant 0 : index
    %c0_8 = arith.constant 0 : index
    %8 = vector.load %arg5[%c0_7, %c0_8] : memref<328x128xf32, #tpu.memory_space<vmem>>, vector<328x128xf32>
    tpu.vector_store %arg5[%c0_7, %c0_8], %7 {strides = array<i32>} : memref<328x128xf32, #tpu.memory_space<vmem>>, vector<328x128xf32>,
    %c0_9 = arith.constant 0 : index
    %c0_10 = arith.constant 0 : index
    %9 = vector.load %arg5[%c0_9, %c0_10] : memref<328x128xf32, #tpu.memory_space<vmem>>, vector<328x128xf32>
    %c0_11 = arith.constant 0 : index
    %c19 = arith.constant 19 : index
    %c0_12 = arith.constant 0 : index
    %10 = vector.load %arg1[%c0_11, %c19, %c0_12] : memref<1x368x128xf32, #tpu.memory_space<vmem>>, vector<1x328x128xf32>
    %11 = vector.shape_cast %10 : vector<1x328x128xf32> to vector<328x128xf32>
    %c1 = arith.constant 1 : index
    %c0_13 = arith.constant 0 : index
    %c0_14 = arith.constant 0 : index
    %12 = vector.load %arg2[%c1, %c0_13, %c0_14] : memref<3x128x128xf32, #tpu.memory_space<vmem>>, vector<1x128x128xf32>
    %13 = vector.shape_cast %12 : vector<1x128x128xf32> to vector<128x128xf32>
    %cst_15 = arith.constant dense<0.000000e+00> : vector<328x128xf32>
    %14 = tpu.matmul %11, %13, %cst_15 {dimension_numbers = #tpu.dot_dimension_numbers<[1], [0], [0], [1], [0, 0, 1, 1], [], []>} : vector<328x128xf32>, vector<128x128xf32>, vector<328x128xf32> -> vector<328x128xf32>
    %15 = arith.addf %9, %14 : vector<328x128xf32>
    %c0_16 = arith.constant 0 : index
    %c0_17 = arith.constant 0 : index
    %16 = vector.load %arg5[%c0_16, %c0_17] : memref<328x128xf32, #tpu.memory_space<vmem>>, vector<328x128xf32>
    tpu.vector_store %arg5[%c0_16, %c0_17], %15 {strides = array<i32>} : memref<328x128xf32, #tpu.memory_space<vmem>>, vector<328x128xf32>,
    %c0_18 = arith.constant 0 : index
    %c0_19 = arith.constant 0 : index
    %17 = vector.load %arg5[%c0_18, %c0_19] : memref<328x128xf32, #tpu.memory_space<vmem>>, vector<328x128xf32>
    %c0_20 = arith.constant 0 : index
    %c38 = arith.constant 38 : index
    %c0_21 = arith.constant 0 : index
    %18 = vector.load %arg1[%c0_20, %c38, %c0_21] : memref<1x368x128xf32, #tpu.memory_space<vmem>>, vector<1x328x128xf32>
    %19 = vector.shape_cast %18 : vector<1x328x128xf32> to vector<328x128xf32>
    %c2 = arith.constant 2 : index
    %c0_22 = arith.constant 0 : index
    %c0_23 = arith.constant 0 : index
    %20 = vector.load %arg2[%c2, %c0_22, %c0_23] : memref<3x128x128xf32, #tpu.memory_space<vmem>>, vector<1x128x128xf32>
    %21 = vector.shape_cast %20 : vector<1x128x128xf32> to vector<128x128xf32>
    %cst_24 = arith.constant dense<0.000000e+00> : vector<328x128xf32>
    %22 = tpu.matmul %19, %21, %cst_24 {dimension_numbers = #tpu.dot_dimension_numbers<[1], [0], [0], [1], [0, 0, 1, 1], [], []>} : vector<328x128xf32>, vector<128x128xf32>, vector<328x128xf32> -> vector<328x128xf32>
    %23 = arith.addf %17, %22 : vector<328x128xf32>
    %c0_25 = arith.constant 0 : index
    %c0_26 = arith.constant 0 : index
    %24 = vector.load %arg5[%c0_25, %c0_26] : memref<328x128xf32, #tpu.memory_space<vmem>>, vector<328x128xf32>
    tpu.vector_store %arg5[%c0_25, %c0_26], %23 {strides = array<i32>} : memref<328x128xf32, #tpu.memory_space<vmem>>, vector<328x128xf32>,
    %c0_27 = arith.constant 0 : index
    %c0_28 = arith.constant 0 : index
    %25 = vector.load %arg5[%c0_27, %c0_28] : memref<328x128xf32, #tpu.memory_space<vmem>>, vector<17x128xf32>
    %c0_29 = arith.constant 0 : index
    %c0_30 = arith.constant 0 : index
    %c0_31 = arith.constant 0 : index
    %c0_32 = arith.constant 0 : index
    %26 = vector.load %arg4[%c0_29, %c0_30, %c0_31, %c0_32] : memref<1x17x17x128xf32, #tpu.memory_space<vmem>>, vector<1x1x17x128xf32>
    %27 = vector.shape_cast %26 : vector<1x1x17x128xf32> to vector<17x128xf32>
    %28 = vector.shape_cast %25 : vector<17x128xf32> to vector<1x1x17x128xf32>
    tpu.vector_store %arg4[%c0_29, %c0_30, %c0_31, %c0_32], %28 {strides = array<i32>} : memref<1x17x17x128xf32, #tpu.memory_space<vmem>>, vector<1x1x17x128xf32>,
    %c19_33 = arith.constant 19 : index
    %c0_34 = arith.constant 0 : index
    %29 = vector.load %arg5[%c19_33, %c0_34] : memref<328x128xf32, #tpu.memory_space<vmem>>, vector<17x128xf32>
    %c0_35 = arith.constant 0 : index
    %c1_36 = arith.constant 1 : index
    %c0_37 = arith.constant 0 : index
    %c0_38 = arith.constant 0 : index
    %30 = vector.load %arg4[%c0_35, %c1_36, %c0_37, %c0_38] : memref<1x17x17x128xf32, #tpu.memory_space<vmem>>, vector<1x1x17x128xf32>
    %31 = vector.shape_cast %30 : vector<1x1x17x128xf32> to vector<17x128xf32>
    %32 = vector.shape_cast %29 : vector<17x128xf32> to vector<1x1x17x128xf32>
    tpu.vector_store %arg4[%c0_35, %c1_36, %c0_37, %c0_38], %32 {strides = array<i32>} : memref<1x17x17x128xf32, #tpu.memory_space<vmem>>, vector<1x1x17x128xf32>,
    %c38_39 = arith.constant 38 : index
    %c0_40 = arith.constant 0 : index
    %33 = vector.load %arg5[%c38_39, %c0_40] : memref<328x128xf32, #tpu.memory_space<vmem>>, vector<17x128xf32>
    %c0_41 = arith.constant 0 : index
    %c2_42 = arith.constant 2 : index
    %c0_43 = arith.constant 0 : index
    %c0_44 = arith.constant 0 : index
    %34 = vector.load %arg4[%c0_41, %c2_42, %c0_43, %c0_44] : memref<1x17x17x128xf32, #tpu.memory_space<vmem>>, vector<1x1x17x128xf32>
    %35 = vector.shape_cast %34 : vector<1x1x17x128xf32> to vector<17x128xf32>
    %36 = vector.shape_cast %33 : vector<17x128xf32> to vector<1x1x17x128xf32>
    tpu.vector_store %arg4[%c0_41, %c2_42, %c0_43, %c0_44], %36 {strides = array<i32>} : memref<1x17x17x128xf32, #tpu.memory_space<vmem>>, vector<1x1x17x128xf32>,
    %c57 = arith.constant 57 : index
    %c0_45 = arith.constant 0 : index
    %37 = vector.load %arg5[%c57, %c0_45] : memref<328x128xf32, #tpu.memory_space<vmem>>, vector<17x128xf32>
    %c0_46 = arith.constant 0 : index
    %c3 = arith.constant 3 : index
    %c0_47 = arith.constant 0 : index
    %c0_48 = arith.constant 0 : index
    %38 = vector.load %arg4[%c0_46, %c3, %c0_47, %c0_48] : memref<1x17x17x128xf32, #tpu.memory_space<vmem>>, vector<1x1x17x128xf32>
    %39 = vector.shape_cast %38 : vector<1x1x17x128xf32> to vector<17x128xf32>
    %40 = vector.shape_cast %37 : vector<17x128xf32> to vector<1x1x17x128xf32>
    tpu.vector_store %arg4[%c0_46, %c3, %c0_47, %c0_48], %40 {strides = array<i32>} : memref<1x17x17x128xf32, #tpu.memory_space<vmem>>, vector<1x1x17x128xf32>,
    %c76 = arith.constant 76 : index
    %c0_49 = arith.constant 0 : index
    %41 = vector.load %arg5[%c76, %c0_49] : memref<328x128xf32, #tpu.memory_space<vmem>>, vector<17x128xf32>
    %c0_50 = arith.constant 0 : index
    %c4 = arith.constant 4 : index
    %c0_51 = arith.constant 0 : index
    %c0_52 = arith.constant 0 : index
    %42 = vector.load %arg4[%c0_50, %c4, %c0_51, %c0_52] : memref<1x17x17x128xf32, #tpu.memory_space<vmem>>, vector<1x1x17x128xf32>
    %43 = vector.shape_cast %42 : vector<1x1x17x128xf32> to vector<17x128xf32>
    %44 = vector.shape_cast %41 : vector<17x128xf32> to vector<1x1x17x128xf32>
    tpu.vector_store %arg4[%c0_50, %c4, %c0_51, %c0_52], %44 {strides = array<i32>} : memref<1x17x17x128xf32, #tpu.memory_space<vmem>>, vector<1x1x17x128xf32>,
    %c95 = arith.constant 95 : index
    %c0_53 = arith.constant 0 : index
    %45 = vector.load %arg5[%c95, %c0_53] : memref<328x128xf32, #tpu.memory_space<vmem>>, vector<17x128xf32>
    %c0_54 = arith.constant 0 : index
    %c5 = arith.constant 5 : index
    %c0_55 = arith.constant 0 : index
    %c0_56 = arith.constant 0 : index
    %46 = vector.load %arg4[%c0_54, %c5, %c0_55, %c0_56] : memref<1x17x17x128xf32, #tpu.memory_space<vmem>>, vector<1x1x17x128xf32>
    %47 = vector.shape_cast %46 : vector<1x1x17x128xf32> to vector<17x128xf32>
    %48 = vector.shape_cast %45 : vector<17x128xf32> to vector<1x1x17x128xf32>
    tpu.vector_store %arg4[%c0_54, %c5, %c0_55, %c0_56], %48 {strides = array<i32>} : memref<1x17x17x128xf32, #tpu.memory_space<vmem>>, vector<1x1x17x128xf32>,
    %c114 = arith.constant 114 : index
    %c0_57 = arith.constant 0 : index
    %49 = vector.load %arg5[%c114, %c0_57] : memref<328x128xf32, #tpu.memory_space<vmem>>, vector<17x128xf32>
    %c0_58 = arith.constant 0 : index
    %c6 = arith.constant 6 : index
    %c0_59 = arith.constant 0 : index
    %c0_60 = arith.constant 0 : index
    %50 = vector.load %arg4[%c0_58, %c6, %c0_59, %c0_60] : memref<1x17x17x128xf32, #tpu.memory_space<vmem>>, vector<1x1x17x128xf32>
    %51 = vector.shape_cast %50 : vector<1x1x17x128xf32> to vector<17x128xf32>
    %52 = vector.shape_cast %49 : vector<17x128xf32> to vector<1x1x17x128xf32>
    tpu.vector_store %arg4[%c0_58, %c6, %c0_59, %c0_60], %52 {strides = array<i32>} : memref<1x17x17x128xf32, #tpu.memory_space<vmem>>, vector<1x1x17x128xf32>,
    %c133 = arith.constant 133 : index
    %c0_61 = arith.constant 0 : index
    %53 = vector.load %arg5[%c133, %c0_61] : memref<328x128xf32, #tpu.memory_space<vmem>>, vector<17x128xf32>
    %c0_62 = arith.constant 0 : index
    %c7 = arith.constant 7 : index
    %c0_63 = arith.constant 0 : index
    %c0_64 = arith.constant 0 : index
    %54 = vector.load %arg4[%c0_62, %c7, %c0_63, %c0_64] : memref<1x17x17x128xf32, #tpu.memory_space<vmem>>, vector<1x1x17x128xf32>
    %55 = vector.shape_cast %54 : vector<1x1x17x128xf32> to vector<17x128xf32>
    %56 = vector.shape_cast %53 : vector<17x128xf32> to vector<1x1x17x128xf32>
    tpu.vector_store %arg4[%c0_62, %c7, %c0_63, %c0_64], %56 {strides = array<i32>} : memref<1x17x17x128xf32, #tpu.memory_space<vmem>>, vector<1x1x17x128xf32>,
    %c152 = arith.constant 152 : index
    %c0_65 = arith.constant 0 : index
    %57 = vector.load %arg5[%c152, %c0_65] : memref<328x128xf32, #tpu.memory_space<vmem>>, vector<17x128xf32>
    %c0_66 = arith.constant 0 : index
    %c8 = arith.constant 8 : index
    %c0_67 = arith.constant 0 : index
    %c0_68 = arith.constant 0 : index
    %58 = vector.load %arg4[%c0_66, %c8, %c0_67, %c0_68] : memref<1x17x17x128xf32, #tpu.memory_space<vmem>>, vector<1x1x17x128xf32>
    %59 = vector.shape_cast %58 : vector<1x1x17x128xf32> to vector<17x128xf32>
    %60 = vector.shape_cast %57 : vector<17x128xf32> to vector<1x1x17x128xf32>
    tpu.vector_store %arg4[%c0_66, %c8, %c0_67, %c0_68], %60 {strides = array<i32>} : memref<1x17x17x128xf32, #tpu.memory_space<vmem>>, vector<1x1x17x128xf32>,
    %c171 = arith.constant 171 : index
    %c0_69 = arith.constant 0 : index
    %61 = vector.load %arg5[%c171, %c0_69] : memref<328x128xf32, #tpu.memory_space<vmem>>, vector<17x128xf32>
    %c0_70 = arith.constant 0 : index
    %c9 = arith.constant 9 : index
    %c0_71 = arith.constant 0 : index
    %c0_72 = arith.constant 0 : index
    %62 = vector.load %arg4[%c0_70, %c9, %c0_71, %c0_72] : memref<1x17x17x128xf32, #tpu.memory_space<vmem>>, vector<1x1x17x128xf32>
    %63 = vector.shape_cast %62 : vector<1x1x17x128xf32> to vector<17x128xf32>
    %64 = vector.shape_cast %61 : vector<17x128xf32> to vector<1x1x17x128xf32>
    tpu.vector_store %arg4[%c0_70, %c9, %c0_71, %c0_72], %64 {strides = array<i32>} : memref<1x17x17x128xf32, #tpu.memory_space<vmem>>, vector<1x1x17x128xf32>,
    %c190 = arith.constant 190 : index
    %c0_73 = arith.constant 0 : index
    %65 = vector.load %arg5[%c190, %c0_73] : memref<328x128xf32, #tpu.memory_space<vmem>>, vector<17x128xf32>
    %c0_74 = arith.constant 0 : index
    %c10 = arith.constant 10 : index
    %c0_75 = arith.constant 0 : index
    %c0_76 = arith.constant 0 : index
    %66 = vector.load %arg4[%c0_74, %c10, %c0_75, %c0_76] : memref<1x17x17x128xf32, #tpu.memory_space<vmem>>, vector<1x1x17x128xf32>
    %67 = vector.shape_cast %66 : vector<1x1x17x128xf32> to vector<17x128xf32>
    %68 = vector.shape_cast %65 : vector<17x128xf32> to vector<1x1x17x128xf32>
    tpu.vector_store %arg4[%c0_74, %c10, %c0_75, %c0_76], %68 {strides = array<i32>} : memref<1x17x17x128xf32, #tpu.memory_space<vmem>>, vector<1x1x17x128xf32>,
    %c209 = arith.constant 209 : index
    %c0_77 = arith.constant 0 : index
    %69 = vector.load %arg5[%c209, %c0_77] : memref<328x128xf32, #tpu.memory_space<vmem>>, vector<17x128xf32>
    %c0_78 = arith.constant 0 : index
    %c11 = arith.constant 11 : index
    %c0_79 = arith.constant 0 : index
    %c0_80 = arith.constant 0 : index
    %70 = vector.load %arg4[%c0_78, %c11, %c0_79, %c0_80] : memref<1x17x17x128xf32, #tpu.memory_space<vmem>>, vector<1x1x17x128xf32>
    %71 = vector.shape_cast %70 : vector<1x1x17x128xf32> to vector<17x128xf32>
    %72 = vector.shape_cast %69 : vector<17x128xf32> to vector<1x1x17x128xf32>
    tpu.vector_store %arg4[%c0_78, %c11, %c0_79, %c0_80], %72 {strides = array<i32>} : memref<1x17x17x128xf32, #tpu.memory_space<vmem>>, vector<1x1x17x128xf32>,
    %c228 = arith.constant 228 : index
    %c0_81 = arith.constant 0 : index
    %73 = vector.load %arg5[%c228, %c0_81] : memref<328x128xf32, #tpu.memory_space<vmem>>, vector<17x128xf32>
    %c0_82 = arith.constant 0 : index
    %c12 = arith.constant 12 : index
    %c0_83 = arith.constant 0 : index
    %c0_84 = arith.constant 0 : index
    %74 = vector.load %arg4[%c0_82, %c12, %c0_83, %c0_84] : memref<1x17x17x128xf32, #tpu.memory_space<vmem>>, vector<1x1x17x128xf32>
    %75 = vector.shape_cast %74 : vector<1x1x17x128xf32> to vector<17x128xf32>
    %76 = vector.shape_cast %73 : vector<17x128xf32> to vector<1x1x17x128xf32>
    tpu.vector_store %arg4[%c0_82, %c12, %c0_83, %c0_84], %76 {strides = array<i32>} : memref<1x17x17x128xf32, #tpu.memory_space<vmem>>, vector<1x1x17x128xf32>,
    %c247 = arith.constant 247 : index
    %c0_85 = arith.constant 0 : index
    %77 = vector.load %arg5[%c247, %c0_85] : memref<328x128xf32, #tpu.memory_space<vmem>>, vector<17x128xf32>
    %c0_86 = arith.constant 0 : index
    %c13 = arith.constant 13 : index
    %c0_87 = arith.constant 0 : index
    %c0_88 = arith.constant 0 : index
    %78 = vector.load %arg4[%c0_86, %c13, %c0_87, %c0_88] : memref<1x17x17x128xf32, #tpu.memory_space<vmem>>, vector<1x1x17x128xf32>
    %79 = vector.shape_cast %78 : vector<1x1x17x128xf32> to vector<17x128xf32>
    %80 = vector.shape_cast %77 : vector<17x128xf32> to vector<1x1x17x128xf32>
    tpu.vector_store %arg4[%c0_86, %c13, %c0_87, %c0_88], %80 {strides = array<i32>} : memref<1x17x17x128xf32, #tpu.memory_space<vmem>>, vector<1x1x17x128xf32>,
    %c266 = arith.constant 266 : index
    %c0_89 = arith.constant 0 : index
    %81 = vector.load %arg5[%c266, %c0_89] : memref<328x128xf32, #tpu.memory_space<vmem>>, vector<17x128xf32>
    %c0_90 = arith.constant 0 : index
    %c14 = arith.constant 14 : index
    %c0_91 = arith.constant 0 : index
    %c0_92 = arith.constant 0 : index
    %82 = vector.load %arg4[%c0_90, %c14, %c0_91, %c0_92] : memref<1x17x17x128xf32, #tpu.memory_space<vmem>>, vector<1x1x17x128xf32>
    %83 = vector.shape_cast %82 : vector<1x1x17x128xf32> to vector<17x128xf32>
    %84 = vector.shape_cast %81 : vector<17x128xf32> to vector<1x1x17x128xf32>
    tpu.vector_store %arg4[%c0_90, %c14, %c0_91, %c0_92], %84 {strides = array<i32>} : memref<1x17x17x128xf32, #tpu.memory_space<vmem>>, vector<1x1x17x128xf32>,
    %c285 = arith.constant 285 : index
    %c0_93 = arith.constant 0 : index
    %85 = vector.load %arg5[%c285, %c0_93] : memref<328x128xf32, #tpu.memory_space<vmem>>, vector<17x128xf32>
    %c0_94 = arith.constant 0 : index
    %c15 = arith.constant 15 : index
    %c0_95 = arith.constant 0 : index
    %c0_96 = arith.constant 0 : index
    %86 = vector.load %arg4[%c0_94, %c15, %c0_95, %c0_96] : memref<1x17x17x128xf32, #tpu.memory_space<vmem>>, vector<1x1x17x128xf32>
    %87 = vector.shape_cast %86 : vector<1x1x17x128xf32> to vector<17x128xf32>
    %88 = vector.shape_cast %85 : vector<17x128xf32> to vector<1x1x17x128xf32>
    tpu.vector_store %arg4[%c0_94, %c15, %c0_95, %c0_96], %88 {strides = array<i32>} : memref<1x17x17x128xf32, #tpu.memory_space<vmem>>, vector<1x1x17x128xf32>,
    %c304 = arith.constant 304 : index
    %c0_97 = arith.constant 0 : index
    %89 = vector.load %arg5[%c304, %c0_97] : memref<328x128xf32, #tpu.memory_space<vmem>>, vector<17x128xf32>
    %c0_98 = arith.constant 0 : index
    %c16 = arith.constant 16 : index
    %c0_99 = arith.constant 0 : index
    %c0_100 = arith.constant 0 : index
    %90 = vector.load %arg4[%c0_98, %c16, %c0_99, %c0_100] : memref<1x17x17x128xf32, #tpu.memory_space<vmem>>, vector<1x1x17x128xf32>
    %91 = vector.shape_cast %90 : vector<1x1x17x128xf32> to vector<17x128xf32>
    %92 = vector.shape_cast %89 : vector<17x128xf32> to vector<1x1x17x128xf32>
    tpu.vector_store %arg4[%c0_98, %c16, %c0_99, %c0_100], %92 {strides = array<i32>} : memref<1x17x17x128xf32, #tpu.memory_space<vmem>>, vector<1x1x17x128xf32>,
    return
  }
  func.func @transform_0(%arg0: i32) -> (i32, i32, i32) {
    %c0_i32 = arith.constant 0 : i32
    %c0_i32_0 = arith.constant 0 : i32
    %c0_i32_1 = arith.constant 0 : i32
    return %arg0, %c0_i32, %c0_i32_0 : i32, i32, i32
  }
  func.func @transform_1(%arg0: i32) -> (i32, i32, i32) {
    %c0_i32 = arith.constant 0 : i32
    %c0_i32_0 = arith.constant 0 : i32
    %c0_i32_1 = arith.constant 0 : i32
    %c0_i32_2 = arith.constant 0 : i32
    return %c0_i32, %c0_i32_0, %c0_i32_1 : i32, i32, i32
  }
  func.func @transform_2(%arg0: i32) -> (i32, i32) {
    %c0_i32 = arith.constant 0 : i32
    %c0_i32_0 = arith.constant 0 : i32
    %c0_i32_1 = arith.constant 0 : i32
    return %c0_i32, %c0_i32_0 : i32, i32
  }
  func.func @transform_3(%arg0: i32) -> (i32, i32, i32, i32) {
    %c0_i32 = arith.constant 0 : i32
    %c0_i32_0 = arith.constant 0 : i32
    %c0_i32_1 = arith.constant 0 : i32
    %c0_i32_2 = arith.constant 0 : i32
    return %arg0, %c0_i32, %c0_i32_0, %c0_i32_1 : i32, i32, i32, i32
  }
}

module attributes {stable_mosaic.version = 11 : i64} {
  func.func @_pool_tap_kernel(%arg0: i32, %arg1: memref<1x328x128xf32, #tpu.memory_space<vmem>>, %arg2: memref<1x8x8x128xf32, #tpu.memory_space<vmem>>, %arg3: memref<72x128xf32, #tpu.memory_space<vmem>>) attributes {dimension_semantics = [#tpu.dimension_semantics<parallel>], iteration_bounds = array<i64: 2>, scalar_prefetch = 0 : i64, scratch_operands = 1 : i64, tpu.core_type = #tpu.core_type<tc>, window_params = [{transform_indices = @transform_0, window_bounds = array<i64: 1, 328, 128>}, {transform_indices = @transform_1, window_bounds = array<i64: 1, 8, 8, 128>}]} {
    %c0 = arith.constant 0 : index
    %c0_0 = arith.constant 0 : index
    %c0_1 = arith.constant 0 : index
    %0 = vector.load %arg1[%c0, %c0_0, %c0_1] : memref<1x328x128xf32, #tpu.memory_space<vmem>>, vector<1x72x128xf32>
    %1 = vector.shape_cast %0 : vector<1x72x128xf32> to vector<72x128xf32>
    %c0_2 = arith.constant 0 : index
    %c0_3 = arith.constant 0 : index
    %2 = vector.load %arg3[%c0_2, %c0_3] : memref<72x128xf32, #tpu.memory_space<vmem>>, vector<72x128xf32>
    tpu.vector_store %arg3[%c0_2, %c0_3], %1 {strides = array<i32>} : memref<72x128xf32, #tpu.memory_space<vmem>>, vector<72x128xf32>,
    %c0_4 = arith.constant 0 : index
    %c0_5 = arith.constant 0 : index
    %3 = vector.load %arg3[%c0_4, %c0_5] : memref<72x128xf32, #tpu.memory_space<vmem>>, vector<72x128xf32>
    %c0_6 = arith.constant 0 : index
    %c81 = arith.constant 81 : index
    %c0_7 = arith.constant 0 : index
    %4 = vector.load %arg1[%c0_6, %c81, %c0_7] : memref<1x328x128xf32, #tpu.memory_space<vmem>>, vector<1x72x128xf32>
    %5 = vector.shape_cast %4 : vector<1x72x128xf32> to vector<72x128xf32>
    %6 = arith.maximumf %3, %5 : vector<72x128xf32>
    %c0_8 = arith.constant 0 : index
    %c0_9 = arith.constant 0 : index
    %7 = vector.load %arg3[%c0_8, %c0_9] : memref<72x128xf32, #tpu.memory_space<vmem>>, vector<72x128xf32>
    tpu.vector_store %arg3[%c0_8, %c0_9], %6 {strides = array<i32>} : memref<72x128xf32, #tpu.memory_space<vmem>>, vector<72x128xf32>,
    %c0_10 = arith.constant 0 : index
    %c0_11 = arith.constant 0 : index
    %8 = vector.load %arg3[%c0_10, %c0_11] : memref<72x128xf32, #tpu.memory_space<vmem>>, vector<72x128xf32>
    %c0_12 = arith.constant 0 : index
    %c1 = arith.constant 1 : index
    %c0_13 = arith.constant 0 : index
    %9 = vector.load %arg1[%c0_12, %c1, %c0_13] : memref<1x328x128xf32, #tpu.memory_space<vmem>>, vector<1x72x128xf32>
    %10 = vector.shape_cast %9 : vector<1x72x128xf32> to vector<72x128xf32>
    %11 = arith.maximumf %8, %10 : vector<72x128xf32>
    %c0_14 = arith.constant 0 : index
    %c0_15 = arith.constant 0 : index
    %12 = vector.load %arg3[%c0_14, %c0_15] : memref<72x128xf32, #tpu.memory_space<vmem>>, vector<72x128xf32>
    tpu.vector_store %arg3[%c0_14, %c0_15], %11 {strides = array<i32>} : memref<72x128xf32, #tpu.memory_space<vmem>>, vector<72x128xf32>,
    %c0_16 = arith.constant 0 : index
    %c0_17 = arith.constant 0 : index
    %13 = vector.load %arg3[%c0_16, %c0_17] : memref<72x128xf32, #tpu.memory_space<vmem>>, vector<72x128xf32>
    %c0_18 = arith.constant 0 : index
    %c162 = arith.constant 162 : index
    %c0_19 = arith.constant 0 : index
    %14 = vector.load %arg1[%c0_18, %c162, %c0_19] : memref<1x328x128xf32, #tpu.memory_space<vmem>>, vector<1x72x128xf32>
    %15 = vector.shape_cast %14 : vector<1x72x128xf32> to vector<72x128xf32>
    %16 = arith.maximumf %13, %15 : vector<72x128xf32>
    %c0_20 = arith.constant 0 : index
    %c0_21 = arith.constant 0 : index
    %17 = vector.load %arg3[%c0_20, %c0_21] : memref<72x128xf32, #tpu.memory_space<vmem>>, vector<72x128xf32>
    tpu.vector_store %arg3[%c0_20, %c0_21], %16 {strides = array<i32>} : memref<72x128xf32, #tpu.memory_space<vmem>>, vector<72x128xf32>,
    %c0_22 = arith.constant 0 : index
    %c0_23 = arith.constant 0 : index
    %18 = vector.load %arg3[%c0_22, %c0_23] : memref<72x128xf32, #tpu.memory_space<vmem>>, vector<72x128xf32>
    %c0_24 = arith.constant 0 : index
    %c243 = arith.constant 243 : index
    %c0_25 = arith.constant 0 : index
    %19 = vector.load %arg1[%c0_24, %c243, %c0_25] : memref<1x328x128xf32, #tpu.memory_space<vmem>>, vector<1x72x128xf32>
    %20 = vector.shape_cast %19 : vector<1x72x128xf32> to vector<72x128xf32>
    %21 = arith.maximumf %18, %20 : vector<72x128xf32>
    %c0_26 = arith.constant 0 : index
    %c0_27 = arith.constant 0 : index
    %22 = vector.load %arg3[%c0_26, %c0_27] : memref<72x128xf32, #tpu.memory_space<vmem>>, vector<72x128xf32>
    tpu.vector_store %arg3[%c0_26, %c0_27], %21 {strides = array<i32>} : memref<72x128xf32, #tpu.memory_space<vmem>>, vector<72x128xf32>,
    %c0_28 = arith.constant 0 : index
    %c0_29 = arith.constant 0 : index
    %23 = vector.load %arg3[%c0_28, %c0_29] : memref<72x128xf32, #tpu.memory_space<vmem>>, vector<72x128xf32>
    %c0_30 = arith.constant 0 : index
    %c163 = arith.constant 163 : index
    %c0_31 = arith.constant 0 : index
    %24 = vector.load %arg1[%c0_30, %c163, %c0_31] : memref<1x328x128xf32, #tpu.memory_space<vmem>>, vector<1x72x128xf32>
    %25 = vector.shape_cast %24 : vector<1x72x128xf32> to vector<72x128xf32>
    %26 = arith.maximumf %23, %25 : vector<72x128xf32>
    %c0_32 = arith.constant 0 : index
    %c0_33 = arith.constant 0 : index
    %27 = vector.load %arg3[%c0_32, %c0_33] : memref<72x128xf32, #tpu.memory_space<vmem>>, vector<72x128xf32>
    tpu.vector_store %arg3[%c0_32, %c0_33], %26 {strides = array<i32>} : memref<72x128xf32, #tpu.memory_space<vmem>>, vector<72x128xf32>,
    %c0_34 = arith.constant 0 : index
    %c0_35 = arith.constant 0 : index
    %28 = vector.load %arg3[%c0_34, %c0_35] : memref<72x128xf32, #tpu.memory_space<vmem>>, vector<72x128xf32>
    %c0_36 = arith.constant 0 : index
    %c9 = arith.constant 9 : index
    %c0_37 = arith.constant 0 : index
    %29 = vector.load %arg1[%c0_36, %c9, %c0_37] : memref<1x328x128xf32, #tpu.memory_space<vmem>>, vector<1x72x128xf32>
    %30 = vector.shape_cast %29 : vector<1x72x128xf32> to vector<72x128xf32>
    %31 = arith.maximumf %28, %30 : vector<72x128xf32>
    %c0_38 = arith.constant 0 : index
    %c0_39 = arith.constant 0 : index
    %32 = vector.load %arg3[%c0_38, %c0_39] : memref<72x128xf32, #tpu.memory_space<vmem>>, vector<72x128xf32>
    tpu.vector_store %arg3[%c0_38, %c0_39], %31 {strides = array<i32>} : memref<72x128xf32, #tpu.memory_space<vmem>>, vector<72x128xf32>,
    %c0_40 = arith.constant 0 : index
    %c0_41 = arith.constant 0 : index
    %33 = vector.load %arg3[%c0_40, %c0_41] : memref<72x128xf32, #tpu.memory_space<vmem>>, vector<72x128xf32>
    %c0_42 = arith.constant 0 : index
    %c90 = arith.constant 90 : index
    %c0_43 = arith.constant 0 : index
    %34 = vector.load %arg1[%c0_42, %c90, %c0_43] : memref<1x328x128xf32, #tpu.memory_space<vmem>>, vector<1x72x128xf32>
    %35 = vector.shape_cast %34 : vector<1x72x128xf32> to vector<72x128xf32>
    %36 = arith.maximumf %33, %35 : vector<72x128xf32>
    %c0_44 = arith.constant 0 : index
    %c0_45 = arith.constant 0 : index
    %37 = vector.load %arg3[%c0_44, %c0_45] : memref<72x128xf32, #tpu.memory_space<vmem>>, vector<72x128xf32>
    tpu.vector_store %arg3[%c0_44, %c0_45], %36 {strides = array<i32>} : memref<72x128xf32, #tpu.memory_space<vmem>>, vector<72x128xf32>,
    %c0_46 = arith.constant 0 : index
    %c0_47 = arith.constant 0 : index
    %38 = vector.load %arg3[%c0_46, %c0_47] : memref<72x128xf32, #tpu.memory_space<vmem>>, vector<72x128xf32>
    %c0_48 = arith.constant 0 : index
    %c10 = arith.constant 10 : index
    %c0_49 = arith.constant 0 : index
    %39 = vector.load %arg1[%c0_48, %c10, %c0_49] : memref<1x328x128xf32, #tpu.memory_space<vmem>>, vector<1x72x128xf32>
    %40 = vector.shape_cast %39 : vector<1x72x128xf32> to vector<72x128xf32>
    %41 = arith.maximumf %38, %40 : vector<72x128xf32>
    %c0_50 = arith.constant 0 : index
    %c0_51 = arith.constant 0 : index
    %42 = vector.load %arg3[%c0_50, %c0_51] : memref<72x128xf32, #tpu.memory_space<vmem>>, vector<72x128xf32>
    tpu.vector_store %arg3[%c0_50, %c0_51], %41 {strides = array<i32>} : memref<72x128xf32, #tpu.memory_space<vmem>>, vector<72x128xf32>,
    %c0_52 = arith.constant 0 : index
    %c0_53 = arith.constant 0 : index
    %43 = vector.load %arg3[%c0_52, %c0_53] : memref<72x128xf32, #tpu.memory_space<vmem>>, vector<8x128xf32>
    %c0_54 = arith.constant 0 : index
    %c0_55 = arith.constant 0 : index
    %c0_56 = arith.constant 0 : index
    %c0_57 = arith.constant 0 : index
    %44 = vector.load %arg2[%c0_54, %c0_55, %c0_56, %c0_57] : memref<1x8x8x128xf32, #tpu.memory_space<vmem>>, vector<1x1x8x128xf32>
    %45 = vector.shape_cast %44 : vector<1x1x8x128xf32> to vector<8x128xf32>
    %46 = vector.shape_cast %43 : vector<8x128xf32> to vector<1x1x8x128xf32>
    tpu.vector_store %arg2[%c0_54, %c0_55, %c0_56, %c0_57], %46 {strides = array<i32>} : memref<1x8x8x128xf32, #tpu.memory_space<vmem>>, vector<1x1x8x128xf32>,
    %c9_58 = arith.constant 9 : index
    %c0_59 = arith.constant 0 : index
    %47 = vector.load %arg3[%c9_58, %c0_59] : memref<72x128xf32, #tpu.memory_space<vmem>>, vector<8x128xf32>
    %c0_60 = arith.constant 0 : index
    %c1_61 = arith.constant 1 : index
    %c0_62 = arith.constant 0 : index
    %c0_63 = arith.constant 0 : index
    %48 = vector.load %arg2[%c0_60, %c1_61, %c0_62, %c0_63] : memref<1x8x8x128xf32, #tpu.memory_space<vmem>>, vector<1x1x8x128xf32>
    %49 = vector.shape_cast %48 : vector<1x1x8x128xf32> to vector<8x128xf32>
    %50 = vector.shape_cast %47 : vector<8x128xf32> to vector<1x1x8x128xf32>
    tpu.vector_store %arg2[%c0_60, %c1_61, %c0_62, %c0_63], %50 {strides = array<i32>} : memref<1x8x8x128xf32, #tpu.memory_space<vmem>>, vector<1x1x8x128xf32>,
    %c18 = arith.constant 18 : index
    %c0_64 = arith.constant 0 : index
    %51 = vector.load %arg3[%c18, %c0_64] : memref<72x128xf32, #tpu.memory_space<vmem>>, vector<8x128xf32>
    %c0_65 = arith.constant 0 : index
    %c2 = arith.constant 2 : index
    %c0_66 = arith.constant 0 : index
    %c0_67 = arith.constant 0 : index
    %52 = vector.load %arg2[%c0_65, %c2, %c0_66, %c0_67] : memref<1x8x8x128xf32, #tpu.memory_space<vmem>>, vector<1x1x8x128xf32>
    %53 = vector.shape_cast %52 : vector<1x1x8x128xf32> to vector<8x128xf32>
    %54 = vector.shape_cast %51 : vector<8x128xf32> to vector<1x1x8x128xf32>
    tpu.vector_store %arg2[%c0_65, %c2, %c0_66, %c0_67], %54 {strides = array<i32>} : memref<1x8x8x128xf32, #tpu.memory_space<vmem>>, vector<1x1x8x128xf32>,
    %c27 = arith.constant 27 : index
    %c0_68 = arith.constant 0 : index
    %55 = vector.load %arg3[%c27, %c0_68] : memref<72x128xf32, #tpu.memory_space<vmem>>, vector<8x128xf32>
    %c0_69 = arith.constant 0 : index
    %c3 = arith.constant 3 : index
    %c0_70 = arith.constant 0 : index
    %c0_71 = arith.constant 0 : index
    %56 = vector.load %arg2[%c0_69, %c3, %c0_70, %c0_71] : memref<1x8x8x128xf32, #tpu.memory_space<vmem>>, vector<1x1x8x128xf32>
    %57 = vector.shape_cast %56 : vector<1x1x8x128xf32> to vector<8x128xf32>
    %58 = vector.shape_cast %55 : vector<8x128xf32> to vector<1x1x8x128xf32>
    tpu.vector_store %arg2[%c0_69, %c3, %c0_70, %c0_71], %58 {strides = array<i32>} : memref<1x8x8x128xf32, #tpu.memory_space<vmem>>, vector<1x1x8x128xf32>,
    %c36 = arith.constant 36 : index
    %c0_72 = arith.constant 0 : index
    %59 = vector.load %arg3[%c36, %c0_72] : memref<72x128xf32, #tpu.memory_space<vmem>>, vector<8x128xf32>
    %c0_73 = arith.constant 0 : index
    %c4 = arith.constant 4 : index
    %c0_74 = arith.constant 0 : index
    %c0_75 = arith.constant 0 : index
    %60 = vector.load %arg2[%c0_73, %c4, %c0_74, %c0_75] : memref<1x8x8x128xf32, #tpu.memory_space<vmem>>, vector<1x1x8x128xf32>
    %61 = vector.shape_cast %60 : vector<1x1x8x128xf32> to vector<8x128xf32>
    %62 = vector.shape_cast %59 : vector<8x128xf32> to vector<1x1x8x128xf32>
    tpu.vector_store %arg2[%c0_73, %c4, %c0_74, %c0_75], %62 {strides = array<i32>} : memref<1x8x8x128xf32, #tpu.memory_space<vmem>>, vector<1x1x8x128xf32>,
    %c45 = arith.constant 45 : index
    %c0_76 = arith.constant 0 : index
    %63 = vector.load %arg3[%c45, %c0_76] : memref<72x128xf32, #tpu.memory_space<vmem>>, vector<8x128xf32>
    %c0_77 = arith.constant 0 : index
    %c5 = arith.constant 5 : index
    %c0_78 = arith.constant 0 : index
    %c0_79 = arith.constant 0 : index
    %64 = vector.load %arg2[%c0_77, %c5, %c0_78, %c0_79] : memref<1x8x8x128xf32, #tpu.memory_space<vmem>>, vector<1x1x8x128xf32>
    %65 = vector.shape_cast %64 : vector<1x1x8x128xf32> to vector<8x128xf32>
    %66 = vector.shape_cast %63 : vector<8x128xf32> to vector<1x1x8x128xf32>
    tpu.vector_store %arg2[%c0_77, %c5, %c0_78, %c0_79], %66 {strides = array<i32>} : memref<1x8x8x128xf32, #tpu.memory_space<vmem>>, vector<1x1x8x128xf32>,
    %c54 = arith.constant 54 : index
    %c0_80 = arith.constant 0 : index
    %67 = vector.load %arg3[%c54, %c0_80] : memref<72x128xf32, #tpu.memory_space<vmem>>, vector<8x128xf32>
    %c0_81 = arith.constant 0 : index
    %c6 = arith.constant 6 : index
    %c0_82 = arith.constant 0 : index
    %c0_83 = arith.constant 0 : index
    %68 = vector.load %arg2[%c0_81, %c6, %c0_82, %c0_83] : memref<1x8x8x128xf32, #tpu.memory_space<vmem>>, vector<1x1x8x128xf32>
    %69 = vector.shape_cast %68 : vector<1x1x8x128xf32> to vector<8x128xf32>
    %70 = vector.shape_cast %67 : vector<8x128xf32> to vector<1x1x8x128xf32>
    tpu.vector_store %arg2[%c0_81, %c6, %c0_82, %c0_83], %70 {strides = array<i32>} : memref<1x8x8x128xf32, #tpu.memory_space<vmem>>, vector<1x1x8x128xf32>,
    %c63 = arith.constant 63 : index
    %c0_84 = arith.constant 0 : index
    %71 = vector.load %arg3[%c63, %c0_84] : memref<72x128xf32, #tpu.memory_space<vmem>>, vector<8x128xf32>
    %c0_85 = arith.constant 0 : index
    %c7 = arith.constant 7 : index
    %c0_86 = arith.constant 0 : index
    %c0_87 = arith.constant 0 : index
    %72 = vector.load %arg2[%c0_85, %c7, %c0_86, %c0_87] : memref<1x8x8x128xf32, #tpu.memory_space<vmem>>, vector<1x1x8x128xf32>
    %73 = vector.shape_cast %72 : vector<1x1x8x128xf32> to vector<8x128xf32>
    %74 = vector.shape_cast %71 : vector<8x128xf32> to vector<1x1x8x128xf32>
    tpu.vector_store %arg2[%c0_85, %c7, %c0_86, %c0_87], %74 {strides = array<i32>} : memref<1x8x8x128xf32, #tpu.memory_space<vmem>>, vector<1x1x8x128xf32>,
    return
  }
  func.func @transform_0(%arg0: i32) -> (i32, i32, i32) {
    %c0_i32 = arith.constant 0 : i32
    %c0_i32_0 = arith.constant 0 : i32
    %c0_i32_1 = arith.constant 0 : i32
    return %arg0, %c0_i32, %c0_i32_0 : i32, i32, i32
  }
  func.func @transform_1(%arg0: i32) -> (i32, i32, i32, i32) {
    %c0_i32 = arith.constant 0 : i32
    %c0_i32_0 = arith.constant 0 : i32
    %c0_i32_1 = arith.constant 0 : i32
    %c0_i32_2 = arith.constant 0 : i32
    return %arg0, %c0_i32, %c0_i32_0, %c0_i32_1 : i32, i32, i32, i32
  }
}

module attributes {stable_mosaic.version = 11 : i64} {
  func.func @_conv_tap_kernel(%arg0: i32, %arg1: memref<1x72x128xf32, #tpu.memory_space<vmem>>, %arg2: memref<9x128x128xf32, #tpu.memory_space<vmem>>, %arg3: memref<1x128xf32, #tpu.memory_space<vmem>>, %arg4: memref<1x6x6x128xf32, #tpu.memory_space<vmem>>, %arg5: memref<48x128xf32, #tpu.memory_space<vmem>>) attributes {dimension_semantics = [#tpu.dimension_semantics<parallel>], iteration_bounds = array<i64: 2>, scalar_prefetch = 0 : i64, scratch_operands = 1 : i64, tpu.core_type = #tpu.core_type<tc>, window_params = [{transform_indices = @transform_0, window_bounds = array<i64: 1, 72, 128>}, {pipeline_mode = #tpu.pipeline_mode<synchronous>, transform_indices = @transform_1, window_bounds = array<i64: 9, 128, 128>}, {pipeline_mode = #tpu.pipeline_mode<synchronous>, transform_indices = @transform_2, window_bounds = array<i64: 1, 128>}, {transform_indices = @transform_3, window_bounds = array<i64: 1, 6, 6, 128>}]} {
    %c0 = arith.constant 0 : index
    %c0_0 = arith.constant 0 : index
    %c0_1 = arith.constant 0 : index
    %0 = vector.load %arg1[%c0, %c0_0, %c0_1] : memref<1x72x128xf32, #tpu.memory_space<vmem>>, vector<1x48x128xf32>
    %1 = vector.shape_cast %0 : vector<1x48x128xf32> to vector<48x128xf32>
    %c0_2 = arith.constant 0 : index
    %c0_3 = arith.constant 0 : index
    %c0_4 = arith.constant 0 : index
    %2 = vector.load %arg2[%c0_2, %c0_3, %c0_4] : memref<9x128x128xf32, #tpu.memory_space<vmem>>, vector<1x128x128xf32>
    %3 = vector.shape_cast %2 : vector<1x128x128xf32> to vector<128x128xf32>
    %cst = arith.constant dense<0.000000e+00> : vector<48x128xf32>
    %4 = tpu.matmul %1, %3, %cst {dimension_numbers = #tpu.dot_dimension_numbers<[1], [0], [0], [1], [0, 0, 1, 1], [], []>} : vector<48x128xf32>, vector<128x128xf32>, vector<48x128xf32> -> vector<48x128xf32>
    %c0_5 = arith.constant 0 : index
    %c0_6 = arith.constant 0 : index
    %5 = vector.load %arg3[%c0_5, %c0_6] : memref<1x128xf32, #tpu.memory_space<vmem>>, vector<1x128xf32>
    %6 = vector.broadcast %5 : vector<1x128xf32> to vector<48x128xf32>
    %7 = arith.addf %4, %6 : vector<48x128xf32>
    %c0_7 = arith.constant 0 : index
    %c0_8 = arith.constant 0 : index
    %8 = vector.load %arg5[%c0_7, %c0_8] : memref<48x128xf32, #tpu.memory_space<vmem>>, vector<48x128xf32>
    tpu.vector_store %arg5[%c0_7, %c0_8], %7 {strides = array<i32>} : memref<48x128xf32, #tpu.memory_space<vmem>>, vector<48x128xf32>,
    %c0_9 = arith.constant 0 : index
    %c0_10 = arith.constant 0 : index
    %9 = vector.load %arg5[%c0_9, %c0_10] : memref<48x128xf32, #tpu.memory_space<vmem>>, vector<48x128xf32>
    %c0_11 = arith.constant 0 : index
    %c1 = arith.constant 1 : index
    %c0_12 = arith.constant 0 : index
    %10 = vector.load %arg1[%c0_11, %c1, %c0_12] : memref<1x72x128xf32, #tpu.memory_space<vmem>>, vector<1x48x128xf32>
    %11 = vector.shape_cast %10 : vector<1x48x128xf32> to vector<48x128xf32>
    %c1_13 = arith.constant 1 : index
    %c0_14 = arith.constant 0 : index
    %c0_15 = arith.constant 0 : index
    %12 = vector.load %arg2[%c1_13, %c0_14, %c0_15] : memref<9x128x128xf32, #tpu.memory_space<vmem>>, vector<1x128x128xf32>
    %13 = vector.shape_cast %12 : vector<1x128x128xf32> to vector<128x128xf32>
    %cst_16 = arith.constant dense<0.000000e+00> : vector<48x128xf32>
    %14 = tpu.matmul %11, %13, %cst_16 {dimension_numbers = #tpu.dot_dimension_numbers<[1], [0], [0], [1], [0, 0, 1, 1], [], []>} : vector<48x128xf32>, vector<128x128xf32>, vector<48x128xf32> -> vector<48x128xf32>
    %15 = arith.addf %9, %14 : vector<48x128xf32>
    %c0_17 = arith.constant 0 : index
    %c0_18 = arith.constant 0 : index
    %16 = vector.load %arg5[%c0_17, %c0_18] : memref<48x128xf32, #tpu.memory_space<vmem>>, vector<48x128xf32>
    tpu.vector_store %arg5[%c0_17, %c0_18], %15 {strides = array<i32>} : memref<48x128xf32, #tpu.memory_space<vmem>>, vector<48x128xf32>,
    %c0_19 = arith.constant 0 : index
    %c0_20 = arith.constant 0 : index
    %17 = vector.load %arg5[%c0_19, %c0_20] : memref<48x128xf32, #tpu.memory_space<vmem>>, vector<48x128xf32>
    %c0_21 = arith.constant 0 : index
    %c2 = arith.constant 2 : index
    %c0_22 = arith.constant 0 : index
    %18 = vector.load %arg1[%c0_21, %c2, %c0_22] : memref<1x72x128xf32, #tpu.memory_space<vmem>>, vector<1x48x128xf32>
    %19 = vector.shape_cast %18 : vector<1x48x128xf32> to vector<48x128xf32>
    %c2_23 = arith.constant 2 : index
    %c0_24 = arith.constant 0 : index
    %c0_25 = arith.constant 0 : index
    %20 = vector.load %arg2[%c2_23, %c0_24, %c0_25] : memref<9x128x128xf32, #tpu.memory_space<vmem>>, vector<1x128x128xf32>
    %21 = vector.shape_cast %20 : vector<1x128x128xf32> to vector<128x128xf32>
    %cst_26 = arith.constant dense<0.000000e+00> : vector<48x128xf32>
    %22 = tpu.matmul %19, %21, %cst_26 {dimension_numbers = #tpu.dot_dimension_numbers<[1], [0], [0], [1], [0, 0, 1, 1], [], []>} : vector<48x128xf32>, vector<128x128xf32>, vector<48x128xf32> -> vector<48x128xf32>
    %23 = arith.addf %17, %22 : vector<48x128xf32>
    %c0_27 = arith.constant 0 : index
    %c0_28 = arith.constant 0 : index
    %24 = vector.load %arg5[%c0_27, %c0_28] : memref<48x128xf32, #tpu.memory_space<vmem>>, vector<48x128xf32>
    tpu.vector_store %arg5[%c0_27, %c0_28], %23 {strides = array<i32>} : memref<48x128xf32, #tpu.memory_space<vmem>>, vector<48x128xf32>,
    %c0_29 = arith.constant 0 : index
    %c0_30 = arith.constant 0 : index
    %25 = vector.load %arg5[%c0_29, %c0_30] : memref<48x128xf32, #tpu.memory_space<vmem>>, vector<48x128xf32>
    %c0_31 = arith.constant 0 : index
    %c8 = arith.constant 8 : index
    %c0_32 = arith.constant 0 : index
    %26 = vector.load %arg1[%c0_31, %c8, %c0_32] : memref<1x72x128xf32, #tpu.memory_space<vmem>>, vector<1x48x128xf32>
    %27 = vector.shape_cast %26 : vector<1x48x128xf32> to vector<48x128xf32>
    %c3 = arith.constant 3 : index
    %c0_33 = arith.constant 0 : index
    %c0_34 = arith.constant 0 : index
    %28 = vector.load %arg2[%c3, %c0_33, %c0_34] : memref<9x128x128xf32, #tpu.memory_space<vmem>>, vector<1x128x128xf32>
    %29 = vector.shape_cast %28 : vector<1x128x128xf32> to vector<128x128xf32>
    %cst_35 = arith.constant dense<0.000000e+00> : vector<48x128xf32>
    %30 = tpu.matmul %27, %29, %cst_35 {dimension_numbers = #tpu.dot_dimension_numbers<[1], [0], [0], [1], [0, 0, 1, 1], [], []>} : vector<48x128xf32>, vector<128x128xf32>, vector<48x128xf32> -> vector<48x128xf32>
    %31 = arith.addf %25, %30 : vector<48x128xf32>
    %c0_36 = arith.constant 0 : index
    %c0_37 = arith.constant 0 : index
    %32 = vector.load %arg5[%c0_36, %c0_37] : memref<48x128xf32, #tpu.memory_space<vmem>>, vector<48x128xf32>
    tpu.vector_store %arg5[%c0_36, %c0_37], %31 {strides = array<i32>} : memref<48x128xf32, #tpu.memory_space<vmem>>, vector<48x128xf32>,
    %c0_38 = arith.constant 0 : index
    %c0_39 = arith.constant 0 : index
    %33 = vector.load %arg5[%c0_38, %c0_39] : memref<48x128xf32, #tpu.memory_space<vmem>>, vector<48x128xf32>
    %c0_40 = arith.constant 0 : index
    %c9 = arith.constant 9 : index
    %c0_41 = arith.constant 0 : index
    %34 = vector.load %arg1[%c0_40, %c9, %c0_41] : memref<1x72x128xf32, #tpu.memory_space<vmem>>, vector<1x48x128xf32>
    %35 = vector.shape_cast %34 : vector<1x48x128xf32> to vector<48x128xf32>
    %c4 = arith.constant 4 : index
    %c0_42 = arith.constant 0 : index
    %c0_43 = arith.constant 0 : index
    %36 = vector.load %arg2[%c4, %c0_42, %c0_43] : memref<9x128x128xf32, #tpu.memory_space<vmem>>, vector<1x128x128xf32>
    %37 = vector.shape_cast %36 : vector<1x128x128xf32> to vector<128x128xf32>
    %cst_44 = arith.constant dense<0.000000e+00> : vector<48x128xf32>
    %38 = tpu.matmul %35, %37, %cst_44 {dimension_numbers = #tpu.dot_dimension_numbers<[1], [0], [0], [1], [0, 0, 1, 1], [], []>} : vector<48x128xf32>, vector<128x128xf32>, vector<48x128xf32> -> vector<48x128xf32>
    %39 = arith.addf %33, %38 : vector<48x128xf32>
    %c0_45 = arith.constant 0 : index
    %c0_46 = arith.constant 0 : index
    %40 = vector.load %arg5[%c0_45, %c0_46] : memref<48x128xf32, #tpu.memory_space<vmem>>, vector<48x128xf32>
    tpu.vector_store %arg5[%c0_45, %c0_46], %39 {strides = array<i32>} : memref<48x128xf32, #tpu.memory_space<vmem>>, vector<48x128xf32>,
    %c0_47 = arith.constant 0 : index
    %c0_48 = arith.constant 0 : index
    %41 = vector.load %arg5[%c0_47, %c0_48] : memref<48x128xf32, #tpu.memory_space<vmem>>, vector<48x128xf32>
    %c0_49 = arith.constant 0 : index
    %c10 = arith.constant 10 : index
    %c0_50 = arith.constant 0 : index
    %42 = vector.load %arg1[%c0_49, %c10, %c0_50] : memref<1x72x128xf32, #tpu.memory_space<vmem>>, vector<1x48x128xf32>
    %43 = vector.shape_cast %42 : vector<1x48x128xf32> to vector<48x128xf32>
    %c5 = arith.constant 5 : index
    %c0_51 = arith.constant 0 : index
    %c0_52 = arith.constant 0 : index
    %44 = vector.load %arg2[%c5, %c0_51, %c0_52] : memref<9x128x128xf32, #tpu.memory_space<vmem>>, vector<1x128x128xf32>
    %45 = vector.shape_cast %44 : vector<1x128x128xf32> to vector<128x128xf32>
    %cst_53 = arith.constant dense<0.000000e+00> : vector<48x128xf32>
    %46 = tpu.matmul %43, %45, %cst_53 {dimension_numbers = #tpu.dot_dimension_numbers<[1], [0], [0], [1], [0, 0, 1, 1], [], []>} : vector<48x128xf32>, vector<128x128xf32>, vector<48x128xf32> -> vector<48x128xf32>
    %47 = arith.addf %41, %46 : vector<48x128xf32>
    %c0_54 = arith.constant 0 : index
    %c0_55 = arith.constant 0 : index
    %48 = vector.load %arg5[%c0_54, %c0_55] : memref<48x128xf32, #tpu.memory_space<vmem>>, vector<48x128xf32>
    tpu.vector_store %arg5[%c0_54, %c0_55], %47 {strides = array<i32>} : memref<48x128xf32, #tpu.memory_space<vmem>>, vector<48x128xf32>,
    %c0_56 = arith.constant 0 : index
    %c0_57 = arith.constant 0 : index
    %49 = vector.load %arg5[%c0_56, %c0_57] : memref<48x128xf32, #tpu.memory_space<vmem>>, vector<48x128xf32>
    %c0_58 = arith.constant 0 : index
    %c16 = arith.constant 16 : index
    %c0_59 = arith.constant 0 : index
    %50 = vector.load %arg1[%c0_58, %c16, %c0_59] : memref<1x72x128xf32, #tpu.memory_space<vmem>>, vector<1x48x128xf32>
    %51 = vector.shape_cast %50 : vector<1x48x128xf32> to vector<48x128xf32>
    %c6 = arith.constant 6 : index
    %c0_60 = arith.constant 0 : index
    %c0_61 = arith.constant 0 : index
    %52 = vector.load %arg2[%c6, %c0_60, %c0_61] : memref<9x128x128xf32, #tpu.memory_space<vmem>>, vector<1x128x128xf32>
    %53 = vector.shape_cast %52 : vector<1x128x128xf32> to vector<128x128xf32>
    %cst_62 = arith.constant dense<0.000000e+00> : vector<48x128xf32>
    %54 = tpu.matmul %51, %53, %cst_62 {dimension_numbers = #tpu.dot_dimension_numbers<[1], [0], [0], [1], [0, 0, 1, 1], [], []>} : vector<48x128xf32>, vector<128x128xf32>, vector<48x128xf32> -> vector<48x128xf32>
    %55 = arith.addf %49, %54 : vector<48x128xf32>
    %c0_63 = arith.constant 0 : index
    %c0_64 = arith.constant 0 : index
    %56 = vector.load %arg5[%c0_63, %c0_64] : memref<48x128xf32, #tpu.memory_space<vmem>>, vector<48x128xf32>
    tpu.vector_store %arg5[%c0_63, %c0_64], %55 {strides = array<i32>} : memref<48x128xf32, #tpu.memory_space<vmem>>, vector<48x128xf32>,
    %c0_65 = arith.constant 0 : index
    %c0_66 = arith.constant 0 : index
    %57 = vector.load %arg5[%c0_65, %c0_66] : memref<48x128xf32, #tpu.memory_space<vmem>>, vector<48x128xf32>
    %c0_67 = arith.constant 0 : index
    %c17 = arith.constant 17 : index
    %c0_68 = arith.constant 0 : index
    %58 = vector.load %arg1[%c0_67, %c17, %c0_68] : memref<1x72x128xf32, #tpu.memory_space<vmem>>, vector<1x48x128xf32>
    %59 = vector.shape_cast %58 : vector<1x48x128xf32> to vector<48x128xf32>
    %c7 = arith.constant 7 : index
    %c0_69 = arith.constant 0 : index
    %c0_70 = arith.constant 0 : index
    %60 = vector.load %arg2[%c7, %c0_69, %c0_70] : memref<9x128x128xf32, #tpu.memory_space<vmem>>, vector<1x128x128xf32>
    %61 = vector.shape_cast %60 : vector<1x128x128xf32> to vector<128x128xf32>
    %cst_71 = arith.constant dense<0.000000e+00> : vector<48x128xf32>
    %62 = tpu.matmul %59, %61, %cst_71 {dimension_numbers = #tpu.dot_dimension_numbers<[1], [0], [0], [1], [0, 0, 1, 1], [], []>} : vector<48x128xf32>, vector<128x128xf32>, vector<48x128xf32> -> vector<48x128xf32>
    %63 = arith.addf %57, %62 : vector<48x128xf32>
    %c0_72 = arith.constant 0 : index
    %c0_73 = arith.constant 0 : index
    %64 = vector.load %arg5[%c0_72, %c0_73] : memref<48x128xf32, #tpu.memory_space<vmem>>, vector<48x128xf32>
    tpu.vector_store %arg5[%c0_72, %c0_73], %63 {strides = array<i32>} : memref<48x128xf32, #tpu.memory_space<vmem>>, vector<48x128xf32>,
    %c0_74 = arith.constant 0 : index
    %c0_75 = arith.constant 0 : index
    %65 = vector.load %arg5[%c0_74, %c0_75] : memref<48x128xf32, #tpu.memory_space<vmem>>, vector<48x128xf32>
    %c0_76 = arith.constant 0 : index
    %c18 = arith.constant 18 : index
    %c0_77 = arith.constant 0 : index
    %66 = vector.load %arg1[%c0_76, %c18, %c0_77] : memref<1x72x128xf32, #tpu.memory_space<vmem>>, vector<1x48x128xf32>
    %67 = vector.shape_cast %66 : vector<1x48x128xf32> to vector<48x128xf32>
    %c8_78 = arith.constant 8 : index
    %c0_79 = arith.constant 0 : index
    %c0_80 = arith.constant 0 : index
    %68 = vector.load %arg2[%c8_78, %c0_79, %c0_80] : memref<9x128x128xf32, #tpu.memory_space<vmem>>, vector<1x128x128xf32>
    %69 = vector.shape_cast %68 : vector<1x128x128xf32> to vector<128x128xf32>
    %cst_81 = arith.constant dense<0.000000e+00> : vector<48x128xf32>
    %70 = tpu.matmul %67, %69, %cst_81 {dimension_numbers = #tpu.dot_dimension_numbers<[1], [0], [0], [1], [0, 0, 1, 1], [], []>} : vector<48x128xf32>, vector<128x128xf32>, vector<48x128xf32> -> vector<48x128xf32>
    %71 = arith.addf %65, %70 : vector<48x128xf32>
    %c0_82 = arith.constant 0 : index
    %c0_83 = arith.constant 0 : index
    %72 = vector.load %arg5[%c0_82, %c0_83] : memref<48x128xf32, #tpu.memory_space<vmem>>, vector<48x128xf32>
    tpu.vector_store %arg5[%c0_82, %c0_83], %71 {strides = array<i32>} : memref<48x128xf32, #tpu.memory_space<vmem>>, vector<48x128xf32>,
    %c0_84 = arith.constant 0 : index
    %c0_85 = arith.constant 0 : index
    %73 = vector.load %arg5[%c0_84, %c0_85] : memref<48x128xf32, #tpu.memory_space<vmem>>, vector<6x128xf32>
    %c0_86 = arith.constant 0 : index
    %c0_87 = arith.constant 0 : index
    %c0_88 = arith.constant 0 : index
    %c0_89 = arith.constant 0 : index
    %74 = vector.load %arg4[%c0_86, %c0_87, %c0_88, %c0_89] : memref<1x6x6x128xf32, #tpu.memory_space<vmem>>, vector<1x1x6x128xf32>
    %75 = vector.shape_cast %74 : vector<1x1x6x128xf32> to vector<6x128xf32>
    %76 = vector.shape_cast %73 : vector<6x128xf32> to vector<1x1x6x128xf32>
    tpu.vector_store %arg4[%c0_86, %c0_87, %c0_88, %c0_89], %76 {strides = array<i32>} : memref<1x6x6x128xf32, #tpu.memory_space<vmem>>, vector<1x1x6x128xf32>,
    %c8_90 = arith.constant 8 : index
    %c0_91 = arith.constant 0 : index
    %77 = vector.load %arg5[%c8_90, %c0_91] : memref<48x128xf32, #tpu.memory_space<vmem>>, vector<6x128xf32>
    %c0_92 = arith.constant 0 : index
    %c1_93 = arith.constant 1 : index
    %c0_94 = arith.constant 0 : index
    %c0_95 = arith.constant 0 : index
    %78 = vector.load %arg4[%c0_92, %c1_93, %c0_94, %c0_95] : memref<1x6x6x128xf32, #tpu.memory_space<vmem>>, vector<1x1x6x128xf32>
    %79 = vector.shape_cast %78 : vector<1x1x6x128xf32> to vector<6x128xf32>
    %80 = vector.shape_cast %77 : vector<6x128xf32> to vector<1x1x6x128xf32>
    tpu.vector_store %arg4[%c0_92, %c1_93, %c0_94, %c0_95], %80 {strides = array<i32>} : memref<1x6x6x128xf32, #tpu.memory_space<vmem>>, vector<1x1x6x128xf32>,
    %c16_96 = arith.constant 16 : index
    %c0_97 = arith.constant 0 : index
    %81 = vector.load %arg5[%c16_96, %c0_97] : memref<48x128xf32, #tpu.memory_space<vmem>>, vector<6x128xf32>
    %c0_98 = arith.constant 0 : index
    %c2_99 = arith.constant 2 : index
    %c0_100 = arith.constant 0 : index
    %c0_101 = arith.constant 0 : index
    %82 = vector.load %arg4[%c0_98, %c2_99, %c0_100, %c0_101] : memref<1x6x6x128xf32, #tpu.memory_space<vmem>>, vector<1x1x6x128xf32>
    %83 = vector.shape_cast %82 : vector<1x1x6x128xf32> to vector<6x128xf32>
    %84 = vector.shape_cast %81 : vector<6x128xf32> to vector<1x1x6x128xf32>
    tpu.vector_store %arg4[%c0_98, %c2_99, %c0_100, %c0_101], %84 {strides = array<i32>} : memref<1x6x6x128xf32, #tpu.memory_space<vmem>>, vector<1x1x6x128xf32>,
    %c24 = arith.constant 24 : index
    %c0_102 = arith.constant 0 : index
    %85 = vector.load %arg5[%c24, %c0_102] : memref<48x128xf32, #tpu.memory_space<vmem>>, vector<6x128xf32>
    %c0_103 = arith.constant 0 : index
    %c3_104 = arith.constant 3 : index
    %c0_105 = arith.constant 0 : index
    %c0_106 = arith.constant 0 : index
    %86 = vector.load %arg4[%c0_103, %c3_104, %c0_105, %c0_106] : memref<1x6x6x128xf32, #tpu.memory_space<vmem>>, vector<1x1x6x128xf32>
    %87 = vector.shape_cast %86 : vector<1x1x6x128xf32> to vector<6x128xf32>
    %88 = vector.shape_cast %85 : vector<6x128xf32> to vector<1x1x6x128xf32>
    tpu.vector_store %arg4[%c0_103, %c3_104, %c0_105, %c0_106], %88 {strides = array<i32>} : memref<1x6x6x128xf32, #tpu.memory_space<vmem>>, vector<1x1x6x128xf32>,
    %c32 = arith.constant 32 : index
    %c0_107 = arith.constant 0 : index
    %89 = vector.load %arg5[%c32, %c0_107] : memref<48x128xf32, #tpu.memory_space<vmem>>, vector<6x128xf32>
    %c0_108 = arith.constant 0 : index
    %c4_109 = arith.constant 4 : index
    %c0_110 = arith.constant 0 : index
    %c0_111 = arith.constant 0 : index
    %90 = vector.load %arg4[%c0_108, %c4_109, %c0_110, %c0_111] : memref<1x6x6x128xf32, #tpu.memory_space<vmem>>, vector<1x1x6x128xf32>
    %91 = vector.shape_cast %90 : vector<1x1x6x128xf32> to vector<6x128xf32>
    %92 = vector.shape_cast %89 : vector<6x128xf32> to vector<1x1x6x128xf32>
    tpu.vector_store %arg4[%c0_108, %c4_109, %c0_110, %c0_111], %92 {strides = array<i32>} : memref<1x6x6x128xf32, #tpu.memory_space<vmem>>, vector<1x1x6x128xf32>,
    %c40 = arith.constant 40 : index
    %c0_112 = arith.constant 0 : index
    %93 = vector.load %arg5[%c40, %c0_112] : memref<48x128xf32, #tpu.memory_space<vmem>>, vector<6x128xf32>
    %c0_113 = arith.constant 0 : index
    %c5_114 = arith.constant 5 : index
    %c0_115 = arith.constant 0 : index
    %c0_116 = arith.constant 0 : index
    %94 = vector.load %arg4[%c0_113, %c5_114, %c0_115, %c0_116] : memref<1x6x6x128xf32, #tpu.memory_space<vmem>>, vector<1x1x6x128xf32>
    %95 = vector.shape_cast %94 : vector<1x1x6x128xf32> to vector<6x128xf32>
    %96 = vector.shape_cast %93 : vector<6x128xf32> to vector<1x1x6x128xf32>
    tpu.vector_store %arg4[%c0_113, %c5_114, %c0_115, %c0_116], %96 {strides = array<i32>} : memref<1x6x6x128xf32, #tpu.memory_space<vmem>>, vector<1x1x6x128xf32>,
    return
  }
  func.func @transform_0(%arg0: i32) -> (i32, i32, i32) {
    %c0_i32 = arith.constant 0 : i32
    %c0_i32_0 = arith.constant 0 : i32
    %c0_i32_1 = arith.constant 0 : i32
    return %arg0, %c0_i32, %c0_i32_0 : i32, i32, i32
  }
  func.func @transform_1(%arg0: i32) -> (i32, i32, i32) {
    %c0_i32 = arith.constant 0 : i32
    %c0_i32_0 = arith.constant 0 : i32
    %c0_i32_1 = arith.constant 0 : i32
    %c0_i32_2 = arith.constant 0 : i32
    return %c0_i32, %c0_i32_0, %c0_i32_1 : i32, i32, i32
  }
  func.func @transform_2(%arg0: i32) -> (i32, i32) {
    %c0_i32 = arith.constant 0 : i32
    %c0_i32_0 = arith.constant 0 : i32
    %c0_i32_1 = arith.constant 0 : i32
    return %c0_i32, %c0_i32_0 : i32, i32
  }
  func.func @transform_3(%arg0: i32) -> (i32, i32, i32, i32) {
    %c0_i32 = arith.constant 0 : i32
    %c0_i32_0 = arith.constant 0 : i32
    %c0_i32_1 = arith.constant 0 : i32
    %c0_i32_2 = arith.constant 0 : i32
    return %arg0, %c0_i32, %c0_i32_0, %c0_i32_1 : i32, i32, i32, i32
  }
}

module attributes {stable_mosaic.version = 11 : i64} {
  func.func @_conv_tap_kernel(%arg0: i32, %arg1: memref<1x24x256xf32, #tpu.memory_space<vmem>>, %arg2: memref<9x256x384xf32, #tpu.memory_space<vmem>>, %arg3: memref<1x384xf32, #tpu.memory_space<vmem>>, %arg4: memref<1x2x2x384xf32, #tpu.memory_space<vmem>>, %arg5: memref<8x384xf32, #tpu.memory_space<vmem>>) attributes {dimension_semantics = [#tpu.dimension_semantics<parallel>], iteration_bounds = array<i64: 2>, scalar_prefetch = 0 : i64, scratch_operands = 1 : i64, tpu.core_type = #tpu.core_type<tc>, window_params = [{transform_indices = @transform_0, window_bounds = array<i64: 1, 24, 256>}, {pipeline_mode = #tpu.pipeline_mode<synchronous>, transform_indices = @transform_1, window_bounds = array<i64: 9, 256, 384>}, {pipeline_mode = #tpu.pipeline_mode<synchronous>, transform_indices = @transform_2, window_bounds = array<i64: 1, 384>}, {transform_indices = @transform_3, window_bounds = array<i64: 1, 2, 2, 384>}]} {
    %c0 = arith.constant 0 : index
    %c0_0 = arith.constant 0 : index
    %c0_1 = arith.constant 0 : index
    %0 = vector.load %arg1[%c0, %c0_0, %c0_1] : memref<1x24x256xf32, #tpu.memory_space<vmem>>, vector<1x8x256xf32>
    %1 = vector.shape_cast %0 : vector<1x8x256xf32> to vector<8x256xf32>
    %c0_2 = arith.constant 0 : index
    %c0_3 = arith.constant 0 : index
    %c0_4 = arith.constant 0 : index
    %2 = vector.load %arg2[%c0_2, %c0_3, %c0_4] : memref<9x256x384xf32, #tpu.memory_space<vmem>>, vector<1x256x384xf32>
    %3 = vector.shape_cast %2 : vector<1x256x384xf32> to vector<256x384xf32>
    %cst = arith.constant dense<0.000000e+00> : vector<8x384xf32>
    %4 = tpu.matmul %1, %3, %cst {dimension_numbers = #tpu.dot_dimension_numbers<[1], [0], [0], [1], [0, 0, 1, 1], [], []>} : vector<8x256xf32>, vector<256x384xf32>, vector<8x384xf32> -> vector<8x384xf32>
    %c0_5 = arith.constant 0 : index
    %c0_6 = arith.constant 0 : index
    %5 = vector.load %arg3[%c0_5, %c0_6] : memref<1x384xf32, #tpu.memory_space<vmem>>, vector<1x384xf32>
    %6 = vector.broadcast %5 : vector<1x384xf32> to vector<8x384xf32>
    %7 = arith.addf %4, %6 : vector<8x384xf32>
    %c0_7 = arith.constant 0 : index
    %c0_8 = arith.constant 0 : index
    %8 = vector.load %arg5[%c0_7, %c0_8] : memref<8x384xf32, #tpu.memory_space<vmem>>, vector<8x384xf32>
    tpu.vector_store %arg5[%c0_7, %c0_8], %7 {strides = array<i32>} : memref<8x384xf32, #tpu.memory_space<vmem>>, vector<8x384xf32>,
    %c0_9 = arith.constant 0 : index
    %c0_10 = arith.constant 0 : index
    %9 = vector.load %arg5[%c0_9, %c0_10] : memref<8x384xf32, #tpu.memory_space<vmem>>, vector<8x384xf32>
    %c0_11 = arith.constant 0 : index
    %c1 = arith.constant 1 : index
    %c0_12 = arith.constant 0 : index
    %10 = vector.load %arg1[%c0_11, %c1, %c0_12] : memref<1x24x256xf32, #tpu.memory_space<vmem>>, vector<1x8x256xf32>
    %11 = vector.shape_cast %10 : vector<1x8x256xf32> to vector<8x256xf32>
    %c1_13 = arith.constant 1 : index
    %c0_14 = arith.constant 0 : index
    %c0_15 = arith.constant 0 : index
    %12 = vector.load %arg2[%c1_13, %c0_14, %c0_15] : memref<9x256x384xf32, #tpu.memory_space<vmem>>, vector<1x256x384xf32>
    %13 = vector.shape_cast %12 : vector<1x256x384xf32> to vector<256x384xf32>
    %cst_16 = arith.constant dense<0.000000e+00> : vector<8x384xf32>
    %14 = tpu.matmul %11, %13, %cst_16 {dimension_numbers = #tpu.dot_dimension_numbers<[1], [0], [0], [1], [0, 0, 1, 1], [], []>} : vector<8x256xf32>, vector<256x384xf32>, vector<8x384xf32> -> vector<8x384xf32>
    %15 = arith.addf %9, %14 : vector<8x384xf32>
    %c0_17 = arith.constant 0 : index
    %c0_18 = arith.constant 0 : index
    %16 = vector.load %arg5[%c0_17, %c0_18] : memref<8x384xf32, #tpu.memory_space<vmem>>, vector<8x384xf32>
    tpu.vector_store %arg5[%c0_17, %c0_18], %15 {strides = array<i32>} : memref<8x384xf32, #tpu.memory_space<vmem>>, vector<8x384xf32>,
    %c0_19 = arith.constant 0 : index
    %c0_20 = arith.constant 0 : index
    %17 = vector.load %arg5[%c0_19, %c0_20] : memref<8x384xf32, #tpu.memory_space<vmem>>, vector<8x384xf32>
    %c0_21 = arith.constant 0 : index
    %c2 = arith.constant 2 : index
    %c0_22 = arith.constant 0 : index
    %18 = vector.load %arg1[%c0_21, %c2, %c0_22] : memref<1x24x256xf32, #tpu.memory_space<vmem>>, vector<1x8x256xf32>
    %19 = vector.shape_cast %18 : vector<1x8x256xf32> to vector<8x256xf32>
    %c2_23 = arith.constant 2 : index
    %c0_24 = arith.constant 0 : index
    %c0_25 = arith.constant 0 : index
    %20 = vector.load %arg2[%c2_23, %c0_24, %c0_25] : memref<9x256x384xf32, #tpu.memory_space<vmem>>, vector<1x256x384xf32>
    %21 = vector.shape_cast %20 : vector<1x256x384xf32> to vector<256x384xf32>
    %cst_26 = arith.constant dense<0.000000e+00> : vector<8x384xf32>
    %22 = tpu.matmul %19, %21, %cst_26 {dimension_numbers = #tpu.dot_dimension_numbers<[1], [0], [0], [1], [0, 0, 1, 1], [], []>} : vector<8x256xf32>, vector<256x384xf32>, vector<8x384xf32> -> vector<8x384xf32>
    %23 = arith.addf %17, %22 : vector<8x384xf32>
    %c0_27 = arith.constant 0 : index
    %c0_28 = arith.constant 0 : index
    %24 = vector.load %arg5[%c0_27, %c0_28] : memref<8x384xf32, #tpu.memory_space<vmem>>, vector<8x384xf32>
    tpu.vector_store %arg5[%c0_27, %c0_28], %23 {strides = array<i32>} : memref<8x384xf32, #tpu.memory_space<vmem>>, vector<8x384xf32>,
    %c0_29 = arith.constant 0 : index
    %c0_30 = arith.constant 0 : index
    %25 = vector.load %arg5[%c0_29, %c0_30] : memref<8x384xf32, #tpu.memory_space<vmem>>, vector<8x384xf32>
    %c0_31 = arith.constant 0 : index
    %c4 = arith.constant 4 : index
    %c0_32 = arith.constant 0 : index
    %26 = vector.load %arg1[%c0_31, %c4, %c0_32] : memref<1x24x256xf32, #tpu.memory_space<vmem>>, vector<1x8x256xf32>
    %27 = vector.shape_cast %26 : vector<1x8x256xf32> to vector<8x256xf32>
    %c3 = arith.constant 3 : index
    %c0_33 = arith.constant 0 : index
    %c0_34 = arith.constant 0 : index
    %28 = vector.load %arg2[%c3, %c0_33, %c0_34] : memref<9x256x384xf32, #tpu.memory_space<vmem>>, vector<1x256x384xf32>
    %29 = vector.shape_cast %28 : vector<1x256x384xf32> to vector<256x384xf32>
    %cst_35 = arith.constant dense<0.000000e+00> : vector<8x384xf32>
    %30 = tpu.matmul %27, %29, %cst_35 {dimension_numbers = #tpu.dot_dimension_numbers<[1], [0], [0], [1], [0, 0, 1, 1], [], []>} : vector<8x256xf32>, vector<256x384xf32>, vector<8x384xf32> -> vector<8x384xf32>
    %31 = arith.addf %25, %30 : vector<8x384xf32>
    %c0_36 = arith.constant 0 : index
    %c0_37 = arith.constant 0 : index
    %32 = vector.load %arg5[%c0_36, %c0_37] : memref<8x384xf32, #tpu.memory_space<vmem>>, vector<8x384xf32>
    tpu.vector_store %arg5[%c0_36, %c0_37], %31 {strides = array<i32>} : memref<8x384xf32, #tpu.memory_space<vmem>>, vector<8x384xf32>,
    %c0_38 = arith.constant 0 : index
    %c0_39 = arith.constant 0 : index
    %33 = vector.load %arg5[%c0_38, %c0_39] : memref<8x384xf32, #tpu.memory_space<vmem>>, vector<8x384xf32>
    %c0_40 = arith.constant 0 : index
    %c5 = arith.constant 5 : index
    %c0_41 = arith.constant 0 : index
    %34 = vector.load %arg1[%c0_40, %c5, %c0_41] : memref<1x24x256xf32, #tpu.memory_space<vmem>>, vector<1x8x256xf32>
    %35 = vector.shape_cast %34 : vector<1x8x256xf32> to vector<8x256xf32>
    %c4_42 = arith.constant 4 : index
    %c0_43 = arith.constant 0 : index
    %c0_44 = arith.constant 0 : index
    %36 = vector.load %arg2[%c4_42, %c0_43, %c0_44] : memref<9x256x384xf32, #tpu.memory_space<vmem>>, vector<1x256x384xf32>
    %37 = vector.shape_cast %36 : vector<1x256x384xf32> to vector<256x384xf32>
    %cst_45 = arith.constant dense<0.000000e+00> : vector<8x384xf32>
    %38 = tpu.matmul %35, %37, %cst_45 {dimension_numbers = #tpu.dot_dimension_numbers<[1], [0], [0], [1], [0, 0, 1, 1], [], []>} : vector<8x256xf32>, vector<256x384xf32>, vector<8x384xf32> -> vector<8x384xf32>
    %39 = arith.addf %33, %38 : vector<8x384xf32>
    %c0_46 = arith.constant 0 : index
    %c0_47 = arith.constant 0 : index
    %40 = vector.load %arg5[%c0_46, %c0_47] : memref<8x384xf32, #tpu.memory_space<vmem>>, vector<8x384xf32>
    tpu.vector_store %arg5[%c0_46, %c0_47], %39 {strides = array<i32>} : memref<8x384xf32, #tpu.memory_space<vmem>>, vector<8x384xf32>,
    %c0_48 = arith.constant 0 : index
    %c0_49 = arith.constant 0 : index
    %41 = vector.load %arg5[%c0_48, %c0_49] : memref<8x384xf32, #tpu.memory_space<vmem>>, vector<8x384xf32>
    %c0_50 = arith.constant 0 : index
    %c6 = arith.constant 6 : index
    %c0_51 = arith.constant 0 : index
    %42 = vector.load %arg1[%c0_50, %c6, %c0_51] : memref<1x24x256xf32, #tpu.memory_space<vmem>>, vector<1x8x256xf32>
    %43 = vector.shape_cast %42 : vector<1x8x256xf32> to vector<8x256xf32>
    %c5_52 = arith.constant 5 : index
    %c0_53 = arith.constant 0 : index
    %c0_54 = arith.constant 0 : index
    %44 = vector.load %arg2[%c5_52, %c0_53, %c0_54] : memref<9x256x384xf32, #tpu.memory_space<vmem>>, vector<1x256x384xf32>
    %45 = vector.shape_cast %44 : vector<1x256x384xf32> to vector<256x384xf32>
    %cst_55 = arith.constant dense<0.000000e+00> : vector<8x384xf32>
    %46 = tpu.matmul %43, %45, %cst_55 {dimension_numbers = #tpu.dot_dimension_numbers<[1], [0], [0], [1], [0, 0, 1, 1], [], []>} : vector<8x256xf32>, vector<256x384xf32>, vector<8x384xf32> -> vector<8x384xf32>
    %47 = arith.addf %41, %46 : vector<8x384xf32>
    %c0_56 = arith.constant 0 : index
    %c0_57 = arith.constant 0 : index
    %48 = vector.load %arg5[%c0_56, %c0_57] : memref<8x384xf32, #tpu.memory_space<vmem>>, vector<8x384xf32>
    tpu.vector_store %arg5[%c0_56, %c0_57], %47 {strides = array<i32>} : memref<8x384xf32, #tpu.memory_space<vmem>>, vector<8x384xf32>,
    %c0_58 = arith.constant 0 : index
    %c0_59 = arith.constant 0 : index
    %49 = vector.load %arg5[%c0_58, %c0_59] : memref<8x384xf32, #tpu.memory_space<vmem>>, vector<8x384xf32>
    %c0_60 = arith.constant 0 : index
    %c8 = arith.constant 8 : index
    %c0_61 = arith.constant 0 : index
    %50 = vector.load %arg1[%c0_60, %c8, %c0_61] : memref<1x24x256xf32, #tpu.memory_space<vmem>>, vector<1x8x256xf32>
    %51 = vector.shape_cast %50 : vector<1x8x256xf32> to vector<8x256xf32>
    %c6_62 = arith.constant 6 : index
    %c0_63 = arith.constant 0 : index
    %c0_64 = arith.constant 0 : index
    %52 = vector.load %arg2[%c6_62, %c0_63, %c0_64] : memref<9x256x384xf32, #tpu.memory_space<vmem>>, vector<1x256x384xf32>
    %53 = vector.shape_cast %52 : vector<1x256x384xf32> to vector<256x384xf32>
    %cst_65 = arith.constant dense<0.000000e+00> : vector<8x384xf32>
    %54 = tpu.matmul %51, %53, %cst_65 {dimension_numbers = #tpu.dot_dimension_numbers<[1], [0], [0], [1], [0, 0, 1, 1], [], []>} : vector<8x256xf32>, vector<256x384xf32>, vector<8x384xf32> -> vector<8x384xf32>
    %55 = arith.addf %49, %54 : vector<8x384xf32>
    %c0_66 = arith.constant 0 : index
    %c0_67 = arith.constant 0 : index
    %56 = vector.load %arg5[%c0_66, %c0_67] : memref<8x384xf32, #tpu.memory_space<vmem>>, vector<8x384xf32>
    tpu.vector_store %arg5[%c0_66, %c0_67], %55 {strides = array<i32>} : memref<8x384xf32, #tpu.memory_space<vmem>>, vector<8x384xf32>,
    %c0_68 = arith.constant 0 : index
    %c0_69 = arith.constant 0 : index
    %57 = vector.load %arg5[%c0_68, %c0_69] : memref<8x384xf32, #tpu.memory_space<vmem>>, vector<8x384xf32>
    %c0_70 = arith.constant 0 : index
    %c9 = arith.constant 9 : index
    %c0_71 = arith.constant 0 : index
    %58 = vector.load %arg1[%c0_70, %c9, %c0_71] : memref<1x24x256xf32, #tpu.memory_space<vmem>>, vector<1x8x256xf32>
    %59 = vector.shape_cast %58 : vector<1x8x256xf32> to vector<8x256xf32>
    %c7 = arith.constant 7 : index
    %c0_72 = arith.constant 0 : index
    %c0_73 = arith.constant 0 : index
    %60 = vector.load %arg2[%c7, %c0_72, %c0_73] : memref<9x256x384xf32, #tpu.memory_space<vmem>>, vector<1x256x384xf32>
    %61 = vector.shape_cast %60 : vector<1x256x384xf32> to vector<256x384xf32>
    %cst_74 = arith.constant dense<0.000000e+00> : vector<8x384xf32>
    %62 = tpu.matmul %59, %61, %cst_74 {dimension_numbers = #tpu.dot_dimension_numbers<[1], [0], [0], [1], [0, 0, 1, 1], [], []>} : vector<8x256xf32>, vector<256x384xf32>, vector<8x384xf32> -> vector<8x384xf32>
    %63 = arith.addf %57, %62 : vector<8x384xf32>
    %c0_75 = arith.constant 0 : index
    %c0_76 = arith.constant 0 : index
    %64 = vector.load %arg5[%c0_75, %c0_76] : memref<8x384xf32, #tpu.memory_space<vmem>>, vector<8x384xf32>
    tpu.vector_store %arg5[%c0_75, %c0_76], %63 {strides = array<i32>} : memref<8x384xf32, #tpu.memory_space<vmem>>, vector<8x384xf32>,
    %c0_77 = arith.constant 0 : index
    %c0_78 = arith.constant 0 : index
    %65 = vector.load %arg5[%c0_77, %c0_78] : memref<8x384xf32, #tpu.memory_space<vmem>>, vector<8x384xf32>
    %c0_79 = arith.constant 0 : index
    %c10 = arith.constant 10 : index
    %c0_80 = arith.constant 0 : index
    %66 = vector.load %arg1[%c0_79, %c10, %c0_80] : memref<1x24x256xf32, #tpu.memory_space<vmem>>, vector<1x8x256xf32>
    %67 = vector.shape_cast %66 : vector<1x8x256xf32> to vector<8x256xf32>
    %c8_81 = arith.constant 8 : index
    %c0_82 = arith.constant 0 : index
    %c0_83 = arith.constant 0 : index
    %68 = vector.load %arg2[%c8_81, %c0_82, %c0_83] : memref<9x256x384xf32, #tpu.memory_space<vmem>>, vector<1x256x384xf32>
    %69 = vector.shape_cast %68 : vector<1x256x384xf32> to vector<256x384xf32>
    %cst_84 = arith.constant dense<0.000000e+00> : vector<8x384xf32>
    %70 = tpu.matmul %67, %69, %cst_84 {dimension_numbers = #tpu.dot_dimension_numbers<[1], [0], [0], [1], [0, 0, 1, 1], [], []>} : vector<8x256xf32>, vector<256x384xf32>, vector<8x384xf32> -> vector<8x384xf32>
    %71 = arith.addf %65, %70 : vector<8x384xf32>
    %c0_85 = arith.constant 0 : index
    %c0_86 = arith.constant 0 : index
    %72 = vector.load %arg5[%c0_85, %c0_86] : memref<8x384xf32, #tpu.memory_space<vmem>>, vector<8x384xf32>
    tpu.vector_store %arg5[%c0_85, %c0_86], %71 {strides = array<i32>} : memref<8x384xf32, #tpu.memory_space<vmem>>, vector<8x384xf32>,
    %c0_87 = arith.constant 0 : index
    %c0_88 = arith.constant 0 : index
    %73 = vector.load %arg5[%c0_87, %c0_88] : memref<8x384xf32, #tpu.memory_space<vmem>>, vector<2x384xf32>
    %c0_89 = arith.constant 0 : index
    %c0_90 = arith.constant 0 : index
    %c0_91 = arith.constant 0 : index
    %c0_92 = arith.constant 0 : index
    %74 = vector.load %arg4[%c0_89, %c0_90, %c0_91, %c0_92] : memref<1x2x2x384xf32, #tpu.memory_space<vmem>>, vector<1x1x2x384xf32>
    %75 = vector.shape_cast %74 : vector<1x1x2x384xf32> to vector<2x384xf32>
    %76 = vector.shape_cast %73 : vector<2x384xf32> to vector<1x1x2x384xf32>
    tpu.vector_store %arg4[%c0_89, %c0_90, %c0_91, %c0_92], %76 {strides = array<i32>} : memref<1x2x2x384xf32, #tpu.memory_space<vmem>>, vector<1x1x2x384xf32>,
    %c4_93 = arith.constant 4 : index
    %c0_94 = arith.constant 0 : index
    %77 = vector.load %arg5[%c4_93, %c0_94] : memref<8x384xf32, #tpu.memory_space<vmem>>, vector<2x384xf32>
    %c0_95 = arith.constant 0 : index
    %c1_96 = arith.constant 1 : index
    %c0_97 = arith.constant 0 : index
    %c0_98 = arith.constant 0 : index
    %78 = vector.load %arg4[%c0_95, %c1_96, %c0_97, %c0_98] : memref<1x2x2x384xf32, #tpu.memory_space<vmem>>, vector<1x1x2x384xf32>
    %79 = vector.shape_cast %78 : vector<1x1x2x384xf32> to vector<2x384xf32>
    %80 = vector.shape_cast %77 : vector<2x384xf32> to vector<1x1x2x384xf32>
    tpu.vector_store %arg4[%c0_95, %c1_96, %c0_97, %c0_98], %80 {strides = array<i32>} : memref<1x2x2x384xf32, #tpu.memory_space<vmem>>, vector<1x1x2x384xf32>,
    return
  }
  func.func @transform_0(%arg0: i32) -> (i32, i32, i32) {
    %c0_i32 = arith.constant 0 : i32
    %c0_i32_0 = arith.constant 0 : i32
    %c0_i32_1 = arith.constant 0 : i32
    return %arg0, %c0_i32, %c0_i32_0 : i32, i32, i32
  }
  func.func @transform_1(%arg0: i32) -> (i32, i32, i32) {
    %c0_i32 = arith.constant 0 : i32
    %c0_i32_0 = arith.constant 0 : i32
    %c0_i32_1 = arith.constant 0 : i32
    %c0_i32_2 = arith.constant 0 : i32
    return %c0_i32, %c0_i32_0, %c0_i32_1 : i32, i32, i32
  }
  func.func @transform_2(%arg0: i32) -> (i32, i32) {
    %c0_i32 = arith.constant 0 : i32
    %c0_i32_0 = arith.constant 0 : i32
    %c0_i32_1 = arith.constant 0 : i32
    return %c0_i32, %c0_i32_0 : i32, i32
  }
  func.func @transform_3(%arg0: i32) -> (i32, i32, i32, i32) {
    %c0_i32 = arith.constant 0 : i32
    %c0_i32_0 = arith.constant 0 : i32
    %c0_i32_1 = arith.constant 0 : i32
    %c0_i32_2 = arith.constant 0 : i32
    return %arg0, %c0_i32, %c0_i32_0, %c0_i32_1 : i32, i32, i32, i32
  }
}

module attributes {stable_mosaic.version = 11 : i64} {
  func.func @_conv_tap_kernel(%arg0: i32, %arg1: memref<1x40x128xf32, #tpu.memory_space<vmem>>, %arg2: memref<9x128x256xf32, #tpu.memory_space<vmem>>, %arg3: memref<1x256xf32, #tpu.memory_space<vmem>>, %arg4: memref<1x2x2x256xf32, #tpu.memory_space<vmem>>, %arg5: memref<8x256xf32, #tpu.memory_space<vmem>>) attributes {dimension_semantics = [#tpu.dimension_semantics<parallel>], iteration_bounds = array<i64: 2>, scalar_prefetch = 0 : i64, scratch_operands = 1 : i64, tpu.core_type = #tpu.core_type<tc>, window_params = [{transform_indices = @transform_0, window_bounds = array<i64: 1, 40, 128>}, {pipeline_mode = #tpu.pipeline_mode<synchronous>, transform_indices = @transform_1, window_bounds = array<i64: 9, 128, 256>}, {pipeline_mode = #tpu.pipeline_mode<synchronous>, transform_indices = @transform_2, window_bounds = array<i64: 1, 256>}, {transform_indices = @transform_3, window_bounds = array<i64: 1, 2, 2, 256>}]} {
    %c0 = arith.constant 0 : index
    %c0_0 = arith.constant 0 : index
    %c0_1 = arith.constant 0 : index
    %0 = vector.load %arg1[%c0, %c0_0, %c0_1] : memref<1x40x128xf32, #tpu.memory_space<vmem>>, vector<1x8x128xf32>
    %1 = vector.shape_cast %0 : vector<1x8x128xf32> to vector<8x128xf32>
    %c0_2 = arith.constant 0 : index
    %c0_3 = arith.constant 0 : index
    %c0_4 = arith.constant 0 : index
    %2 = vector.load %arg2[%c0_2, %c0_3, %c0_4] : memref<9x128x256xf32, #tpu.memory_space<vmem>>, vector<1x128x256xf32>
    %3 = vector.shape_cast %2 : vector<1x128x256xf32> to vector<128x256xf32>
    %cst = arith.constant dense<0.000000e+00> : vector<8x256xf32>
    %4 = tpu.matmul %1, %3, %cst {dimension_numbers = #tpu.dot_dimension_numbers<[1], [0], [0], [1], [0, 0, 1, 1], [], []>} : vector<8x128xf32>, vector<128x256xf32>, vector<8x256xf32> -> vector<8x256xf32>
    %c0_5 = arith.constant 0 : index
    %c0_6 = arith.constant 0 : index
    %5 = vector.load %arg3[%c0_5, %c0_6] : memref<1x256xf32, #tpu.memory_space<vmem>>, vector<1x256xf32>
    %6 = vector.broadcast %5 : vector<1x256xf32> to vector<8x256xf32>
    %7 = arith.addf %4, %6 : vector<8x256xf32>
    %c0_7 = arith.constant 0 : index
    %c0_8 = arith.constant 0 : index
    %8 = vector.load %arg5[%c0_7, %c0_8] : memref<8x256xf32, #tpu.memory_space<vmem>>, vector<8x256xf32>
    tpu.vector_store %arg5[%c0_7, %c0_8], %7 {strides = array<i32>} : memref<8x256xf32, #tpu.memory_space<vmem>>, vector<8x256xf32>,
    %c0_9 = arith.constant 0 : index
    %c0_10 = arith.constant 0 : index
    %9 = vector.load %arg5[%c0_9, %c0_10] : memref<8x256xf32, #tpu.memory_space<vmem>>, vector<8x256xf32>
    %c0_11 = arith.constant 0 : index
    %c9 = arith.constant 9 : index
    %c0_12 = arith.constant 0 : index
    %10 = vector.load %arg1[%c0_11, %c9, %c0_12] : memref<1x40x128xf32, #tpu.memory_space<vmem>>, vector<1x8x128xf32>
    %11 = vector.shape_cast %10 : vector<1x8x128xf32> to vector<8x128xf32>
    %c1 = arith.constant 1 : index
    %c0_13 = arith.constant 0 : index
    %c0_14 = arith.constant 0 : index
    %12 = vector.load %arg2[%c1, %c0_13, %c0_14] : memref<9x128x256xf32, #tpu.memory_space<vmem>>, vector<1x128x256xf32>
    %13 = vector.shape_cast %12 : vector<1x128x256xf32> to vector<128x256xf32>
    %cst_15 = arith.constant dense<0.000000e+00> : vector<8x256xf32>
    %14 = tpu.matmul %11, %13, %cst_15 {dimension_numbers = #tpu.dot_dimension_numbers<[1], [0], [0], [1], [0, 0, 1, 1], [], []>} : vector<8x128xf32>, vector<128x256xf32>, vector<8x256xf32> -> vector<8x256xf32>
    %15 = arith.addf %9, %14 : vector<8x256xf32>
    %c0_16 = arith.constant 0 : index
    %c0_17 = arith.constant 0 : index
    %16 = vector.load %arg5[%c0_16, %c0_17] : memref<8x256xf32, #tpu.memory_space<vmem>>, vector<8x256xf32>
    tpu.vector_store %arg5[%c0_16, %c0_17], %15 {strides = array<i32>} : memref<8x256xf32, #tpu.memory_space<vmem>>, vector<8x256xf32>,
    %c0_18 = arith.constant 0 : index
    %c0_19 = arith.constant 0 : index
    %17 = vector.load %arg5[%c0_18, %c0_19] : memref<8x256xf32, #tpu.memory_space<vmem>>, vector<8x256xf32>
    %c0_20 = arith.constant 0 : index
    %c1_21 = arith.constant 1 : index
    %c0_22 = arith.constant 0 : index
    %18 = vector.load %arg1[%c0_20, %c1_21, %c0_22] : memref<1x40x128xf32, #tpu.memory_space<vmem>>, vector<1x8x128xf32>
    %19 = vector.shape_cast %18 : vector<1x8x128xf32> to vector<8x128xf32>
    %c2 = arith.constant 2 : index
    %c0_23 = arith.constant 0 : index
    %c0_24 = arith.constant 0 : index
    %20 = vector.load %arg2[%c2, %c0_23, %c0_24] : memref<9x128x256xf32, #tpu.memory_space<vmem>>, vector<1x128x256xf32>
    %21 = vector.shape_cast %20 : vector<1x128x256xf32> to vector<128x256xf32>
    %cst_25 = arith.constant dense<0.000000e+00> : vector<8x256xf32>
    %22 = tpu.matmul %19, %21, %cst_25 {dimension_numbers = #tpu.dot_dimension_numbers<[1], [0], [0], [1], [0, 0, 1, 1], [], []>} : vector<8x128xf32>, vector<128x256xf32>, vector<8x256xf32> -> vector<8x256xf32>
    %23 = arith.addf %17, %22 : vector<8x256xf32>
    %c0_26 = arith.constant 0 : index
    %c0_27 = arith.constant 0 : index
    %24 = vector.load %arg5[%c0_26, %c0_27] : memref<8x256xf32, #tpu.memory_space<vmem>>, vector<8x256xf32>
    tpu.vector_store %arg5[%c0_26, %c0_27], %23 {strides = array<i32>} : memref<8x256xf32, #tpu.memory_space<vmem>>, vector<8x256xf32>,
    %c0_28 = arith.constant 0 : index
    %c0_29 = arith.constant 0 : index
    %25 = vector.load %arg5[%c0_28, %c0_29] : memref<8x256xf32, #tpu.memory_space<vmem>>, vector<8x256xf32>
    %c0_30 = arith.constant 0 : index
    %c18 = arith.constant 18 : index
    %c0_31 = arith.constant 0 : index
    %26 = vector.load %arg1[%c0_30, %c18, %c0_31] : memref<1x40x128xf32, #tpu.memory_space<vmem>>, vector<1x8x128xf32>
    %27 = vector.shape_cast %26 : vector<1x8x128xf32> to vector<8x128xf32>
    %c3 = arith.constant 3 : index
    %c0_32 = arith.constant 0 : index
    %c0_33 = arith.constant 0 : index
    %28 = vector.load %arg2[%c3, %c0_32, %c0_33] : memref<9x128x256xf32, #tpu.memory_space<vmem>>, vector<1x128x256xf32>
    %29 = vector.shape_cast %28 : vector<1x128x256xf32> to vector<128x256xf32>
    %cst_34 = arith.constant dense<0.000000e+00> : vector<8x256xf32>
    %30 = tpu.matmul %27, %29, %cst_34 {dimension_numbers = #tpu.dot_dimension_numbers<[1], [0], [0], [1], [0, 0, 1, 1], [], []>} : vector<8x128xf32>, vector<128x256xf32>, vector<8x256xf32> -> vector<8x256xf32>
    %31 = arith.addf %25, %30 : vector<8x256xf32>
    %c0_35 = arith.constant 0 : index
    %c0_36 = arith.constant 0 : index
    %32 = vector.load %arg5[%c0_35, %c0_36] : memref<8x256xf32, #tpu.memory_space<vmem>>, vector<8x256xf32>
    tpu.vector_store %arg5[%c0_35, %c0_36], %31 {strides = array<i32>} : memref<8x256xf32, #tpu.memory_space<vmem>>, vector<8x256xf32>,
    %c0_37 = arith.constant 0 : index
    %c0_38 = arith.constant 0 : index
    %33 = vector.load %arg5[%c0_37, %c0_38] : memref<8x256xf32, #tpu.memory_space<vmem>>, vector<8x256xf32>
    %c0_39 = arith.constant 0 : index
    %c27 = arith.constant 27 : index
    %c0_40 = arith.constant 0 : index
    %34 = vector.load %arg1[%c0_39, %c27, %c0_40] : memref<1x40x128xf32, #tpu.memory_space<vmem>>, vector<1x8x128xf32>
    %35 = vector.shape_cast %34 : vector<1x8x128xf32> to vector<8x128xf32>
    %c4 = arith.constant 4 : index
    %c0_41 = arith.constant 0 : index
    %c0_42 = arith.constant 0 : index
    %36 = vector.load %arg2[%c4, %c0_41, %c0_42] : memref<9x128x256xf32, #tpu.memory_space<vmem>>, vector<1x128x256xf32>
    %37 = vector.shape_cast %36 : vector<1x128x256xf32> to vector<128x256xf32>
    %cst_43 = arith.constant dense<0.000000e+00> : vector<8x256xf32>
    %38 = tpu.matmul %35, %37, %cst_43 {dimension_numbers = #tpu.dot_dimension_numbers<[1], [0], [0], [1], [0, 0, 1, 1], [], []>} : vector<8x128xf32>, vector<128x256xf32>, vector<8x256xf32> -> vector<8x256xf32>
    %39 = arith.addf %33, %38 : vector<8x256xf32>
    %c0_44 = arith.constant 0 : index
    %c0_45 = arith.constant 0 : index
    %40 = vector.load %arg5[%c0_44, %c0_45] : memref<8x256xf32, #tpu.memory_space<vmem>>, vector<8x256xf32>
    tpu.vector_store %arg5[%c0_44, %c0_45], %39 {strides = array<i32>} : memref<8x256xf32, #tpu.memory_space<vmem>>, vector<8x256xf32>,
    %c0_46 = arith.constant 0 : index
    %c0_47 = arith.constant 0 : index
    %41 = vector.load %arg5[%c0_46, %c0_47] : memref<8x256xf32, #tpu.memory_space<vmem>>, vector<8x256xf32>
    %c0_48 = arith.constant 0 : index
    %c19 = arith.constant 19 : index
    %c0_49 = arith.constant 0 : index
    %42 = vector.load %arg1[%c0_48, %c19, %c0_49] : memref<1x40x128xf32, #tpu.memory_space<vmem>>, vector<1x8x128xf32>
    %43 = vector.shape_cast %42 : vector<1x8x128xf32> to vector<8x128xf32>
    %c5 = arith.constant 5 : index
    %c0_50 = arith.constant 0 : index
    %c0_51 = arith.constant 0 : index
    %44 = vector.load %arg2[%c5, %c0_50, %c0_51] : memref<9x128x256xf32, #tpu.memory_space<vmem>>, vector<1x128x256xf32>
    %45 = vector.shape_cast %44 : vector<1x128x256xf32> to vector<128x256xf32>
    %cst_52 = arith.constant dense<0.000000e+00> : vector<8x256xf32>
    %46 = tpu.matmul %43, %45, %cst_52 {dimension_numbers = #tpu.dot_dimension_numbers<[1], [0], [0], [1], [0, 0, 1, 1], [], []>} : vector<8x128xf32>, vector<128x256xf32>, vector<8x256xf32> -> vector<8x256xf32>
    %47 = arith.addf %41, %46 : vector<8x256xf32>
    %c0_53 = arith.constant 0 : index
    %c0_54 = arith.constant 0 : index
    %48 = vector.load %arg5[%c0_53, %c0_54] : memref<8x256xf32, #tpu.memory_space<vmem>>, vector<8x256xf32>
    tpu.vector_store %arg5[%c0_53, %c0_54], %47 {strides = array<i32>} : memref<8x256xf32, #tpu.memory_space<vmem>>, vector<8x256xf32>,
    %c0_55 = arith.constant 0 : index
    %c0_56 = arith.constant 0 : index
    %49 = vector.load %arg5[%c0_55, %c0_56] : memref<8x256xf32, #tpu.memory_space<vmem>>, vector<8x256xf32>
    %c0_57 = arith.constant 0 : index
    %c3_58 = arith.constant 3 : index
    %c0_59 = arith.constant 0 : index
    %50 = vector.load %arg1[%c0_57, %c3_58, %c0_59] : memref<1x40x128xf32, #tpu.memory_space<vmem>>, vector<1x8x128xf32>
    %51 = vector.shape_cast %50 : vector<1x8x128xf32> to vector<8x128xf32>
    %c6 = arith.constant 6 : index
    %c0_60 = arith.constant 0 : index
    %c0_61 = arith.constant 0 : index
    %52 = vector.load %arg2[%c6, %c0_60, %c0_61] : memref<9x128x256xf32, #tpu.memory_space<vmem>>, vector<1x128x256xf32>
    %53 = vector.shape_cast %52 : vector<1x128x256xf32> to vector<128x256xf32>
    %cst_62 = arith.constant dense<0.000000e+00> : vector<8x256xf32>
    %54 = tpu.matmul %51, %53, %cst_62 {dimension_numbers = #tpu.dot_dimension_numbers<[1], [0], [0], [1], [0, 0, 1, 1], [], []>} : vector<8x128xf32>, vector<128x256xf32>, vector<8x256xf32> -> vector<8x256xf32>
    %55 = arith.addf %49, %54 : vector<8x256xf32>
    %c0_63 = arith.constant 0 : index
    %c0_64 = arith.constant 0 : index
    %56 = vector.load %arg5[%c0_63, %c0_64] : memref<8x256xf32, #tpu.memory_space<vmem>>, vector<8x256xf32>
    tpu.vector_store %arg5[%c0_63, %c0_64], %55 {strides = array<i32>} : memref<8x256xf32, #tpu.memory_space<vmem>>, vector<8x256xf32>,
    %c0_65 = arith.constant 0 : index
    %c0_66 = arith.constant 0 : index
    %57 = vector.load %arg5[%c0_65, %c0_66] : memref<8x256xf32, #tpu.memory_space<vmem>>, vector<8x256xf32>
    %c0_67 = arith.constant 0 : index
    %c12 = arith.constant 12 : index
    %c0_68 = arith.constant 0 : index
    %58 = vector.load %arg1[%c0_67, %c12, %c0_68] : memref<1x40x128xf32, #tpu.memory_space<vmem>>, vector<1x8x128xf32>
    %59 = vector.shape_cast %58 : vector<1x8x128xf32> to vector<8x128xf32>
    %c7 = arith.constant 7 : index
    %c0_69 = arith.constant 0 : index
    %c0_70 = arith.constant 0 : index
    %60 = vector.load %arg2[%c7, %c0_69, %c0_70] : memref<9x128x256xf32, #tpu.memory_space<vmem>>, vector<1x128x256xf32>
    %61 = vector.shape_cast %60 : vector<1x128x256xf32> to vector<128x256xf32>
    %cst_71 = arith.constant dense<0.000000e+00> : vector<8x256xf32>
    %62 = tpu.matmul %59, %61, %cst_71 {dimension_numbers = #tpu.dot_dimension_numbers<[1], [0], [0], [1], [0, 0, 1, 1], [], []>} : vector<8x128xf32>, vector<128x256xf32>, vector<8x256xf32> -> vector<8x256xf32>
    %63 = arith.addf %57, %62 : vector<8x256xf32>
    %c0_72 = arith.constant 0 : index
    %c0_73 = arith.constant 0 : index
    %64 = vector.load %arg5[%c0_72, %c0_73] : memref<8x256xf32, #tpu.memory_space<vmem>>, vector<8x256xf32>
    tpu.vector_store %arg5[%c0_72, %c0_73], %63 {strides = array<i32>} : memref<8x256xf32, #tpu.memory_space<vmem>>, vector<8x256xf32>,
    %c0_74 = arith.constant 0 : index
    %c0_75 = arith.constant 0 : index
    %65 = vector.load %arg5[%c0_74, %c0_75] : memref<8x256xf32, #tpu.memory_space<vmem>>, vector<8x256xf32>
    %c0_76 = arith.constant 0 : index
    %c4_77 = arith.constant 4 : index
    %c0_78 = arith.constant 0 : index
    %66 = vector.load %arg1[%c0_76, %c4_77, %c0_78] : memref<1x40x128xf32, #tpu.memory_space<vmem>>, vector<1x8x128xf32>
    %67 = vector.shape_cast %66 : vector<1x8x128xf32> to vector<8x128xf32>
    %c8 = arith.constant 8 : index
    %c0_79 = arith.constant 0 : index
    %c0_80 = arith.constant 0 : index
    %68 = vector.load %arg2[%c8, %c0_79, %c0_80] : memref<9x128x256xf32, #tpu.memory_space<vmem>>, vector<1x128x256xf32>
    %69 = vector.shape_cast %68 : vector<1x128x256xf32> to vector<128x256xf32>
    %cst_81 = arith.constant dense<0.000000e+00> : vector<8x256xf32>
    %70 = tpu.matmul %67, %69, %cst_81 {dimension_numbers = #tpu.dot_dimension_numbers<[1], [0], [0], [1], [0, 0, 1, 1], [], []>} : vector<8x128xf32>, vector<128x256xf32>, vector<8x256xf32> -> vector<8x256xf32>
    %71 = arith.addf %65, %70 : vector<8x256xf32>
    %c0_82 = arith.constant 0 : index
    %c0_83 = arith.constant 0 : index
    %72 = vector.load %arg5[%c0_82, %c0_83] : memref<8x256xf32, #tpu.memory_space<vmem>>, vector<8x256xf32>
    tpu.vector_store %arg5[%c0_82, %c0_83], %71 {strides = array<i32>} : memref<8x256xf32, #tpu.memory_space<vmem>>, vector<8x256xf32>,
    %c0_84 = arith.constant 0 : index
    %c0_85 = arith.constant 0 : index
    %73 = vector.load %arg5[%c0_84, %c0_85] : memref<8x256xf32, #tpu.memory_space<vmem>>, vector<2x256xf32>
    %c0_86 = arith.constant 0 : index
    %c0_87 = arith.constant 0 : index
    %c0_88 = arith.constant 0 : index
    %c0_89 = arith.constant 0 : index
    %74 = vector.load %arg4[%c0_86, %c0_87, %c0_88, %c0_89] : memref<1x2x2x256xf32, #tpu.memory_space<vmem>>, vector<1x1x2x256xf32>
    %75 = vector.shape_cast %74 : vector<1x1x2x256xf32> to vector<2x256xf32>
    %76 = vector.shape_cast %73 : vector<2x256xf32> to vector<1x1x2x256xf32>
    tpu.vector_store %arg4[%c0_86, %c0_87, %c0_88, %c0_89], %76 {strides = array<i32>} : memref<1x2x2x256xf32, #tpu.memory_space<vmem>>, vector<1x1x2x256xf32>,
    %c3_90 = arith.constant 3 : index
    %c0_91 = arith.constant 0 : index
    %77 = vector.load %arg5[%c3_90, %c0_91] : memref<8x256xf32, #tpu.memory_space<vmem>>, vector<2x256xf32>
    %c0_92 = arith.constant 0 : index
    %c1_93 = arith.constant 1 : index
    %c0_94 = arith.constant 0 : index
    %c0_95 = arith.constant 0 : index
    %78 = vector.load %arg4[%c0_92, %c1_93, %c0_94, %c0_95] : memref<1x2x2x256xf32, #tpu.memory_space<vmem>>, vector<1x1x2x256xf32>
    %79 = vector.shape_cast %78 : vector<1x1x2x256xf32> to vector<2x256xf32>
    %80 = vector.shape_cast %77 : vector<2x256xf32> to vector<1x1x2x256xf32>
    tpu.vector_store %arg4[%c0_92, %c1_93, %c0_94, %c0_95], %80 {strides = array<i32>} : memref<1x2x2x256xf32, #tpu.memory_space<vmem>>, vector<1x1x2x256xf32>,
    return
  }
  func.func @transform_0(%arg0: i32) -> (i32, i32, i32) {
    %c0_i32 = arith.constant 0 : i32
    %c0_i32_0 = arith.constant 0 : i32
    %c0_i32_1 = arith.constant 0 : i32
    return %arg0, %c0_i32, %c0_i32_0 : i32, i32, i32
  }
  func.func @transform_1(%arg0: i32) -> (i32, i32, i32) {
    %c0_i32 = arith.constant 0 : i32
    %c0_i32_0 = arith.constant 0 : i32
    %c0_i32_1 = arith.constant 0 : i32
    %c0_i32_2 = arith.constant 0 : i32
    return %c0_i32, %c0_i32_0, %c0_i32_1 : i32, i32, i32
  }
  func.func @transform_2(%arg0: i32) -> (i32, i32) {
    %c0_i32 = arith.constant 0 : i32
    %c0_i32_0 = arith.constant 0 : i32
    %c0_i32_1 = arith.constant 0 : i32
    return %c0_i32, %c0_i32_0 : i32, i32
  }
  func.func @transform_3(%arg0: i32) -> (i32, i32, i32, i32) {
    %c0_i32 = arith.constant 0 : i32
    %c0_i32_0 = arith.constant 0 : i32
    %c0_i32_1 = arith.constant 0 : i32
    %c0_i32_2 = arith.constant 0 : i32
    return %arg0, %c0_i32, %c0_i32_0, %c0_i32_1 : i32, i32, i32, i32
  }
}

</mosaic_0001>

<bundles_post_ra>
// kernel: preconv_forward.7
= control target key start
LH: loop header
LB: loop body
LE: loop exit
PB: predicated region body
PF: predicated region fallthrough
CT: control target
= control target key end

     0   :  { %s2480_s12 = smov 0   ;;  %s3048_s0 = inlined_call_operand.vmem [shape: f32[2,800,128], index: 0, kind: input, shape index: {}]   ;;  %s3049_s1 = inlined_call_operand.vmem [shape: f32[3,128,128], index: 1, kind: input, shape index: {}]   ;;  %s3050_s2 = inlined_call_operand.vmem [shape: f32[1,128], index: 2, kind: input, shape index: {}]   ;;  %s3051_s3 = inlined_call_operand.vmem [shape: f32[2,19,19,128], index: 3, kind: output, shape index: {}]  }
   0x1 LB: > { %s1810_s13 = sadd.s32 4294967295, %s2458_s12   ;;  %p1814_p0 = scmp.ge.s32.totalorder %s2458_s12, 1  ;;  %s2458_s12 = sphi %s2480_s12, %s13_s12  }
   0x2   : > { %p137_p1 = scmp.lt.s32.totalorder %s2458_s12, 3 }
   0x4   : > { %p138_p2 = pnand %p1814_p0, %p137_p1 }
   0x6   : > { %141 = sbr.rel (%p138_p2) target bundleno = 401 (0x191), region = 32 }
   0xb   : > { %v234_v0 = vld [vmem:[%s3049_s1 + $0x78] sm:$0xff]  ;;  %v233_v1 = vld [vmem:[%s3049_s1 + $0x70] sm:$0xff]  ;;  %v232_v2 = vld [vmem:[%s3049_s1 + $0x68] sm:$0xff]  ;;  %p161_p3 = scmp.lt.s32.totalorder %s1810_s13, 1 }
   0xc   : > { %2410 = vmatprep.subr.mxu1 %v234_v0  ;;  %2098 = vmatprep.subr.mxu0 %v234_v0  ;;  %v231_v3 = vld [vmem:[%s3049_s1 + $0x60] sm:$0xff]  ;;  %v230_v4 = vld [vmem:[%s3049_s1 + $0x58] sm:$0xff]  ;;  %v229_v5 = vld [vmem:[%s3049_s1 + $0x50] sm:$0xff] }
   0xd   : > { %2426 = vmatpush3.msra.mxu1 %v234_v0  ;;  %2099 = vmatpush3.msra.mxu0 %v234_v0  ;;  %v228_v6 = vld [vmem:[%s3049_s1 + $0x48] sm:$0xff]  ;;  %s3059_s13 = smov (!%p161_p3, %s1810_s13), 1  ;;  %v227_v7 = vld [vmem:[%s3049_s1 + $0x40] sm:$0xff]  ;;  %v226_v8 = vld [vmem:[%s3049_s1 + $0x38] sm:$0xff] }
   0xe   : > { %2411 = vmatprep.subr.mxu1 %v233_v1  ;;  %2100 = vmatprep.subr.mxu0 %v233_v1  ;;  %s2442_s5 = smul.u32 800, %s3059_s13  ;;  %v225_v9 = vld [vmem:[%s3049_s1 + $0x30] sm:$0xff]  ;;  %v224_v10 = vld [vmem:[%s3049_s1 + $0x28] sm:$0xff]  ;;  %v223_v11 = vld [vmem:[%s3049_s1 + $0x20] sm:$0xff] }
   0xf   : > { %2427 = vmatpush3.msra.mxu1 %v233_v1  ;;  %2101 = vmatpush3.msra.mxu0 %v233_v1  ;;  %v222_v13 = vld [vmem:[%s3049_s1 + $0x18] sm:$0xff]  ;;  %v221_v14 = vld [vmem:[%s3049_s1 + $0x10] sm:$0xff]  ;;  %v220_v15 = vld [vmem:[%s3049_s1 + $0x8] sm:$0xff]  ;;  %s2443_s18 = smul.u32 456, %s3059_s13 }
  0x10   : > { %2412 = vmatprep.subr.mxu1 %v232_v2  ;;  %2102 = vmatprep.subr.mxu0 %v232_v2  ;;  %s2531_s14 = scalar_lea.vmem %s3048_s0, %s2442_s5  ;;  %v219_v16 = vld [vmem:[%s3049_s1] sm:$0xff]  ;;  %v1833_v18 = vld [vmem:[%s3049_s1 + $0xf8] sm:$0xff]  ;;  %v1832_v20 = vld [vmem:[%s3049_s1 + $0xf0] sm:$0xff] }
  0x11   : > { %2428 = vmatpush3.msra.mxu1 %v232_v2  ;;  %2103 = vmatpush3.msra.mxu0 %v232_v2  ;;  %v195_v12 = vld [vmem:[%s2531_s14 + $0xc0] sm:$0xff]  ;;  %v196_v17 = vld [vmem:[%s2531_s14 + $0xc8] sm:$0xff]  ;;  %v197_v19 = vld [vmem:[%s2531_s14 + $0xd0] sm:$0xff]  ;;  %s2912_s21 = scalar_lea.vmem %s3051_s3, %s2443_s18 }
  0x12   : > { %2413 = vmatprep.subr.mxu1 %v231_v3  ;;  %2104 = vmatprep.subr.mxu0 %v231_v3  ;;  %v171_v21 = vld [vmem:[%s2531_s14] sm:$0xff]  ;;  %v198_v22 = vld [vmem:[%s2531_s14 + $0xd8] sm:$0xff]  ;;  %v1831_v23 = vld [vmem:[%s3049_s1 + $0xe8] sm:$0xff] }
  0x13   : > { %2429 = vmatpush3.msra.mxu1 %v231_v3  ;;  %2105 = vmatpush3.msra.mxu0 %v231_v3  ;;  %v199_v24 = vld [vmem:[%s2531_s14 + $0xe0] sm:$0xff]  ;;  %v172_v25 = vld [vmem:[%s2531_s14 + $0x8] sm:$0xff]  ;;  %v1849_v27 = vld [vmem:[%s3049_s1 + $0x178] sm:$0xff] }
  0x14   : > { %2414 = vmatprep.subr.mxu1 %v230_v4  ;;  %2106 = vmatprep.subr.mxu0 %v230_v4  ;;  %v1830_v26 = vld [vmem:[%s3049_s1 + $0xe0] sm:$0xff]  ;;  %v200_v28 = vld [vmem:[%s2531_s14 + $0xe8] sm:$0xff]  ;;  %v201_v29 = vld [vmem:[%s2531_s14 + $0xf0] sm:$0xff] }
  0x15   : > { %2430 = vmatpush3.msra.mxu1 %v230_v4  ;;  %2107 = vmatpush3.msra.mxu0 %v230_v4  ;;  %v173_v30 = vld [vmem:[%s2531_s14 + $0x10] sm:$0xff]  ;;  %v1829_v31 = vld [vmem:[%s3049_s1 + $0xd8] sm:$0xff]  ;;  %v203_v35 = vld [vmem:[%s2531_s14 + $0x100] sm:$0xff] }
  0x16   : > { %2415 = vmatprep.subr.mxu1 %v229_v5  ;;  %2108 = vmatprep.subr.mxu0 %v229_v5  ;;  %v174_v32 = vld [vmem:[%s2531_s14 + $0x18] sm:$0xff]  ;;  %v1848_v33 = vld [vmem:[%s3049_s1 + $0x170] sm:$0xff]  ;;  %v175_v37 = vld [vmem:[%s2531_s14 + $0x20] sm:$0xff] }
  0x17   : > { %2431 = vmatpush3.msra.mxu1 %v229_v5  ;;  %2109 = vmatpush3.msra.mxu0 %v229_v5  ;;  %v202_v34 = vld [vmem:[%s2531_s14 + $0xf8] sm:$0xff]  ;;  %v1828_v36 = vld [vmem:[%s3049_s1 + $0xd0] sm:$0xff]  ;;  %v1847_v38 = vld [vmem:[%s3049_s1 + $0x168] sm:$0xff] }
  0x18   : > { %2416 = vmatprep.subr.mxu1 %v228_v6  ;;  %2110 = vmatprep.subr.mxu0 %v228_v6  ;;  %v176_v39 = vld [vmem:[%s2531_s14 + $0x28] sm:$0xff]  ;;  %v205_v42 = vld [vmem:[%s2531_s14 + $0x110] sm:$0xff]  ;;  %v1846_v43 = vld [vmem:[%s3049_s1 + $0x160] sm:$0xff] }
  0x19   : > { %2432 = vmatpush3.msra.mxu1 %v228_v6  ;;  %2111 = vmatpush3.msra.mxu0 %v228_v6  ;;  %v204_v40 = vld [vmem:[%s2531_s14 + $0x108] sm:$0xff]  ;;  %v177_v44 = vld [vmem:[%s2531_s14 + $0x30] sm:$0xff]  ;;  %v206_v45 = vld [vmem:[%s2531_s14 + $0x118] sm:$0xff] }
  0x1a   : > { %2417 = vmatprep.subr.mxu1 %v227_v7  ;;  %2112 = vmatprep.subr.mxu0 %v227_v7  ;;  %v1827_v41 = vld [vmem:[%s3049_s1 + $0xc8] sm:$0xff]  ;;  %v178_v46 = vld [vmem:[%s2531_s14 + $0x38] sm:$0xff]  ;;  %v1826_v47 = vld [vmem:[%s3049_s1 + $0xc0] sm:$0xff] }
  0x1b   : > { %2433 = vmatpush3.msra.mxu1 %v227_v7  ;;  %2113 = vmatpush3.msra.mxu0 %v227_v7  ;;  %v1845_v48 = vld [vmem:[%s3049_s1 + $0x158] sm:$0xff]  ;;  %v207_v49 = vld [vmem:[%s2531_s14 + $0x120] sm:$0xff]  ;;  %v208_v51 = vld [vmem:[%s2531_s14 + $0x128] sm:$0xff] }
  0x1c   : > { %2418 = vmatprep.subr.mxu1 %v226_v8  ;;  %2114 = vmatprep.subr.mxu0 %v226_v8  ;;  %v179_v50 = vld [vmem:[%s2531_s14 + $0x40] sm:$0xff]  ;;  %v1825_v52 = vld [vmem:[%s3049_s1 + $0xb8] sm:$0xff]  ;;  %v180_v53 = vld [vmem:[%s2531_s14 + $0x48] sm:$0xff] }
  0x1d   : > { %2434 = vmatpush3.msra.mxu1 %v226_v8  ;;  %2115 = vmatpush3.msra.mxu0 %v226_v8  ;;  %v1844_v54 = vld [vmem:[%s3049_s1 + $0x150] sm:$0xff]  ;;  %v210_v58 = vld [vmem:[%s2531_s14 + $0x138] sm:$0xff]  ;;  %v1843_v59 = vld [vmem:[%s3049_s1 + $0x148] sm:$0xff] }
  0x1e   : > { %2419 = vmatprep.subr.mxu1 %v225_v9  ;;  %2116 = vmatprep.subr.mxu0 %v225_v9  ;;  %v209_v55 = vld [vmem:[%s2531_s14 + $0x130] sm:$0xff]  ;;  %v182_v60 = vld [vmem:[%s2531_s14 + $0x58] sm:$0xff]  ;;  %v1823_v61 = vld [vmem:[%s3049_s1 + $0xa8] sm:$0xff] }
  0x1f   : > { %2435 = vmatpush3.msra.mxu1 %v225_v9  ;;  %2117 = vmatpush3.msra.mxu0 %v225_v9  ;;  %v1824_v56 = vld [vmem:[%s3049_s1 + $0xb0] sm:$0xff]  ;;  %v211_v62 = vld [vmem:[%s2531_s14 + $0x140] sm:$0xff]  ;;  %v212_v1 = vld [vmem:[%s2531_s14 + $0x148] sm:$0xff] }
  0x20   : > { %2420 = vmatprep.subr.mxu1 %v224_v10  ;;  %2118 = vmatprep.subr.mxu0 %v224_v10  ;;  %v181_v57 = vld [vmem:[%s2531_s14 + $0x50] sm:$0xff]  ;;  %v1842_v63 = vld [vmem:[%s3049_s1 + $0x140] sm:$0xff]  ;;  %v184_v3 = vld [vmem:[%s2531_s14 + $0x68] sm:$0xff] }
  0x21   : > { %2436 = vmatpush3.msra.mxu1 %v224_v10  ;;  %2119 = vmatpush3.msra.mxu0 %v224_v10  ;;  %v183_v0 = vld [vmem:[%s2531_s14 + $0x60] sm:$0xff]  ;;  %v1841_v4 = vld [vmem:[%s3049_s1 + $0x138] sm:$0xff]  ;;  %v213_v5 = vld [vmem:[%s2531_s14 + $0x150] sm:$0xff] }
  0x22   : > { %2421 = vmatprep.subr.mxu1 %v223_v11  ;;  %2120 = vmatprep.subr.mxu0 %v223_v11  ;;  %v1822_v2 = vld [vmem:[%s3049_s1 + $0xa0] sm:$0xff]  ;;  %v185_v6 = vld [vmem:[%s2531_s14 + $0x70] sm:$0xff]  ;;  %v214_v7 = vld [vmem:[%s2531_s14 + $0x158] sm:$0xff] }
  0x23   : > { %2437 = vmatpush3.msra.mxu1 %v223_v11  ;;  %2166 = vmatprep.mubr.f32.mxu1 %v195_v12  ;;  %v1821_v8 = vld [vmem:[%s3049_s1 + $0x98] sm:$0xff]  ;;  %v1840_v10 = vld [vmem:[%s3049_s1 + $0x130] sm:$0xff] }
  0x24   : > { %2422 = vmatprep.subr.mxu1 %v222_v13  ;;  %2121 = vmatpush3.msra.mxu0 %v223_v11  ;;  %v186_v9 = vld [vmem:[%s2531_s14 + $0x78] sm:$0xff]  ;;  %v215_v11 = vld [vmem:[%s2531_s14 + $0x160] sm:$0xff]  ;;  %v1820_v12 = vld [vmem:[%s3049_s1 + $0x90] sm:$0xff] }
  0x25   : > { %2438 = vmatpush3.msra.mxu1 %v222_v13  ;;  %2122 = vmatprep.subr.mxu0 %v222_v13 }
  0x26   : > { %2423 = vmatprep.subr.mxu1 %v221_v14  ;;  %2123 = vmatpush3.msra.mxu0 %v222_v13  ;;  %v187_v13 = vld [vmem:[%s2531_s14 + $0x80] sm:$0xff] }
  0x27   : > { %2439 = vmatpush3.msra.mxu1 %v221_v14  ;;  %2124 = vmatprep.subr.mxu0 %v221_v14 }
  0x28   : > { %2424 = vmatprep.subr.mxu1 %v220_v15  ;;  %2125 = vmatpush3.msra.mxu0 %v221_v14  ;;  %v216_v14 = vld [vmem:[%s2531_s14 + $0x168] sm:$0xff] }
  0x29   : > { %2440 = vmatpush3.msra.mxu1 %v220_v15  ;;  %2126 = vmatprep.subr.mxu0 %v220_v15 }
  0x2a   : > { %2425 = vmatprep.subr.mxu1 %v219_v16  ;;  %2127 = vmatpush3.msra.mxu0 %v220_v15  ;;  %v1839_v15 = vld [vmem:[%s3049_s1 + $0x128] sm:$0xff] }
  0x2b   : > { %2441 = vmatpush3.msra.mxu1 %v219_v16  ;;  %2128 = vmatprep.subr.mxu0 %v219_v16 }
  0x2c   : > { %2167 = vmatmul.mubr.f32.vlgmr.msra.gmra.mxu1 %v196_v17  ;;  %2202 = vmatprep.subr.mxu1 %v1833_v18  ;;  %v1819_v17 = vld [vmem:[%s3049_s1 + $0x88] sm:$0xff] }
  0x2d   : > { %2203 = vmatpush3.msra.mxu1 %v1833_v18  ;;  %2169 = vmatprep.mubr.f32.mxu1 %v197_v19  ;;  %v217_v18 = vld [vmem:[%s2531_s14 + $0x170] sm:$0xff]  ;;  %v1838_v19 = vld [vmem:[%s3049_s1 + $0x120] sm:$0xff] }
  0x2e   : > { %2204 = vmatprep.subr.mxu1 %v1832_v20  ;;  %2129 = vmatpush3.msra.mxu0 %v219_v16  ;;  %v188_v16 = vld [vmem:[%s2531_s14 + $0x88] sm:$0xff] }
  0x2f   : > { %2205 = vmatpush3.msra.mxu1 %v1832_v20  ;;  %2130 = vmatprep.mubr.f32.mxu0 %v171_v21  ;;  %v189_v20 = vld [vmem:[%s2531_s14 + $0x90] sm:$0xff]  ;;  %v218_v21 = vld [vmem:[%s2531_s14 + $0x178] sm:$0xff] }
  0x30   : > { %2170 = vmatmul.mubr.f32.gmra.mxu1 %v198_v22  ;;  %2206 = vmatprep.subr.mxu1 %v1831_v23  ;;  %v1818_v22 = vld [vmem:[%s3049_s1 + $0x80] sm:$0xff] }
  0x31   : > { %2172 = vmatprep.mubr.f32.mxu1 %v199_v24  ;;  %2207 = vmatpush3.msra.mxu1 %v1831_v23  ;;  %v190_v23 = vld [vmem:[%s2531_s14 + $0x98] sm:$0xff] }
  0x32   : > { %2131 = vmatmul.mubr.f32.vlgmr.msra.gmra.mxu0 %v172_v25  ;;  %2208 = vmatprep.subr.mxu1 %v1830_v26  ;;  %v1837_v24 = vld [vmem:[%s3049_s1 + $0x118] sm:$0xff]  ;;  %v643_v25 = vld [vmem:[%s2531_s14 + $0x190] sm:$0xff] }
  0x33   : > { %2209 = vmatpush3.msra.mxu1 %v1830_v26  ;;  %2306 = vmatprep.subr.mxu0 %v1849_v27  ;;  %v191_v26 = vld [vmem:[%s2531_s14 + $0xa0] sm:$0xff] }
  0x34   : > { %2173 = vmatmul.mubr.f32.gmra.mxu1 %v200_v28  ;;  %2307 = vmatpush3.msra.mxu0 %v1849_v27  ;;  %v644_v27 = vld [vmem:[%s2531_s14 + $0x198] sm:$0xff]  ;;  %v1836_v28 = vld [vmem:[%s3049_s1 + $0x110] sm:$0xff] }
  0x35   : > { %2175 = vmatprep.mubr.f32.mxu1 %v201_v29  ;;  %2133 = vmatprep.mubr.f32.mxu0 %v173_v30  ;;  %v192_v29 = vld [vmem:[%s2531_s14 + $0xa8] sm:$0xff]  ;;  %v645_v30 = vld [vmem:[%s2531_s14 + $0x1a0] sm:$0xff] }
  0x36   : > { %2210 = vmatprep.subr.mxu1 %v1829_v31  ;;  %2134 = vmatmul.mubr.f32.gmra.mxu0 %v174_v32  ;;  %v1835_v32 = vld [vmem:[%s3049_s1 + $0x108] sm:$0xff] }
  0x37   : > { %2211 = vmatpush3.msra.mxu1 %v1829_v31  ;;  %2308 = vmatprep.subr.mxu0 %v1848_v33  ;;  %v193_v31 = vld [vmem:[%s2531_s14 + $0xb0] sm:$0xff] }
  0x38   : > { %2176 = vmatmul.mubr.f32.gmra.mxu1 %v202_v34  ;;  %2309 = vmatpush3.msra.mxu0 %v1848_v33  ;;  %v646_v33 = vld [vmem:[%s2531_s14 + $0x1a8] sm:$0xff]  ;;  %v194_v34 = vld [vmem:[%s2531_s14 + $0xb8] sm:$0xff] }
  0x39   : > { %2178 = vmatprep.mubr.f32.mxu1 %v203_v35  ;;  %2212 = vmatprep.subr.mxu1 %v1828_v36  ;;  %v647_v35 = vld [vmem:[%s2531_s14 + $0x1b0] sm:$0xff] }
  0x3a   : > { %2136 = vmatprep.mubr.f32.mxu0 %v175_v37  ;;  %2213 = vmatpush3.msra.mxu1 %v1828_v36  ;;  %v1834_v36 = vld [vmem:[%s3049_s1 + $0x100] sm:$0xff]  ;;  %v1157_v37 = vld [vmem:[%s2531_s14 + $0x14] sm:$0xff] }
  0x3b   : > { %2310 = vmatprep.subr.mxu0 %v1847_v38  ;;  %2137 = vmatmul.mubr.f32.gmra.mxu0 %v176_v39  ;;  %v1158_v39 = vld [vmem:[%s2531_s14 + $0x1c] sm:$0xff] }
  0x3c   : > { %2179 = vmatmul.mubr.f32.gmra.mxu1 %v204_v40  ;;  %2311 = vmatpush3.msra.mxu0 %v1847_v38  ;;  %v648_v38 = vld [vmem:[%s2531_s14 + $0x1b8] sm:$0xff]  ;;  %v649_v40 = vld [vmem:[%s2531_s14 + $0x1c0] sm:$0xff] }
  0x3d   : > { %2214 = vmatprep.subr.mxu1 %v1827_v41  ;;  %2181 = vmatprep.mubr.f32.mxu1 %v205_v42  ;;  %v650_v42 = vld [vmem:[%s2531_s14 + $0x1c8] sm:$0xff] }
  0x3e   : > { %2215 = vmatpush3.msra.mxu1 %v1827_v41  ;;  %2312 = vmatprep.subr.mxu0 %v1846_v43  ;;  %v1159_v41 = vld [vmem:[%s2531_s14 + $0x24] sm:$0xff] }
  0x3f   : > { %2139 = vmatprep.mubr.f32.mxu0 %v177_v44  ;;  %2313 = vmatpush3.msra.mxu0 %v1846_v43  ;;  %v1160_v43 = vld [vmem:[%s2531_s14 + $0x2c] sm:$0xff] }
  0x40   : > { %2182 = vmatmul.mubr.f32.gmra.mxu1 %v206_v45  ;;  %2140 = vmatmul.mubr.f32.gmra.mxu0 %v178_v46  ;;  %v651_v44 = vld [vmem:[%s2531_s14 + $0x1d0] sm:$0xff]  ;;  %v652_v46 = vld [vmem:[%s2531_s14 + $0x1d8] sm:$0xff] }
  0x41   : > { %2216 = vmatprep.subr.mxu1 %v1826_v47  ;;  %2314 = vmatprep.subr.mxu0 %v1845_v48  ;;  %v1161_v45 = vld [vmem:[%s2531_s14 + $0x34] sm:$0xff] }
  0x42   : > { %2217 = vmatpush3.msra.mxu1 %v1826_v47  ;;  %2184 = vmatprep.mubr.f32.mxu1 %v207_v49  ;;  %v1162_v47 = vld [vmem:[%s2531_s14 + $0x3c] sm:$0xff]  ;;  %v1163_v49 = vld [vmem:[%s2531_s14 + $0x44] sm:$0xff] }
  0x43   : > { %2315 = vmatpush3.msra.mxu0 %v1845_v48  ;;  %2142 = vmatprep.mubr.f32.mxu0 %v179_v50  ;;  %v653_v48 = vld [vmem:[%s2531_s14 + $0x1e0] sm:$0xff]  ;;  %v654_v50 = vld [vmem:[%s2531_s14 + $0x1e8] sm:$0xff] }
  0x44   : > { %2185 = vmatmul.mubr.f32.gmra.mxu1 %v208_v51  ;;  %2218 = vmatprep.subr.mxu1 %v1825_v52  ;;  %v1164_v51 = vld [vmem:[%s2531_s14 + $0x4c] sm:$0xff] }
  0x45   : > { %2143 = vmatmul.mubr.f32.gmra.mxu0 %v180_v53  ;;  %2219 = vmatpush3.msra.mxu1 %v1825_v52  ;;  %v655_v52 = vld [vmem:[%s2531_s14 + $0x1f0] sm:$0xff] }
  0x46   : > { %2316 = vmatprep.subr.mxu0 %v1844_v54  ;;  %2187 = vmatprep.mubr.f32.mxu1 %v209_v55  ;;  %v1165_v53 = vld [vmem:[%s2531_s14 + $0x54] sm:$0xff]  ;;  %v1166_v55 = vld [vmem:[%s2531_s14 + $0x5c] sm:$0xff] }
  0x47   : > { %2317 = vmatpush3.msra.mxu0 %v1844_v54  ;;  %2220 = vmatprep.subr.mxu1 %v1824_v56  ;;  %v656_v54 = vld [vmem:[%s2531_s14 + $0x1f8] sm:$0xff] }
  0x48   : > { %2145 = vmatprep.mubr.f32.mxu0 %v181_v57  ;;  %2188 = vmatmul.mubr.f32.gmra.mxu1 %v210_v58  ;;  %v1167_v57 = vld [vmem:[%s2531_s14 + $0x64] sm:$0xff] }
  0x49   : > { %2221 = vmatpush3.msra.mxu1 %v1824_v56  ;;  %2318 = vmatprep.subr.mxu0 %v1843_v59  ;;  %v657_v56 = vld [vmem:[%s2531_s14 + $0x200] sm:$0xff]  ;;  %v658_v58 = vld [vmem:[%s2531_s14 + $0x208] sm:$0xff] }
  0x4a   : > { %2146 = vmatmul.mubr.f32.gmra.mxu0 %v182_v60  ;;  %2222 = vmatprep.subr.mxu1 %v1823_v61  ;;  %v659_v60 = vld [vmem:[%s2531_s14 + $0x210] sm:$0xff] }
  0x4b   : > { %2319 = vmatpush3.msra.mxu0 %v1843_v59  ;;  %2190 = vmatprep.mubr.f32.mxu1 %v211_v62  ;;  %v1168_v59 = vld [vmem:[%s2531_s14 + $0x6c] sm:$0xff]  ;;  %v660_v62 = vld [vmem:[%s2531_s14 + $0x218] sm:$0xff] }
  0x4c   : > { %2223 = vmatpush3.msra.mxu1 %v1823_v61  ;;  %2320 = vmatprep.subr.mxu0 %v1842_v63  ;;  %v1169_v61 = vld [vmem:[%s2531_s14 + $0x74] sm:$0xff] }
  0x4d   : > { %2148 = vmatprep.mubr.f32.mxu0 %v183_v0  ;;  %2191 = vmatmul.mubr.f32.gmra.mxu1 %v212_v1  ;;  %v661_v0 = vld [vmem:[%s2531_s14 + $0x220] sm:$0xff] }
  0x4e   : > { %2321 = vmatpush3.msra.mxu0 %v1842_v63  ;;  %2224 = vmatprep.subr.mxu1 %v1822_v2  ;;  %v1170_v63 = vld [vmem:[%s2531_s14 + $0x7c] sm:$0xff]  ;;  %v1171_v1 = vld [vmem:[%s2531_s14 + $0x84] sm:$0xff] }
  0x4f   : > { %2149 = vmatmul.mubr.f32.gmra.mxu0 %v184_v3  ;;  %2225 = vmatpush3.msra.mxu1 %v1822_v2  ;;  %v662_v2 = vld [vmem:[%s2531_s14 + $0x228] sm:$0xff] }
  0x50   : > { %2322 = vmatprep.subr.mxu0 %v1841_v4  ;;  %2193 = vmatprep.mubr.f32.mxu1 %v213_v5  ;;  %v1172_v3 = vld [vmem:[%s2531_s14 + $0x8c] sm:$0xff]  ;;  %v1173_v5 = vld [vmem:[%s2531_s14 + $0x94] sm:$0xff] }
  0x51   : > { %2323 = vmatpush3.msra.mxu0 %v1841_v4  ;;  %2151 = vmatprep.mubr.f32.mxu0 %v185_v6  ;;  %v663_v4 = vld [vmem:[%s2531_s14 + $0x230] sm:$0xff]  ;;  %v664_v6 = vld [vmem:[%s2531_s14 + $0x238] sm:$0xff] }
  0x52   : > { %2194 = vmatmul.mubr.f32.gmra.mxu1 %v214_v7  ;;  %2226 = vmatprep.subr.mxu1 %v1821_v8  ;;  %v1174_v7 = vld [vmem:[%s2531_s14 + $0x9c] sm:$0xff] }
  0x53   : > { %2152 = vmatmul.mubr.f32.gmra.mxu0 %v186_v9  ;;  %2227 = vmatpush3.msra.mxu1 %v1821_v8  ;;  %v665_v8 = vld [vmem:[%s2531_s14 + $0x240] sm:$0xff] }
  0x54   : > { %2324 = vmatprep.subr.mxu0 %v1840_v10  ;;  %2196 = vmatprep.mubr.f32.mxu1 %v215_v11  ;;  %v1175_v9 = vld [vmem:[%s2531_s14 + $0xa4] sm:$0xff]  ;;  %v1176_v11 = vld [vmem:[%s2531_s14 + $0xac] sm:$0xff] }
  0x55   : > { %2325 = vmatpush3.msra.mxu0 %v1840_v10  ;;  %2228 = vmatprep.subr.mxu1 %v1820_v12  ;;  %v666_v10 = vld [vmem:[%s2531_s14 + $0x248] sm:$0xff] }
  0x56   : > { %2154 = vmatprep.mubr.f32.mxu0 %v187_v13  ;;  %2197 = vmatmul.mubr.f32.gmra.mxu1 %v216_v14  ;;  %v1177_v13 = vld [vmem:[%s2531_s14 + $0xb4] sm:$0xff] }
  0x57   : > { %2229 = vmatpush3.msra.mxu1 %v1820_v12  ;;  %2326 = vmatprep.subr.mxu0 %v1839_v15  ;;  %v667_v12 = vld [vmem:[%s2531_s14 + $0x250] sm:$0xff]  ;;  %v668_v14 = vld [vmem:[%s2531_s14 + $0x258] sm:$0xff] }
  0x58   : > { %2155 = vmatmul.mubr.f32.gmra.mxu0 %v188_v16  ;;  %2230 = vmatprep.subr.mxu1 %v1819_v17  ;;  %v669_v16 = vld [vmem:[%s2531_s14 + $0x260] sm:$0xff] }
  0x59   : > { %2327 = vmatpush3.msra.mxu0 %v1839_v15  ;;  %2199 = vmatprep.mubr.f32.mxu1 %v217_v18  ;;  %v1178_v15 = vld [vmem:[%s2531_s14 + $0xbc] sm:$0xff]  ;;  %v670_v18 = vld [vmem:[%s2531_s14 + $0x268] sm:$0xff] }
  0x5a   : > { %2231 = vmatpush3.msra.mxu1 %v1819_v17  ;;  %2328 = vmatprep.subr.mxu0 %v1838_v19  ;;  %v1179_v17 = vld [vmem:[%s2531_s14 + $0xc4] sm:$0xff] }
  0x5b   : > { %2157 = vmatprep.mubr.f32.mxu0 %v189_v20  ;;  %2200 = vmatmul.mubr.f32.gmra.mxu1 %v218_v21  ;;  %v671_v20 = vld [vmem:[%s2531_s14 + $0x270] sm:$0xff] }
  0x5c   : > { %2329 = vmatpush3.msra.mxu0 %v1838_v19  ;;  %2232 = vmatprep.subr.mxu1 %v1818_v22  ;;  %v1180_v19 = vld [vmem:[%s2531_s14 + $0xcc] sm:$0xff]  ;;  %v1181_v21 = vld [vmem:[%s2531_s14 + $0xd4] sm:$0xff] }
  0x5d   : > { %2158 = vmatmul.mubr.f32.gmra.mxu0 %v190_v23  ;;  %2233 = vmatpush3.msra.mxu1 %v1818_v22  ;;  %v672_v22 = vld [vmem:[%s2531_s14 + $0x278] sm:$0xff] }
  0x5e   : > { %2330 = vmatprep.subr.mxu0 %v1837_v24  ;;  %2234 = vmatprep.mubr.f32.mxu1 %v643_v25  ;;  %v1182_v23 = vld [vmem:[%s2531_s14 + $0xdc] sm:$0xff]  ;;  %v1183_v25 = vld [vmem:[%s2531_s14 + $0xe4] sm:$0xff] }
  0x5f   : > { %2331 = vmatpush3.msra.mxu0 %v1837_v24  ;;  %2160 = vmatprep.mubr.f32.mxu0 %v191_v26  ;;  %v673_v24 = vld [vmem:[%s2531_s14 + $0x280] sm:$0xff]  ;;  %v674_v26 = vld [vmem:[%s2531_s14 + $0x288] sm:$0xff] }
  0x60   : > { %2235 = vmatmul.mubr.f32.vlgmr.msra.gmra.mxu1 %v644_v27  ;;  %2332 = vmatprep.subr.mxu0 %v1836_v28  ;;  %v1184_v27 = vld [vmem:[%s2531_s14 + $0xec] sm:$0xff] }
  0x61   : > { %2161 = vmatmul.mubr.f32.gmra.mxu0 %v192_v29  ;;  %2237 = vmatprep.mubr.f32.mxu1 %v645_v30  ;;  %v1185_v29 = vld [vmem:[%s2531_s14 + $0xf4] sm:$0xff] }
  0x62   : > { %2333 = vmatpush3.msra.mxu0 %v1836_v28  ;;  %2163 = vmatprep.mubr.f32.mxu0 %v193_v31  ;;  %v675_v28 = vld [vmem:[%s2531_s14 + $0x290] sm:$0xff]  ;;  %v676_v30 = vld [vmem:[%s2531_s14 + $0x298] sm:$0xff] }
  0x63   : > { %2334 = vmatprep.subr.mxu0 %v1835_v32  ;;  %v1186_v31 = vld [vmem:[%s2531_s14 + $0xfc] sm:$0xff] }
  0x64   : > { %2238 = vmatmul.mubr.f32.gmra.mxu1 %v646_v33  ;;  %2335 = vmatpush3.msra.mxu0 %v1835_v32  ;;  %v677_v32 = vld [vmem:[%s2531_s14 + $0x2a0] sm:$0xff] }
  0x65   : > { %2164 = vmatmul.mubr.f32.gmra.mxu0 %v194_v34  ;;  %2240 = vmatprep.mubr.f32.mxu1 %v647_v35  ;;  %v1187_v33 = vld [vmem:[%s2531_s14 + $0x104] sm:$0xff]  ;;  %v1188_v35 = vld [vmem:[%s2531_s14 + $0x10c] sm:$0xff] }
  0x66   : > { %2336 = vmatprep.subr.mxu0 %v1834_v36  ;;  %2338 = vmatprep.mubr.f32.mxu0 %v1157_v37  ;;  %v678_v34 = vld [vmem:[%s2531_s14 + $0x2a8] sm:$0xff]  ;;  %v1189_v37 = vld [vmem:[%s2531_s14 + $0x114] sm:$0xff] }
  0x67   : > { %2337 = vmatpush3.msra.mxu0 %v1834_v36  ;;  %v679_v36 = vld [vmem:[%s2531_s14 + $0x2b0] sm:$0xff] }
  0x68   : > { %2241 = vmatmul.mubr.f32.gmra.mxu1 %v648_v38  ;;  %v680_v38 = vld [vmem:[%s2531_s14 + $0x2b8] sm:$0xff] }
  0x69   : > { %2339 = vmatmul.mubr.f32.vlgmr.msra.gmra.mxu0 %v1158_v39  ;;  %2243 = vmatprep.mubr.f32.mxu1 %v649_v40  ;;  %v1190_v39 = vld [vmem:[%s2531_s14 + $0x11c] sm:$0xff] }
  0x6a   : > { %2341 = vmatprep.mubr.f32.mxu0 %v1159_v41  ;;  %v681_v40 = vld [vmem:[%s2531_s14 + $0x2c0] sm:$0xff] }
  0x6b   : > { %v1191_v41 = vld [vmem:[%s2531_s14 + $0x124] sm:$0xff] }
  0x6c   : > { %2244 = vmatmul.mubr.f32.gmra.mxu1 %v650_v42  ;;  %v682_v42 = vld [vmem:[%s2531_s14 + $0x2c8] sm:$0xff] }
  0x6d   : > { %2342 = vmatmul.mubr.f32.gmra.mxu0 %v1160_v43  ;;  %2246 = vmatprep.mubr.f32.mxu1 %v651_v44  ;;  %v1192_v43 = vld [vmem:[%s2531_s14 + $0x12c] sm:$0xff] }
  0x6e   : > { %2344 = vmatprep.mubr.f32.mxu0 %v1161_v45  ;;  %v683_v44 = vld [vmem:[%s2531_s14 + $0x2d0] sm:$0xff] }
  0x6f   : > { %v1193_v45 = vld [vmem:[%s2531_s14 + $0x134] sm:$0xff] }
  0x70   : > { %2247 = vmatmul.mubr.f32.gmra.mxu1 %v652_v46  ;;  %v684_v46 = vld [vmem:[%s2531_s14 + $0x2d8] sm:$0xff] }
  0x71   : > { %2345 = vmatmul.mubr.f32.gmra.mxu0 %v1162_v47  ;;  %2249 = vmatprep.mubr.f32.mxu1 %v653_v48  ;;  %v1194_v47 = vld [vmem:[%s2531_s14 + $0x13c] sm:$0xff] }
  0x72   : > { %2347 = vmatprep.mubr.f32.mxu0 %v1163_v49  ;;  %v685_v48 = vld [vmem:[%s2531_s14 + $0x2e0] sm:$0xff] }
  0x73   : > { %v1195_v49 = vld [vmem:[%s2531_s14 + $0x144] sm:$0xff] }
  0x74   : > { %2250 = vmatmul.mubr.f32.gmra.mxu1 %v654_v50  ;;  %v686_v50 = vld [vmem:[%s2531_s14 + $0x2e8] sm:$0xff] }
  0x75   : > { %2348 = vmatmul.mubr.f32.gmra.mxu0 %v1164_v51  ;;  %2252 = vmatprep.mubr.f32.mxu1 %v655_v52  ;;  %v1196_v51 = vld [vmem:[%s2531_s14 + $0x14c] sm:$0xff] }
  0x76   : > { %2350 = vmatprep.mubr.f32.mxu0 %v1165_v53  ;;  %v687_v52 = vld [vmem:[%s2531_s14 + $0x2f0] sm:$0xff] }
  0x77   : > { %v1197_v53 = vld [vmem:[%s2531_s14 + $0x154] sm:$0xff] }
  0x78   : > { %2253 = vmatmul.mubr.f32.gmra.mxu1 %v656_v54  ;;  %v688_v54 = vld [vmem:[%s2531_s14 + $0x2f8] sm:$0xff] }
  0x79   : > { %2351 = vmatmul.mubr.f32.gmra.mxu0 %v1166_v55  ;;  %2255 = vmatprep.mubr.f32.mxu1 %v657_v56  ;;  %v1198_v55 = vld [vmem:[%s2531_s14 + $0x15c] sm:$0xff] }
  0x7a   : > { %2353 = vmatprep.mubr.f32.mxu0 %v1167_v57  ;;  %v689_v56 = vld [vmem:[%s2531_s14 + $0x300] sm:$0xff] }
  0x7b   : > { %v1199_v57 = vld [vmem:[%s2531_s14 + $0x164] sm:$0xff] }
  0x7c   : > { %2256 = vmatmul.mubr.f32.gmra.mxu1 %v658_v58  ;;  %v690_v58 = vld [vmem:[%s2531_s14 + $0x308] sm:$0xff] }
  0x7d   : > { %2354 = vmatmul.mubr.f32.gmra.mxu0 %v1168_v59  ;;  %2258 = vmatprep.mubr.f32.mxu1 %v659_v60  ;;  %v1200_v59 = vld [vmem:[%s2531_s14 + $0x16c] sm:$0xff]  ;;  %v1201_v60 = vld [vmem:[%s2531_s14 + $0x174] sm:$0xff] }
  0x7e   : > { %2356 = vmatprep.mubr.f32.mxu0 %v1169_v61  ;;  %v1202_v61 = vld [vmem:[%s2531_s14 + $0x17c] sm:$0xff] }
  0x80   : > { %2259 = vmatmul.mubr.f32.gmra.mxu1 %v660_v62  ;;  %v1203_v62 = vld [vmem:[%s2531_s14 + $0x184] sm:$0xff] }
  0x81   : > { %2357 = vmatmul.mubr.f32.gmra.mxu0 %v1170_v63  ;;  %2261 = vmatprep.mubr.f32.mxu1 %v661_v0  ;;  %v1204_v63 = vld [vmem:[%s2531_s14 + $0x18c] sm:$0xff] }
  0x82   : > { %2359 = vmatprep.mubr.f32.mxu0 %v1171_v1 }
  0x84   : > { %2262 = vmatmul.mubr.f32.gmra.mxu1 %v662_v2 }
  0x85   : > { %2360 = vmatmul.mubr.f32.gmra.mxu0 %v1172_v3  ;;  %2264 = vmatprep.mubr.f32.mxu1 %v663_v4 }
  0x86   : > { %2362 = vmatprep.mubr.f32.mxu0 %v1173_v5 }
  0x88   : > { %2265 = vmatmul.mubr.f32.gmra.mxu1 %v664_v6 }
  0x89   : > { %2363 = vmatmul.mubr.f32.gmra.mxu0 %v1174_v7  ;;  %2267 = vmatprep.mubr.f32.mxu1 %v665_v8 }
  0x8a   : > { %2365 = vmatprep.mubr.f32.mxu0 %v1175_v9 }
  0x8c   : > { %2268 = vmatmul.mubr.f32.gmra.mxu1 %v666_v10 }
  0x8d   : > { %2366 = vmatmul.mubr.f32.gmra.mxu0 %v1176_v11  ;;  %2270 = vmatprep.mubr.f32.mxu1 %v667_v12 }
  0x8e   : > { %2368 = vmatprep.mubr.f32.mxu0 %v1177_v13  ;;  %v2815_v13 = vld [vmem:[%s3050_s2] ss:$0 sm:$0xff] }
  0x90   : > { %2271 = vmatmul.mubr.f32.gmra.mxu1 %v668_v14 }
  0x91   : > { %2369 = vmatmul.mubr.f32.gmra.mxu0 %v1178_v15  ;;  %2273 = vmatprep.mubr.f32.mxu1 %v669_v16 }
  0x92   : > { %2371 = vmatprep.mubr.f32.mxu0 %v1179_v17 }
  0x94   : > { %2274 = vmatmul.mubr.f32.gmra.mxu1 %v670_v18 }
  0x95   : > { %2372 = vmatmul.mubr.f32.gmra.mxu0 %v1180_v19  ;;  %2276 = vmatprep.mubr.f32.mxu1 %v671_v20 }
  0x96   : > { %2374 = vmatprep.mubr.f32.mxu0 %v1181_v21 }
  0x98   : > { %2277 = vmatmul.mubr.f32.gmra.mxu1 %v672_v22 }
  0x99   : > { %2375 = vmatmul.mubr.f32.gmra.mxu0 %v1182_v23  ;;  %2279 = vmatprep.mubr.f32.mxu1 %v673_v24 }
  0x9a   : > { %2377 = vmatprep.mubr.f32.mxu0 %v1183_v25 }
  0x9c   : > { %2280 = vmatmul.mubr.f32.gmra.mxu1 %v674_v26 }
  0x9d   : > { %2378 = vmatmul.mubr.f32.gmra.mxu0 %v1184_v27  ;;  %2282 = vmatprep.mubr.f32.mxu1 %v675_v28 }
  0x9e   : > { %2380 = vmatprep.mubr.f32.mxu0 %v1185_v29 }
  0xa0   : > { %2283 = vmatmul.mubr.f32.gmra.mxu1 %v676_v30 }
  0xa1   : > { %2381 = vmatmul.mubr.f32.gmra.mxu0 %v1186_v31  ;;  %2285 = vmatprep.mubr.f32.mxu1 %v677_v32 }
  0xa2   : > { %2383 = vmatprep.mubr.f32.mxu0 %v1187_v33 }
  0xa4   : > { %2286 = vmatmul.mubr.f32.gmra.mxu1 %v678_v34 }
  0xa5   : > { %2384 = vmatmul.mubr.f32.gmra.mxu0 %v1188_v35  ;;  %2288 = vmatprep.mubr.f32.mxu1 %v679_v36 }
  0xa6   : > { %2386 = vmatprep.mubr.f32.mxu0 %v1189_v37 }
  0xa8   : > { %2289 = vmatmul.mubr.f32.gmra.mxu1 %v680_v38 }
  0xa9   : > { %2387 = vmatmul.mubr.f32.gmra.mxu0 %v1190_v39  ;;  %2291 = vmatprep.mubr.f32.mxu1 %v681_v40 }
  0xaa   : > { %2389 = vmatprep.mubr.f32.mxu0 %v1191_v41 }
  0xac   : > { %2292 = vmatmul.mubr.f32.gmra.mxu1 %v682_v42 }
  0xad   : > { %2390 = vmatmul.mubr.f32.gmra.mxu0 %v1192_v43  ;;  %2294 = vmatprep.mubr.f32.mxu1 %v683_v44 }
  0xae   : > { %2392 = vmatprep.mubr.f32.mxu0 %v1193_v45 }
  0xb0   : > { %2295 = vmatmul.mubr.f32.gmra.mxu1 %v684_v46 }
  0xb1   : > { %2393 = vmatmul.mubr.f32.gmra.mxu0 %v1194_v47  ;;  %2297 = vmatprep.mubr.f32.mxu1 %v685_v48 }
  0xb2   : > { %2395 = vmatprep.mubr.f32.mxu0 %v1195_v49 }
  0xb4   : > { %2298 = vmatmul.mubr.f32.gmra.mxu1 %v686_v50 }
  0xb5   : > { %2396 = vmatmul.mubr.f32.gmra.mxu0 %v1196_v51  ;;  %2300 = vmatprep.mubr.f32.mxu1 %v687_v52 }
  0xb6   : > { %2398 = vmatprep.mubr.f32.mxu0 %v1197_v53 }
  0xb8   : > { %2301 = vmatmul.mubr.f32.gmra.mxu1 %v688_v54 }
  0xb9   : > { %2399 = vmatmul.mubr.f32.gmra.mxu0 %v1198_v55  ;;  %2303 = vmatprep.mubr.f32.mxu1 %v689_v56 }
  0xba   : > { %2401 = vmatprep.mubr.f32.mxu0 %v1199_v57 }
  0xbc   : > { %2304 = vmatmul.mubr.f32.gmra.mxu1 %v690_v58 }
  0xbd   : > { %2402 = vmatmul.mubr.f32.gmra.mxu0 %v1200_v59 }
  0xbe   : > { %2404 = vmatprep.mubr.f32.mxu0 %v1201_v60 }
  0xc1   : > { %2405 = vmatmul.mubr.f32.gmra.mxu0 %v1202_v61 }
  0xc2   : > { %2407 = vmatprep.mubr.f32.mxu0 %v1203_v62 }
  0xc5   : > { %2408 = vmatmul.mubr.f32.gmra.mxu0 %v1204_v63 }
  0xec   : > { %v2788_v0 = vpop.f32.mrf.mxu1 }
  0xee   : > { %v2790_v1 = vpop.f32.mrf.mxu1 }
  0xf0   : > { %v2792_v2 = vpop.f32.mrf.mxu1 }
  0xf2   : > { %v2794_v3 = vpop.f32.mrf.mxu1  ;;  %v2132_v4 = vpop.f32.mrf.mxu0 }
  0xf4   : > { %v2796_v5 = vpop.f32.mrf.mxu1  ;;  %v2798_v6 = vpop.f32.mrf.mxu0 }
  0xf6   : > { %v2800_v7 = vpop.f32.mrf.mxu1  ;;  %v2802_v8 = vpop.f32.mrf.mxu0 }
  0xf8   : > { %v2804_v9 = vpop.f32.mrf.mxu1  ;;  %v2806_v10 = vpop.f32.mrf.mxu0 }
  0xfa   : > { %v2808_v11 = vpop.f32.mrf.mxu1 }
  0xfb   : > { %v2810_v12 = vpop.f32.mrf.mxu0 }
  0xfc   : > { %v2180_v14 = vpop.f32.mrf.mxu1 }
  0xfd   : > { %v2818_v15 = vadd.f32 %v2180_v14, %v2815_v13  ;;  %v2820_v16 = vpop.f32.mrf.mxu0 }
  0xfe   : > { %v468_v17 = vpop.f32.mrf.mxu1 }
  0xff   : > { %v2823_v18 = vadd.f32 %v2815_v13, %v468_v17  ;;  %v314_v17 = vadd.f32 %v2132_v4, %v2815_v13 }
 0x100   : > { %v2183_v19 = vpop.f32.mrf.mxu1  ;;  %v2825_v20 = vpop.f32.mrf.mxu0 }
 0x101   : > { %v2828_v21 = vadd.f32 %v2183_v19, %v2815_v13 }
 0x102   : > { %v478_v22 = vpop.f32.mrf.mxu1  ;;  %v2830_v23 = vpop.f32.mrf.mxu0 }
 0x103   : > { %v2833_v24 = vadd.f32 %v2815_v13, %v478_v22 }
 0x104   : > { %v2186_v25 = vpop.f32.mrf.mxu1 }
 0x105   : > { %v2836_v26 = vadd.f32 %v2186_v25, %v2815_v13  ;;  %v2838_v27 = vpop.f32.mrf.mxu0  ;;  %v309_v25 = vadd.f32 %v2815_v13, %v2798_v6  ;;  %v319_v6 = vadd.f32 %v2815_v13, %v2806_v10 }
 0x106   : > { %v488_v28 = vpop.f32.mrf.mxu1 }
 0x107   : > { %v2841_v29 = vadd.f32 %v2815_v13, %v488_v28  ;;  %v2843_v30 = vpop.f32.mrf.mxu0 }
 0x108   : > { %v2189_v31 = vpop.f32.mrf.mxu1 }
 0x109   : > { %v2846_v32 = vadd.f32 %v2189_v31, %v2815_v13 }
 0x10a   : > { %v2848_v33 = vpop.f32.mrf.mxu0  ;;  %v498_v34 = vpop.f32.mrf.mxu1 }
 0x10b   : > { %v2851_v35 = vadd.f32 %v2815_v13, %v498_v34 }
 0x10c   : > { %v2853_v36 = vpop.f32.mrf.mxu0 }
 0x10d   : > { %v2192_v37 = vpop.f32.mrf.mxu1 }
 0x10e   : > { %v2856_v38 = vadd.f32 %v2192_v37, %v2815_v13  ;;  %v324_v37 = vadd.f32 %v2802_v8, %v2815_v13  ;;  %v334_v8 = vadd.f32 %v2810_v12, %v2815_v13 }
 0x10f   : > { %v2858_v39 = vpop.f32.mrf.mxu0  ;;  %v508_v40 = vpop.f32.mrf.mxu1 }
 0x110   : > { %v2861_v41 = vadd.f32 %v2815_v13, %v508_v40 }
 0x111   : > { %v2863_v42 = vpop.f32.mrf.mxu0 }
 0x112   : > { %v2195_v43 = vpop.f32.mrf.mxu1 }
 0x113   : > { %v2866_v44 = vadd.f32 %v2195_v43, %v2815_v13  ;;  %v2868_v45 = vpop.f32.mrf.mxu0 }
 0x114   : > { %v518_v46 = vpop.f32.mrf.mxu1 }
 0x115   : > { %v2871_v47 = vadd.f32 %v2815_v13, %v518_v46  ;;  %v2873_v48 = vpop.f32.mrf.mxu0 }
 0x116   : > { %v2198_v49 = vpop.f32.mrf.mxu1 }
 0x117   : > { %v2876_v50 = vadd.f32 %v2198_v49, %v2815_v13 }
 0x118   : > { %v2878_v51 = vpop.f32.mrf.mxu0  ;;  %v528_v52 = vpop.f32.mrf.mxu1 }
 0x119   : > { %v2881_v53 = vadd.f32 %v2815_v13, %v528_v52 }
 0x11a   : > { %v2883_v54 = vpop.f32.mrf.mxu0 }
 0x11b   : > { %3052 = vst [vmem:[#allocation3_spill] sm:$0xff] %v2881_v53  ;;  %v2201_v55 = vpop.f32.mrf.mxu1 }
 0x11c   : > { %v2886_v56 = vadd.f32 %v2201_v55, %v2815_v13 }
 0x11d   : > { %v2888_v57 = vpop.f32.mrf.mxu0  ;;  %v538_v58 = vpop.f32.mrf.mxu1 }
 0x11e   : > { %3053 = vst [vmem:[#allocation4_spill] sm:$0xff] %v2886_v56  ;;  %v2891_v59 = vadd.f32 %v2815_v13, %v538_v58 }
 0x11f   : > { %v2893_v60 = vpop.f32.mrf.mxu0 }
 0x120   : > { %3054 = vst [vmem:[#allocation5_spill] sm:$0xff] %v2891_v59  ;;  %v2236_v61 = vpop.f32.mrf.mxu1 }
 0x121   : > { %v2895_v62 = vpop.f32.mrf.mxu0  ;;  %v1014_v28 = vadd.f32 %v2236_v61, %v314_v17 }
 0x122   : > { %v774_v63 = vpop.f32.mrf.mxu1 }
 0x123   : > { %v2897_v14 = vpop.f32.mrf.mxu0  ;;  %v1013_v40 = vadd.f32 %v774_v63, %v309_v25  ;;  %v329_v25 = vadd.f32 %v2815_v13, %v2820_v16 }
 0x124   : > { %v2239_v19 = vpop.f32.mrf.mxu1 }
 0x125   : > { %v2900_v22 = vpop.f32.mrf.mxu0  ;;  %v1016_v46 = vadd.f32 %v2239_v19, %v324_v37  ;;  %v344_v19 = vadd.f32 %v2825_v20, %v2815_v13 }
 0x126   : > { %v784_v31 = vpop.f32.mrf.mxu1 }
 0x127   : > { %v2905_v34 = vpop.f32.mrf.mxu0  ;;  %v1015_v58 = vadd.f32 %v784_v31, %v319_v6 }
 0x128   : > { %v2242_v43 = vpop.f32.mrf.mxu1 }
 0x129   : > { %v2340_v4 = vpop.f32.mrf.mxu0  ;;  %v1018_v59 = vadd.f32 %v2242_v43, %v334_v8 }
 0x12a   : > { %v1528_v49 = vadd.f32 %v2340_v4, %v1014_v28  ;;  %v794_v52 = vpop.f32.mrf.mxu1 }
 0x12b   : > { %v1288_v55 = vpop.f32.mrf.mxu0  ;;  %v1017_v28 = vadd.f32 %v794_v52, %v329_v25 }
 0x12c   : > { %1627 = vst [vmem:[%s2912_s21 + $0x8] sm:$0xff] %v1528_v49  ;;  %v1527_v61 = vadd.f32 %v1288_v55, %v1013_v40  ;;  %v2245_v63 = vpop.f32.mrf.mxu1  ;;  %v339_v40 = vadd.f32 %v2815_v13, %v2830_v23 }
 0x12d   : > { %v2343_v17 = vpop.f32.mrf.mxu0  ;;  %v1020_v4 = vadd.f32 %v2245_v63, %v344_v19 }
 0x12e   : > { %1626 = vst [vmem:[%s2912_s21] sm:$0xff] %v1527_v61  ;;  %v1530_v56 = vadd.f32 %v2343_v17, %v1016_v46  ;;  %v804_v53 = vpop.f32.mrf.mxu1  ;;  %v354_v46 = vadd.f32 %v2838_v27, %v2815_v13  ;;  %v364_v61 = vadd.f32 %v2848_v33, %v2815_v13  ;;  %v374_v33 = vadd.f32 %v2858_v39, %v2815_v13 }
 0x12f   : > { %v1298_v10 = vpop.f32.mrf.mxu0  ;;  %v1019_v49 = vadd.f32 %v804_v53, %v339_v40 }
 0x130   : > { %1578 = vst [vmem:[#allocation2 + $0x18] sm:$0xff] %v1530_v56  ;;  %v1529_v12 = vadd.f32 %v1298_v10, %v1015_v58  ;;  %v2248_v31 = vpop.f32.mrf.mxu1  ;;  %v349_v56 = vadd.f32 %v2815_v13, %v2843_v30  ;;  %v359_v30 = vadd.f32 %v2815_v13, %v2853_v36 }
 0x131   : > { %v2346_v37 = vpop.f32.mrf.mxu0  ;;  %v1022_v8 = vadd.f32 %v2248_v31, %v354_v46 }
 0x132   : > { %1577 = vst [vmem:[#allocation2 + $0x10] sm:$0xff] %v1529_v12  ;;  %v1532_v16 = vadd.f32 %v2346_v37, %v1018_v59  ;;  %v814_v43 = vpop.f32.mrf.mxu1 }
 0x133   : > { %v1308_v6 = vpop.f32.mrf.mxu0  ;;  %v1021_v27 = vadd.f32 %v814_v43, %v349_v56 }
 0x134   : > { %1853 = vst [vmem:[%s2912_s21 + $0x30] sm:$0xff] %v1532_v16  ;;  %v1531_v55 = vadd.f32 %v1308_v6, %v1017_v28  ;;  %v2251_v20 = vpop.f32.mrf.mxu1  ;;  %v369_v6 = vadd.f32 %v2815_v13, %v2863_v42  ;;  %v379_v42 = vadd.f32 %v2815_v13, %v2873_v48 }
 0x135   : > { %v2349_v52 = vpop.f32.mrf.mxu0  ;;  %v1024_v19 = vadd.f32 %v2251_v20, %v364_v61 }
 0x136   : > { %1579 = vst [vmem:[#allocation2 + $0x20] sm:$0xff] %v1531_v55  ;;  %v1534_v23 = vadd.f32 %v2349_v52, %v1020_v4  ;;  %v824_v59 = vpop.f32.mrf.mxu1  ;;  %v384_v52 = vadd.f32 %v2868_v45, %v2815_v13  ;;  %v394_v45 = vadd.f32 %v2878_v51, %v2815_v13  ;;  %v404_v51 = vadd.f32 %v2888_v57, %v2815_v13 }
 0x137   : > { %v1318_v58 = vpop.f32.mrf.mxu0  ;;  %v1023_v37 = vadd.f32 %v824_v59, %v359_v30 }
 0x138   : > { %1582 = vst [vmem:[#allocation2 + $0x38] sm:$0xff] %v1534_v23  ;;  %v1533_v53 = vadd.f32 %v1318_v58, %v1019_v49  ;;  %v2254_v63 = vpop.f32.mrf.mxu1 }
 0x139   : > { %v1625_v17 = vld [vmem:[#allocation2 + $0x10] sm:$0x7]  ;;  %v1629_v25 = vld [vmem:[#allocation2 + $0x14] sm:$0xff]  ;;  %v2352_v10 = vpop.f32.mrf.mxu0  ;;  %v1026_v46 = vadd.f32 %v2254_v63, %v374_v33 }
 0x13a   : > { %1628 = vst [vmem:[%s2912_s21 + $0x10] sm:$0x7] %v1625_v17  ;;  %1850 = vst [vmem:[%s2912_s21 + $0x18] sm:$0xff] %v1629_v25  ;;  %v1536_v28 = vadd.f32 %v2352_v10, %v1022_v8  ;;  %v834_v12 = vpop.f32.mrf.mxu1 }
 0x13b   : > { %1854 = vst [vmem:[%s2912_s21 + $0x38] sm:$0xff] %v1533_v53  ;;  %v1328_v31 = vpop.f32.mrf.mxu0  ;;  %v1025_v56 = vadd.f32 %v834_v12, %v369_v6 }
 0x13c   : > { %1584 = vst [vmem:[#allocation2 + $0x48] sm:$0xff] %v1536_v28  ;;  %v1535_v40 = vadd.f32 %v1328_v31, %v1021_v27  ;;  %v2257_v4 = vpop.f32.mrf.mxu1  ;;  %v389_v28 = vadd.f32 %v2815_v13, %v2883_v54 }
 0x13d   : > { %v1630_v16 = vld [vmem:[#allocation2 + $0x1c] sm:$0xff]  ;;  %v1631_v36 = vld [vmem:[#allocation2 + $0x24] sm:$0x7]  ;;  %v2355_v43 = vpop.f32.mrf.mxu0  ;;  %v1028_v58 = vadd.f32 %v2257_v4, %v384_v52 }
 0x13e   : > { %1851 = vst [vmem:[%s2912_s21 + $0x20] sm:$0xff] %v1630_v16  ;;  %1852 = vst [vmem:[%s2912_s21 + $0x28] sm:$0x7] %v1631_v36  ;;  %v1538_v49 = vadd.f32 %v2355_v43, %v1024_v19  ;;  %v844_v55 = vpop.f32.mrf.mxu1  ;;  %v399_v43 = vadd.f32 %v2815_v13, %v2893_v60  ;;  %v409_v60 = vadd.f32 %v2815_v13, %v2897_v14 }
 0x13f   : > { %1583 = vst [vmem:[#allocation2 + $0x40] sm:$0xff] %v1535_v40  ;;  %v1638_v39 = vld [vmem:[#allocation2 + $0x38] sm:$0x7]  ;;  %v1338_v20 = vpop.f32.mrf.mxu0  ;;  %v1027_v17 = vadd.f32 %v844_v55, %v379_v42  ;;  %v414_v55 = vadd.f32 %v2895_v62, %v2815_v13  ;;  %v424_v62 = vadd.f32 %v2900_v22, %v2815_v13 }
 0x140   : > { %1855 = vst [vmem:[%s2912_s21 + $0x40] sm:$0x7] %v1638_v39  ;;  %1860 = vst [vmem:[%s2912_s21 + $0x68] sm:$0xff] %v1538_v49  ;;  %v1537_v8 = vadd.f32 %v1338_v20, %v1023_v37  ;;  %v2260_v23 = vpop.f32.mrf.mxu1 }
 0x141   : > { %v2358_v59 = vpop.f32.mrf.mxu0  ;;  %v1030_v12 = vadd.f32 %v2260_v23, %v394_v45 }
 0x142   : > { %1859 = vst [vmem:[%s2912_s21 + $0x60] sm:$0xff] %v1537_v8  ;;  %v1540_v61 = vadd.f32 %v2358_v59, %v1026_v46  ;;  %v854_v27 = vpop.f32.mrf.mxu1 }
 0x143   : > { %v1645_v53 = vld [vmem:[#allocation2 + $0x4c] sm:$0x7]  ;;  %v1348_v63 = vpop.f32.mrf.mxu0  ;;  %v1029_v40 = vadd.f32 %v854_v27, %v389_v28 }
 0x144   : > { %1858 = vst [vmem:[%s2912_s21 + $0x58] sm:$0x7] %v1645_v53  ;;  %1588 = vst [vmem:[#allocation2 + $0x68] sm:$0xff] %v1540_v61  ;;  %v1539_v25 = vadd.f32 %v1348_v63, %v1025_v56  ;;  %v2263_v10 = vpop.f32.mrf.mxu1 }
 0x145   : > { %v2361_v48 = vpop.f32.mrf.mxu0  ;;  %v1032_v54 = vadd.f32 %v2263_v10, %v404_v51 }
 0x146   : > { %v1643_v30 = vld [vmem:[#allocation2 + $0x3c] sm:$0xff]  ;;  %v1644_v19 = vld [vmem:[#allocation2 + $0x44] sm:$0xff]  ;;  %1587 = vst [vmem:[#allocation2 + $0x60] sm:$0xff] %v1539_v25  ;;  %v1542_v31 = vadd.f32 %v2361_v48, %v1028_v58  ;;  %v864_v33 = vpop.f32.mrf.mxu1  ;;  %v434_v48 = vadd.f32 %v2788_v0, %v2815_v13  ;;  %v444_v0 = vadd.f32 %v2792_v2, %v2815_v13  ;;  %v454_v2 = vadd.f32 %v2796_v5, %v2815_v13 }
 0x147   : > { %1856 = vst [vmem:[%s2912_s21 + $0x48] sm:$0xff] %v1643_v30  ;;  %1857 = vst [vmem:[%s2912_s21 + $0x50] sm:$0xff] %v1644_v19  ;;  %v1358_v37 = vpop.f32.mrf.mxu0  ;;  %v1031_v57 = vadd.f32 %v864_v33, %v399_v43 }
 0x148   : > { %1865 = vst [vmem:[%s2912_s21 + $0x90] sm:$0xff] %v1542_v31  ;;  %v1541_v4 = vadd.f32 %v1358_v37, %v1027_v17  ;;  %v2266_v16 = vpop.f32.mrf.mxu1  ;;  %v419_v17 = vadd.f32 %v2815_v13, %v2905_v34  ;;  %v429_v34 = vadd.f32 %v2815_v13, %v2790_v1 }
 0x149   : > { %v2364_v36 = vpop.f32.mrf.mxu0  ;;  %v1034_v23 = vadd.f32 %v2266_v16, %v414_v55 }
 0x14a   : > { %1589 = vst [vmem:[#allocation2 + $0x70] sm:$0xff] %v1541_v4  ;;  %v1544_v6 = vadd.f32 %v2364_v36, %v1030_v12  ;;  %v874_v46 = vpop.f32.mrf.mxu1 }
 0x14b   : > { %v1368_v49 = vpop.f32.mrf.mxu0  ;;  %v1033_v61 = vadd.f32 %v874_v46, %v409_v60 }
 0x14c   : > { %1592 = vst [vmem:[#allocation2 + $0x88] sm:$0xff] %v1544_v6  ;;  %v1543_v39 = vadd.f32 %v1368_v49, %v1029_v40  ;;  %v2269_v20 = vpop.f32.mrf.mxu1  ;;  %v439_v49 = vadd.f32 %v2815_v13, %v2794_v3 }
 0x14d   : > { %v1652_v52 = vld [vmem:[#allocation2 + $0x60] sm:$0x7]  ;;  %v1657_v56 = vld [vmem:[#allocation2 + $0x64] sm:$0xff]  ;;  %v2367_v8 = vpop.f32.mrf.mxu0  ;;  %v1036_v25 = vadd.f32 %v2269_v20, %v424_v62  ;;  %v464_v62 = vadd.f32 %v2804_v9, %v2815_v13 }
 0x14e   : > { %1861 = vst [vmem:[%s2912_s21 + $0x70] sm:$0x7] %v1652_v52  ;;  %1862 = vst [vmem:[%s2912_s21 + $0x78] sm:$0xff] %v1657_v56  ;;  %v1546_v59 = vadd.f32 %v2367_v8, %v1032_v54  ;;  %v884_v42 = vpop.f32.mrf.mxu1 }
 0x14f   : > { %1866 = vst [vmem:[%s2912_s21 + $0x98] sm:$0xff] %v1543_v39  ;;  %v1378_v58 = vpop.f32.mrf.mxu0  ;;  %v1035_v28 = vadd.f32 %v884_v42, %v419_v17 }
 0x150   : > { %1594 = vst [vmem:[#allocation2 + $0x98] sm:$0xff] %v1546_v59  ;;  %v1545_v27 = vadd.f32 %v1378_v58, %v1031_v57  ;;  %v2272_v53 = vpop.f32.mrf.mxu1 }
 0x151   : > { %v1658_v63 = vld [vmem:[#allocation2 + $0x6c] sm:$0xff]  ;;  %v1659_v14 = vld [vmem:[#allocation2 + $0x74] sm:$0x7]  ;;  %v2370_v45 = vpop.f32.mrf.mxu0  ;;  %v1038_v37 = vadd.f32 %v2272_v53, %v434_v48 }
 0x152   : > { %1863 = vst [vmem:[%s2912_s21 + $0x80] sm:$0xff] %v1658_v63  ;;  %1864 = vst [vmem:[%s2912_s21 + $0x88] sm:$0x7] %v1659_v14  ;;  %v1548_v10 = vadd.f32 %v2370_v45, %v1034_v23  ;;  %v894_v30 = vpop.f32.mrf.mxu1  ;;  %v449_v23 = vadd.f32 %v2815_v13, %v2800_v7  ;;  %v459_v7 = vadd.f32 %v2815_v13, %v2808_v11 }
 0x153   : > { %1593 = vst [vmem:[#allocation2 + $0x90] sm:$0xff] %v1545_v27  ;;  %v1666_v22 = vld [vmem:[#allocation2 + $0x88] sm:$0x7]  ;;  %v1388_v19 = vpop.f32.mrf.mxu0  ;;  %v1037_v36 = vadd.f32 %v894_v30, %v429_v34 }
 0x154   : > { %1867 = vst [vmem:[%s2912_s21 + $0xa0] sm:$0x7] %v1666_v22  ;;  %1872 = vst [vmem:[%s2912_s21 + $0xc8] sm:$0xff] %v1548_v10  ;;  %v1547_v12 = vadd.f32 %v1388_v19, %v1033_v61  ;;  %v2275_v31 = vpop.f32.mrf.mxu1 }
 0x155   : > { %v2373_v33 = vpop.f32.mrf.mxu0  ;;  %v1040_v55 = vadd.f32 %v2275_v31, %v444_v0 }
 0x156   : > { %1871 = vst [vmem:[%s2912_s21 + $0xc0] sm:$0xff] %v1547_v12  ;;  %v1550_v51 = vadd.f32 %v2373_v33, %v1036_v25  ;;  %v904_v40 = vpop.f32.mrf.mxu1 }
 0x157   : > { %v1673_v4 = vld [vmem:[#allocation2 + $0x9c] sm:$0x7]  ;;  %v1398_v16 = vpop.f32.mrf.mxu0  ;;  %v1039_v52 = vadd.f32 %v904_v40, %v439_v49 }
 0x158   : > { %1870 = vst [vmem:[%s2912_s21 + $0xb8] sm:$0x7] %v1673_v4  ;;  %1598 = vst [vmem:[#allocation2 + $0xb8] sm:$0xff] %v1550_v51  ;;  %v1549_v43 = vadd.f32 %v1398_v16, %v1035_v28  ;;  %v2278_v54 = vpop.f32.mrf.mxu1 }
 0x159   : > { %v2376_v1 = vpop.f32.mrf.mxu0  ;;  %v1042_v3 = vadd.f32 %v2278_v54, %v454_v2 }
 0x15a   : > { %v1671_v6 = vld [vmem:[#allocation2 + $0x8c] sm:$0xff]  ;;  %v1672_v46 = vld [vmem:[#allocation2 + $0x94] sm:$0xff]  ;;  %1597 = vst [vmem:[#allocation2 + $0xb0] sm:$0xff] %v1549_v43  ;;  %v1552_v57 = vadd.f32 %v2376_v1, %v1038_v37  ;;  %v914_v39 = vpop.f32.mrf.mxu1 }
 0x15b   : > { %1868 = vst [vmem:[%s2912_s21 + $0xa8] sm:$0xff] %v1671_v6  ;;  %1869 = vst [vmem:[%s2912_s21 + $0xb0] sm:$0xff] %v1672_v46  ;;  %v1408_v20 = vpop.f32.mrf.mxu0  ;;  %v1041_v5 = vadd.f32 %v914_v39, %v449_v23 }
 0x15c   : > { %1877 = vst [vmem:[%s2912_s21 + $0xf0] sm:$0xff] %v1552_v57  ;;  %v1551_v56 = vadd.f32 %v1408_v20, %v1037_v36  ;;  %v2281_v8 = vpop.f32.mrf.mxu1 }
 0x15d   : > { %v2379_v60 = vpop.f32.mrf.mxu0  ;;  %v1044_v45 = vadd.f32 %v2281_v8, %v464_v62 }
 0x15e   : > { %1599 = vst [vmem:[#allocation2 + $0xc0] sm:$0xff] %v1551_v56  ;;  %v1554_v59 = vadd.f32 %v2379_v60, %v1040_v55  ;;  %v924_v42 = vpop.f32.mrf.mxu1 }
 0x15f   : > { %v1418_v58 = vpop.f32.mrf.mxu0  ;;  %v1043_v9 = vadd.f32 %v924_v42, %v459_v7 }
 0x160   : > { %1602 = vst [vmem:[#allocation2 + $0xd8] sm:$0xff] %v1554_v59  ;;  %v1553_v61 = vadd.f32 %v1418_v58, %v1039_v52  ;;  %v2284_v27 = vpop.f32.mrf.mxu1 }
 0x161   : > { %v1680_v53 = vld [vmem:[#allocation2 + $0xb0] sm:$0x7]  ;;  %v1685_v63 = vld [vmem:[#allocation2 + $0xb4] sm:$0xff]  ;;  %v2382_v14 = vpop.f32.mrf.mxu0  ;;  %v1046_v11 = vadd.f32 %v2284_v27, %v2818_v15 }
 0x162   : > { %1873 = vst [vmem:[%s2912_s21 + $0xd0] sm:$0x7] %v1680_v53  ;;  %1874 = vst [vmem:[%s2912_s21 + $0xd8] sm:$0xff] %v1685_v63  ;;  %v1556_v17 = vadd.f32 %v2382_v14, %v1042_v3  ;;  %v934_v25 = vpop.f32.mrf.mxu1 }
 0x163   : > { %1878 = vst [vmem:[%s2912_s21 + $0xf8] sm:$0xff] %v1553_v61  ;;  %v1428_v10 = vpop.f32.mrf.mxu0  ;;  %v1045_v34 = vadd.f32 %v934_v25, %v2823_v18 }
 0x164   : > { %1604 = vst [vmem:[#allocation2 + $0xe8] sm:$0xff] %v1556_v17  ;;  %v1555_v30 = vadd.f32 %v1428_v10, %v1041_v5  ;;  %v2287_v22 = vpop.f32.mrf.mxu1 }
 0x165   : > { %v1686_v19 = vld [vmem:[#allocation2 + $0xbc] sm:$0xff]  ;;  %v1687_v48 = vld [vmem:[#allocation2 + $0xc4] sm:$0x7]  ;;  %v2385_v28 = vpop.f32.mrf.mxu0  ;;  %v1048_v4 = vadd.f32 %v2287_v22, %v2828_v21 }
 0x166   : > { %1875 = vst [vmem:[%s2912_s21 + $0xe0] sm:$0xff] %v1686_v19  ;;  %1876 = vst [vmem:[%s2912_s21 + $0xe8] sm:$0x7] %v1687_v48  ;;  %v1558_v13 = vadd.f32 %v2385_v28, %v1044_v45  ;;  %v944_v12 = vpop.f32.mrf.mxu1  ;;  %v3055_v28 = vld [vmem:[#allocation3_spill] sm:$0xff] }
 0x167   : > { %1603 = vst [vmem:[#allocation2 + $0xe0] sm:$0xff] %v1555_v30  ;;  %v1694_v31 = vld [vmem:[#allocation2 + $0xd8] sm:$0x7]  ;;  %v1438_v33 = vpop.f32.mrf.mxu0  ;;  %v1047_v43 = vadd.f32 %v944_v12, %v2833_v24 }
 0x168   : > { %1879 = vst [vmem:[%s2912_s21 + $0x100] sm:$0x7] %v1694_v31  ;;  %1884 = vst [vmem:[%s2912_s21 + $0x128] sm:$0xff] %v1558_v13  ;;  %v1557_v37 = vadd.f32 %v1438_v33, %v1043_v9  ;;  %v2290_v51 = vpop.f32.mrf.mxu1 }
 0x169   : > { %v2388_v40 = vpop.f32.mrf.mxu0  ;;  %v1050_v49 = vadd.f32 %v2290_v51, %v2836_v26 }
 0x16a   : > { %1883 = vst [vmem:[%s2912_s21 + $0x120] sm:$0xff] %v1557_v37  ;;  %v1560_v16 = vadd.f32 %v2388_v40, %v1046_v11  ;;  %v954_v15 = vpop.f32.mrf.mxu1  ;;  %v3057_v40 = vld [vmem:[#allocation5_spill] sm:$0xff] }
 0x16b   : > { %v1701_v0 = vld [vmem:[#allocation2 + $0xec] sm:$0x7]  ;;  %v1448_v36 = vpop.f32.mrf.mxu0  ;;  %v1049_v39 = vadd.f32 %v954_v15, %v2841_v29 }
 0x16c   : > { %1882 = vst [vmem:[%s2912_s21 + $0x118] sm:$0x7] %v1701_v0  ;;  %1608 = vst [vmem:[#allocation2 + $0x108] sm:$0xff] %v1560_v16  ;;  %v1559_v54 = vadd.f32 %v1448_v36, %v1045_v34  ;;  %v2293_v18 = vpop.f32.mrf.mxu1  ;;  %v3056_v34 = vld [vmem:[#allocation4_spill] sm:$0xff] }
 0x16d   : > { %v2391_v1 = vpop.f32.mrf.mxu0  ;;  %v1052_v52 = vadd.f32 %v2293_v18, %v2846_v32 }
 0x16e   : > { %v1699_v6 = vld [vmem:[#allocation2 + $0xdc] sm:$0xff]  ;;  %v1700_v46 = vld [vmem:[#allocation2 + $0xe4] sm:$0xff]  ;;  %1607 = vst [vmem:[#allocation2 + $0x100] sm:$0xff] %v1559_v54  ;;  %v1562_v21 = vadd.f32 %v2391_v1, %v1048_v4  ;;  %v964_v55 = vpop.f32.mrf.mxu1 }
 0x16f   : > { %1880 = vst [vmem:[%s2912_s21 + $0x108] sm:$0xff] %v1699_v6  ;;  %1881 = vst [vmem:[%s2912_s21 + $0x110] sm:$0xff] %v1700_v46  ;;  %v1458_v57 = vpop.f32.mrf.mxu0  ;;  %v1051_v26 = vadd.f32 %v964_v55, %v2851_v35 }
 0x170   : > { %1889 = vst [vmem:[%s2912_s21 + $0x150] sm:$0xff] %v1562_v21  ;;  %v1561_v20 = vadd.f32 %v1458_v57, %v1047_v43  ;;  %v2296_v24 = vpop.f32.mrf.mxu1 }
 0x171   : > { %v2394_v2 = vpop.f32.mrf.mxu0  ;;  %v1054_v58 = vadd.f32 %v2296_v24, %v2856_v38 }
 0x172   : > { %1609 = vst [vmem:[#allocation2 + $0x110] sm:$0xff] %v1561_v20  ;;  %v1564_v56 = vadd.f32 %v2394_v2, %v1050_v49  ;;  %v974_v8 = vpop.f32.mrf.mxu1 }
 0x173   : > { %v1468_v60 = vpop.f32.mrf.mxu0  ;;  %v1053_v61 = vadd.f32 %v974_v8, %v2861_v41 }
 0x174   : > { %1612 = vst [vmem:[#allocation2 + $0x128] sm:$0xff] %v1564_v56  ;;  %v1563_v23 = vadd.f32 %v1468_v60, %v1049_v39  ;;  %v2299_v3 = vpop.f32.mrf.mxu1 }
 0x175   : > { %v1708_v59 = vld [vmem:[#allocation2 + $0x100] sm:$0x7]  ;;  %v1713_v29 = vld [vmem:[#allocation2 + $0x104] sm:$0xff]  ;;  %v2397_v42 = vpop.f32.mrf.mxu0  ;;  %v1056_v7 = vadd.f32 %v2299_v3, %v2866_v44 }
 0x176   : > { %1885 = vst [vmem:[%s2912_s21 + $0x130] sm:$0x7] %v1708_v59  ;;  %1886 = vst [vmem:[%s2912_s21 + $0x138] sm:$0xff] %v1713_v29  ;;  %v1566_v32 = vadd.f32 %v2397_v42, %v1052_v52  ;;  %v984_v62 = vpop.f32.mrf.mxu1 }
 0x177   : > { %1890 = vst [vmem:[%s2912_s21 + $0x158] sm:$0xff] %v1563_v23  ;;  %v1478_v5 = vpop.f32.mrf.mxu0  ;;  %v1055_v41 = vadd.f32 %v984_v62, %v2871_v47 }
 0x178   : > { %1614 = vst [vmem:[#allocation2 + $0x138] sm:$0xff] %v1566_v32  ;;  %v1565_v35 = vadd.f32 %v1478_v5, %v1051_v26  ;;  %v2302_v27 = vpop.f32.mrf.mxu1 }
 0x179   : > { %v1714_v53 = vld [vmem:[#allocation2 + $0x10c] sm:$0xff]  ;;  %v1715_v63 = vld [vmem:[#allocation2 + $0x114] sm:$0x7]  ;;  %v2400_v14 = vpop.f32.mrf.mxu0  ;;  %v1058_v22 = vadd.f32 %v2302_v27, %v2876_v50 }
 0x17a   : > { %1887 = vst [vmem:[%s2912_s21 + $0x140] sm:$0xff] %v1714_v53  ;;  %1888 = vst [vmem:[%s2912_s21 + $0x148] sm:$0x7] %v1715_v63  ;;  %v1568_v38 = vadd.f32 %v2400_v14, %v1054_v58  ;;  %v994_v45 = vpop.f32.mrf.mxu1 }
 0x17b   : > { %1613 = vst [vmem:[#allocation2 + $0x130] sm:$0xff] %v1565_v35  ;;  %v1722_v17 = vld [vmem:[#allocation2 + $0x128] sm:$0x7]  ;;  %v1488_v25 = vpop.f32.mrf.mxu0  ;;  %v1057_v11 = vadd.f32 %v994_v45, %v3055_v28 }
 0x17c   : > { %1891 = vst [vmem:[%s2912_s21 + $0x160] sm:$0x7] %v1722_v17  ;;  %1896 = vst [vmem:[%s2912_s21 + $0x188] sm:$0xff] %v1568_v38  ;;  %v1567_v10 = vadd.f32 %v1488_v25, %v1053_v61  ;;  %v2305_v9 = vpop.f32.mrf.mxu1 }
 0x17d   : > { %v2403_v30 = vpop.f32.mrf.mxu0  ;;  %v1060_v37 = vadd.f32 %v2305_v9, %v3056_v34 }
 0x17e   : > { %1895 = vst [vmem:[%s2912_s21 + $0x180] sm:$0xff] %v1567_v10  ;;  %v1570_v19 = vadd.f32 %v2403_v30, %v1056_v7  ;;  %v1004_v31 = vpop.f32.mrf.mxu1 }
 0x17f   : > { %v1729_v44 = vld [vmem:[#allocation2 + $0x13c] sm:$0x7]  ;;  %v1498_v48 = vpop.f32.mrf.mxu0  ;;  %v1059_v4 = vadd.f32 %v1004_v31, %v3057_v40 }
 0x180   : > { %1894 = vst [vmem:[%s2912_s21 + $0x178] sm:$0x7] %v1729_v44  ;;  %1618 = vst [vmem:[#allocation2 + $0x158] sm:$0xff] %v1570_v19  ;;  %v1569_v13 = vadd.f32 %v1498_v48, %v1055_v41 }
 0x181   : > { %v2406_v33 = vpop.f32.mrf.mxu0 }
 0x182   : > { %v1727_v12 = vld [vmem:[#allocation2 + $0x12c] sm:$0xff]  ;;  %v1728_v47 = vld [vmem:[#allocation2 + $0x134] sm:$0xff]  ;;  %1617 = vst [vmem:[#allocation2 + $0x150] sm:$0xff] %v1569_v13  ;;  %v1572_v50 = vadd.f32 %v2406_v33, %v1058_v22 }
 0x183   : > { %1892 = vst [vmem:[%s2912_s21 + $0x168] sm:$0xff] %v1727_v12  ;;  %1893 = vst [vmem:[%s2912_s21 + $0x170] sm:$0xff] %v1728_v47  ;;  %v1508_v51 = vpop.f32.mrf.mxu0 }
 0x184   : > { %1901 = vst [vmem:[%s2912_s21 + $0x1b0] sm:$0xff] %v1572_v50  ;;  %v1571_v16 = vadd.f32 %v1508_v51, %v1057_v11 }
 0x185   : > { %v2409_v15 = vpop.f32.mrf.mxu0 }
 0x186   : > { %1619 = vst [vmem:[#allocation2 + $0x160] sm:$0xff] %v1571_v16  ;;  %v1574_v0 = vadd.f32 %v2409_v15, %v1060_v37 }
 0x187   : > { %v1518_v36 = vpop.f32.mrf.mxu0 }
 0x188   : > { %1622 = vst [vmem:[#allocation2 + $0x178] sm:$0xff] %v1574_v0  ;;  %v1573_v43 = vadd.f32 %v1518_v36, %v1059_v4 }
 0x189   : > { %v1736_v54 = vld [vmem:[#allocation2 + $0x150] sm:$0x7]  ;;  %v1741_v18 = vld [vmem:[#allocation2 + $0x154] sm:$0xff] }
 0x18a   : > { %1897 = vst [vmem:[%s2912_s21 + $0x190] sm:$0x7] %v1736_v54  ;;  %1898 = vst [vmem:[%s2912_s21 + $0x198] sm:$0xff] %v1741_v18 }
 0x18b   : > { %1902 = vst [vmem:[%s2912_s21 + $0x1b8] sm:$0xff] %v1573_v43 }
 0x18d   : > { %v1742_v6 = vld [vmem:[#allocation2 + $0x15c] sm:$0xff]  ;;  %v1743_v46 = vld [vmem:[#allocation2 + $0x164] sm:$0x7] }
 0x18e   : > { %1899 = vst [vmem:[%s2912_s21 + $0x1a0] sm:$0xff] %v1742_v6  ;;  %1900 = vst [vmem:[%s2912_s21 + $0x1a8] sm:$0x7] %v1743_v46 }
 0x18f   : > { %v1750_v1 = vld [vmem:[#allocation2 + $0x178] sm:$0x7] }
 0x190   : > { %1903 = vst [vmem:[%s2912_s21 + $0x1c0] sm:$0x7] %v1750_v1 }
 0x191 PF: > { %s13_s12 = sadd.s32 1, %s2458_s12  }
 0x192   : > { %p10_p4 = scmp.ge.s32.totalorder %s13_s12, 4  }
 0x194   :  { %12 = sbr.rel (!%p10_p4) target bundleno = 1 (0x1), region = 82 }

// kernel: preconv_forward.8
= control target key start
LH: loop header
LB: loop body
LE: loop exit
PB: predicated region body
PF: predicated region fallthrough
CT: control target
= control target key end

     0   :  { %s2421_s12 = smov 0   ;;  %s3247_s0 = inlined_call_operand.vmem [shape: f32[2,368,128], index: 0, kind: input, shape index: {}]   ;;  %s3248_s1 = inlined_call_operand.vmem [shape: f32[3,128,128], index: 1, kind: input, shape index: {}]   ;;  %s3249_s2 = inlined_call_operand.vmem [shape: f32[1,128], index: 2, kind: input, shape index: {}]   ;;  %s3250_s3 = inlined_call_operand.vmem [shape: f32[2,17,17,128], index: 3, kind: output, shape index: {}]  }
   0x1 LB: > { %s1621_s13 = sadd.s32 4294967295, %s2397_s12   ;;  %p1625_p0 = scmp.ge.s32.totalorder %s2397_s12, 1  ;;  %s2397_s12 = sphi %s2421_s12, %s13_s12  }
   0x2   : > { %p137_p1 = scmp.lt.s32.totalorder %s2397_s12, 3 }
   0x4   : > { %p138_p2 = pnand %p1625_p0, %p137_p1 }
   0x5   : > { %p161_p3 = scmp.lt.s32.totalorder (!%p138_p2), %s1621_s13, 1 }
   0x6   : > { %141 = sbr.rel (%p138_p2) target bundleno = 495 (0x1ef), region = 32 }
   0xb   : > { %v227_v0 = vld [vmem:[%s3248_s1 + $0x78] sm:$0xff]  ;;  %v2399_v1 = vmov 0.0   ;;  %v226_v2 = vld [vmem:[%s3248_s1 + $0x70] sm:$0xff]  ;;  %v225_v3 = vld [vmem:[%s3248_s1 + $0x68] sm:$0xff]  ;;  %s3252_s13 = smov (!%p161_p3, %s1621_s13), 1  ;;  %vm2400_vm0 = vmmov 0  }
   0xc   : > { %2347 = vmatprep.subr.mxu1 %v2399_v1  ;;  %1882 = vmatprep.subr.mxu0 %v2399_v1  ;;  %v224_v4 = vld [vmem:[%s3248_s1 + $0x60] sm:$0xff]  ;;  %v223_v5 = vld [vmem:[%s3248_s1 + $0x58] sm:$0xff]  ;;  %v222_v6 = vld [vmem:[%s3248_s1 + $0x50] sm:$0xff]  ;;  %s2379_s15 = smul.u32 368, %s3252_s13 }
   0xd   : > { %2363 = vmatpush3.msra.mxu1 %v227_v0  ;;  %1883 = vmatpush3.msra.mxu0 %v227_v0  ;;  %v221_v7 = vld [vmem:[%s3248_s1 + $0x48] sm:$0xff]  ;;  %v220_v8 = vld [vmem:[%s3248_s1 + $0x40] sm:$0xff]  ;;  %v219_v9 = vld [vmem:[%s3248_s1 + $0x38] sm:$0xff]  ;;  %s2380_s17 = smul.u32 408, %s3252_s13 }
   0xe   : > { %2348 = vmatprep.subr.mxu1 %v2399_v1  ;;  %1884 = vmatprep.subr.mxu0 %v2399_v1  ;;  %v218_v10 = vld [vmem:[%s3248_s1 + $0x30] sm:$0xff]  ;;  %v217_v11 = vld [vmem:[%s3248_s1 + $0x28] sm:$0xff]  ;;  %v216_v12 = vld [vmem:[%s3248_s1 + $0x20] sm:$0xff]  ;;  %s2512_s22 = scalar_lea.vmem %s3247_s0, %s2379_s15 }
   0xf   : > { %2364 = vmatpush3.msra.mxu1 %v226_v2  ;;  %1885 = vmatpush3.msra.mxu0 %v226_v2  ;;  %v215_v13 = vld [vmem:[%s3248_s1 + $0x18] sm:$0xff]  ;;  %v214_v14 = vld [vmem:[%s3248_s1 + $0x10] sm:$0xff]  ;;  %v213_v15 = vld [vmem:[%s3248_s1 + $0x8] sm:$0xff]  ;;  %s3111_s20 = scalar_lea.vmem %s3250_s3, %s2380_s17 }
  0x10   : > { %2349 = vmatprep.subr.mxu1 %v2399_v1  ;;  %1886 = vmatprep.subr.mxu0 %v2399_v1  ;;  %v212_v16 = vld [vmem:[%s3248_s1] sm:$0xff]  ;;  %v192_v17 = vld [vmem:[%s2512_s22 + $0xa8] sm:$0xff]  ;;  %v1644_v18 = vld [vmem:[%s3248_s1 + $0xf8] sm:$0xff] }
  0x11   : > { %2365 = vmatpush3.msra.mxu1 %v225_v3  ;;  %1887 = vmatpush3.msra.mxu0 %v225_v3  ;;  %v171_v19 = vld [vmem:[%s2512_s22] sm:$0xff]  ;;  %v193_v20 = vld [vmem:[%s2512_s22 + $0xb0] sm:$0xff]  ;;  %v1660_v22 = vld [vmem:[%s3248_s1 + $0x178] sm:$0xff] }
  0x12   : > { %2350 = vmatprep.subr.mxu1 %v2399_v1  ;;  %1888 = vmatprep.subr.mxu0 %v2399_v1  ;;  %v1643_v21 = vld [vmem:[%s3248_s1 + $0xf0] sm:$0xff]  ;;  %v172_v23 = vld [vmem:[%s2512_s22 + $0x8] sm:$0xff]  ;;  %v194_v24 = vld [vmem:[%s2512_s22 + $0xb8] sm:$0xff] }
  0x13   : > { %2366 = vmatpush3.msra.mxu1 %v224_v4  ;;  %1889 = vmatpush3.msra.mxu0 %v224_v4  ;;  %v1642_v25 = vld [vmem:[%s3248_s1 + $0xe8] sm:$0xff]  ;;  %v173_v26 = vld [vmem:[%s2512_s22 + $0x10] sm:$0xff]  ;;  %v1641_v27 = vld [vmem:[%s3248_s1 + $0xe0] sm:$0xff] }
  0x14   : > { %2351 = vmatprep.subr.mxu1 %v2399_v1  ;;  %1890 = vmatprep.subr.mxu0 %v2399_v1  ;;  %v195_v28 = vld [vmem:[%s2512_s22 + $0xc0] sm:$0xff]  ;;  %v1659_v29 = vld [vmem:[%s3248_s1 + $0x170] sm:$0xff]  ;;  %v174_v30 = vld [vmem:[%s2512_s22 + $0x18] sm:$0xff] }
  0x15   : > { %2367 = vmatpush3.msra.mxu1 %v223_v5  ;;  %1891 = vmatpush3.msra.mxu0 %v223_v5  ;;  %v1640_v31 = vld [vmem:[%s3248_s1 + $0xd8] sm:$0xff]  ;;  %v196_v32 = vld [vmem:[%s2512_s22 + $0xc8] sm:$0xff]  ;;  %v175_v34 = vld [vmem:[%s2512_s22 + $0x20] sm:$0xff] }
  0x16   : > { %2352 = vmatprep.subr.mxu1 %v2399_v1  ;;  %1892 = vmatprep.subr.mxu0 %v2399_v1  ;;  %v1658_v33 = vld [vmem:[%s3248_s1 + $0x168] sm:$0xff]  ;;  %v1639_v35 = vld [vmem:[%s3248_s1 + $0xd0] sm:$0xff]  ;;  %v1657_v37 = vld [vmem:[%s3248_s1 + $0x160] sm:$0xff] }
  0x17   : > { %2368 = vmatpush3.msra.mxu1 %v222_v6  ;;  %1893 = vmatpush3.msra.mxu0 %v222_v6  ;;  %v197_v36 = vld [vmem:[%s2512_s22 + $0xd0] sm:$0xff]  ;;  %v176_v38 = vld [vmem:[%s2512_s22 + $0x28] sm:$0xff]  ;;  %v198_v40 = vld [vmem:[%s2512_s22 + $0xd8] sm:$0xff] }
  0x18   : > { %2353 = vmatprep.subr.mxu1 %v2399_v1  ;;  %1894 = vmatprep.subr.mxu0 %v2399_v1  ;;  %v1638_v39 = vld [vmem:[%s3248_s1 + $0xc8] sm:$0xff]  ;;  %v1656_v41 = vld [vmem:[%s3248_s1 + $0x158] sm:$0xff]  ;;  %v177_v42 = vld [vmem:[%s2512_s22 + $0x30] sm:$0xff] }
  0x19   : > { %2369 = vmatpush3.msra.mxu1 %v221_v7  ;;  %1895 = vmatpush3.msra.mxu0 %v221_v7  ;;  %v1637_v43 = vld [vmem:[%s3248_s1 + $0xc0] sm:$0xff]  ;;  %v1655_v45 = vld [vmem:[%s3248_s1 + $0x150] sm:$0xff]  ;;  %v178_v46 = vld [vmem:[%s2512_s22 + $0x38] sm:$0xff] }
  0x1a   : > { %2354 = vmatprep.subr.mxu1 %v2399_v1  ;;  %1896 = vmatprep.subr.mxu0 %v2399_v1  ;;  %v199_v44 = vld [vmem:[%s2512_s22 + $0xe0] sm:$0xff]  ;;  %v1636_v47 = vld [vmem:[%s3248_s1 + $0xb8] sm:$0xff]  ;;  %v200_v48 = vld [vmem:[%s2512_s22 + $0xe8] sm:$0xff] }
  0x1b   : > { %2370 = vmatpush3.msra.mxu1 %v220_v8  ;;  %1897 = vmatpush3.msra.mxu0 %v220_v8  ;;  %v1654_v49 = vld [vmem:[%s3248_s1 + $0x148] sm:$0xff]  ;;  %v179_v50 = vld [vmem:[%s2512_s22 + $0x40] sm:$0xff]  ;;  %v1635_v51 = vld [vmem:[%s3248_s1 + $0xb0] sm:$0xff] }
  0x1c   : > { %2355 = vmatprep.subr.mxu1 %v2399_v1  ;;  %1898 = vmatprep.subr.mxu0 %v2399_v1  ;;  %v201_v52 = vld [vmem:[%s2512_s22 + $0xf0] sm:$0xff]  ;;  %v1653_v53 = vld [vmem:[%s3248_s1 + $0x140] sm:$0xff]  ;;  %v180_v54 = vld [vmem:[%s2512_s22 + $0x48] sm:$0xff] }
  0x1d   : > { %2371 = vmatpush3.msra.mxu1 %v219_v9  ;;  %1899 = vmatpush3.msra.mxu0 %v219_v9  ;;  %v1634_v55 = vld [vmem:[%s3248_s1 + $0xa8] sm:$0xff]  ;;  %v202_v56 = vld [vmem:[%s2512_s22 + $0xf8] sm:$0xff]  ;;  %v181_v58 = vld [vmem:[%s2512_s22 + $0x50] sm:$0xff] }
  0x1e   : > { %2356 = vmatprep.subr.mxu1 %v2399_v1  ;;  %1900 = vmatprep.subr.mxu0 %v2399_v1  ;;  %v1652_v57 = vld [vmem:[%s3248_s1 + $0x138] sm:$0xff]  ;;  %v1633_v59 = vld [vmem:[%s3248_s1 + $0xa0] sm:$0xff]  ;;  %v1651_v61 = vld [vmem:[%s3248_s1 + $0x130] sm:$0xff] }
  0x1f   : > { %2372 = vmatpush3.msra.mxu1 %v218_v10  ;;  %1901 = vmatpush3.msra.mxu0 %v218_v10  ;;  %v203_v60 = vld [vmem:[%s2512_s22 + $0x100] sm:$0xff]  ;;  %v182_v62 = vld [vmem:[%s2512_s22 + $0x58] sm:$0xff]  ;;  %v204_v0 = vld [vmem:[%s2512_s22 + $0x108] sm:$0xff] }
  0x20   : > { %2357 = vmatprep.subr.mxu1 %v2399_v1  ;;  %1902 = vmatprep.subr.mxu0 %v2399_v1  ;;  %v1632_v63 = vld [vmem:[%s3248_s1 + $0x98] sm:$0xff]  ;;  %v1650_v2 = vld [vmem:[%s3248_s1 + $0x128] sm:$0xff]  ;;  %v183_v3 = vld [vmem:[%s2512_s22 + $0x60] sm:$0xff] }
  0x21   : > { %2373 = vmatpush3.msra.mxu1 %v217_v11  ;;  %1903 = vmatpush3.msra.mxu0 %v217_v11  ;;  %v1631_v4 = vld [vmem:[%s3248_s1 + $0x90] sm:$0xff]  ;;  %v1649_v6 = vld [vmem:[%s3248_s1 + $0x120] sm:$0xff]  ;;  %v184_v7 = vld [vmem:[%s2512_s22 + $0x68] sm:$0xff] }
  0x22   : > { %2358 = vmatprep.subr.mxu1 %v2399_v1  ;;  %1904 = vmatprep.subr.mxu0 %v2399_v1  ;;  %v205_v5 = vld [vmem:[%s2512_s22 + $0x110] sm:$0xff]  ;;  %v1630_v8 = vld [vmem:[%s3248_s1 + $0x88] sm:$0xff]  ;;  %v206_v9 = vld [vmem:[%s2512_s22 + $0x118] sm:$0xff] }
  0x23   : > { %2374 = vmatpush3.msra.mxu1 %v216_v12  ;;  %1905 = vmatpush3.msra.mxu0 %v216_v12  ;;  %v1648_v10 = vld [vmem:[%s3248_s1 + $0x118] sm:$0xff]  ;;  %v185_v11 = vld [vmem:[%s2512_s22 + $0x70] sm:$0xff]  ;;  %v1629_v12 = vld [vmem:[%s3248_s1 + $0x80] sm:$0xff] }
  0x24   : > { %2359 = vmatprep.subr.mxu1 %v2399_v1  ;;  %1906 = vmatprep.subr.mxu0 %v2399_v1 }
  0x25   : > { %2375 = vmatpush3.msra.mxu1 %v215_v13  ;;  %1907 = vmatpush3.msra.mxu0 %v215_v13  ;;  %v207_v13 = vld [vmem:[%s2512_s22 + $0x120] sm:$0xff] }
  0x26   : > { %2360 = vmatprep.subr.mxu1 %v2399_v1  ;;  %1908 = vmatprep.subr.mxu0 %v2399_v1 }
  0x27   : > { %2376 = vmatpush3.msra.mxu1 %v214_v14  ;;  %1977 = vmatprep.mubr.msk.f32.mxu1 %vm2400_vm0, %v2399_v1 }
  0x28   : > { %2361 = vmatprep.subr.mxu1 %v2399_v1  ;;  %1909 = vmatpush3.msra.mxu0 %v214_v14  ;;  %v1647_v14 = vld [vmem:[%s3248_s1 + $0x110] sm:$0xff] }
  0x29   : > { %2377 = vmatpush3.msra.mxu1 %v213_v15  ;;  %1910 = vmatprep.subr.mxu0 %v2399_v1 }
  0x2a   : > { %2362 = vmatprep.subr.mxu1 %v2399_v1  ;;  %1911 = vmatpush3.msra.mxu0 %v213_v15  ;;  %v186_v15 = vld [vmem:[%s2512_s22 + $0x78] sm:$0xff] }
  0x2b   : > { %2378 = vmatpush3.msra.mxu1 %v212_v16  ;;  %1912 = vmatprep.subr.mxu0 %v2399_v1 }
  0x2c   : > { %1978 = vmatmul.mubr.f32.vlgmr.msra.gmra.mxu1 %v192_v17  ;;  %2037 = vmatprep.subr.mxu1 %v2399_v1  ;;  %v1646_v17 = vld [vmem:[%s3248_s1 + $0x108] sm:$0xff] }
  0x2d   : > { %2038 = vmatpush3.msra.mxu1 %v1644_v18  ;;  %1980 = vmatprep.mubr.msk.f32.mxu1 %vm2400_vm0, %v2399_v1  ;;  %v187_v18 = vld [vmem:[%s2512_s22 + $0x80] sm:$0xff] }
  0x2e   : > { %1913 = vmatpush3.msra.mxu0 %v212_v16  ;;  %1914 = vmatprep.mubr.msk.f32.mxu0 %vm2400_vm0, %v2399_v1  ;;  %v208_v16 = vld [vmem:[%s2512_s22 + $0x128] sm:$0xff] }
  0x2f   : > { %1915 = vmatmul.mubr.f32.vlgmr.msra.gmra.mxu0 %v171_v19  ;;  %2039 = vmatprep.subr.mxu1 %v2399_v1  ;;  %v209_v19 = vld [vmem:[%s2512_s22 + $0x130] sm:$0xff] }
  0x30   : > { %1981 = vmatmul.mubr.f32.gmra.mxu1 %v193_v20  ;;  %2192 = vmatprep.subr.mxu0 %v2399_v1  ;;  %v1645_v20 = vld [vmem:[%s3248_s1 + $0x100] sm:$0xff] }
  0x31   : > { %2040 = vmatpush3.msra.mxu1 %v1643_v21  ;;  %1983 = vmatprep.mubr.msk.f32.mxu1 %vm2400_vm0, %v2399_v1  ;;  %v188_v21 = vld [vmem:[%s2512_s22 + $0x88] sm:$0xff] }
  0x32   : > { %2193 = vmatpush3.msra.mxu0 %v1660_v22  ;;  %1917 = vmatprep.mubr.msk.f32.mxu0 %vm2400_vm0, %v2399_v1  ;;  %v210_v22 = vld [vmem:[%s2512_s22 + $0x138] sm:$0xff] }
  0x33   : > { %1918 = vmatmul.mubr.f32.gmra.mxu0 %v172_v23  ;;  %2041 = vmatprep.subr.mxu1 %v2399_v1  ;;  %v189_v23 = vld [vmem:[%s2512_s22 + $0x90] sm:$0xff] }
  0x34   : > { %1984 = vmatmul.mubr.f32.gmra.mxu1 %v194_v24  ;;  %1920 = vmatprep.mubr.msk.f32.mxu0 %vm2400_vm0, %v2399_v1  ;;  %v211_v24 = vld [vmem:[%s2512_s22 + $0x140] sm:$0xff] }
  0x35   : > { %1986 = vmatprep.mubr.msk.f32.mxu1 %vm2400_vm0, %v2399_v1  ;;  %2042 = vmatpush3.msra.mxu1 %v1642_v25  ;;  %v190_v25 = vld [vmem:[%s2512_s22 + $0x98] sm:$0xff] }
  0x36   : > { %2194 = vmatprep.subr.mxu0 %v2399_v1  ;;  %2043 = vmatprep.subr.mxu1 %v2399_v1 }
  0x37   : > { %1921 = vmatmul.mubr.f32.gmra.mxu0 %v173_v26  ;;  %2044 = vmatpush3.msra.mxu1 %v1641_v27  ;;  %v587_v26 = vld [vmem:[%s2512_s22 + $0x13] sm:$0xff]  ;;  %v191_v27 = vld [vmem:[%s2512_s22 + $0xa0] sm:$0xff] }
  0x38   : > { %1987 = vmatmul.mubr.f32.gmra.mxu1 %v195_v28  ;;  %2195 = vmatpush3.msra.mxu0 %v1659_v29  ;;  %v588_v28 = vld [vmem:[%s2512_s22 + $0x1b] sm:$0xff]  ;;  %v1038_v29 = vld [vmem:[%s2512_s22 + $0x26] sm:$0xff] }
  0x39   : > { %1989 = vmatprep.mubr.msk.f32.mxu1 %vm2400_vm0, %v2399_v1  ;;  %1923 = vmatprep.mubr.msk.f32.mxu0 %vm2400_vm0, %v2399_v1 }
  0x3a   : > { %2196 = vmatprep.subr.mxu0 %v2399_v1  ;;  %2045 = vmatprep.subr.mxu1 %v2399_v1 }
  0x3b   : > { %1924 = vmatmul.mubr.f32.gmra.mxu0 %v174_v30  ;;  %2046 = vmatpush3.msra.mxu1 %v1640_v31  ;;  %v589_v30 = vld [vmem:[%s2512_s22 + $0x23] sm:$0xff]  ;;  %v1039_v31 = vld [vmem:[%s2512_s22 + $0x2e] sm:$0xff] }
  0x3c   : > { %1990 = vmatmul.mubr.f32.gmra.mxu1 %v196_v32  ;;  %2197 = vmatpush3.msra.mxu0 %v1658_v33  ;;  %v590_v32 = vld [vmem:[%s2512_s22 + $0x2b] sm:$0xff]  ;;  %v1040_v33 = vld [vmem:[%s2512_s22 + $0x36] sm:$0xff] }
  0x3d   : > { %1992 = vmatprep.mubr.msk.f32.mxu1 %vm2400_vm0, %v2399_v1  ;;  %1926 = vmatprep.mubr.msk.f32.mxu0 %vm2400_vm0, %v2399_v1 }
  0x3e   : > { %2198 = vmatprep.subr.mxu0 %v2399_v1  ;;  %2047 = vmatprep.subr.mxu1 %v2399_v1 }
  0x3f   : > { %1927 = vmatmul.mubr.f32.gmra.mxu0 %v175_v34  ;;  %2048 = vmatpush3.msra.mxu1 %v1639_v35  ;;  %v591_v34 = vld [vmem:[%s2512_s22 + $0x33] sm:$0xff]  ;;  %v1041_v35 = vld [vmem:[%s2512_s22 + $0x3e] sm:$0xff] }
  0x40   : > { %1993 = vmatmul.mubr.f32.gmra.mxu1 %v197_v36  ;;  %2199 = vmatpush3.msra.mxu0 %v1657_v37  ;;  %v592_v36 = vld [vmem:[%s2512_s22 + $0x3b] sm:$0xff]  ;;  %v1042_v37 = vld [vmem:[%s2512_s22 + $0x46] sm:$0xff] }
  0x41   : > { %1995 = vmatprep.mubr.msk.f32.mxu1 %vm2400_vm0, %v2399_v1  ;;  %1929 = vmatprep.mubr.msk.f32.mxu0 %vm2400_vm0, %v2399_v1 }
  0x42   : > { %2200 = vmatprep.subr.mxu0 %v2399_v1  ;;  %2049 = vmatprep.subr.mxu1 %v2399_v1 }
  0x43   : > { %1930 = vmatmul.mubr.f32.gmra.mxu0 %v176_v38  ;;  %2050 = vmatpush3.msra.mxu1 %v1638_v39  ;;  %v593_v38 = vld [vmem:[%s2512_s22 + $0x43] sm:$0xff]  ;;  %v1043_v39 = vld [vmem:[%s2512_s22 + $0x4e] sm:$0xff] }
  0x44   : > { %1996 = vmatmul.mubr.f32.gmra.mxu1 %v198_v40  ;;  %1932 = vmatprep.mubr.msk.f32.mxu0 %vm2400_vm0, %v2399_v1  ;;  %v594_v40 = vld [vmem:[%s2512_s22 + $0x4b] sm:$0xff] }
  0x45   : > { %1998 = vmatprep.mubr.msk.f32.mxu1 %vm2400_vm0, %v2399_v1  ;;  %2201 = vmatpush3.msra.mxu0 %v1656_v41  ;;  %v1044_v41 = vld [vmem:[%s2512_s22 + $0x56] sm:$0xff] }
  0x46   : > { %2202 = vmatprep.subr.mxu0 %v2399_v1  ;;  %2051 = vmatprep.subr.mxu1 %v2399_v1 }
  0x47   : > { %1933 = vmatmul.mubr.f32.gmra.mxu0 %v177_v42  ;;  %2052 = vmatpush3.msra.mxu1 %v1637_v43  ;;  %v595_v42 = vld [vmem:[%s2512_s22 + $0x53] sm:$0xff]  ;;  %v1045_v43 = vld [vmem:[%s2512_s22 + $0x5e] sm:$0xff] }
  0x48   : > { %1999 = vmatmul.mubr.f32.gmra.mxu1 %v199_v44  ;;  %1935 = vmatprep.mubr.msk.f32.mxu0 %vm2400_vm0, %v2399_v1  ;;  %v596_v44 = vld [vmem:[%s2512_s22 + $0x5b] sm:$0xff] }
  0x49   : > { %2001 = vmatprep.mubr.msk.f32.mxu1 %vm2400_vm0, %v2399_v1  ;;  %2203 = vmatpush3.msra.mxu0 %v1655_v45  ;;  %v1046_v45 = vld [vmem:[%s2512_s22 + $0x66] sm:$0xff] }
  0x4a   : > { %2204 = vmatprep.subr.mxu0 %v2399_v1  ;;  %2053 = vmatprep.subr.mxu1 %v2399_v1 }
  0x4b   : > { %1936 = vmatmul.mubr.f32.gmra.mxu0 %v178_v46  ;;  %2054 = vmatpush3.msra.mxu1 %v1636_v47  ;;  %v597_v46 = vld [vmem:[%s2512_s22 + $0x63] sm:$0xff]  ;;  %v1047_v47 = vld [vmem:[%s2512_s22 + $0x6e] sm:$0xff] }
  0x4c   : > { %2002 = vmatmul.mubr.f32.gmra.mxu1 %v200_v48  ;;  %1938 = vmatprep.mubr.msk.f32.mxu0 %vm2400_vm0, %v2399_v1  ;;  %v598_v48 = vld [vmem:[%s2512_s22 + $0x6b] sm:$0xff] }
  0x4d   : > { %2004 = vmatprep.mubr.msk.f32.mxu1 %vm2400_vm0, %v2399_v1  ;;  %2205 = vmatpush3.msra.mxu0 %v1654_v49  ;;  %v1048_v49 = vld [vmem:[%s2512_s22 + $0x76] sm:$0xff] }
  0x4e   : > { %2206 = vmatprep.subr.mxu0 %v2399_v1  ;;  %2055 = vmatprep.subr.mxu1 %v2399_v1 }
  0x4f   : > { %1939 = vmatmul.mubr.f32.gmra.mxu0 %v179_v50  ;;  %2056 = vmatpush3.msra.mxu1 %v1635_v51  ;;  %v599_v50 = vld [vmem:[%s2512_s22 + $0x73] sm:$0xff]  ;;  %v1049_v51 = vld [vmem:[%s2512_s22 + $0x7e] sm:$0xff] }
  0x50   : > { %2005 = vmatmul.mubr.f32.gmra.mxu1 %v201_v52  ;;  %1941 = vmatprep.mubr.msk.f32.mxu0 %vm2400_vm0, %v2399_v1  ;;  %v600_v52 = vld [vmem:[%s2512_s22 + $0x7b] sm:$0xff] }
  0x51   : > { %2007 = vmatprep.mubr.msk.f32.mxu1 %vm2400_vm0, %v2399_v1  ;;  %2207 = vmatpush3.msra.mxu0 %v1653_v53  ;;  %v1050_v53 = vld [vmem:[%s2512_s22 + $0x86] sm:$0xff] }
  0x52   : > { %2208 = vmatprep.subr.mxu0 %v2399_v1  ;;  %2057 = vmatprep.subr.mxu1 %v2399_v1 }
  0x53   : > { %1942 = vmatmul.mubr.f32.gmra.mxu0 %v180_v54  ;;  %2058 = vmatpush3.msra.mxu1 %v1634_v55  ;;  %v601_v54 = vld [vmem:[%s2512_s22 + $0x83] sm:$0xff]  ;;  %v1051_v55 = vld [vmem:[%s2512_s22 + $0x8e] sm:$0xff] }
  0x54   : > { %2008 = vmatmul.mubr.f32.gmra.mxu1 %v202_v56  ;;  %1944 = vmatprep.mubr.msk.f32.mxu0 %vm2400_vm0, %v2399_v1  ;;  %v602_v56 = vld [vmem:[%s2512_s22 + $0x8b] sm:$0xff] }
  0x55   : > { %2010 = vmatprep.mubr.msk.f32.mxu1 %vm2400_vm0, %v2399_v1  ;;  %2209 = vmatpush3.msra.mxu0 %v1652_v57  ;;  %v1052_v57 = vld [vmem:[%s2512_s22 + $0x96] sm:$0xff] }
  0x56   : > { %2210 = vmatprep.subr.mxu0 %v2399_v1  ;;  %2059 = vmatprep.subr.mxu1 %v2399_v1 }
  0x57   : > { %1945 = vmatmul.mubr.f32.gmra.mxu0 %v181_v58  ;;  %2060 = vmatpush3.msra.mxu1 %v1633_v59  ;;  %v603_v58 = vld [vmem:[%s2512_s22 + $0x93] sm:$0xff]  ;;  %v1053_v59 = vld [vmem:[%s2512_s22 + $0x9e] sm:$0xff] }
  0x58   : > { %2011 = vmatmul.mubr.f32.gmra.mxu1 %v203_v60  ;;  %1947 = vmatprep.mubr.msk.f32.mxu0 %vm2400_vm0, %v2399_v1  ;;  %v604_v60 = vld [vmem:[%s2512_s22 + $0x9b] sm:$0xff] }
  0x59   : > { %2013 = vmatprep.mubr.msk.f32.mxu1 %vm2400_vm0, %v2399_v1  ;;  %2211 = vmatpush3.msra.mxu0 %v1651_v61  ;;  %v1054_v61 = vld [vmem:[%s2512_s22 + $0xa6] sm:$0xff] }
  0x5a   : > { %2212 = vmatprep.subr.mxu0 %v2399_v1  ;;  %2061 = vmatprep.subr.mxu1 %v2399_v1 }
  0x5b   : > { %1948 = vmatmul.mubr.f32.gmra.mxu0 %v182_v62  ;;  %2062 = vmatpush3.msra.mxu1 %v1632_v63  ;;  %v605_v62 = vld [vmem:[%s2512_s22 + $0xa3] sm:$0xff]  ;;  %v1055_v63 = vld [vmem:[%s2512_s22 + $0xae] sm:$0xff] }
  0x5c   : > { %2014 = vmatmul.mubr.f32.gmra.mxu1 %v204_v0  ;;  %1950 = vmatprep.mubr.msk.f32.mxu0 %vm2400_vm0, %v2399_v1  ;;  %v606_v0 = vld [vmem:[%s2512_s22 + $0xab] sm:$0xff] }
  0x5d   : > { %2016 = vmatprep.mubr.msk.f32.mxu1 %vm2400_vm0, %v2399_v1  ;;  %2213 = vmatpush3.msra.mxu0 %v1650_v2  ;;  %v1056_v2 = vld [vmem:[%s2512_s22 + $0xb6] sm:$0xff] }
  0x5e   : > { %2214 = vmatprep.subr.mxu0 %v2399_v1  ;;  %2063 = vmatprep.subr.mxu1 %v2399_v1 }
  0x5f   : > { %1951 = vmatmul.mubr.f32.gmra.mxu0 %v183_v3  ;;  %2064 = vmatpush3.msra.mxu1 %v1631_v4  ;;  %v607_v3 = vld [vmem:[%s2512_s22 + $0xb3] sm:$0xff]  ;;  %v1057_v4 = vld [vmem:[%s2512_s22 + $0xbe] sm:$0xff] }
  0x60   : > { %2017 = vmatmul.mubr.f32.gmra.mxu1 %v205_v5  ;;  %1953 = vmatprep.mubr.msk.f32.mxu0 %vm2400_vm0, %v2399_v1  ;;  %v608_v5 = vld [vmem:[%s2512_s22 + $0xbb] sm:$0xff] }
  0x61   : > { %2019 = vmatprep.mubr.msk.f32.mxu1 %vm2400_vm0, %v2399_v1  ;;  %2215 = vmatpush3.msra.mxu0 %v1649_v6  ;;  %v1058_v6 = vld [vmem:[%s2512_s22 + $0xc6] sm:$0xff] }
  0x62   : > { %2216 = vmatprep.subr.mxu0 %v2399_v1  ;;  %2065 = vmatprep.subr.mxu1 %v2399_v1 }
  0x63   : > { %1954 = vmatmul.mubr.f32.gmra.mxu0 %v184_v7  ;;  %2066 = vmatpush3.msra.mxu1 %v1630_v8  ;;  %v609_v7 = vld [vmem:[%s2512_s22 + $0xc3] sm:$0xff]  ;;  %v1059_v8 = vld [vmem:[%s2512_s22 + $0xce] sm:$0xff] }
  0x64   : > { %2020 = vmatmul.mubr.f32.gmra.mxu1 %v206_v9  ;;  %1956 = vmatprep.mubr.msk.f32.mxu0 %vm2400_vm0, %v2399_v1  ;;  %v610_v9 = vld [vmem:[%s2512_s22 + $0xcb] sm:$0xff] }
  0x65   : > { %2022 = vmatprep.mubr.msk.f32.mxu1 %vm2400_vm0, %v2399_v1  ;;  %2217 = vmatpush3.msra.mxu0 %v1648_v10  ;;  %v1060_v10 = vld [vmem:[%s2512_s22 + $0xd6] sm:$0xff] }
  0x66   : > { %2067 = vmatprep.subr.mxu1 %v2399_v1  ;;  %2218 = vmatprep.subr.mxu0 %v2399_v1 }
  0x67   : > { %1957 = vmatmul.mubr.f32.gmra.mxu0 %v185_v11  ;;  %2068 = vmatpush3.msra.mxu1 %v1629_v12  ;;  %v611_v11 = vld [vmem:[%s2512_s22 + $0xd3] sm:$0xff]  ;;  %v1061_v12 = vld [vmem:[%s2512_s22 + $0xde] sm:$0xff] }
  0x68   : > { %2023 = vmatmul.mubr.f32.gmra.mxu1 %v207_v13  ;;  %1959 = vmatprep.mubr.msk.f32.mxu0 %vm2400_vm0, %v2399_v1  ;;  %v612_v13 = vld [vmem:[%s2512_s22 + $0xdb] sm:$0xff] }
  0x69   : > { %2025 = vmatprep.mubr.msk.f32.mxu1 %vm2400_vm0, %v2399_v1  ;;  %2219 = vmatpush3.msra.mxu0 %v1647_v14  ;;  %v1062_v14 = vld [vmem:[%s2512_s22 + $0xe6] sm:$0xff] }
  0x6a   : > { %2220 = vmatprep.subr.mxu0 %v2399_v1 }
  0x6b   : > { %1960 = vmatmul.mubr.f32.gmra.mxu0 %v186_v15  ;;  %v613_v15 = vld [vmem:[%s2512_s22 + $0xe3] sm:$0xff] }
  0x6c   : > { %2026 = vmatmul.mubr.f32.gmra.mxu1 %v208_v16  ;;  %1962 = vmatprep.mubr.msk.f32.mxu0 %vm2400_vm0, %v2399_v1  ;;  %v1063_v16 = vld [vmem:[%s2512_s22 + $0xee] sm:$0xff] }
  0x6d   : > { %2028 = vmatprep.mubr.msk.f32.mxu1 %vm2400_vm0, %v2399_v1  ;;  %2221 = vmatpush3.msra.mxu0 %v1646_v17  ;;  %v614_v17 = vld [vmem:[%s2512_s22 + $0xeb] sm:$0xff] }
  0x6e   : > { %2222 = vmatprep.subr.mxu0 %v2399_v1 }
  0x6f   : > { %1963 = vmatmul.mubr.f32.gmra.mxu0 %v187_v18  ;;  %v1064_v18 = vld [vmem:[%s2512_s22 + $0xf6] sm:$0xff] }
  0x70   : > { %2029 = vmatmul.mubr.f32.gmra.mxu1 %v209_v19  ;;  %1965 = vmatprep.mubr.msk.f32.mxu0 %vm2400_vm0, %v2399_v1  ;;  %v615_v19 = vld [vmem:[%s2512_s22 + $0xf3] sm:$0xff] }
  0x71   : > { %2031 = vmatprep.mubr.msk.f32.mxu1 %vm2400_vm0, %v2399_v1  ;;  %2223 = vmatpush3.msra.mxu0 %v1645_v20 }
  0x73   : > { %1966 = vmatmul.mubr.f32.gmra.mxu0 %v188_v21  ;;  %v1065_v21 = vld [vmem:[%s2512_s22 + $0xfe] sm:$0xff] }
  0x74   : > { %2032 = vmatmul.mubr.f32.gmra.mxu1 %v210_v22  ;;  %1968 = vmatprep.mubr.msk.f32.mxu0 %vm2400_vm0, %v2399_v1  ;;  %v616_v22 = vld [vmem:[%s2512_s22 + $0xfb] sm:$0xff] }
  0x75   : > { %2034 = vmatprep.mubr.msk.f32.mxu1 %vm2400_vm0, %v2399_v1 }
  0x77   : > { %1969 = vmatmul.mubr.f32.gmra.mxu0 %v189_v23 }
  0x78   : > { %2035 = vmatmul.mubr.f32.gmra.mxu1 %v211_v24  ;;  %1971 = vmatprep.mubr.msk.f32.mxu0 %vm2400_vm0, %v2399_v1 }
  0x79   : > { %2069 = vmatprep.mubr.msk.f32.mxu1 %vm2400_vm0, %v2399_v1 }
  0x7b   : > { %1972 = vmatmul.mubr.f32.gmra.mxu0 %v190_v25 }
  0x7c   : > { %2070 = vmatmul.mubr.f32.vlgmr.msra.gmra.mxu1 %v587_v26  ;;  %1974 = vmatprep.mubr.msk.f32.mxu0 %vm2400_vm0, %v2399_v1  ;;  %v1066_v26 = vld [vmem:[%s2512_s22 + $0x106] sm:$0xff] }
  0x7d   : > { %2072 = vmatprep.mubr.msk.f32.mxu1 %vm2400_vm0, %v2399_v1 }
  0x7f   : > { %1975 = vmatmul.mubr.f32.gmra.mxu0 %v191_v27 }
  0x80   : > { %2073 = vmatmul.mubr.f32.gmra.mxu1 %v588_v28  ;;  %2224 = vmatprep.mubr.msk.f32.mxu0 %vm2400_vm0, %v2399_v1  ;;  %v617_v28 = vld [vmem:[%s2512_s22 + $0x103] sm:$0xff] }
  0x81   : > { %2075 = vmatprep.mubr.msk.f32.mxu1 %vm2400_vm0, %v2399_v1 }
  0x83   : > { %2225 = vmatmul.mubr.f32.vlgmr.msra.gmra.mxu0 %v1038_v29 }
  0x84   : > { %2076 = vmatmul.mubr.f32.gmra.mxu1 %v589_v30  ;;  %2227 = vmatprep.mubr.msk.f32.mxu0 %vm2400_vm0, %v2399_v1 }
  0x85   : > { %2078 = vmatprep.mubr.msk.f32.mxu1 %vm2400_vm0, %v2399_v1 }
  0x87   : > { %2228 = vmatmul.mubr.f32.gmra.mxu0 %v1039_v31 }
  0x88   : > { %2079 = vmatmul.mubr.f32.gmra.mxu1 %v590_v32  ;;  %2230 = vmatprep.mubr.msk.f32.mxu0 %vm2400_vm0, %v2399_v1  ;;  %v1067_v32 = vld [vmem:[%s2512_s22 + $0x10e] sm:$0xff] }
  0x89   : > { %2081 = vmatprep.mubr.msk.f32.mxu1 %vm2400_vm0, %v2399_v1 }
  0x8b   : > { %2231 = vmatmul.mubr.f32.gmra.mxu0 %v1040_v33 }
  0x8c   : > { %2082 = vmatmul.mubr.f32.gmra.mxu1 %v591_v34  ;;  %2233 = vmatprep.mubr.msk.f32.mxu0 %vm2400_vm0, %v2399_v1  ;;  %v618_v34 = vld [vmem:[%s2512_s22 + $0x10b] sm:$0xff] }
  0x8d   : > { %2084 = vmatprep.mubr.msk.f32.mxu1 %vm2400_vm0, %v2399_v1 }
  0x8f   : > { %2234 = vmatmul.mubr.f32.gmra.mxu0 %v1041_v35 }
  0x90   : > { %2085 = vmatmul.mubr.f32.gmra.mxu1 %v592_v36  ;;  %2236 = vmatprep.mubr.msk.f32.mxu0 %vm2400_vm0, %v2399_v1 }
  0x91   : > { %2087 = vmatprep.mubr.msk.f32.mxu1 %vm2400_vm0, %v2399_v1 }
  0x93   : > { %2237 = vmatmul.mubr.f32.gmra.mxu0 %v1042_v37 }
  0x94   : > { %2088 = vmatmul.mubr.f32.gmra.mxu1 %v593_v38  ;;  %2239 = vmatprep.mubr.msk.f32.mxu0 %vm2400_vm0, %v2399_v1  ;;  %v1068_v38 = vld [vmem:[%s2512_s22 + $0x116] sm:$0xff] }
  0x95   : > { %2090 = vmatprep.mubr.msk.f32.mxu1 %vm2400_vm0, %v2399_v1 }
  0x97   : > { %2240 = vmatmul.mubr.f32.gmra.mxu0 %v1043_v39 }
  0x98   : > { %2091 = vmatmul.mubr.f32.gmra.mxu1 %v594_v40  ;;  %2242 = vmatprep.mubr.msk.f32.mxu0 %vm2400_vm0, %v2399_v1  ;;  %v619_v40 = vld [vmem:[%s2512_s22 + $0x113] sm:$0xff] }
  0x99   : > { %2093 = vmatprep.mubr.msk.f32.mxu1 %vm2400_vm0, %v2399_v1 }
  0x9b   : > { %2243 = vmatmul.mubr.f32.gmra.mxu0 %v1044_v41 }
  0x9c   : > { %2094 = vmatmul.mubr.f32.gmra.mxu1 %v595_v42  ;;  %2245 = vmatprep.mubr.msk.f32.mxu0 %vm2400_vm0, %v2399_v1 }
  0x9d   : > { %2096 = vmatprep.mubr.msk.f32.mxu1 %vm2400_vm0, %v2399_v1 }
  0x9f   : > { %2246 = vmatmul.mubr.f32.gmra.mxu0 %v1045_v43 }
  0xa0   : > { %2097 = vmatmul.mubr.f32.gmra.mxu1 %v596_v44  ;;  %2248 = vmatprep.mubr.msk.f32.mxu0 %vm2400_vm0, %v2399_v1  ;;  %v1069_v44 = vld [vmem:[%s2512_s22 + $0x11e] sm:$0xff] }
  0xa1   : > { %2099 = vmatprep.mubr.msk.f32.mxu1 %vm2400_vm0, %v2399_v1 }
  0xa3   : > { %2249 = vmatmul.mubr.f32.gmra.mxu0 %v1046_v45 }
  0xa4   : > { %2100 = vmatmul.mubr.f32.gmra.mxu1 %v597_v46  ;;  %2251 = vmatprep.mubr.msk.f32.mxu0 %vm2400_vm0, %v2399_v1  ;;  %v620_v46 = vld [vmem:[%s2512_s22 + $0x11b] sm:$0xff] }
  0xa5   : > { %2102 = vmatprep.mubr.msk.f32.mxu1 %vm2400_vm0, %v2399_v1 }
  0xa7   : > { %2252 = vmatmul.mubr.f32.gmra.mxu0 %v1047_v47 }
  0xa8   : > { %2103 = vmatmul.mubr.f32.gmra.mxu1 %v598_v48  ;;  %2254 = vmatprep.mubr.msk.f32.mxu0 %vm2400_vm0, %v2399_v1 }
  0xa9   : > { %2105 = vmatprep.mubr.msk.f32.mxu1 %vm2400_vm0, %v2399_v1 }
  0xab   : > { %2255 = vmatmul.mubr.f32.gmra.mxu0 %v1048_v49 }
  0xac   : > { %2106 = vmatmul.mubr.f32.gmra.mxu1 %v599_v50  ;;  %2257 = vmatprep.mubr.msk.f32.mxu0 %vm2400_vm0, %v2399_v1  ;;  %v1070_v50 = vld [vmem:[%s2512_s22 + $0x126] sm:$0xff] }
  0xad   : > { %2108 = vmatprep.mubr.msk.f32.mxu1 %vm2400_vm0, %v2399_v1 }
  0xaf   : > { %2258 = vmatmul.mubr.f32.gmra.mxu0 %v1049_v51 }
  0xb0   : > { %2109 = vmatmul.mubr.f32.gmra.mxu1 %v600_v52  ;;  %2260 = vmatprep.mubr.msk.f32.mxu0 %vm2400_vm0, %v2399_v1  ;;  %v621_v52 = vld [vmem:[%s2512_s22 + $0x123] sm:$0xff] }
  0xb1   : > { %2111 = vmatprep.mubr.msk.f32.mxu1 %vm2400_vm0, %v2399_v1 }
  0xb3   : > { %2261 = vmatmul.mubr.f32.gmra.mxu0 %v1050_v53 }
  0xb4   : > { %2112 = vmatmul.mubr.f32.gmra.mxu1 %v601_v54  ;;  %2263 = vmatprep.mubr.msk.f32.mxu0 %vm2400_vm0, %v2399_v1 }
  0xb5   : > { %2114 = vmatprep.mubr.msk.f32.mxu1 %vm2400_vm0, %v2399_v1 }
  0xb7   : > { %2264 = vmatmul.mubr.f32.gmra.mxu0 %v1051_v55 }
  0xb8   : > { %2115 = vmatmul.mubr.f32.gmra.mxu1 %v602_v56  ;;  %2266 = vmatprep.mubr.msk.f32.mxu0 %vm2400_vm0, %v2399_v1  ;;  %v1071_v56 = vld [vmem:[%s2512_s22 + $0x12e] sm:$0xff] }
  0xb9   : > { %2117 = vmatprep.mubr.msk.f32.mxu1 %vm2400_vm0, %v2399_v1 }
  0xbb   : > { %2267 = vmatmul.mubr.f32.gmra.mxu0 %v1052_v57 }
  0xbc   : > { %2118 = vmatmul.mubr.f32.gmra.mxu1 %v603_v58  ;;  %2269 = vmatprep.mubr.msk.f32.mxu0 %vm2400_vm0, %v2399_v1  ;;  %v622_v58 = vld [vmem:[%s2512_s22 + $0x12b] sm:$0xff] }
  0xbd   : > { %2120 = vmatprep.mubr.msk.f32.mxu1 %vm2400_vm0, %v2399_v1 }
  0xbf   : > { %2270 = vmatmul.mubr.f32.gmra.mxu0 %v1053_v59 }
  0xc0   : > { %2121 = vmatmul.mubr.f32.gmra.mxu1 %v604_v60  ;;  %2272 = vmatprep.mubr.msk.f32.mxu0 %vm2400_vm0, %v2399_v1 }
  0xc1   : > { %2123 = vmatprep.mubr.msk.f32.mxu1 %vm2400_vm0, %v2399_v1 }
  0xc3   : > { %2273 = vmatmul.mubr.f32.gmra.mxu0 %v1054_v61 }
  0xc4   : > { %2124 = vmatmul.mubr.f32.gmra.mxu1 %v605_v62  ;;  %2275 = vmatprep.mubr.msk.f32.mxu0 %vm2400_vm0, %v2399_v1  ;;  %v1072_v62 = vld [vmem:[%s2512_s22 + $0x136] sm:$0xff] }
  0xc5   : > { %2126 = vmatprep.mubr.msk.f32.mxu1 %vm2400_vm0, %v2399_v1 }
  0xc7   : > { %2276 = vmatmul.mubr.f32.gmra.mxu0 %v1055_v63 }
  0xc8   : > { %2127 = vmatmul.mubr.f32.gmra.mxu1 %v606_v0  ;;  %2278 = vmatprep.mubr.msk.f32.mxu0 %vm2400_vm0, %v2399_v1  ;;  %v623_v0 = vld [vmem:[%s2512_s22 + $0x133] sm:$0xff] }
  0xc9   : > { %2129 = vmatprep.mubr.msk.f32.mxu1 %vm2400_vm0, %v2399_v1 }
  0xcb   : > { %2279 = vmatmul.mubr.f32.gmra.mxu0 %v1056_v2 }
  0xcc   : > { %2130 = vmatmul.mubr.f32.gmra.mxu1 %v607_v3  ;;  %2281 = vmatprep.mubr.msk.f32.mxu0 %vm2400_vm0, %v2399_v1 }
  0xcd   : > { %2132 = vmatprep.mubr.msk.f32.mxu1 %vm2400_vm0, %v2399_v1 }
  0xcf   : > { %2282 = vmatmul.mubr.f32.gmra.mxu0 %v1057_v4 }
  0xd0   : > { %2133 = vmatmul.mubr.f32.gmra.mxu1 %v608_v5  ;;  %2284 = vmatprep.mubr.msk.f32.mxu0 %vm2400_vm0, %v2399_v1  ;;  %v1073_v5 = vld [vmem:[%s2512_s22 + $0x13e] sm:$0xff] }
  0xd1   : > { %2135 = vmatprep.mubr.msk.f32.mxu1 %vm2400_vm0, %v2399_v1 }
  0xd3   : > { %2285 = vmatmul.mubr.f32.gmra.mxu0 %v1058_v6 }
  0xd4   : > { %2136 = vmatmul.mubr.f32.gmra.mxu1 %v609_v7  ;;  %2287 = vmatprep.mubr.msk.f32.mxu0 %vm2400_vm0, %v2399_v1  ;;  %v624_v7 = vld [vmem:[%s2512_s22 + $0x13b] sm:$0xff] }
  0xd5   : > { %2138 = vmatprep.mubr.msk.f32.mxu1 %vm2400_vm0, %v2399_v1 }
  0xd7   : > { %2288 = vmatmul.mubr.f32.gmra.mxu0 %v1059_v8 }
  0xd8   : > { %2139 = vmatmul.mubr.f32.gmra.mxu1 %v610_v9  ;;  %2290 = vmatprep.mubr.msk.f32.mxu0 %vm2400_vm0, %v2399_v1 }
  0xd9   : > { %2141 = vmatprep.mubr.msk.f32.mxu1 %vm2400_vm0, %v2399_v1 }
  0xdb   : > { %2291 = vmatmul.mubr.f32.gmra.mxu0 %v1060_v10 }
  0xdc   : > { %2142 = vmatmul.mubr.f32.gmra.mxu1 %v611_v11  ;;  %2293 = vmatprep.mubr.msk.f32.mxu0 %vm2400_vm0, %v2399_v1  ;;  %v1074_v11 = vld [vmem:[%s2512_s22 + $0x146] sm:$0xff] }
  0xdd   : > { %2144 = vmatprep.mubr.msk.f32.mxu1 %vm2400_vm0, %v2399_v1 }
  0xdf   : > { %2294 = vmatmul.mubr.f32.gmra.mxu0 %v1061_v12 }
  0xe0   : > { %2145 = vmatmul.mubr.f32.gmra.mxu1 %v612_v13  ;;  %2296 = vmatprep.mubr.msk.f32.mxu0 %vm2400_vm0, %v2399_v1  ;;  %v625_v13 = vld [vmem:[%s2512_s22 + $0x143] sm:$0xff] }
  0xe1   : > { %2147 = vmatprep.mubr.msk.f32.mxu1 %vm2400_vm0, %v2399_v1 }
  0xe3   : > { %2297 = vmatmul.mubr.f32.gmra.mxu0 %v1062_v14 }
  0xe4   : > { %2148 = vmatmul.mubr.f32.gmra.mxu1 %v613_v15  ;;  %2299 = vmatprep.mubr.msk.f32.mxu0 %vm2400_vm0, %v2399_v1 }
  0xe5   : > { %2150 = vmatprep.mubr.msk.f32.mxu1 %vm2400_vm0, %v2399_v1 }
  0xe7   : > { %2300 = vmatmul.mubr.f32.gmra.mxu0 %v1063_v16 }
  0xe8   : > { %2151 = vmatmul.mubr.f32.gmra.mxu1 %v614_v17  ;;  %2302 = vmatprep.mubr.msk.f32.mxu0 %vm2400_vm0, %v2399_v1  ;;  %v1075_v17 = vld [vmem:[%s2512_s22 + $0x14e] sm:$0xff] }
  0xe9   : > { %2153 = vmatprep.mubr.msk.f32.mxu1 %vm2400_vm0, %v2399_v1 }
  0xeb   : > { %2303 = vmatmul.mubr.f32.gmra.mxu0 %v1064_v18 }
  0xec   : > { %v2940_v20 = vpop.f32.mrf.mxu1  ;;  %2154 = vmatmul.mubr.f32.gmra.mxu1 %v615_v19  ;;  %2305 = vmatprep.mubr.msk.f32.mxu0 %vm2400_vm0, %v2399_v1  ;;  %v626_v19 = vld [vmem:[%s2512_s22 + $0x14b] sm:$0xff] }
  0xed   : > { %2156 = vmatprep.mubr.msk.f32.mxu1 %vm2400_vm0, %v2399_v1 }
  0xee   : > { %v1979_v23 = vpop.f32.mrf.mxu1 }
  0xef   : > { %v2948_v24 = vpop.f32.mrf.mxu0  ;;  %2306 = vmatmul.mubr.f32.gmra.mxu0 %v1065_v21 }
  0xf0   : > { %v2950_v25 = vpop.f32.mrf.mxu1  ;;  %2157 = vmatmul.mubr.f32.gmra.mxu1 %v616_v22  ;;  %2308 = vmatprep.mubr.msk.f32.mxu0 %vm2400_vm0, %v2399_v1 }
  0xf1   : > { %v1916_v27 = vpop.f32.mrf.mxu0  ;;  %2159 = vmatprep.mubr.msk.f32.mxu1 %vm2400_vm0, %v2399_v1 }
  0xf2   : > { %v1982_v29 = vpop.f32.mrf.mxu1 }
  0xf3   : > { %v2958_v30 = vpop.f32.mrf.mxu0  ;;  %2309 = vmatmul.mubr.f32.gmra.mxu0 %v1066_v26  ;;  %v1076_v26 = vld [vmem:[%s2512_s22 + $0x156] sm:$0xff] }
  0xf4   : > { %v2960_v31 = vpop.f32.mrf.mxu1  ;;  %2160 = vmatmul.mubr.f32.gmra.mxu1 %v617_v28  ;;  %2311 = vmatprep.mubr.msk.f32.mxu0 %vm2400_vm0, %v2399_v1  ;;  %v627_v28 = vld [vmem:[%s2512_s22 + $0x153] sm:$0xff] }
  0xf5   : > { %v1919_v33 = vpop.f32.mrf.mxu0  ;;  %2162 = vmatprep.mubr.msk.f32.mxu1 %vm2400_vm0, %v2399_v1 }
  0xf6   : > { %v1985_v35 = vpop.f32.mrf.mxu1 }
  0xf7   : > { %v2968_v36 = vpop.f32.mrf.mxu0  ;;  %2312 = vmatmul.mubr.f32.gmra.mxu0 %v1067_v32 }
  0xf8   : > { %v2970_v37 = vpop.f32.mrf.mxu1  ;;  %2163 = vmatmul.mubr.f32.gmra.mxu1 %v618_v34  ;;  %2314 = vmatprep.mubr.msk.f32.mxu0 %vm2400_vm0, %v2399_v1  ;;  %v1077_v34 = vld [vmem:[%s2512_s22 + $0x15e] sm:$0xff] }
  0xf9   : > { %v1922_v39 = vpop.f32.mrf.mxu0  ;;  %2165 = vmatprep.mubr.msk.f32.mxu1 %vm2400_vm0, %v2399_v1 }
  0xfa   : > { %v1988_v41 = vpop.f32.mrf.mxu1 }
  0xfb   : > { %v2978_v42 = vpop.f32.mrf.mxu0  ;;  %2315 = vmatmul.mubr.f32.gmra.mxu0 %v1068_v38  ;;  %v1078_v41 = vld [vmem:[%s2512_s22 + $0x166] sm:$0xff] }
  0xfc   : > { %v2980_v43 = vpop.f32.mrf.mxu1  ;;  %2166 = vmatmul.mubr.f32.gmra.mxu1 %v619_v40  ;;  %2317 = vmatprep.mubr.msk.f32.mxu0 %vm2400_vm0, %v2399_v1 }
  0xfd   : > { %v1925_v45 = vpop.f32.mrf.mxu0  ;;  %2168 = vmatprep.mubr.msk.f32.mxu1 %vm2400_vm0, %v2399_v1 }
  0xfe   : > { %v1991_v47 = vpop.f32.mrf.mxu1 }
  0xff   : > { %v2988_v48 = vpop.f32.mrf.mxu0  ;;  %2318 = vmatmul.mubr.f32.gmra.mxu0 %v1069_v44 }
 0x100   : > { %v2990_v49 = vpop.f32.mrf.mxu1  ;;  %2169 = vmatmul.mubr.f32.gmra.mxu1 %v620_v46  ;;  %2320 = vmatprep.mubr.msk.f32.mxu0 %vm2400_vm0, %v2399_v1 }
 0x101   : > { %v1928_v51 = vpop.f32.mrf.mxu0  ;;  %2171 = vmatprep.mubr.msk.f32.mxu1 %vm2400_vm0, %v2399_v1 }
 0x102   : > { %v1994_v53 = vpop.f32.mrf.mxu1 }
 0x103   : > { %v2998_v54 = vpop.f32.mrf.mxu0  ;;  %2321 = vmatmul.mubr.f32.gmra.mxu0 %v1070_v50 }
 0x104   : > { %v3000_v55 = vpop.f32.mrf.mxu1  ;;  %2172 = vmatmul.mubr.f32.gmra.mxu1 %v621_v52  ;;  %2323 = vmatprep.mubr.msk.f32.mxu0 %vm2400_vm0, %v2399_v1 }
 0x105   : > { %v1931_v57 = vpop.f32.mrf.mxu0  ;;  %2174 = vmatprep.mubr.msk.f32.mxu1 %vm2400_vm0, %v2399_v1 }
 0x106   : > { %v1997_v59 = vpop.f32.mrf.mxu1 }
 0x107   : > { %v3008_v60 = vpop.f32.mrf.mxu0  ;;  %2324 = vmatmul.mubr.f32.gmra.mxu0 %v1071_v56 }
 0x108   : > { %v3010_v61 = vpop.f32.mrf.mxu1  ;;  %2175 = vmatmul.mubr.f32.gmra.mxu1 %v622_v58  ;;  %2326 = vmatprep.mubr.msk.f32.mxu0 %vm2400_vm0, %v2399_v1 }
 0x109   : > { %v1934_v63 = vpop.f32.mrf.mxu0  ;;  %2177 = vmatprep.mubr.msk.f32.mxu1 %vm2400_vm0, %v2399_v1 }
 0x10a   : > { %v2000_v2 = vpop.f32.mrf.mxu1 }
 0x10b   : > { %v3018_v3 = vpop.f32.mrf.mxu0  ;;  %2327 = vmatmul.mubr.f32.gmra.mxu0 %v1072_v62 }
 0x10c   : > { %v3020_v4 = vpop.f32.mrf.mxu1  ;;  %2178 = vmatmul.mubr.f32.gmra.mxu1 %v623_v0  ;;  %2329 = vmatprep.mubr.msk.f32.mxu0 %vm2400_vm0, %v2399_v1 }
 0x10d   : > { %v1937_v6 = vpop.f32.mrf.mxu0  ;;  %2180 = vmatprep.mubr.msk.f32.mxu1 %vm2400_vm0, %v2399_v1 }
 0x10e   : > { %v2003_v8 = vpop.f32.mrf.mxu1 }
 0x10f   : > { %v3028_v9 = vpop.f32.mrf.mxu0  ;;  %2330 = vmatmul.mubr.f32.gmra.mxu0 %v1073_v5 }
 0x110   : > { %v3030_v10 = vpop.f32.mrf.mxu1  ;;  %2181 = vmatmul.mubr.f32.gmra.mxu1 %v624_v7  ;;  %2332 = vmatprep.mubr.msk.f32.mxu0 %vm2400_vm0, %v2399_v1 }
 0x111   : > { %v1940_v12 = vpop.f32.mrf.mxu0  ;;  %2183 = vmatprep.mubr.msk.f32.mxu1 %vm2400_vm0, %v2399_v1 }
 0x112   : > { %v2006_v14 = vpop.f32.mrf.mxu1 }
 0x113   : > { %v3038_v15 = vpop.f32.mrf.mxu0  ;;  %2333 = vmatmul.mubr.f32.gmra.mxu0 %v1074_v11 }
 0x114   : > { %v3040_v16 = vpop.f32.mrf.mxu1  ;;  %2184 = vmatmul.mubr.f32.gmra.mxu1 %v625_v13  ;;  %2335 = vmatprep.mubr.msk.f32.mxu0 %vm2400_vm0, %v2399_v1 }
 0x115   : > { %v1943_v18 = vpop.f32.mrf.mxu0  ;;  %2186 = vmatprep.mubr.msk.f32.mxu1 %vm2400_vm0, %v2399_v1 }
 0x116   : > { %v2009_v21 = vpop.f32.mrf.mxu1 }
 0x117   : > { %v3048_v22 = vpop.f32.mrf.mxu0  ;;  %2336 = vmatmul.mubr.f32.gmra.mxu0 %v1075_v17  ;;  %v3101_v21 = vld [vmem:[%s3249_s2] ss:$0 sm:$0xff] }
 0x118   : > { %v3050_v23 = vpop.f32.mrf.mxu1  ;;  %2187 = vmatmul.mubr.f32.gmra.mxu1 %v626_v19  ;;  %2338 = vmatprep.mubr.msk.f32.mxu0 %vm2400_vm0, %v2399_v1 }
 0x119   : > { %v1946_v27 = vpop.f32.mrf.mxu0  ;;  %2189 = vmatprep.mubr.msk.f32.mxu1 %vm2400_vm0, %v2399_v1 }
 0x11a   : > { %v2012_v29 = vpop.f32.mrf.mxu1 }
 0x11b   : > { %v3058_v32 = vpop.f32.mrf.mxu0  ;;  %2339 = vmatmul.mubr.f32.gmra.mxu0 %v1076_v26  ;;  %v302_v29 = vadd.f32 %v3101_v21, %v2948_v24 }
 0x11c   : > { %v3060_v33 = vpop.f32.mrf.mxu1  ;;  %2190 = vmatmul.mubr.f32.gmra.mxu1 %v627_v28  ;;  %2341 = vmatprep.mubr.msk.f32.mxu0 %vm2400_vm0, %v2399_v1 }
 0x11d   : > { %v1949_v35 = vpop.f32.mrf.mxu0 }
 0x11e   : > { %v2015_v38 = vpop.f32.mrf.mxu1 }
 0x11f   : > { %v3065_v39 = vpop.f32.mrf.mxu0  ;;  %2342 = vmatmul.mubr.f32.gmra.mxu0 %v1077_v34 }
 0x120   : > { %v3067_v40 = vpop.f32.mrf.mxu1  ;;  %2344 = vmatprep.mubr.msk.f32.mxu0 %vm2400_vm0, %v2399_v1 }
 0x121   : > { %v1952_v44 = vpop.f32.mrf.mxu0 }
 0x122   : > { %v2018_v45 = vpop.f32.mrf.mxu1 }
 0x123   : > { %v3072_v46 = vpop.f32.mrf.mxu0  ;;  %2345 = vmatmul.mubr.f32.gmra.mxu0 %v1078_v41  ;;  %v307_v45 = vadd.f32 %v3101_v21, %v2958_v30  ;;  %v317_v30 = vadd.f32 %v3101_v21, %v2978_v42  ;;  %v327_v42 = vadd.f32 %v3101_v21, %v2998_v54 }
 0x124   : > { %v3074_v47 = vpop.f32.mrf.mxu1 }
 0x125   : > { %v1955_v50 = vpop.f32.mrf.mxu0 }
 0x126   : > { %v2021_v51 = vpop.f32.mrf.mxu1 }
 0x127   : > { %v3076_v52 = vpop.f32.mrf.mxu0 }
 0x128   : > { %v3078_v53 = vpop.f32.mrf.mxu1 }
 0x129   : > { %v1958_v56 = vpop.f32.mrf.mxu0 }
 0x12a   : > { %v2024_v57 = vpop.f32.mrf.mxu1 }
 0x12b   : > { %v3080_v58 = vpop.f32.mrf.mxu0 }
 0x12c   : > { %v3082_v59 = vpop.f32.mrf.mxu1 }
 0x12d   : > { %v1961_v1 = vpop.f32.mrf.mxu0 }
 0x12e   : > { %v2027_v62 = vpop.f32.mrf.mxu1 }
 0x12f   : > { %v3084_v63 = vpop.f32.mrf.mxu0  ;;  %v312_v62 = vadd.f32 %v3101_v21, %v2968_v36  ;;  %v322_v36 = vadd.f32 %v3101_v21, %v2988_v48 }
 0x130   : > { %v3086_v0 = vpop.f32.mrf.mxu1 }
 0x131   : > { %v1964_v2 = vpop.f32.mrf.mxu0 }
 0x132   : > { %v2030_v5 = vpop.f32.mrf.mxu1 }
 0x133   : > { %v3088_v6 = vpop.f32.mrf.mxu0 }
 0x134   : > { %v3090_v7 = vpop.f32.mrf.mxu1 }
 0x135   : > { %v1967_v8 = vpop.f32.mrf.mxu0 }
 0x136   : > { %v2033_v11 = vpop.f32.mrf.mxu1 }
 0x137   : > { %v3092_v12 = vpop.f32.mrf.mxu0 }
 0x138   : > { %v3094_v13 = vpop.f32.mrf.mxu1 }
 0x139   : > { %v1970_v14 = vpop.f32.mrf.mxu0 }
 0x13a   : > { %v2036_v17 = vpop.f32.mrf.mxu1 }
 0x13b   : > { %v3096_v18 = vpop.f32.mrf.mxu0 }
 0x13c   : > { %v711_v19 = vpop.f32.mrf.mxu1 }
 0x13d   : > { %v1973_v26 = vpop.f32.mrf.mxu0  ;;  %v915_v38 = vadd.f32 %v711_v19, %v302_v29 }
 0x13e   : > { %v2071_v27 = vpop.f32.mrf.mxu1 }
 0x13f   : > { %v3103_v28 = vpop.f32.mrf.mxu0 }
 0x140   : > { %v716_v34 = vpop.f32.mrf.mxu1 }
 0x141   : > { %v1976_v35 = vpop.f32.mrf.mxu0  ;;  %v916_v57 = vadd.f32 %v716_v34, %v307_v45 }
 0x142   : > { %v2074_v41 = vpop.f32.mrf.mxu1 }
 0x143   : > { %v1162_v44 = vpop.f32.mrf.mxu0 }
 0x144   : > { %v721_v50 = vpop.f32.mrf.mxu1  ;;  %v1366_v51 = vadd.f32 %v1162_v44, %v915_v38 }
 0x145   : > { %v2226_v56 = vpop.f32.mrf.mxu0  ;;  %v917_v11 = vadd.f32 %v721_v50, %v312_v62 }
 0x146   : > { %1451 = vst [vmem:[%s3111_s20] sm:$0xff] %v1366_v51  ;;  %v2077_v24 = vpop.f32.mrf.mxu1 }
 0x147   : > { %v1167_v1 = vpop.f32.mrf.mxu0 }
 0x148   : > { %v726_v2 = vpop.f32.mrf.mxu1  ;;  %v1367_v5 = vadd.f32 %v1167_v1, %v916_v57 }
 0x149   : > { %v2229_v8 = vpop.f32.mrf.mxu0  ;;  %v918_v29 = vadd.f32 %v726_v2, %v317_v30 }
 0x14a   : > { %1452 = vst [vmem:[%s3111_s20 + $0x8] sm:$0xff] %v1367_v5  ;;  %v2080_v14 = vpop.f32.mrf.mxu1  ;;  %v332_v5 = vadd.f32 %v3101_v21, %v3008_v60 }
 0x14b   : > { %v1172_v17 = vpop.f32.mrf.mxu0 }
 0x14c   : > { %v731_v19 = vpop.f32.mrf.mxu1  ;;  %v1368_v26 = vadd.f32 %v1172_v17, %v917_v11 }
 0x14d   : > { %v2232_v27 = vpop.f32.mrf.mxu0  ;;  %v919_v45 = vadd.f32 %v731_v19, %v322_v36 }
 0x14e   : > { %1409 = vst [vmem:[#allocation2 + $0x10] sm:$0xff] %v1368_v26  ;;  %v2083_v34 = vpop.f32.mrf.mxu1  ;;  %v337_v26 = vadd.f32 %v3101_v21, %v3018_v3 }
 0x14f   : > { %v1177_v35 = vpop.f32.mrf.mxu0 }
 0x150   : > { %v736_v38 = vpop.f32.mrf.mxu1  ;;  %v1369_v41 = vadd.f32 %v1177_v35, %v918_v29 }
 0x151   : > { %v2235_v44 = vpop.f32.mrf.mxu0  ;;  %v920_v62 = vadd.f32 %v736_v38, %v327_v42 }
 0x152   : > { %1410 = vst [vmem:[#allocation2 + $0x18] sm:$0xff] %v1369_v41  ;;  %v2086_v50 = vpop.f32.mrf.mxu1  ;;  %v342_v44 = vadd.f32 %v3101_v21, %v3028_v9 }
 0x153   : > { %v1182_v51 = vpop.f32.mrf.mxu0 }
 0x154   : > { %v741_v56 = vpop.f32.mrf.mxu1  ;;  %v1370_v57 = vadd.f32 %v1182_v51, %v919_v45 }
 0x155   : > { %v1450_v24 = vld [vmem:[#allocation2 + $0x10] sm:$0x1]  ;;  %v2238_v1 = vpop.f32.mrf.mxu0  ;;  %v921_v54 = vadd.f32 %v741_v56, %v332_v5 }
 0x156   : > { %1453 = vst [vmem:[%s3111_s20 + $0x10] sm:$0x1] %v1450_v24  ;;  %1411 = vst [vmem:[#allocation2 + $0x20] sm:$0xff] %v1370_v57  ;;  %v2089_v2 = vpop.f32.mrf.mxu1  ;;  %v347_v24 = vadd.f32 %v3101_v21, %v3038_v15 }
 0x157   : > { %v1187_v48 = vpop.f32.mrf.mxu0 }
 0x158   : > { %v746_v8 = vpop.f32.mrf.mxu1  ;;  %v1371_v11 = vadd.f32 %v1187_v48, %v920_v62 }
 0x159   : > { %v1454_v14 = vld [vmem:[#allocation2 + $0x13] sm:$0xff]  ;;  %v2241_v17 = vpop.f32.mrf.mxu0  ;;  %v922_v36 = vadd.f32 %v746_v8, %v337_v26 }
 0x15a   : > { %1661 = vst [vmem:[%s3111_s20 + $0x18] sm:$0xff] %v1454_v14  ;;  %1412 = vst [vmem:[#allocation2 + $0x28] sm:$0xff] %v1371_v11  ;;  %v2092_v30 = vpop.f32.mrf.mxu1  ;;  %v352_v14 = vadd.f32 %v3101_v21, %v3048_v22 }
 0x15b   : > { %v1192_v19 = vpop.f32.mrf.mxu0 }
 0x15c   : > { %v751_v27 = vpop.f32.mrf.mxu1  ;;  %v1372_v29 = vadd.f32 %v1192_v19, %v921_v54 }
 0x15d   : > { %v1455_v34 = vld [vmem:[#allocation2 + $0x1b] sm:$0xff]  ;;  %v1456_v35 = vld [vmem:[#allocation2 + $0x23] sm:$0x1]  ;;  %v2244_v60 = vpop.f32.mrf.mxu0  ;;  %v923_v42 = vadd.f32 %v751_v27, %v342_v44  ;;  %v357_v27 = vadd.f32 %v3101_v21, %v3058_v32 }
 0x15e   : > { %1662 = vst [vmem:[%s3111_s20 + $0x20] sm:$0xff] %v1455_v34  ;;  %1663 = vst [vmem:[%s3111_s20 + $0x28] sm:$0x1] %v1456_v35  ;;  %v2095_v38 = vpop.f32.mrf.mxu1 }
 0x15f   : > { %1413 = vst [vmem:[#allocation2 + $0x30] sm:$0xff] %v1372_v29  ;;  %v1197_v41 = vpop.f32.mrf.mxu0 }
 0x160   : > { %v756_v45 = vpop.f32.mrf.mxu1  ;;  %v1373_v50 = vadd.f32 %v1197_v41, %v922_v36  ;;  %v362_v41 = vadd.f32 %v3101_v21, %v3065_v39 }
 0x161   : > { %v1461_v3 = vld [vmem:[#allocation2 + $0x26] sm:$0xff]  ;;  %v2247_v51 = vpop.f32.mrf.mxu0  ;;  %v924_v9 = vadd.f32 %v756_v45, %v347_v24 }
 0x162   : > { %1664 = vst [vmem:[%s3111_s20 + $0x30] sm:$0xff] %v1461_v3  ;;  %1414 = vst [vmem:[#allocation2 + $0x38] sm:$0xff] %v1373_v50  ;;  %v2098_v56 = vpop.f32.mrf.mxu1 }
 0x163   : > { %v1202_v57 = vpop.f32.mrf.mxu0 }
 0x164   : > { %v761_v1 = vpop.f32.mrf.mxu1  ;;  %v1374_v62 = vadd.f32 %v1202_v57, %v923_v42  ;;  %v367_v57 = vadd.f32 %v3101_v21, %v3072_v46 }
 0x165   : > { %v2250_v5 = vpop.f32.mrf.mxu0  ;;  %v925_v19 = vadd.f32 %v761_v1, %v352_v14 }
 0x166   : > { %v1462_v2 = vld [vmem:[#allocation2 + $0x2e] sm:$0xff]  ;;  %v1463_v48 = vld [vmem:[#allocation2 + $0x36] sm:$0x1]  ;;  %1415 = vst [vmem:[#allocation2 + $0x40] sm:$0xff] %v1374_v62  ;;  %v2101_v8 = vpop.f32.mrf.mxu1 }
 0x167   : > { %1665 = vst [vmem:[%s3111_s20 + $0x38] sm:$0xff] %v1462_v2  ;;  %1666 = vst [vmem:[%s3111_s20 + $0x40] sm:$0x1] %v1463_v48  ;;  %v1207_v11 = vpop.f32.mrf.mxu0 }
 0x168   : > { %v766_v17 = vpop.f32.mrf.mxu1  ;;  %v1375_v54 = vadd.f32 %v1207_v11, %v924_v9  ;;  %v372_v9 = vadd.f32 %v3101_v21, %v3076_v52 }
 0x169   : > { %v2253_v30 = vpop.f32.mrf.mxu0  ;;  %v926_v36 = vadd.f32 %v766_v17, %v357_v27 }
 0x16a   : > { %1416 = vst [vmem:[#allocation2 + $0x48] sm:$0xff] %v1375_v54  ;;  %v2104_v15 = vpop.f32.mrf.mxu1 }
 0x16b   : > { %v1212_v26 = vpop.f32.mrf.mxu0  ;;  %v377_v15 = vadd.f32 %v3101_v21, %v3080_v58 }
 0x16c   : > { %v771_v29 = vpop.f32.mrf.mxu1  ;;  %v1376_v34 = vadd.f32 %v1212_v26, %v925_v19 }
 0x16d   : > { %v1468_v35 = vld [vmem:[#allocation2 + $0x39] sm:$0xff]  ;;  %v2256_v60 = vpop.f32.mrf.mxu0  ;;  %v927_v51 = vadd.f32 %v771_v29, %v362_v41 }
 0x16e   : > { %1667 = vst [vmem:[%s3111_s20 + $0x48] sm:$0xff] %v1468_v35  ;;  %1417 = vst [vmem:[#allocation2 + $0x50] sm:$0xff] %v1376_v34  ;;  %v2107_v22 = vpop.f32.mrf.mxu1 }
 0x16f   : > { %v1217_v38 = vpop.f32.mrf.mxu0 }
 0x170   : > { %v776_v44 = vpop.f32.mrf.mxu1  ;;  %v1377_v45 = vadd.f32 %v1217_v38, %v926_v36  ;;  %v382_v36 = vadd.f32 %v3101_v21, %v3084_v63 }
 0x171   : > { %v1469_v50 = vld [vmem:[#allocation2 + $0x41] sm:$0xff]  ;;  %v1470_v3 = vld [vmem:[#allocation2 + $0x49] sm:$0x1]  ;;  %v2259_v32 = vpop.f32.mrf.mxu0  ;;  %v928_v2 = vadd.f32 %v776_v44, %v367_v57 }
 0x172   : > { %1668 = vst [vmem:[%s3111_s20 + $0x50] sm:$0xff] %v1469_v50  ;;  %1669 = vst [vmem:[%s3111_s20 + $0x58] sm:$0x1] %v1470_v3  ;;  %v2110_v42 = vpop.f32.mrf.mxu1  ;;  %v387_v32 = vadd.f32 %v3101_v21, %v3088_v6 }
 0x173   : > { %1418 = vst [vmem:[#allocation2 + $0x58] sm:$0xff] %v1377_v45  ;;  %v1222_v56 = vpop.f32.mrf.mxu0 }
 0x174   : > { %v781_v24 = vpop.f32.mrf.mxu1  ;;  %v1378_v1 = vadd.f32 %v1222_v56, %v927_v51 }
 0x175   : > { %v1475_v39 = vld [vmem:[#allocation2 + $0x4c] sm:$0xff]  ;;  %v2262_v62 = vpop.f32.mrf.mxu0  ;;  %v929_v54 = vadd.f32 %v781_v24, %v372_v9 }
 0x176   : > { %1670 = vst [vmem:[%s3111_s20 + $0x60] sm:$0xff] %v1475_v39  ;;  %1419 = vst [vmem:[#allocation2 + $0x60] sm:$0xff] %v1378_v1  ;;  %v2113_v48 = vpop.f32.mrf.mxu1  ;;  %v392_v1 = vadd.f32 %v3101_v21, %v3092_v12 }
 0x177   : > { %v1227_v5 = vpop.f32.mrf.mxu0 }
 0x178   : > { %v786_v8 = vpop.f32.mrf.mxu1  ;;  %v1379_v11 = vadd.f32 %v1227_v5, %v928_v2 }
 0x179   : > { %v2265_v46 = vpop.f32.mrf.mxu0  ;;  %v930_v34 = vadd.f32 %v786_v8, %v377_v15  ;;  %v397_v8 = vadd.f32 %v3101_v21, %v3096_v18  ;;  %v402_v15 = vadd.f32 %v3101_v21, %v3103_v28 }
 0x17a   : > { %v1476_v14 = vld [vmem:[#allocation2 + $0x54] sm:$0xff]  ;;  %v1477_v17 = vld [vmem:[#allocation2 + $0x5c] sm:$0x1]  ;;  %1420 = vst [vmem:[#allocation2 + $0x68] sm:$0xff] %v1379_v11  ;;  %v2116_v30 = vpop.f32.mrf.mxu1 }
 0x17b   : > { %1671 = vst [vmem:[%s3111_s20 + $0x68] sm:$0xff] %v1476_v14  ;;  %1672 = vst [vmem:[%s3111_s20 + $0x70] sm:$0x1] %v1477_v17  ;;  %v1232_v19 = vpop.f32.mrf.mxu0 }
 0x17c   : > { %v791_v26 = vpop.f32.mrf.mxu1  ;;  %v1380_v27 = vadd.f32 %v1232_v19, %v929_v54 }
 0x17d   : > { %v1482_v52 = vld [vmem:[#allocation2 + $0x5f] sm:$0xff]  ;;  %v2268_v29 = vpop.f32.mrf.mxu0  ;;  %v931_v58 = vadd.f32 %v791_v26, %v382_v36 }
 0x17e   : > { %1673 = vst [vmem:[%s3111_s20 + $0x78] sm:$0xff] %v1482_v52  ;;  %1421 = vst [vmem:[#allocation2 + $0x70] sm:$0xff] %v1380_v27  ;;  %v2119_v35 = vpop.f32.mrf.mxu1 }
 0x17f   : > { %v1237_v60 = vpop.f32.mrf.mxu0 }
 0x180   : > { %v796_v22 = vpop.f32.mrf.mxu1  ;;  %v1381_v38 = vadd.f32 %v1237_v60, %v930_v34  ;;  %v407_v60 = vadd.f32 %v3101_v21, %v2940_v20 }
 0x181   : > { %v1483_v41 = vld [vmem:[#allocation2 + $0x67] sm:$0xff]  ;;  %v1484_v44 = vld [vmem:[#allocation2 + $0x6f] sm:$0x1]  ;;  %v2271_v45 = vpop.f32.mrf.mxu0  ;;  %v932_v57 = vadd.f32 %v796_v22, %v387_v32 }
 0x182   : > { %1674 = vst [vmem:[%s3111_s20 + $0x80] sm:$0xff] %v1483_v41  ;;  %1675 = vst [vmem:[%s3111_s20 + $0x88] sm:$0x1] %v1484_v44  ;;  %v2122_v50 = vpop.f32.mrf.mxu1 }
 0x183   : > { %1422 = vst [vmem:[#allocation2 + $0x78] sm:$0xff] %v1381_v38  ;;  %v1242_v3 = vpop.f32.mrf.mxu0  ;;  %v412_v50 = vadd.f32 %v3101_v21, %v2950_v25  ;;  %v422_v25 = vadd.f32 %v3101_v21, %v2970_v37 }
 0x184   : > { %v801_v51 = vpop.f32.mrf.mxu1  ;;  %v1382_v42 = vadd.f32 %v1242_v3, %v931_v58 }
 0x185   : > { %v2274_v56 = vpop.f32.mrf.mxu0  ;;  %v933_v5 = vadd.f32 %v801_v51, %v392_v1 }
 0x186   : > { %1423 = vst [vmem:[#allocation2 + $0x80] sm:$0xff] %v1382_v42  ;;  %v2125_v63 = vpop.f32.mrf.mxu1 }
 0x187   : > { %v1247_v24 = vpop.f32.mrf.mxu0 }
 0x188   : > { %v806_v39 = vpop.f32.mrf.mxu1  ;;  %v1383_v62 = vadd.f32 %v1247_v24, %v932_v57  ;;  %v417_v57 = vadd.f32 %v3101_v21, %v2960_v31 }
 0x189   : > { %v2277_v48 = vpop.f32.mrf.mxu0  ;;  %v934_v54 = vadd.f32 %v806_v39, %v397_v8 }
 0x18a   : > { %v1489_v2 = vld [vmem:[#allocation2 + $0x72] sm:$0xff]  ;;  %1424 = vst [vmem:[#allocation2 + $0x88] sm:$0xff] %v1383_v62  ;;  %v2128_v6 = vpop.f32.mrf.mxu1 }
 0x18b   : > { %1676 = vst [vmem:[%s3111_s20 + $0x90] sm:$0xff] %v1489_v2  ;;  %v1252_v9 = vpop.f32.mrf.mxu0 }
 0x18c   : > { %v811_v11 = vpop.f32.mrf.mxu1  ;;  %v1384_v14 = vadd.f32 %v1252_v9, %v933_v5 }
 0x18d   : > { %v1490_v17 = vld [vmem:[#allocation2 + $0x7a] sm:$0xff]  ;;  %v1491_v12 = vld [vmem:[#allocation2 + $0x82] sm:$0x1]  ;;  %v2280_v46 = vpop.f32.mrf.mxu0  ;;  %v935_v29 = vadd.f32 %v811_v11, %v402_v15  ;;  %v432_v15 = vadd.f32 %v3101_v21, %v2990_v49 }
 0x18e   : > { %1677 = vst [vmem:[%s3111_s20 + $0x98] sm:$0xff] %v1490_v17  ;;  %1678 = vst [vmem:[%s3111_s20 + $0xa0] sm:$0x1] %v1491_v12  ;;  %v2131_v30 = vpop.f32.mrf.mxu1 }
 0x18f   : > { %1425 = vst [vmem:[#allocation2 + $0x90] sm:$0xff] %v1384_v14  ;;  %v1257_v19 = vpop.f32.mrf.mxu0  ;;  %v427_v14 = vadd.f32 %v3101_v21, %v2980_v43 }
 0x190   : > { %v816_v26 = vpop.f32.mrf.mxu1  ;;  %v1385_v18 = vadd.f32 %v1257_v19, %v934_v54 }
 0x191   : > { %v1496_v27 = vld [vmem:[#allocation2 + $0x85] sm:$0xff]  ;;  %v2283_v52 = vpop.f32.mrf.mxu0  ;;  %v936_v44 = vadd.f32 %v816_v26, %v407_v60  ;;  %v437_v60 = vadd.f32 %v3101_v21, %v3000_v55 }
 0x192   : > { %1679 = vst [vmem:[%s3111_s20 + $0xa8] sm:$0xff] %v1496_v27  ;;  %1682 = vst [vmem:[%s3111_s20 + $0xc0] sm:$0xff] %v1385_v18  ;;  %v2134_v34 = vpop.f32.mrf.mxu1 }
 0x193   : > { %v1262_v35 = vpop.f32.mrf.mxu0 }
 0x194   : > { %v821_v36 = vpop.f32.mrf.mxu1  ;;  %v1386_v22 = vadd.f32 %v1262_v35, %v935_v29 }
 0x195   : > { %v2286_v28 = vpop.f32.mrf.mxu0  ;;  %v937_v42 = vadd.f32 %v821_v36, %v412_v50 }
 0x196   : > { %v1497_v38 = vld [vmem:[#allocation2 + $0x8d] sm:$0xff]  ;;  %v1498_v41 = vld [vmem:[#allocation2 + $0x95] sm:$0x1]  ;;  %1683 = vst [vmem:[%s3111_s20 + $0xc8] sm:$0xff] %v1386_v22  ;;  %v2137_v45 = vpop.f32.mrf.mxu1 }
 0x197   : > { %1680 = vst [vmem:[%s3111_s20 + $0xb0] sm:$0xff] %v1497_v38  ;;  %1681 = vst [vmem:[%s3111_s20 + $0xb8] sm:$0x1] %v1498_v41  ;;  %v1267_v58 = vpop.f32.mrf.mxu0  ;;  %v442_v45 = vadd.f32 %v3101_v21, %v3010_v61 }
 0x198   : > { %v826_v3 = vpop.f32.mrf.mxu1  ;;  %v1387_v32 = vadd.f32 %v1267_v58, %v936_v44 }
 0x199   : > { %v2289_v51 = vpop.f32.mrf.mxu0  ;;  %v938_v39 = vadd.f32 %v826_v3, %v417_v57 }
 0x19a   : > { %1428 = vst [vmem:[#allocation2 + $0xa8] sm:$0xff] %v1387_v32  ;;  %v2140_v20 = vpop.f32.mrf.mxu1 }
 0x19b   : > { %v1272_v56 = vpop.f32.mrf.mxu0 }
 0x19c   : > { %v831_v63 = vpop.f32.mrf.mxu1  ;;  %v1388_v24 = vadd.f32 %v1272_v56, %v937_v42  ;;  %v447_v56 = vadd.f32 %v3101_v21, %v3020_v4 }
 0x19d   : > { %v2292_v1 = vpop.f32.mrf.mxu0  ;;  %v939_v8 = vadd.f32 %v831_v63, %v422_v25 }
 0x19e   : > { %1429 = vst [vmem:[#allocation2 + $0xb0] sm:$0xff] %v1388_v24  ;;  %v2143_v62 = vpop.f32.mrf.mxu1 }
 0x19f   : > { %v1277_v2 = vpop.f32.mrf.mxu0  ;;  %v452_v62 = vadd.f32 %v3101_v21, %v3030_v10 }
 0x1a0   : > { %v836_v48 = vpop.f32.mrf.mxu1  ;;  %v1389_v5 = vadd.f32 %v1277_v2, %v938_v39 }
 0x1a1   : > { %v1505_v6 = vld [vmem:[#allocation2 + $0xa8] sm:$0x1]  ;;  %v2295_v9 = vpop.f32.mrf.mxu0  ;;  %v940_v37 = vadd.f32 %v836_v48, %v427_v14 }
 0x1a2   : > { %1684 = vst [vmem:[%s3111_s20 + $0xd0] sm:$0x1] %v1505_v6  ;;  %1430 = vst [vmem:[#allocation2 + $0xb8] sm:$0xff] %v1389_v5  ;;  %v2146_v11 = vpop.f32.mrf.mxu1 }
 0x1a3   : > { %v1282_v31 = vpop.f32.mrf.mxu0 }
 0x1a4   : > { %v841_v17 = vpop.f32.mrf.mxu1  ;;  %v1390_v12 = vadd.f32 %v1282_v31, %v939_v8  ;;  %v457_v8 = vadd.f32 %v3101_v21, %v3040_v16 }
 0x1a5   : > { %v1510_v46 = vld [vmem:[#allocation2 + $0xab] sm:$0xff]  ;;  %v2298_v54 = vpop.f32.mrf.mxu0  ;;  %v941_v29 = vadd.f32 %v841_v17, %v432_v15 }
 0x1a6   : > { %1685 = vst [vmem:[%s3111_s20 + $0xd8] sm:$0xff] %v1510_v46  ;;  %1431 = vst [vmem:[#allocation2 + $0xc0] sm:$0xff] %v1390_v12  ;;  %v2149_v30 = vpop.f32.mrf.mxu1 }
 0x1a7   : > { %v1287_v19 = vpop.f32.mrf.mxu0 }
 0x1a8   : > { %v846_v26 = vpop.f32.mrf.mxu1  ;;  %v1391_v18 = vadd.f32 %v1287_v19, %v940_v37  ;;  %v462_v37 = vadd.f32 %v3101_v21, %v3050_v23 }
 0x1a9   : > { %v1511_v27 = vld [vmem:[#allocation2 + $0xb3] sm:$0xff]  ;;  %v1512_v52 = vld [vmem:[#allocation2 + $0xbb] sm:$0x1]  ;;  %v2301_v43 = vpop.f32.mrf.mxu0  ;;  %v942_v41 = vadd.f32 %v846_v26, %v437_v60 }
 0x1aa   : > { %1686 = vst [vmem:[%s3111_s20 + $0xe0] sm:$0xff] %v1511_v27  ;;  %1687 = vst [vmem:[%s3111_s20 + $0xe8] sm:$0x1] %v1512_v52  ;;  %v2152_v34 = vpop.f32.mrf.mxu1  ;;  %v467_v52 = vadd.f32 %v3101_v21, %v3060_v33 }
 0x1ab   : > { %1432 = vst [vmem:[#allocation2 + $0xc8] sm:$0xff] %v1391_v18  ;;  %v1292_v35 = vpop.f32.mrf.mxu0 }
 0x1ac   : > { %v851_v36 = vpop.f32.mrf.mxu1  ;;  %v1392_v22 = vadd.f32 %v1292_v35, %v941_v29 }
 0x1ad   : > { %v1517_v49 = vld [vmem:[#allocation2 + $0xbe] sm:$0xff]  ;;  %v2304_v38 = vpop.f32.mrf.mxu0  ;;  %v943_v55 = vadd.f32 %v851_v36, %v442_v45 }
 0x1ae   : > { %1688 = vst [vmem:[%s3111_s20 + $0xf0] sm:$0xff] %v1517_v49  ;;  %1433 = vst [vmem:[#allocation2 + $0xd0] sm:$0xff] %v1392_v22  ;;  %v2155_v28 = vpop.f32.mrf.mxu1  ;;  %v472_v49 = vadd.f32 %v3101_v21, %v3067_v40 }
 0x1af   : > { %v1297_v44 = vpop.f32.mrf.mxu0 }
 0x1b0   : > { %v856_v58 = vpop.f32.mrf.mxu1  ;;  %v1393_v50 = vadd.f32 %v1297_v44, %v942_v41 }
 0x1b1   : > { %v2307_v51 = vpop.f32.mrf.mxu0  ;;  %v944_v1 = vadd.f32 %v856_v58, %v447_v56 }
 0x1b2   : > { %v1518_v3 = vld [vmem:[#allocation2 + $0xc6] sm:$0xff]  ;;  %v1519_v32 = vld [vmem:[#allocation2 + $0xce] sm:$0x1]  ;;  %1434 = vst [vmem:[#allocation2 + $0xd8] sm:$0xff] %v1393_v50  ;;  %v2158_v42 = vpop.f32.mrf.mxu1  ;;  %v477_v50 = vadd.f32 %v3101_v21, %v3074_v47 }
 0x1b3   : > { %1689 = vst [vmem:[%s3111_s20 + $0xf8] sm:$0xff] %v1518_v3  ;;  %1690 = vst [vmem:[%s3111_s20 + $0x100] sm:$0x1] %v1519_v32  ;;  %v1302_v20 = vpop.f32.mrf.mxu0 }
 0x1b4   : > { %v861_v57 = vpop.f32.mrf.mxu1  ;;  %v1394_v63 = vadd.f32 %v1302_v20, %v943_v55 }
 0x1b5   : > { %v2310_v24 = vpop.f32.mrf.mxu0  ;;  %v945_v6 = vadd.f32 %v861_v57, %v452_v62  ;;  %v482_v57 = vadd.f32 %v3101_v21, %v3078_v53  ;;  %v487_v62 = vadd.f32 %v3101_v21, %v3082_v59 }
 0x1b6   : > { %1435 = vst [vmem:[#allocation2 + $0xe0] sm:$0xff] %v1394_v63  ;;  %v2161_v61 = vpop.f32.mrf.mxu1 }
 0x1b7   : > { %v1307_v39 = vpop.f32.mrf.mxu0 }
 0x1b8   : > { %v866_v2 = vpop.f32.mrf.mxu1  ;;  %v1395_v25 = vadd.f32 %v1307_v39, %v944_v1 }
 0x1b9   : > { %v1524_v48 = vld [vmem:[#allocation2 + $0xd1] sm:$0xff]  ;;  %v2313_v5 = vpop.f32.mrf.mxu0  ;;  %v946_v12 = vadd.f32 %v866_v2, %v457_v8 }
 0x1ba   : > { %1691 = vst [vmem:[%s3111_s20 + $0x108] sm:$0xff] %v1524_v48  ;;  %1436 = vst [vmem:[#allocation2 + $0xe8] sm:$0xff] %v1395_v25  ;;  %v2164_v4 = vpop.f32.mrf.mxu1 }
 0x1bb   : > { %v1312_v9 = vpop.f32.mrf.mxu0 }
 0x1bc   : > { %v871_v11 = vpop.f32.mrf.mxu1  ;;  %v1396_v31 = vadd.f32 %v1312_v9, %v945_v6  ;;  %v492_v9 = vadd.f32 %v3101_v21, %v3086_v0 }
 0x1bd   : > { %v1525_v14 = vld [vmem:[#allocation2 + $0xd9] sm:$0xff]  ;;  %v1526_v17 = vld [vmem:[#allocation2 + $0xe1] sm:$0x1]  ;;  %v2316_v10 = vpop.f32.mrf.mxu0  ;;  %v947_v26 = vadd.f32 %v871_v11, %v462_v37 }
 0x1be   : > { %1692 = vst [vmem:[%s3111_s20 + $0x110] sm:$0xff] %v1525_v14  ;;  %1693 = vst [vmem:[%s3111_s20 + $0x118] sm:$0x1] %v1526_v17  ;;  %v2167_v46 = vpop.f32.mrf.mxu1 }
 0x1bf   : > { %1437 = vst [vmem:[#allocation2 + $0xf0] sm:$0xff] %v1396_v31  ;;  %v1317_v54 = vpop.f32.mrf.mxu0  ;;  %v497_v46 = vadd.f32 %v3101_v21, %v3090_v7 }
 0x1c0   : > { %v876_v30 = vpop.f32.mrf.mxu1  ;;  %v1397_v19 = vadd.f32 %v1317_v54, %v946_v12 }
 0x1c1   : > { %v1531_v16 = vld [vmem:[#allocation2 + $0xe4] sm:$0xff]  ;;  %v2319_v15 = vpop.f32.mrf.mxu0  ;;  %v948_v60 = vadd.f32 %v876_v30, %v467_v52 }
 0x1c2   : > { %1694 = vst [vmem:[%s3111_s20 + $0x120] sm:$0xff] %v1531_v16  ;;  %1438 = vst [vmem:[#allocation2 + $0xf8] sm:$0xff] %v1397_v19  ;;  %v2170_v18 = vpop.f32.mrf.mxu1 }
 0x1c3   : > { %v1322_v27 = vpop.f32.mrf.mxu0 }
 0x1c4   : > { %v881_v43 = vpop.f32.mrf.mxu1  ;;  %v1398_v29 = vadd.f32 %v1322_v27, %v947_v26  ;;  %v502_v26 = vadd.f32 %v3101_v21, %v3094_v13 }
 0x1c5   : > { %v2322_v23 = vpop.f32.mrf.mxu0  ;;  %v949_v44 = vadd.f32 %v881_v43, %v472_v49 }
 0x1c6   : > { %v1532_v34 = vld [vmem:[#allocation2 + $0xec] sm:$0xff]  ;;  %v1533_v35 = vld [vmem:[#allocation2 + $0xf4] sm:$0x1]  ;;  %1439 = vst [vmem:[#allocation2 + $0x100] sm:$0xff] %v1398_v29  ;;  %v2173_v36 = vpop.f32.mrf.mxu1 }
 0x1c7   : > { %1695 = vst [vmem:[%s3111_s20 + $0x128] sm:$0xff] %v1532_v34  ;;  %1696 = vst [vmem:[%s3111_s20 + $0x130] sm:$0x1] %v1533_v35  ;;  %v1327_v22 = vpop.f32.mrf.mxu0 }
 0x1c8   : > { %v886_v38 = vpop.f32.mrf.mxu1  ;;  %v1399_v41 = vadd.f32 %v1327_v22, %v948_v60 }
 0x1c9   : > { %v1538_v33 = vld [vmem:[#allocation2 + $0xf7] sm:$0xff]  ;;  %v2325_v28 = vpop.f32.mrf.mxu0  ;;  %v950_v40 = vadd.f32 %v886_v38, %v477_v50 }
 0x1ca   : > { %1697 = vst [vmem:[%s3111_s20 + $0x138] sm:$0xff] %v1538_v33  ;;  %1440 = vst [vmem:[#allocation2 + $0x108] sm:$0xff] %v1399_v41  ;;  %v2176_v45 = vpop.f32.mrf.mxu1 }
 0x1cb   : > { %v1332_v58 = vpop.f32.mrf.mxu0 }
 0x1cc   : > { %v891_v3 = vpop.f32.mrf.mxu1  ;;  %v1400_v32 = vadd.f32 %v1332_v58, %v949_v44 }
 0x1cd   : > { %v1539_v51 = vld [vmem:[#allocation2 + $0xff] sm:$0xff]  ;;  %v1540_v55 = vld [vmem:[#allocation2 + $0x107] sm:$0x1]  ;;  %v2328_v42 = vpop.f32.mrf.mxu0  ;;  %v951_v61 = vadd.f32 %v891_v3, %v482_v57 }
 0x1ce   : > { %1698 = vst [vmem:[%s3111_s20 + $0x140] sm:$0xff] %v1539_v51  ;;  %1699 = vst [vmem:[%s3111_s20 + $0x148] sm:$0x1] %v1540_v55  ;;  %v2179_v20 = vpop.f32.mrf.mxu1 }
 0x1cf   : > { %1441 = vst [vmem:[#allocation2 + $0x110] sm:$0xff] %v1400_v32  ;;  %v1337_v56 = vpop.f32.mrf.mxu0 }
 0x1d0   : > { %v896_v63 = vpop.f32.mrf.mxu1  ;;  %v1401_v24 = vadd.f32 %v1337_v56, %v950_v40 }
 0x1d1   : > { %v2331_v1 = vpop.f32.mrf.mxu0  ;;  %v952_v6 = vadd.f32 %v896_v63, %v487_v62 }
 0x1d2   : > { %1442 = vst [vmem:[#allocation2 + $0x118] sm:$0xff] %v1401_v24  ;;  %v2182_v47 = vpop.f32.mrf.mxu1 }
 0x1d3   : > { %v1342_v39 = vpop.f32.mrf.mxu0 }
 0x1d4   : > { %v901_v2 = vpop.f32.mrf.mxu1  ;;  %v1402_v25 = vadd.f32 %v1342_v39, %v951_v61 }
 0x1d5   : > { %v2334_v5 = vpop.f32.mrf.mxu0  ;;  %v953_v17 = vadd.f32 %v901_v2, %v492_v9 }
 0x1d6   : > { %v1545_v48 = vld [vmem:[#allocation2 + $0x10a] sm:$0xff]  ;;  %1443 = vst [vmem:[#allocation2 + $0x120] sm:$0xff] %v1402_v25  ;;  %v2185_v53 = vpop.f32.mrf.mxu1 }
 0x1d7   : > { %1700 = vst [vmem:[%s3111_s20 + $0x150] sm:$0xff] %v1545_v48  ;;  %v1347_v4 = vpop.f32.mrf.mxu0 }
 0x1d8   : > { %v906_v8 = vpop.f32.mrf.mxu1  ;;  %v1403_v11 = vadd.f32 %v1347_v4, %v952_v6 }
 0x1d9   : > { %v1546_v31 = vld [vmem:[#allocation2 + $0x112] sm:$0xff]  ;;  %v1547_v59 = vld [vmem:[#allocation2 + $0x11a] sm:$0x1]  ;;  %v2337_v14 = vpop.f32.mrf.mxu0  ;;  %v954_v19 = vadd.f32 %v906_v8, %v497_v46 }
 0x1da   : > { %1701 = vst [vmem:[%s3111_s20 + $0x158] sm:$0xff] %v1546_v31  ;;  %1702 = vst [vmem:[%s3111_s20 + $0x160] sm:$0x1] %v1547_v59  ;;  %v2188_v10 = vpop.f32.mrf.mxu1 }
 0x1db   : > { %1444 = vst [vmem:[#allocation2 + $0x128] sm:$0xff] %v1403_v11  ;;  %v1352_v12 = vpop.f32.mrf.mxu0 }
 0x1dc   : > { %v911_v54 = vpop.f32.mrf.mxu1  ;;  %v1404_v0 = vadd.f32 %v1352_v12, %v953_v17 }
 0x1dd   : > { %v1552_v37 = vld [vmem:[#allocation2 + $0x11d] sm:$0xff]  ;;  %v2340_v30 = vpop.f32.mrf.mxu0  ;;  %v955_v7 = vadd.f32 %v911_v54, %v502_v26 }
 0x1de   : > { %1703 = vst [vmem:[%s3111_s20 + $0x168] sm:$0xff] %v1552_v37  ;;  %1706 = vst [vmem:[%s3111_s20 + $0x180] sm:$0xff] %v1404_v0  ;;  %v2191_v16 = vpop.f32.mrf.mxu1 }
 0x1df   : > { %v1357_v15 = vpop.f32.mrf.mxu0 }
 0x1e0   : > { %v1405_v18 = vadd.f32 %v1357_v15, %v954_v19 }
 0x1e1   : > { %v2343_v43 = vpop.f32.mrf.mxu0 }
 0x1e2   : > { %v1553_v27 = vld [vmem:[#allocation2 + $0x125] sm:$0xff]  ;;  %v1554_v52 = vld [vmem:[#allocation2 + $0x12d] sm:$0x1]  ;;  %1707 = vst [vmem:[%s3111_s20 + $0x188] sm:$0xff] %v1405_v18 }
 0x1e3   : > { %1704 = vst [vmem:[%s3111_s20 + $0x170] sm:$0xff] %v1553_v27  ;;  %1705 = vst [vmem:[%s3111_s20 + $0x178] sm:$0x1] %v1554_v52  ;;  %v1362_v29 = vpop.f32.mrf.mxu0 }
 0x1e4   : > { %v1406_v34 = vadd.f32 %v1362_v29, %v955_v7 }
 0x1e5   : > { %v2346_v35 = vpop.f32.mrf.mxu0 }
 0x1e6   : > { %1447 = vst [vmem:[#allocation2 + $0x140] sm:$0xff] %v1406_v34 }
 0x1ed   : > { %v1561_v23 = vld [vmem:[#allocation2 + $0x140] sm:$0x1] }
 0x1ee   : > { %1708 = vst [vmem:[%s3111_s20 + $0x190] sm:$0x1] %v1561_v23 }
 0x1ef PF: > { %s13_s12 = sadd.s32 1, %s2397_s12  }
 0x1f0   : > { %p10_p4 = scmp.ge.s32.totalorder %s13_s12, 4  }
 0x1f2   :  { %12 = sbr.rel (!%p10_p4) target bundleno = 1 (0x1), region = 80 }

// kernel: preconv_forward.10
= control target key start
LH: loop header
LB: loop body
LE: loop exit
PB: predicated region body
PF: predicated region fallthrough
CT: control target
= control target key end

     0   :  { %s546_s6 = smov 0   ;;  %s684_s0 = inlined_call_operand.vmem [shape: f32[2,328,128], index: 0, kind: input, shape index: {}]   ;;  %s685_s1 = inlined_call_operand.vmem [shape: f32[2,8,8,128], index: 1, kind: output, shape index: {}]  }
   0x1 LB: > { %s501_s7 = sadd.s32 4294967295, %s534_s6   ;;  %p505_p0 = scmp.ge.s32.totalorder %s534_s6, 1  ;;  %s534_s6 = sphi %s546_s6, %s11_s6  }
   0x2   : > { %p87_p1 = scmp.lt.s32.totalorder %s534_s6, 3 }
   0x4   : > { %p88_p2 = pnand %p505_p0, %p87_p1 }
   0x5   : > { %p107_p3 = scmp.lt.s32.totalorder (!%p88_p2), %s501_s7, 1 }
   0x6   : > { %91 = sbr.rel (%p88_p2) target bundleno = 53 (0x35), region = 24 }
   0xb   : > { %s687_s7 = smov (!%p107_p3, %s501_s7), 1 }
   0xc   : > { %s519_s8 = smul.u32 328, %s687_s7  ;;  %s518_s12 = sshll.u32 %s687_s7, 6 }
   0xd   : > { %s667_s15 = scalar_lea.vmem %s685_s1, %s518_s12 }
   0xe   : > { %s560_s11 = scalar_lea.vmem %s684_s0, %s519_s8 }
   0xf   : > { %v117_v0 = vld [vmem:[%s560_s11] sm:$0xff]  ;;  %v118_v1 = vld [vmem:[%s560_s11 + $0x8] sm:$0xff]  ;;  %v119_v2 = vld [vmem:[%s560_s11 + $0x10] sm:$0xff] }
  0x10   : > { %v120_v3 = vld [vmem:[%s560_s11 + $0x18] sm:$0xff]  ;;  %v121_v4 = vld [vmem:[%s560_s11 + $0x20] sm:$0xff]  ;;  %v122_v5 = vld [vmem:[%s560_s11 + $0x28] sm:$0xff] }
  0x11   : > { %v123_v6 = vld [vmem:[%s560_s11 + $0x30] sm:$0xff]  ;;  %v124_v7 = vld [vmem:[%s560_s11 + $0x38] sm:$0xff]  ;;  %v125_v8 = vld [vmem:[%s560_s11 + $0x40] sm:$0xff] }
  0x12   : > { %v144_v9 = vld [vmem:[%s560_s11 + $0x51] sm:$0xff]  ;;  %v145_v10 = vld [vmem:[%s560_s11 + $0x59] sm:$0xff]  ;;  %v146_v11 = vld [vmem:[%s560_s11 + $0x61] sm:$0xff] }
  0x13   : > { %v153_v12 = vmax.f32 %v117_v0, %v144_v9  ;;  %v154_v13 = vmax.f32 %v118_v1, %v145_v10  ;;  %v155_v14 = vmax.f32 %v119_v2, %v146_v11  ;;  %v147_v15 = vld [vmem:[%s560_s11 + $0x69] sm:$0xff]  ;;  %v148_v16 = vld [vmem:[%s560_s11 + $0x71] sm:$0xff]  ;;  %v149_v17 = vld [vmem:[%s560_s11 + $0x79] sm:$0xff] }
  0x14   : > { %v156_v18 = vmax.f32 %v120_v3, %v147_v15  ;;  %v157_v19 = vmax.f32 %v121_v4, %v148_v16  ;;  %v158_v20 = vmax.f32 %v122_v5, %v149_v17  ;;  %v150_v21 = vld [vmem:[%s560_s11 + $0x81] sm:$0xff]  ;;  %v151_v22 = vld [vmem:[%s560_s11 + $0x89] sm:$0xff]  ;;  %v152_v23 = vld [vmem:[%s560_s11 + $0x91] sm:$0xff] }
  0x15   : > { %v159_v24 = vmax.f32 %v123_v6, %v150_v21  ;;  %v160_v25 = vmax.f32 %v124_v7, %v151_v22  ;;  %v161_v26 = vmax.f32 %v125_v8, %v152_v23  ;;  %v180_v27 = vld [vmem:[%s560_s11 + $0x1] sm:$0xff]  ;;  %v582_v28 = vld [vmem:[%s560_s11 + $0x9] sm:$0xff]  ;;  %v585_v29 = vld [vmem:[%s560_s11 + $0x11] sm:$0xff] }
  0x16   : > { %v189_v30 = vmax.f32 %v153_v12, %v180_v27  ;;  %v190_v31 = vmax.f32 %v154_v13, %v582_v28  ;;  %v191_v32 = vmax.f32 %v155_v14, %v585_v29  ;;  %v590_v33 = vld [vmem:[%s560_s11 + $0x19] sm:$0xff]  ;;  %v593_v34 = vld [vmem:[%s560_s11 + $0x21] sm:$0xff]  ;;  %v596_v35 = vld [vmem:[%s560_s11 + $0x29] sm:$0xff] }
  0x17   : > { %v192_v36 = vmax.f32 %v156_v18, %v590_v33  ;;  %v193_v37 = vmax.f32 %v157_v19, %v593_v34  ;;  %v194_v38 = vmax.f32 %v158_v20, %v596_v35  ;;  %v602_v39 = vld [vmem:[%s560_s11 + $0x31] sm:$0xff]  ;;  %v605_v40 = vld [vmem:[%s560_s11 + $0x39] sm:$0xff]  ;;  %v608_v41 = vld [vmem:[%s560_s11 + $0x41] sm:$0xff] }
  0x18   : > { %v195_v42 = vmax.f32 %v159_v24, %v602_v39  ;;  %v196_v43 = vmax.f32 %v160_v25, %v605_v40  ;;  %v197_v44 = vmax.f32 %v161_v26, %v608_v41  ;;  %v216_v45 = vld [vmem:[%s560_s11 + $0xa2] sm:$0xff]  ;;  %v217_v46 = vld [vmem:[%s560_s11 + $0xaa] sm:$0xff]  ;;  %v218_v47 = vld [vmem:[%s560_s11 + $0xb2] sm:$0xff] }
  0x19   : > { %v225_v48 = vmax.f32 %v189_v30, %v216_v45  ;;  %v226_v49 = vmax.f32 %v190_v31, %v217_v46  ;;  %v227_v50 = vmax.f32 %v191_v32, %v218_v47  ;;  %v219_v51 = vld [vmem:[%s560_s11 + $0xba] sm:$0xff]  ;;  %v220_v52 = vld [vmem:[%s560_s11 + $0xc2] sm:$0xff]  ;;  %v221_v53 = vld [vmem:[%s560_s11 + $0xca] sm:$0xff] }
  0x1a   : > { %v228_v54 = vmax.f32 %v192_v36, %v219_v51  ;;  %v229_v55 = vmax.f32 %v193_v37, %v220_v52  ;;  %v230_v56 = vmax.f32 %v194_v38, %v221_v53  ;;  %v222_v57 = vld [vmem:[%s560_s11 + $0xd2] sm:$0xff]  ;;  %v223_v58 = vld [vmem:[%s560_s11 + $0xda] sm:$0xff]  ;;  %v224_v59 = vld [vmem:[%s560_s11 + $0xe2] sm:$0xff] }
  0x1b   : > { %v231_v60 = vmax.f32 %v195_v42, %v222_v57  ;;  %v232_v61 = vmax.f32 %v196_v43, %v223_v58  ;;  %v233_v62 = vmax.f32 %v197_v44, %v224_v59  ;;  %v252_v63 = vld [vmem:[%s560_s11 + $0xf3] sm:$0xff]  ;;  %v253_v0 = vld [vmem:[%s560_s11 + $0xfb] sm:$0xff]  ;;  %v254_v1 = vld [vmem:[%s560_s11 + $0x103] sm:$0xff] }
  0x1c   : > { %v261_v2 = vmax.f32 %v225_v48, %v252_v63  ;;  %v262_v3 = vmax.f32 %v226_v49, %v253_v0  ;;  %v263_v4 = vmax.f32 %v227_v50, %v254_v1  ;;  %v255_v5 = vld [vmem:[%s560_s11 + $0x10b] sm:$0xff]  ;;  %v256_v6 = vld [vmem:[%s560_s11 + $0x113] sm:$0xff]  ;;  %v257_v7 = vld [vmem:[%s560_s11 + $0x11b] sm:$0xff] }
  0x1d   : > { %v264_v8 = vmax.f32 %v228_v54, %v255_v5  ;;  %v265_v9 = vmax.f32 %v229_v55, %v256_v6  ;;  %v266_v10 = vmax.f32 %v230_v56, %v257_v7  ;;  %v258_v11 = vld [vmem:[%s560_s11 + $0x123] sm:$0xff]  ;;  %v259_v12 = vld [vmem:[%s560_s11 + $0x12b] sm:$0xff]  ;;  %v260_v13 = vld [vmem:[%s560_s11 + $0x133] sm:$0xff] }
  0x1e   : > { %v267_v14 = vmax.f32 %v231_v60, %v258_v11  ;;  %v268_v15 = vmax.f32 %v232_v61, %v259_v12  ;;  %v269_v16 = vmax.f32 %v233_v62, %v260_v13  ;;  %v288_v17 = vld [vmem:[%s560_s11 + $0xa3] sm:$0xff]  ;;  %v289_v18 = vld [vmem:[%s560_s11 + $0xab] sm:$0xff]  ;;  %v290_v19 = vld [vmem:[%s560_s11 + $0xb3] sm:$0xff] }
  0x1f   : > { %v297_v20 = vmax.f32 %v261_v2, %v288_v17  ;;  %v298_v21 = vmax.f32 %v262_v3, %v289_v18  ;;  %v299_v22 = vmax.f32 %v263_v4, %v290_v19  ;;  %v291_v23 = vld [vmem:[%s560_s11 + $0xbb] sm:$0xff]  ;;  %v292_v24 = vld [vmem:[%s560_s11 + $0xc3] sm:$0xff]  ;;  %v293_v25 = vld [vmem:[%s560_s11 + $0xcb] sm:$0xff] }
  0x20   : > { %v300_v26 = vmax.f32 %v264_v8, %v291_v23  ;;  %v301_v27 = vmax.f32 %v265_v9, %v292_v24  ;;  %v302_v30 = vmax.f32 %v266_v10, %v293_v25  ;;  %v294_v31 = vld [vmem:[%s560_s11 + $0xd3] sm:$0xff]  ;;  %v295_v32 = vld [vmem:[%s560_s11 + $0xdb] sm:$0xff]  ;;  %v296_v36 = vld [vmem:[%s560_s11 + $0xe3] sm:$0xff] }
  0x21   : > { %v303_v37 = vmax.f32 %v267_v14, %v294_v31  ;;  %v304_v38 = vmax.f32 %v268_v15, %v295_v32  ;;  %v305_v42 = vmax.f32 %v269_v16, %v296_v36  ;;  %v333_v43 = vmax.f32 %v297_v20, %v582_v28  ;;  %v332_v44 = vld [vmem:[%s560_s11 + $0x49] sm:$0xff]  ;;  %v360_v45 = vld [vmem:[%s560_s11 + $0x5a] sm:$0xff]  ;;  %v363_v52 = vld [vmem:[%s560_s11 + $0x72] sm:$0xff] }
  0x22   : > { %v361_v46 = vld [vmem:[%s560_s11 + $0x62] sm:$0xff]  ;;  %v334_v47 = vmax.f32 %v298_v21, %v585_v29  ;;  %v335_v48 = vmax.f32 %v299_v22, %v590_v33  ;;  %v336_v49 = vmax.f32 %v300_v26, %v593_v34  ;;  %v337_v50 = vmax.f32 %v301_v27, %v596_v35  ;;  %v362_v51 = vld [vmem:[%s560_s11 + $0x6a] sm:$0xff]  ;;  %v364_v28 = vld [vmem:[%s560_s11 + $0x7a] sm:$0xff] }
  0x23   : > { %v338_v53 = vmax.f32 %v302_v30, %v602_v39  ;;  %v339_v54 = vmax.f32 %v303_v37, %v605_v40  ;;  %v340_v55 = vmax.f32 %v304_v38, %v608_v41  ;;  %v341_v29 = vmax.f32 %v305_v42, %v332_v44  ;;  %v365_v33 = vld [vmem:[%s560_s11 + $0x82] sm:$0xff]  ;;  %v366_v34 = vld [vmem:[%s560_s11 + $0x8a] sm:$0xff]  ;;  %v367_v35 = vld [vmem:[%s560_s11 + $0x92] sm:$0xff] }
  0x24   : > { %v369_v56 = vmax.f32 %v333_v43, %v360_v45  ;;  %v370_v57 = vmax.f32 %v334_v47, %v361_v46  ;;  %v371_v58 = vmax.f32 %v335_v48, %v362_v51  ;;  %v372_v59 = vmax.f32 %v336_v49, %v363_v52  ;;  %v368_v60 = vld [vmem:[%s560_s11 + $0x9a] sm:$0xff]  ;;  %v396_v61 = vld [vmem:[%s560_s11 + $0xa] sm:$0xff]  ;;  %v397_v39 = vld [vmem:[%s560_s11 + $0x12] sm:$0xff] }
  0x25   : > { %v373_v40 = vmax.f32 %v337_v50, %v364_v28  ;;  %v374_v62 = vmax.f32 %v338_v53, %v365_v33  ;;  %v375_v41 = vmax.f32 %v339_v54, %v366_v34  ;;  %v376_v63 = vmax.f32 %v340_v55, %v367_v35  ;;  %v398_v0 = vld [vmem:[%s560_s11 + $0x1a] sm:$0xff]  ;;  %v399_v1 = vld [vmem:[%s560_s11 + $0x22] sm:$0xff]  ;;  %v400_v2 = vld [vmem:[%s560_s11 + $0x2a] sm:$0xff] }
  0x26   : > { %v377_v3 = vmax.f32 %v341_v29, %v368_v60  ;;  %v405_v4 = vmax.f32 %v369_v56, %v396_v61  ;;  %v406_v5 = vmax.f32 %v370_v57, %v397_v39  ;;  %v407_v6 = vmax.f32 %v371_v58, %v398_v0  ;;  %v401_v7 = vld [vmem:[%s560_s11 + $0x32] sm:$0xff]  ;;  %v402_v8 = vld [vmem:[%s560_s11 + $0x3a] sm:$0xff]  ;;  %v403_v9 = vld [vmem:[%s560_s11 + $0x42] sm:$0xff] }
  0x27   : > { %v408_v10 = vmax.f32 %v372_v59, %v399_v1  ;;  %v409_v11 = vmax.f32 %v373_v40, %v400_v2  ;;  %v410_v12 = vmax.f32 %v374_v62, %v401_v7  ;;  %v411_v13 = vmax.f32 %v375_v41, %v402_v8  ;;  %v404_v14 = vld [vmem:[%s560_s11 + $0x4a] sm:$0xff] }
  0x28   : > { %415 = vst [vmem:[#allocation2 + $0x8] sm:$0xff] %v406_v5  ;;  %416 = vst [vmem:[#allocation2 + $0x10] sm:$0xff] %v407_v6  ;;  %v412_v15 = vmax.f32 %v376_v63, %v403_v9  ;;  %v413_v16 = vmax.f32 %v377_v3, %v404_v14 }
  0x29   : > { %424 = vst [vmem:[%s667_s15] sm:$0xff] %v405_v4  ;;  %417 = vst [vmem:[#allocation2 + $0x18] sm:$0xff] %v408_v10 }
  0x2a   : > { %418 = vst [vmem:[#allocation2 + $0x20] sm:$0xff] %v409_v11  ;;  %419 = vst [vmem:[#allocation2 + $0x28] sm:$0xff] %v410_v12 }
  0x2b   : > { %420 = vst [vmem:[#allocation2 + $0x30] sm:$0xff] %v411_v13  ;;  %421 = vst [vmem:[#allocation2 + $0x38] sm:$0xff] %v412_v15 }
  0x2c   : > { %422 = vst [vmem:[#allocation2 + $0x40] sm:$0xff] %v413_v16 }
  0x2f   : > { %v425_v17 = vld [vmem:[#allocation2 + $0x9] sm:$0xff] }
  0x30   : > { %509 = vst [vmem:[%s667_s15 + $0x8] sm:$0xff] %v425_v17  ;;  %v428_v18 = vld [vmem:[#allocation2 + $0x12] sm:$0xff] }
  0x31   : > { %v431_v19 = vld [vmem:[#allocation2 + $0x1b] sm:$0xff]  ;;  %v434_v20 = vld [vmem:[#allocation2 + $0x24] sm:$0xff]  ;;  %510 = vst [vmem:[%s667_s15 + $0x10] sm:$0xff] %v428_v18 }
  0x32   : > { %511 = vst [vmem:[%s667_s15 + $0x18] sm:$0xff] %v431_v19  ;;  %512 = vst [vmem:[%s667_s15 + $0x20] sm:$0xff] %v434_v20  ;;  %v437_v21 = vld [vmem:[#allocation2 + $0x2d] sm:$0xff]  ;;  %v440_v22 = vld [vmem:[#allocation2 + $0x36] sm:$0xff] }
  0x33   : > { %v443_v23 = vld [vmem:[#allocation2 + $0x3f] sm:$0xff]  ;;  %513 = vst [vmem:[%s667_s15 + $0x28] sm:$0xff] %v437_v21  ;;  %514 = vst [vmem:[%s667_s15 + $0x30] sm:$0xff] %v440_v22 }
  0x34   : > { %515 = vst [vmem:[%s667_s15 + $0x38] sm:$0xff] %v443_v23 }
  0x35 PF: > { %s11_s6 = sadd.s32 1, %s534_s6  }
  0x36   : > { %p8_p4 = scmp.ge.s32.totalorder %s11_s6, 4  }
  0x38   :  { %10 = sbr.rel (!%p8_p4) target bundleno = 1 (0x1), region = 61 }

// kernel: preconv_forward.11
= control target key start
LH: loop header
LB: loop body
LE: loop exit
PB: predicated region body
PF: predicated region fallthrough
CT: control target
= control target key end

     0   :  { %s2241_s12 = smov 0   ;;  %s2811_s0 = inlined_call_operand.vmem [shape: f32[2,72,128], index: 0, kind: input, shape index: {}]   ;;  %s2812_s1 = inlined_call_operand.vmem [shape: f32[9,128,128], index: 1, kind: input, shape index: {}]   ;;  %s2813_s2 = inlined_call_operand.vmem [shape: f32[1,128], index: 2, kind: input, shape index: {}]   ;;  %s2814_s3 = inlined_call_operand.vmem [shape: f32[2,6,6,128], index: 3, kind: output, shape index: {}]  }
   0x1 LB: > { %s1461_s13 = sadd.s32 4294967295, %s2219_s12   ;;  %p1465_p0 = scmp.ge.s32.totalorder %s2219_s12, 1  ;;  %s2219_s12 = sphi %s2241_s12, %s13_s12  }
   0x2   : > { %p137_p1 = scmp.lt.s32.totalorder %s2219_s12, 3 }
   0x4   : > { %p138_p2 = pnand %p1465_p0, %p137_p1 }
   0x5   : > { %p161_p3 = scmp.lt.s32.totalorder (!%p138_p2), %s1461_s13, 1 }
   0x6   : > { %141 = sbr.rel (%p138_p2) target bundleno = 408 (0x198), region = 32 }
   0xb   : > { %v192_v0 = vld [vmem:[%s2812_s1 + $0x78] sm:$0xff]  ;;  %v191_v2 = vld [vmem:[%s2812_s1 + $0x70] sm:$0xff]  ;;  %v190_v4 = vld [vmem:[%s2812_s1 + $0x68] sm:$0xff]  ;;  %s2816_s13 = smov (!%p161_p3, %s1461_s13), 1 }
   0xc   : > { %v1484_v1 = vld [vmem:[%s2812_s1 + $0xf8] sm:$0xff]  ;;  %1802 = vmatprep.subr.mxu0 %v192_v0  ;;  %v1483_v3 = vld [vmem:[%s2812_s1 + $0xf0] sm:$0xff]  ;;  %v1482_v5 = vld [vmem:[%s2812_s1 + $0xe8] sm:$0xff]  ;;  %s2203_s16 = smul.u32 72, %s2816_s13 }
   0xd   : > { %1843 = vmatprep.subr.mxu1 %v1484_v1  ;;  %1803 = vmatpush3.msra.mxu0 %v192_v0  ;;  %v189_v6 = vld [vmem:[%s2812_s1 + $0x60] sm:$0xff]  ;;  %v188_v8 = vld [vmem:[%s2812_s1 + $0x58] sm:$0xff]  ;;  %v187_v10 = vld [vmem:[%s2812_s1 + $0x50] sm:$0xff] }
   0xe   : > { %1844 = vmatpush3.msra.mxu1 %v1484_v1  ;;  %1804 = vmatprep.subr.mxu0 %v191_v2  ;;  %v1481_v7 = vld [vmem:[%s2812_s1 + $0xe0] sm:$0xff]  ;;  %v1480_v9 = vld [vmem:[%s2812_s1 + $0xd8] sm:$0xff]  ;;  %v1479_v11 = vld [vmem:[%s2812_s1 + $0xd0] sm:$0xff]  ;;  %s2349_s27 = scalar_lea.vmem %s2811_s0, %s2203_s16  ;;  %s2204_s16 = smul.u32 48, %s2816_s13 }
   0xf   : > { %1845 = vmatprep.subr.mxu1 %v1483_v3  ;;  %1805 = vmatpush3.msra.mxu0 %v191_v2  ;;  %v186_v12 = vld [vmem:[%s2812_s1 + $0x48] sm:$0xff]  ;;  %v185_v14 = vld [vmem:[%s2812_s1 + $0x40] sm:$0xff]  ;;  %v184_v16 = vld [vmem:[%s2812_s1 + $0x38] sm:$0xff] }
  0x10   : > { %1846 = vmatpush3.msra.mxu1 %v1483_v3  ;;  %1806 = vmatprep.subr.mxu0 %v190_v4  ;;  %v1478_v13 = vld [vmem:[%s2812_s1 + $0xc8] sm:$0xff]  ;;  %v1477_v15 = vld [vmem:[%s2812_s1 + $0xc0] sm:$0xff]  ;;  %v1476_v17 = vld [vmem:[%s2812_s1 + $0xb8] sm:$0xff]  ;;  %s170_s19 = scalar_lea.vmem %s2814_s3, %s2204_s16 }
  0x11   : > { %1847 = vmatprep.subr.mxu1 %v1482_v5  ;;  %1807 = vmatpush3.msra.mxu0 %v190_v4  ;;  %v183_v18 = vld [vmem:[%s2812_s1 + $0x30] sm:$0xff]  ;;  %v182_v20 = vld [vmem:[%s2812_s1 + $0x28] sm:$0xff]  ;;  %v181_v22 = vld [vmem:[%s2812_s1 + $0x20] sm:$0xff] }
  0x12   : > { %1848 = vmatpush3.msra.mxu1 %v1482_v5  ;;  %1808 = vmatprep.subr.mxu0 %v189_v6  ;;  %v1475_v19 = vld [vmem:[%s2812_s1 + $0xb0] sm:$0xff]  ;;  %v1474_v21 = vld [vmem:[%s2812_s1 + $0xa8] sm:$0xff]  ;;  %v1473_v23 = vld [vmem:[%s2812_s1 + $0xa0] sm:$0xff] }
  0x13   : > { %1849 = vmatprep.subr.mxu1 %v1481_v7  ;;  %1809 = vmatpush3.msra.mxu0 %v189_v6  ;;  %v180_v24 = vld [vmem:[%s2812_s1 + $0x18] sm:$0xff]  ;;  %v179_v26 = vld [vmem:[%s2812_s1 + $0x10] sm:$0xff]  ;;  %v178_v28 = vld [vmem:[%s2812_s1 + $0x8] sm:$0xff] }
  0x14   : > { %1850 = vmatpush3.msra.mxu1 %v1481_v7  ;;  %1810 = vmatprep.subr.mxu0 %v188_v8  ;;  %v1472_v25 = vld [vmem:[%s2812_s1 + $0x98] sm:$0xff]  ;;  %v1471_v27 = vld [vmem:[%s2812_s1 + $0x90] sm:$0xff]  ;;  %v1470_v29 = vld [vmem:[%s2812_s1 + $0x88] sm:$0xff] }
  0x15   : > { %1851 = vmatprep.subr.mxu1 %v1480_v9  ;;  %1811 = vmatpush3.msra.mxu0 %v188_v8  ;;  %v177_v30 = vld [vmem:[%s2812_s1] sm:$0xff]  ;;  %v2360_v34 = vld [vmem:[%s2349_s27 + $0x8] sm:$0xff]  ;;  %v1500_v36 = vld [vmem:[%s2812_s1 + $0x178] sm:$0xff] }
  0x16   : > { %1852 = vmatpush3.msra.mxu1 %v1480_v9  ;;  %1812 = vmatprep.subr.mxu0 %v187_v10  ;;  %v1469_v31 = vld [vmem:[%s2812_s1 + $0x80] sm:$0xff]  ;;  %v2363_v35 = vld [vmem:[%s2349_s27 + $0x9] sm:$0xff]  ;;  %v1516_v37 = vld [vmem:[%s2812_s1 + $0x1f8] sm:$0xff] }
  0x17   : > { %1853 = vmatprep.subr.mxu1 %v1479_v11  ;;  %1813 = vmatpush3.msra.mxu0 %v187_v10  ;;  %v171_v32 = vld [vmem:[%s2349_s27] sm:$0xff]  ;;  %v1499_v38 = vld [vmem:[%s2812_s1 + $0x170] sm:$0xff]  ;;  %v1498_v40 = vld [vmem:[%s2812_s1 + $0x168] sm:$0xff] }
  0x18   : > { %1854 = vmatpush3.msra.mxu1 %v1479_v11  ;;  %1814 = vmatprep.subr.mxu0 %v186_v12  ;;  %v307_v33 = vld [vmem:[%s2349_s27 + $0x1] sm:$0xff]  ;;  %v1515_v39 = vld [vmem:[%s2812_s1 + $0x1f0] sm:$0xff]  ;;  %v1496_v44 = vld [vmem:[%s2812_s1 + $0x158] sm:$0xff] }
  0x19   : > { %1855 = vmatprep.subr.mxu1 %v1478_v13  ;;  %1815 = vmatpush3.msra.mxu0 %v186_v12  ;;  %v1514_v41 = vld [vmem:[%s2812_s1 + $0x1e8] sm:$0xff]  ;;  %v1497_v42 = vld [vmem:[%s2812_s1 + $0x160] sm:$0xff]  ;;  %v1512_v45 = vld [vmem:[%s2812_s1 + $0x1d8] sm:$0xff] }
  0x1a   : > { %1856 = vmatpush3.msra.mxu1 %v1478_v13  ;;  %1816 = vmatprep.subr.mxu0 %v185_v14  ;;  %v1513_v43 = vld [vmem:[%s2812_s1 + $0x1e0] sm:$0xff]  ;;  %v1495_v46 = vld [vmem:[%s2812_s1 + $0x150] sm:$0xff]  ;;  %v1494_v49 = vld [vmem:[%s2812_s1 + $0x148] sm:$0xff] }
  0x1b   : > { %1857 = vmatprep.subr.mxu1 %v1477_v15  ;;  %1817 = vmatpush3.msra.mxu0 %v185_v14  ;;  %v1511_v47 = vld [vmem:[%s2812_s1 + $0x1d0] sm:$0xff]  ;;  %v1510_v50 = vld [vmem:[%s2812_s1 + $0x1c8] sm:$0xff]  ;;  %v2413_v51 = vld [vmem:[%s2349_s27 + $0x18] sm:$0xff] }
  0x1c   : > { %1858 = vmatpush3.msra.mxu1 %v1477_v15  ;;  %1818 = vmatprep.subr.mxu0 %v184_v16  ;;  %v2404_v48 = vld [vmem:[%s2349_s27 + $0x10] sm:$0xff]  ;;  %v1493_v52 = vld [vmem:[%s2812_s1 + $0x140] sm:$0xff]  ;;  %v1492_v55 = vld [vmem:[%s2812_s1 + $0x138] sm:$0xff] }
  0x1d   : > { %1859 = vmatprep.subr.mxu1 %v1476_v17  ;;  %1819 = vmatpush3.msra.mxu0 %v184_v16  ;;  %v1509_v53 = vld [vmem:[%s2812_s1 + $0x1c0] sm:$0xff]  ;;  %v1508_v56 = vld [vmem:[%s2812_s1 + $0x1b8] sm:$0xff]  ;;  %v2433_v57 = vld [vmem:[%s2349_s27 + $0x28] sm:$0xff] }
  0x1e   : > { %1860 = vmatpush3.msra.mxu1 %v1476_v17  ;;  %1820 = vmatprep.subr.mxu0 %v183_v18  ;;  %v2424_v54 = vld [vmem:[%s2349_s27 + $0x20] sm:$0xff]  ;;  %v1491_v58 = vld [vmem:[%s2812_s1 + $0x130] sm:$0xff]  ;;  %v1490_v60 = vld [vmem:[%s2812_s1 + $0x128] sm:$0xff] }
  0x1f   : > { %1861 = vmatprep.subr.mxu1 %v1475_v19  ;;  %1821 = vmatpush3.msra.mxu0 %v183_v18  ;;  %v1507_v59 = vld [vmem:[%s2812_s1 + $0x1b0] sm:$0xff]  ;;  %v1506_v61 = vld [vmem:[%s2812_s1 + $0x1a8] sm:$0xff]  ;;  %v1489_v63 = vld [vmem:[%s2812_s1 + $0x120] sm:$0xff] }
  0x20   : > { %1862 = vmatpush3.msra.mxu1 %v1475_v19  ;;  %1822 = vmatprep.subr.mxu0 %v182_v20  ;;  %v2450_v62 = vld [vmem:[%s2349_s27 + $0x11] sm:$0xff]  ;;  %v1505_v0 = vld [vmem:[%s2812_s1 + $0x1a0] sm:$0xff]  ;;  %v2479_v7 = vld [vmem:[%s2349_s27 + $0x29] sm:$0xff] }
  0x21   : > { %1863 = vmatprep.subr.mxu1 %v1474_v21  ;;  %1823 = vmatpush3.msra.mxu0 %v182_v20  ;;  %v2459_v1 = vld [vmem:[%s2349_s27 + $0x19] sm:$0xff]  ;;  %v2470_v4 = vld [vmem:[%s2349_s27 + $0x21] sm:$0xff]  ;;  %v1487_v5 = vld [vmem:[%s2812_s1 + $0x110] sm:$0xff] }
  0x22   : > { %1864 = vmatpush3.msra.mxu1 %v1474_v21  ;;  %1824 = vmatprep.subr.mxu0 %v181_v22  ;;  %v1488_v2 = vld [vmem:[%s2812_s1 + $0x118] sm:$0xff]  ;;  %v1503_v6 = vld [vmem:[%s2812_s1 + $0x190] sm:$0xff]  ;;  %v1486_v8 = vld [vmem:[%s2812_s1 + $0x108] sm:$0xff] }
  0x23   : > { %1865 = vmatprep.subr.mxu1 %v1473_v23  ;;  %1825 = vmatpush3.msra.mxu0 %v181_v22  ;;  %v1504_v3 = vld [vmem:[%s2812_s1 + $0x198] sm:$0xff]  ;;  %v1502_v9 = vld [vmem:[%s2812_s1 + $0x188] sm:$0xff]  ;;  %v1485_v10 = vld [vmem:[%s2812_s1 + $0x100] sm:$0xff] }
  0x24   : > { %1866 = vmatpush3.msra.mxu1 %v1473_v23  ;;  %1826 = vmatprep.subr.mxu0 %v180_v24  ;;  %v1501_v11 = vld [vmem:[%s2812_s1 + $0x180] sm:$0xff]  ;;  %v2497_v13 = vld [vmem:[%s2349_s27 + $0xa] sm:$0xff]  ;;  %v1532_v14 = vld [vmem:[%s2812_s1 + $0x278] sm:$0xff] }
  0x25   : > { %1867 = vmatprep.subr.mxu1 %v1472_v25  ;;  %1827 = vmatpush3.msra.mxu0 %v180_v24  ;;  %v443_v12 = vld [vmem:[%s2349_s27 + $0x2] sm:$0xff]  ;;  %v1548_v15 = vld [vmem:[%s2812_s1 + $0x2f8] sm:$0xff]  ;;  %v1531_v16 = vld [vmem:[%s2812_s1 + $0x270] sm:$0xff] }
  0x26   : > { %1868 = vmatpush3.msra.mxu1 %v1472_v25  ;;  %1828 = vmatprep.subr.mxu0 %v179_v26  ;;  %v1547_v17 = vld [vmem:[%s2812_s1 + $0x2f0] sm:$0xff]  ;;  %v2518_v19 = vld [vmem:[%s2349_s27 + $0x1a] sm:$0xff]  ;;  %v1530_v20 = vld [vmem:[%s2812_s1 + $0x268] sm:$0xff] }
  0x27   : > { %1869 = vmatprep.subr.mxu1 %v1471_v27  ;;  %1829 = vmatpush3.msra.mxu0 %v179_v26  ;;  %v2515_v18 = vld [vmem:[%s2349_s27 + $0x12] sm:$0xff]  ;;  %v1546_v21 = vld [vmem:[%s2812_s1 + $0x2e8] sm:$0xff]  ;;  %v1529_v22 = vld [vmem:[%s2812_s1 + $0x260] sm:$0xff] }
  0x28   : > { %1870 = vmatpush3.msra.mxu1 %v1471_v27  ;;  %1830 = vmatprep.subr.mxu0 %v178_v28  ;;  %v1545_v23 = vld [vmem:[%s2812_s1 + $0x2e0] sm:$0xff]  ;;  %v2538_v25 = vld [vmem:[%s2349_s27 + $0x2a] sm:$0xff]  ;;  %v1528_v26 = vld [vmem:[%s2812_s1 + $0x258] sm:$0xff] }
  0x29   : > { %1871 = vmatprep.subr.mxu1 %v1470_v29  ;;  %1831 = vmatpush3.msra.mxu0 %v178_v28  ;;  %v2535_v24 = vld [vmem:[%s2349_s27 + $0x22] sm:$0xff]  ;;  %v1544_v27 = vld [vmem:[%s2812_s1 + $0x2d8] sm:$0xff]  ;;  %v1527_v28 = vld [vmem:[%s2812_s1 + $0x250] sm:$0xff] }
  0x2a   : > { %1872 = vmatpush3.msra.mxu1 %v1470_v29  ;;  %1832 = vmatprep.subr.mxu0 %v177_v30  ;;  %v1543_v29 = vld [vmem:[%s2812_s1 + $0x2d0] sm:$0xff] }
  0x2b   : > { %1873 = vmatprep.subr.mxu1 %v1469_v31  ;;  %1833 = vmatpush3.msra.mxu0 %v177_v30  ;;  %v1526_v30 = vld [vmem:[%s2812_s1 + $0x248] sm:$0xff] }
  0x2c   : > { %1834 = vmatprep.mubr.f32.mxu0 %v171_v32  ;;  %1874 = vmatpush3.msra.mxu1 %v1469_v31  ;;  %v1542_v31 = vld [vmem:[%s2812_s1 + $0x2c8] sm:$0xff]  ;;  %v1525_v32 = vld [vmem:[%s2812_s1 + $0x240] sm:$0xff] }
  0x2d   : > { %1875 = vmatprep.mubr.f32.mxu1 %v307_v33  ;;  %1835 = vmatmul.mubr.f32.vlgmr.msra.gmra.mxu0 %v2360_v34  ;;  %v1541_v33 = vld [vmem:[%s2812_s1 + $0x2c0] sm:$0xff] }
  0x2e   : > { %1876 = vmatmul.mubr.f32.vlgmr.msra.gmra.mxu1 %v2363_v35  ;;  %1884 = vmatprep.subr.mxu0 %v1500_v36 }
  0x2f   : > { %1925 = vmatprep.subr.mxu1 %v1516_v37  ;;  %1885 = vmatpush3.msra.mxu0 %v1500_v36  ;;  %v1540_v36 = vld [vmem:[%s2812_s1 + $0x2b8] sm:$0xff] }
  0x30   : > { %1926 = vmatpush3.msra.mxu1 %v1516_v37  ;;  %1886 = vmatprep.subr.mxu0 %v1499_v38  ;;  %v1523_v37 = vld [vmem:[%s2812_s1 + $0x230] sm:$0xff] }
  0x31   : > { %1927 = vmatprep.subr.mxu1 %v1515_v39  ;;  %1887 = vmatpush3.msra.mxu0 %v1499_v38  ;;  %v2578_v38 = vld [vmem:[%s2349_s27 + $0x30] sm:$0xff] }
  0x32   : > { %1928 = vmatpush3.msra.mxu1 %v1515_v39  ;;  %1888 = vmatprep.subr.mxu0 %v1498_v40  ;;  %v1539_v39 = vld [vmem:[%s2812_s1 + $0x2b0] sm:$0xff] }
  0x33   : > { %1929 = vmatprep.subr.mxu1 %v1514_v41  ;;  %1889 = vmatpush3.msra.mxu0 %v1498_v40  ;;  %v1522_v40 = vld [vmem:[%s2812_s1 + $0x228] sm:$0xff] }
  0x34   : > { %1930 = vmatpush3.msra.mxu1 %v1514_v41  ;;  %1890 = vmatprep.subr.mxu0 %v1497_v42  ;;  %v1538_v41 = vld [vmem:[%s2812_s1 + $0x2a8] sm:$0xff] }
  0x35   : > { %1931 = vmatprep.subr.mxu1 %v1513_v43  ;;  %1891 = vmatpush3.msra.mxu0 %v1497_v42  ;;  %v1521_v42 = vld [vmem:[%s2812_s1 + $0x220] sm:$0xff] }
  0x36   : > { %1932 = vmatpush3.msra.mxu1 %v1513_v43  ;;  %1892 = vmatprep.subr.mxu0 %v1496_v44  ;;  %v1537_v43 = vld [vmem:[%s2812_s1 + $0x2a0] sm:$0xff] }
  0x37   : > { %1933 = vmatprep.subr.mxu1 %v1512_v45  ;;  %1893 = vmatpush3.msra.mxu0 %v1496_v44  ;;  %v1520_v44 = vld [vmem:[%s2812_s1 + $0x218] sm:$0xff] }
  0x38   : > { %1934 = vmatpush3.msra.mxu1 %v1512_v45  ;;  %1894 = vmatprep.subr.mxu0 %v1495_v46  ;;  %v1536_v45 = vld [vmem:[%s2812_s1 + $0x298] sm:$0xff] }
  0x39   : > { %1935 = vmatprep.subr.mxu1 %v1511_v47  ;;  %1895 = vmatpush3.msra.mxu0 %v1495_v46  ;;  %v1519_v46 = vld [vmem:[%s2812_s1 + $0x210] sm:$0xff] }
  0x3a   : > { %1936 = vmatpush3.msra.mxu1 %v1511_v47  ;;  %1837 = vmatprep.mubr.f32.mxu0 %v2404_v48  ;;  %v1535_v47 = vld [vmem:[%s2812_s1 + $0x290] sm:$0xff] }
  0x3b   : > { %1896 = vmatprep.subr.mxu0 %v1494_v49  ;;  %1937 = vmatprep.subr.mxu1 %v1510_v50 }
  0x3c   : > { %1838 = vmatmul.mubr.f32.gmra.mxu0 %v2413_v51  ;;  %1938 = vmatpush3.msra.mxu1 %v1510_v50  ;;  %v1534_v50 = vld [vmem:[%s2812_s1 + $0x288] sm:$0xff] }
  0x3d   : > { %1897 = vmatpush3.msra.mxu0 %v1494_v49  ;;  %1939 = vmatprep.subr.mxu1 %v1509_v53  ;;  %v1518_v49 = vld [vmem:[%s2812_s1 + $0x208] sm:$0xff] }
  0x3e   : > { %1898 = vmatprep.subr.mxu0 %v1493_v52  ;;  %1940 = vmatpush3.msra.mxu1 %v1509_v53  ;;  %v1533_v53 = vld [vmem:[%s2812_s1 + $0x280] sm:$0xff] }
  0x3f   : > { %1899 = vmatpush3.msra.mxu0 %v1493_v52  ;;  %1840 = vmatprep.mubr.f32.mxu0 %v2424_v54  ;;  %v1517_v52 = vld [vmem:[%s2812_s1 + $0x200] sm:$0xff] }
  0x40   : > { %1900 = vmatprep.subr.mxu0 %v1492_v55  ;;  %1941 = vmatprep.subr.mxu1 %v1508_v56 }
  0x41   : > { %1841 = vmatmul.mubr.f32.gmra.mxu0 %v2433_v57  ;;  %1942 = vmatpush3.msra.mxu1 %v1508_v56  ;;  %v1580_v56 = vld [vmem:[%s2812_s1 + $0x3f8] sm:$0xff] }
  0x42   : > { %1901 = vmatpush3.msra.mxu0 %v1492_v55  ;;  %1943 = vmatprep.subr.mxu1 %v1507_v59  ;;  %v1564_v55 = vld [vmem:[%s2812_s1 + $0x378] sm:$0xff] }
  0x43   : > { %1902 = vmatprep.subr.mxu0 %v1491_v58  ;;  %1944 = vmatpush3.msra.mxu1 %v1507_v59  ;;  %v1562_v59 = vld [vmem:[%s2812_s1 + $0x368] sm:$0xff] }
  0x44   : > { %1903 = vmatpush3.msra.mxu0 %v1491_v58  ;;  %1945 = vmatprep.subr.mxu1 %v1506_v61  ;;  %v1563_v58 = vld [vmem:[%s2812_s1 + $0x370] sm:$0xff] }
  0x45   : > { %1904 = vmatprep.subr.mxu0 %v1490_v60  ;;  %1946 = vmatpush3.msra.mxu1 %v1506_v61  ;;  %v1561_v61 = vld [vmem:[%s2812_s1 + $0x360] sm:$0xff] }
  0x46   : > { %1905 = vmatpush3.msra.mxu0 %v1490_v60  ;;  %1878 = vmatprep.mubr.f32.mxu1 %v2450_v62  ;;  %v1578_v60 = vld [vmem:[%s2812_s1 + $0x3e8] sm:$0xff] }
  0x47   : > { %1906 = vmatprep.subr.mxu0 %v1489_v63  ;;  %1947 = vmatprep.subr.mxu1 %v1505_v0 }
  0x48   : > { %1879 = vmatmul.mubr.f32.gmra.mxu1 %v2459_v1  ;;  %1907 = vmatpush3.msra.mxu0 %v1489_v63  ;;  %v1577_v63 = vld [vmem:[%s2812_s1 + $0x3e0] sm:$0xff] }
  0x49   : > { %1948 = vmatpush3.msra.mxu1 %v1505_v0  ;;  %1908 = vmatprep.subr.mxu0 %v1488_v2  ;;  %v2652_v0 = vld [vmem:[%s2349_s27 + $0x31] sm:$0xff] }
  0x4a   : > { %1949 = vmatprep.subr.mxu1 %v1504_v3  ;;  %1909 = vmatpush3.msra.mxu0 %v1488_v2  ;;  %v1560_v2 = vld [vmem:[%s2812_s1 + $0x358] sm:$0xff] }
  0x4b   : > { %1950 = vmatpush3.msra.mxu1 %v1504_v3  ;;  %1881 = vmatprep.mubr.f32.mxu1 %v2470_v4  ;;  %v1576_v3 = vld [vmem:[%s2812_s1 + $0x3d8] sm:$0xff] }
  0x4c   : > { %1910 = vmatprep.subr.mxu0 %v1487_v5  ;;  %1951 = vmatprep.subr.mxu1 %v1503_v6 }
  0x4d   : > { %1882 = vmatmul.mubr.f32.gmra.mxu1 %v2479_v7  ;;  %1911 = vmatpush3.msra.mxu0 %v1487_v5  ;;  %v1559_v5 = vld [vmem:[%s2812_s1 + $0x350] sm:$0xff] }
  0x4e   : > { %1952 = vmatpush3.msra.mxu1 %v1503_v6  ;;  %1912 = vmatprep.subr.mxu0 %v1486_v8  ;;  %v1575_v6 = vld [vmem:[%s2812_s1 + $0x3d0] sm:$0xff] }
  0x4f   : > { %1953 = vmatprep.subr.mxu1 %v1502_v9  ;;  %1913 = vmatpush3.msra.mxu0 %v1486_v8  ;;  %v1558_v8 = vld [vmem:[%s2812_s1 + $0x348] sm:$0xff] }
  0x50   : > { %1954 = vmatpush3.msra.mxu1 %v1502_v9  ;;  %1914 = vmatprep.subr.mxu0 %v1485_v10  ;;  %v1574_v9 = vld [vmem:[%s2812_s1 + $0x3c8] sm:$0xff] }
  0x51   : > { %1955 = vmatprep.subr.mxu1 %v1501_v11  ;;  %1915 = vmatpush3.msra.mxu0 %v1485_v10  ;;  %v1557_v10 = vld [vmem:[%s2812_s1 + $0x340] sm:$0xff] }
  0x52   : > { %1916 = vmatprep.mubr.f32.mxu0 %v443_v12  ;;  %1956 = vmatpush3.msra.mxu1 %v1501_v11  ;;  %v1573_v11 = vld [vmem:[%s2812_s1 + $0x3c0] sm:$0xff]  ;;  %v1556_v12 = vld [vmem:[%s2812_s1 + $0x338] sm:$0xff] }
  0x53   : > { %1957 = vmatprep.mubr.f32.mxu1 %v2360_v34  ;;  %1917 = vmatmul.mubr.f32.vlgmr.msra.gmra.mxu0 %v2497_v13  ;;  %v1524_v34 = vld [vmem:[%s2812_s1 + $0x238] sm:$0xff] }
  0x54   : > { %1958 = vmatmul.mubr.f32.vlgmr.msra.gmra.mxu1 %v2404_v48  ;;  %1966 = vmatprep.subr.mxu0 %v1532_v14 }
  0x55   : > { %2007 = vmatprep.subr.mxu1 %v1548_v15  ;;  %1967 = vmatpush3.msra.mxu0 %v1532_v14  ;;  %v1555_v14 = vld [vmem:[%s2812_s1 + $0x330] sm:$0xff] }
  0x56   : > { %2008 = vmatpush3.msra.mxu1 %v1548_v15  ;;  %1968 = vmatprep.subr.mxu0 %v1531_v16  ;;  %v2692_v15 = vld [vmem:[%s2349_s27 + $0x32] sm:$0xff] }
  0x57   : > { %2009 = vmatprep.subr.mxu1 %v1547_v17  ;;  %1919 = vmatprep.mubr.f32.mxu0 %v2515_v18 }
  0x58   : > { %1969 = vmatpush3.msra.mxu0 %v1531_v16  ;;  %2010 = vmatpush3.msra.mxu1 %v1547_v17  ;;  %v1571_v16 = vld [vmem:[%s2812_s1 + $0x3b0] sm:$0xff]  ;;  %v1554_v17 = vld [vmem:[%s2812_s1 + $0x328] sm:$0xff] }
  0x59   : > { %1920 = vmatmul.mubr.f32.gmra.mxu0 %v2518_v19  ;;  %1970 = vmatprep.subr.mxu0 %v1530_v20 }
  0x5a   : > { %2011 = vmatprep.subr.mxu1 %v1546_v21  ;;  %1971 = vmatpush3.msra.mxu0 %v1530_v20  ;;  %v1570_v20 = vld [vmem:[%s2812_s1 + $0x3a8] sm:$0xff] }
  0x5b   : > { %2012 = vmatpush3.msra.mxu1 %v1546_v21  ;;  %1972 = vmatprep.subr.mxu0 %v1529_v22  ;;  %v1553_v21 = vld [vmem:[%s2812_s1 + $0x320] sm:$0xff] }
  0x5c   : > { %2013 = vmatprep.subr.mxu1 %v1545_v23  ;;  %1922 = vmatprep.mubr.f32.mxu0 %v2535_v24 }
  0x5d   : > { %1973 = vmatpush3.msra.mxu0 %v1529_v22  ;;  %2014 = vmatpush3.msra.mxu1 %v1545_v23  ;;  %v1569_v22 = vld [vmem:[%s2812_s1 + $0x3a0] sm:$0xff]  ;;  %v1552_v23 = vld [vmem:[%s2812_s1 + $0x318] sm:$0xff] }
  0x5e   : > { %1923 = vmatmul.mubr.f32.gmra.mxu0 %v2538_v25  ;;  %1974 = vmatprep.subr.mxu0 %v1528_v26 }
  0x5f   : > { %2015 = vmatprep.subr.mxu1 %v1544_v27  ;;  %1975 = vmatpush3.msra.mxu0 %v1528_v26  ;;  %v1568_v26 = vld [vmem:[%s2812_s1 + $0x398] sm:$0xff] }
  0x60   : > { %2016 = vmatpush3.msra.mxu1 %v1544_v27  ;;  %1976 = vmatprep.subr.mxu0 %v1527_v28  ;;  %v1551_v27 = vld [vmem:[%s2812_s1 + $0x310] sm:$0xff] }
  0x61   : > { %2017 = vmatprep.subr.mxu1 %v1543_v29  ;;  %1977 = vmatpush3.msra.mxu0 %v1527_v28  ;;  %v1567_v28 = vld [vmem:[%s2812_s1 + $0x390] sm:$0xff] }
  0x62   : > { %2018 = vmatpush3.msra.mxu1 %v1543_v29  ;;  %1978 = vmatprep.subr.mxu0 %v1526_v30  ;;  %v1550_v29 = vld [vmem:[%s2812_s1 + $0x308] sm:$0xff] }
  0x63   : > { %2019 = vmatprep.subr.mxu1 %v1542_v31  ;;  %1960 = vmatprep.mubr.f32.mxu1 %v2413_v51 }
  0x64   : > { %1979 = vmatpush3.msra.mxu0 %v1526_v30  ;;  %2020 = vmatpush3.msra.mxu1 %v1542_v31  ;;  %v1566_v30 = vld [vmem:[%s2812_s1 + $0x388] sm:$0xff]  ;;  %v1549_v31 = vld [vmem:[%s2812_s1 + $0x300] sm:$0xff] }
  0x65   : > { %1980 = vmatprep.subr.mxu0 %v1525_v32  ;;  %1961 = vmatmul.mubr.f32.gmra.mxu1 %v2424_v54 }
  0x66   : > { %2021 = vmatprep.subr.mxu1 %v1541_v33  ;;  %1981 = vmatpush3.msra.mxu0 %v1525_v32  ;;  %v1565_v32 = vld [vmem:[%s2812_s1 + $0x380] sm:$0xff] }
  0x67   : > { %2022 = vmatpush3.msra.mxu1 %v1541_v33  ;;  %1982 = vmatprep.subr.mxu0 %v1524_v34  ;;  %v1596_v33 = vld [vmem:[%s2812_s1 + $0x478] sm:$0xff] }
  0x68   : > { %2023 = vmatprep.subr.mxu1 %v1540_v36  ;;  %1963 = vmatprep.mubr.f32.mxu1 %v2433_v57 }
  0x69   : > { %1983 = vmatpush3.msra.mxu0 %v1524_v34  ;;  %2024 = vmatpush3.msra.mxu1 %v1540_v36  ;;  %v1595_v34 = vld [vmem:[%s2812_s1 + $0x470] sm:$0xff]  ;;  %v1589_v36 = vld [vmem:[%s2812_s1 + $0x440] sm:$0xff] }
  0x6a   : > { %1984 = vmatprep.subr.mxu0 %v1523_v37  ;;  %1964 = vmatmul.mubr.f32.gmra.mxu1 %v2578_v38 }
  0x6b   : > { %2025 = vmatprep.subr.mxu1 %v1539_v39  ;;  %1985 = vmatpush3.msra.mxu0 %v1523_v37  ;;  %v1588_v37 = vld [vmem:[%s2812_s1 + $0x438] sm:$0xff] }
  0x6c   : > { %2026 = vmatpush3.msra.mxu1 %v1539_v39  ;;  %1986 = vmatprep.subr.mxu0 %v1522_v40  ;;  %v1128_v39 = vld [vmem:[%s2349_s27 + $0x39] sm:$0xff] }
  0x6d   : > { %2027 = vmatprep.subr.mxu1 %v1538_v41  ;;  %1987 = vmatpush3.msra.mxu0 %v1522_v40  ;;  %v1584_v40 = vld [vmem:[%s2812_s1 + $0x418] sm:$0xff] }
  0x6e   : > { %2028 = vmatpush3.msra.mxu1 %v1538_v41  ;;  %1988 = vmatprep.subr.mxu0 %v1521_v42  ;;  %v1583_v41 = vld [vmem:[%s2812_s1 + $0x410] sm:$0xff] }
  0x6f   : > { %2029 = vmatprep.subr.mxu1 %v1537_v43  ;;  %1989 = vmatpush3.msra.mxu0 %v1521_v42  ;;  %v1582_v42 = vld [vmem:[%s2812_s1 + $0x408] sm:$0xff] }
  0x70   : > { %2030 = vmatpush3.msra.mxu1 %v1537_v43  ;;  %1990 = vmatprep.subr.mxu0 %v1520_v44  ;;  %v1581_v43 = vld [vmem:[%s2812_s1 + $0x400] sm:$0xff] }
  0x71   : > { %2031 = vmatprep.subr.mxu1 %v1536_v45  ;;  %1991 = vmatpush3.msra.mxu0 %v1520_v44  ;;  %v1264_v44 = vld [vmem:[%s2349_s27 + $0x3a] sm:$0xff] }
  0x72   : > { %2032 = vmatpush3.msra.mxu1 %v1536_v45  ;;  %1992 = vmatprep.subr.mxu0 %v1519_v46 }
  0x73   : > { %2033 = vmatprep.subr.mxu1 %v1535_v47  ;;  %1993 = vmatpush3.msra.mxu0 %v1519_v46 }
  0x74   : > { %2034 = vmatpush3.msra.mxu1 %v1535_v47  ;;  %1994 = vmatprep.subr.mxu0 %v1518_v49 }
  0x75   : > { %2035 = vmatprep.subr.mxu1 %v1534_v50  ;;  %1995 = vmatpush3.msra.mxu0 %v1518_v49 }
  0x76   : > { %2036 = vmatpush3.msra.mxu1 %v1534_v50  ;;  %1996 = vmatprep.subr.mxu0 %v1517_v52 }
  0x77   : > { %2037 = vmatprep.subr.mxu1 %v1533_v53  ;;  %1997 = vmatpush3.msra.mxu0 %v1517_v52 }
  0x78   : > { %1998 = vmatprep.mubr.f32.mxu0 %v2363_v35  ;;  %2038 = vmatpush3.msra.mxu1 %v1533_v53  ;;  %v1579_v35 = vld [vmem:[%s2812_s1 + $0x3f0] sm:$0xff] }
  0x79   : > { %2039 = vmatprep.mubr.f32.mxu1 %v2497_v13  ;;  %1999 = vmatmul.mubr.f32.vlgmr.msra.gmra.mxu0 %v2450_v62  ;;  %v1572_v13 = vld [vmem:[%s2812_s1 + $0x3b8] sm:$0xff] }
  0x7a   : > { %2040 = vmatmul.mubr.f32.vlgmr.msra.gmra.mxu1 %v2515_v18  ;;  %2048 = vmatprep.subr.mxu0 %v1564_v55 }
  0x7b   : > { %2089 = vmatprep.subr.mxu1 %v1580_v56  ;;  %2049 = vmatpush3.msra.mxu0 %v1564_v55 }
  0x7c   : > { %2090 = vmatpush3.msra.mxu1 %v1580_v56  ;;  %2050 = vmatprep.subr.mxu0 %v1563_v58 }
  0x7d   : > { %2091 = vmatprep.subr.mxu1 %v1579_v35  ;;  %2001 = vmatprep.mubr.f32.mxu0 %v2459_v1 }
  0x7e   : > { %2051 = vmatpush3.msra.mxu0 %v1563_v58  ;;  %2092 = vmatpush3.msra.mxu1 %v1579_v35 }
  0x7f   : > { %2002 = vmatmul.mubr.f32.gmra.mxu0 %v2470_v4  ;;  %2052 = vmatprep.subr.mxu0 %v1562_v59 }
  0x80   : > { %2093 = vmatprep.subr.mxu1 %v1578_v60  ;;  %2053 = vmatpush3.msra.mxu0 %v1562_v59 }
  0x81   : > { %2094 = vmatpush3.msra.mxu1 %v1578_v60  ;;  %2054 = vmatprep.subr.mxu0 %v1561_v61 }
  0x82   : > { %2095 = vmatprep.subr.mxu1 %v1577_v63  ;;  %2004 = vmatprep.mubr.f32.mxu0 %v2479_v7 }
  0x83   : > { %2055 = vmatpush3.msra.mxu0 %v1561_v61  ;;  %2096 = vmatpush3.msra.mxu1 %v1577_v63 }
  0x84   : > { %2005 = vmatmul.mubr.f32.gmra.mxu0 %v2652_v0  ;;  %2056 = vmatprep.subr.mxu0 %v1560_v2 }
  0x85   : > { %2097 = vmatprep.subr.mxu1 %v1576_v3  ;;  %2057 = vmatpush3.msra.mxu0 %v1560_v2 }
  0x86   : > { %2098 = vmatpush3.msra.mxu1 %v1576_v3  ;;  %2058 = vmatprep.subr.mxu0 %v1559_v5 }
  0x87   : > { %2099 = vmatprep.subr.mxu1 %v1575_v6  ;;  %2059 = vmatpush3.msra.mxu0 %v1559_v5 }
  0x88   : > { %2100 = vmatpush3.msra.mxu1 %v1575_v6  ;;  %2060 = vmatprep.subr.mxu0 %v1558_v8 }
  0x89   : > { %2101 = vmatprep.subr.mxu1 %v1574_v9  ;;  %2042 = vmatprep.mubr.f32.mxu1 %v2518_v19 }
  0x8a   : > { %2061 = vmatpush3.msra.mxu0 %v1558_v8  ;;  %2102 = vmatpush3.msra.mxu1 %v1574_v9 }
  0x8b   : > { %2062 = vmatprep.subr.mxu0 %v1557_v10  ;;  %2043 = vmatmul.mubr.f32.gmra.mxu1 %v2535_v24 }
  0x8c   : > { %2103 = vmatprep.subr.mxu1 %v1573_v11  ;;  %2063 = vmatpush3.msra.mxu0 %v1557_v10 }
  0x8d   : > { %2104 = vmatpush3.msra.mxu1 %v1573_v11  ;;  %2064 = vmatprep.subr.mxu0 %v1556_v12 }
  0x8e   : > { %2105 = vmatprep.subr.mxu1 %v1572_v13  ;;  %2045 = vmatprep.mubr.f32.mxu1 %v2538_v25 }
  0x8f   : > { %2065 = vmatpush3.msra.mxu0 %v1556_v12  ;;  %2106 = vmatpush3.msra.mxu1 %v1572_v13 }
  0x90   : > { %2066 = vmatprep.subr.mxu0 %v1555_v14  ;;  %2046 = vmatmul.mubr.f32.gmra.mxu1 %v2692_v15 }
  0x91   : > { %2107 = vmatprep.subr.mxu1 %v1571_v16  ;;  %2067 = vmatpush3.msra.mxu0 %v1555_v14 }
  0x92   : > { %2108 = vmatpush3.msra.mxu1 %v1571_v16  ;;  %2068 = vmatprep.subr.mxu0 %v1554_v17 }
  0x93   : > { %2109 = vmatprep.subr.mxu1 %v1570_v20  ;;  %2069 = vmatpush3.msra.mxu0 %v1554_v17  ;;  %v1468_v17 = vld [vmem:[%s2813_s2] ss:$0 sm:$0xff] }
  0x94   : > { %2110 = vmatpush3.msra.mxu1 %v1570_v20  ;;  %2070 = vmatprep.subr.mxu0 %v1553_v21 }
  0x95   : > { %2111 = vmatprep.subr.mxu1 %v1569_v22  ;;  %2071 = vmatpush3.msra.mxu0 %v1553_v21 }
  0x96   : > { %2112 = vmatpush3.msra.mxu1 %v1569_v22  ;;  %2072 = vmatprep.subr.mxu0 %v1552_v23 }
  0x97   : > { %2113 = vmatprep.subr.mxu1 %v1568_v26  ;;  %2073 = vmatpush3.msra.mxu0 %v1552_v23 }
  0x98   : > { %2114 = vmatpush3.msra.mxu1 %v1568_v26  ;;  %2074 = vmatprep.subr.mxu0 %v1551_v27 }
  0x99   : > { %2115 = vmatprep.subr.mxu1 %v1567_v28  ;;  %2075 = vmatpush3.msra.mxu0 %v1551_v27 }
  0x9a   : > { %2116 = vmatpush3.msra.mxu1 %v1567_v28  ;;  %2076 = vmatprep.subr.mxu0 %v1550_v29 }
  0x9b   : > { %2117 = vmatprep.subr.mxu1 %v1566_v30  ;;  %2077 = vmatpush3.msra.mxu0 %v1550_v29 }
  0x9c   : > { %2118 = vmatpush3.msra.mxu1 %v1566_v30  ;;  %2078 = vmatprep.subr.mxu0 %v1549_v31 }
  0x9d   : > { %2119 = vmatprep.subr.mxu1 %v1565_v32  ;;  %2079 = vmatpush3.msra.mxu0 %v1549_v31 }
  0x9e   : > { %2080 = vmatprep.mubr.f32.mxu0 %v2404_v48  ;;  %2120 = vmatpush3.msra.mxu1 %v1565_v32  ;;  %v1594_v48 = vld [vmem:[%s2812_s1 + $0x468] sm:$0xff] }
  0x9f   : > { %2121 = vmatprep.mubr.f32.mxu1 %v2450_v62  ;;  %2081 = vmatmul.mubr.f32.vlgmr.msra.gmra.mxu0 %v2413_v51  ;;  %v1593_v51 = vld [vmem:[%s2812_s1 + $0x460] sm:$0xff]  ;;  %v992_v62 = vld [vmem:[%s2349_s27 + $0x38] sm:$0xff] }
  0xa0   : > { %2122 = vmatmul.mubr.f32.vlgmr.msra.gmra.mxu1 %v2459_v1  ;;  %2130 = vmatprep.subr.mxu0 %v1596_v33  ;;  %v1592_v1 = vld [vmem:[%s2812_s1 + $0x458] sm:$0xff] }
  0xa1   : > { %2171 = vmatprep.subr.mxu1 %v1596_v33  ;;  %2131 = vmatpush3.msra.mxu0 %v1596_v33 }
  0xa2   : > { %2187 = vmatpush3.msra.mxu1 %v1596_v33  ;;  %2132 = vmatprep.subr.mxu0 %v1595_v34 }
  0xa3   : > { %2172 = vmatprep.subr.mxu1 %v1595_v34  ;;  %2083 = vmatprep.mubr.f32.mxu0 %v2424_v54  ;;  %v1591_v54 = vld [vmem:[%s2812_s1 + $0x450] sm:$0xff] }
  0xa4   : > { %2133 = vmatpush3.msra.mxu0 %v1595_v34  ;;  %2188 = vmatpush3.msra.mxu1 %v1595_v34 }
  0xa5   : > { %2084 = vmatmul.mubr.f32.gmra.mxu0 %v2433_v57  ;;  %2134 = vmatprep.subr.mxu0 %v1594_v48  ;;  %v1590_v57 = vld [vmem:[%s2812_s1 + $0x448] sm:$0xff] }
  0xa6   : > { %2173 = vmatprep.subr.mxu1 %v1594_v48  ;;  %2135 = vmatpush3.msra.mxu0 %v1594_v48 }
  0xa7   : > { %2189 = vmatpush3.msra.mxu1 %v1594_v48  ;;  %2136 = vmatprep.subr.mxu0 %v1593_v51 }
  0xa8   : > { %2174 = vmatprep.subr.mxu1 %v1593_v51  ;;  %2086 = vmatprep.mubr.f32.mxu0 %v2578_v38  ;;  %v1587_v38 = vld [vmem:[%s2812_s1 + $0x430] sm:$0xff] }
  0xa9   : > { %2137 = vmatpush3.msra.mxu0 %v1593_v51  ;;  %2190 = vmatpush3.msra.mxu1 %v1593_v51 }
  0xaa   : > { %2087 = vmatmul.mubr.f32.gmra.mxu0 %v992_v62  ;;  %2138 = vmatprep.subr.mxu0 %v1592_v1 }
  0xab   : > { %2175 = vmatprep.subr.mxu1 %v1592_v1  ;;  %2139 = vmatpush3.msra.mxu0 %v1592_v1 }
  0xac   : > { %2191 = vmatpush3.msra.mxu1 %v1592_v1  ;;  %2140 = vmatprep.subr.mxu0 %v1591_v54 }
  0xad   : > { %2176 = vmatprep.subr.mxu1 %v1591_v54  ;;  %2141 = vmatpush3.msra.mxu0 %v1591_v54 }
  0xae   : > { %2192 = vmatpush3.msra.mxu1 %v1591_v54  ;;  %2142 = vmatprep.subr.mxu0 %v1590_v57 }
  0xaf   : > { %2177 = vmatprep.subr.mxu1 %v1590_v57  ;;  %2124 = vmatprep.mubr.f32.mxu1 %v2470_v4  ;;  %v1586_v4 = vld [vmem:[%s2812_s1 + $0x428] sm:$0xff] }
  0xb0   : > { %2143 = vmatpush3.msra.mxu0 %v1590_v57  ;;  %2193 = vmatpush3.msra.mxu1 %v1590_v57 }
  0xb1   : > { %2144 = vmatprep.subr.mxu0 %v1589_v36  ;;  %2125 = vmatmul.mubr.f32.gmra.mxu1 %v2479_v7  ;;  %v1585_v7 = vld [vmem:[%s2812_s1 + $0x420] sm:$0xff] }
  0xb2   : > { %2178 = vmatprep.subr.mxu1 %v1589_v36  ;;  %2145 = vmatpush3.msra.mxu0 %v1589_v36 }
  0xb3   : > { %2194 = vmatpush3.msra.mxu1 %v1589_v36  ;;  %2146 = vmatprep.subr.mxu0 %v1588_v37 }
  0xb4   : > { %2179 = vmatprep.subr.mxu1 %v1588_v37  ;;  %2127 = vmatprep.mubr.f32.mxu1 %v2652_v0 }
  0xb5   : > { %2147 = vmatpush3.msra.mxu0 %v1588_v37  ;;  %2195 = vmatpush3.msra.mxu1 %v1588_v37 }
  0xb6   : > { %2148 = vmatprep.subr.mxu0 %v1587_v38  ;;  %2128 = vmatmul.mubr.f32.gmra.mxu1 %v1128_v39 }
  0xb7   : > { %2180 = vmatprep.subr.mxu1 %v1587_v38  ;;  %2149 = vmatpush3.msra.mxu0 %v1587_v38 }
  0xb8   : > { %2196 = vmatpush3.msra.mxu1 %v1587_v38  ;;  %2150 = vmatprep.subr.mxu0 %v1586_v4 }
  0xb9   : > { %2181 = vmatprep.subr.mxu1 %v1586_v4  ;;  %2151 = vmatpush3.msra.mxu0 %v1586_v4 }
  0xba   : > { %2197 = vmatpush3.msra.mxu1 %v1586_v4  ;;  %2152 = vmatprep.subr.mxu0 %v1585_v7 }
  0xbb   : > { %2182 = vmatprep.subr.mxu1 %v1585_v7  ;;  %2153 = vmatpush3.msra.mxu0 %v1585_v7 }
  0xbc   : > { %2198 = vmatpush3.msra.mxu1 %v1585_v7  ;;  %2154 = vmatprep.subr.mxu0 %v1584_v40 }
  0xbd   : > { %2183 = vmatprep.subr.mxu1 %v1584_v40  ;;  %2155 = vmatpush3.msra.mxu0 %v1584_v40 }
  0xbe   : > { %2199 = vmatpush3.msra.mxu1 %v1584_v40  ;;  %2156 = vmatprep.subr.mxu0 %v1583_v41 }
  0xbf   : > { %2184 = vmatprep.subr.mxu1 %v1583_v41  ;;  %2157 = vmatpush3.msra.mxu0 %v1583_v41 }
  0xc0   : > { %2200 = vmatpush3.msra.mxu1 %v1583_v41  ;;  %2158 = vmatprep.subr.mxu0 %v1582_v42 }
  0xc1   : > { %2185 = vmatprep.subr.mxu1 %v1582_v42  ;;  %2159 = vmatpush3.msra.mxu0 %v1582_v42 }
  0xc2   : > { %2201 = vmatpush3.msra.mxu1 %v1582_v42  ;;  %2160 = vmatprep.subr.mxu0 %v1581_v43 }
  0xc3   : > { %2186 = vmatprep.subr.mxu1 %v1581_v43  ;;  %2161 = vmatpush3.msra.mxu0 %v1581_v43 }
  0xc4   : > { %2202 = vmatpush3.msra.mxu1 %v1581_v43  ;;  %2162 = vmatprep.mubr.f32.mxu0 %v2515_v18 }
  0xc5   : > { %2165 = vmatprep.mubr.f32.mxu1 %v2535_v24  ;;  %2163 = vmatmul.mubr.f32.vlgmr.msra.gmra.mxu0 %v2518_v19 }
  0xc6   : > { %2166 = vmatmul.mubr.f32.vlgmr.msra.gmra.mxu1 %v2538_v25 }
  0xc7   : > { %2168 = vmatprep.mubr.f32.mxu1 %v2692_v15 }
  0xca   : > { %2169 = vmatmul.mubr.f32.gmra.mxu1 %v1264_v44 }
  0xed   : > { %v1836_v45 = vpop.f32.mrf.mxu0 }
  0xee   : > { %v1877_v46 = vpop.f32.mrf.mxu1  ;;  %v272_v22 = vadd.f32 %v1836_v45, %v1468_v17 }
  0xef   : > { %v266_v47 = vpop.f32.mrf.mxu0 }
  0xf0   : > { %v396_v50 = vpop.f32.mrf.mxu1  ;;  %v267_v26 = vadd.f32 %v1468_v17, %v266_v47  ;;  %v426_v31 = vadd.f32 %v1877_v46, %v272_v22 }
  0xf2   : > { %v425_v34 = vadd.f32 %v396_v50, %v267_v26 }
  0xfc   : > { %v1839_v49 = vpop.f32.mrf.mxu0 }
  0xfd   : > { %v282_v23 = vadd.f32 %v1839_v49, %v1468_v17 }
  0xfe   : > { %v276_v52 = vpop.f32.mrf.mxu0 }
  0xff   : > { %v277_v29 = vadd.f32 %v1468_v17, %v276_v52 }
 0x101   : > { %v1842_v55 = vpop.f32.mrf.mxu0 }
 0x102   : > { %v292_v32 = vadd.f32 %v1842_v55, %v1468_v17 }
 0x103   : > { %v286_v18 = vpop.f32.mrf.mxu0 }
 0x104   : > { %v287_v51 = vadd.f32 %v1468_v17, %v286_v18 }
 0x108   : > { %v1880_v53 = vpop.f32.mrf.mxu1 }
 0x109   : > { %v428_v33 = vadd.f32 %v1880_v53, %v282_v23 }
 0x10a   : > { %v406_v56 = vpop.f32.mrf.mxu1 }
 0x10b   : > { %v427_v62 = vadd.f32 %v406_v56, %v277_v29 }
 0x10d   : > { %v1883_v58 = vpop.f32.mrf.mxu1 }
 0x10e   : > { %v430_v37 = vadd.f32 %v1883_v58, %v292_v32 }
 0x10f   : > { %v416_v35 = vpop.f32.mrf.mxu1 }
 0x110   : > { %v429_v7 = vadd.f32 %v416_v35, %v287_v51 }
 0x113   : > { %v1918_v24 = vpop.f32.mrf.mxu0 }
 0x114   : > { %v1959_v59 = vpop.f32.mrf.mxu1  ;;  %v562_v1 = vadd.f32 %v1918_v24, %v426_v31 }
 0x115   : > { %v532_v19 = vpop.f32.mrf.mxu0 }
 0x116   : > { %v668_v60 = vpop.f32.mrf.mxu1  ;;  %v561_v57 = vadd.f32 %v532_v19, %v425_v34  ;;  %v698_v40 = vadd.f32 %v1959_v59, %v562_v1 }
 0x118   : > { %v697_v43 = vadd.f32 %v668_v60, %v561_v57 }
 0x119   : > { %v1921_v25 = vpop.f32.mrf.mxu0 }
 0x11a   : > { %v564_v54 = vadd.f32 %v1921_v25, %v428_v33 }
 0x11b   : > { %v542_v61 = vpop.f32.mrf.mxu0 }
 0x11c   : > { %v563_v38 = vadd.f32 %v542_v61, %v427_v62 }
 0x11e   : > { %v1924_v0 = vpop.f32.mrf.mxu0 }
 0x11f   : > { %v566_v41 = vadd.f32 %v1924_v0, %v430_v37 }
 0x120   : > { %v552_v3 = vpop.f32.mrf.mxu0 }
 0x121   : > { %v565_v44 = vadd.f32 %v552_v3, %v429_v7 }
 0x125   : > { %v1962_v63 = vpop.f32.mrf.mxu1 }
 0x126   : > { %v700_v42 = vadd.f32 %v1962_v63, %v564_v54 }
 0x127   : > { %v678_v2 = vpop.f32.mrf.mxu1 }
 0x128   : > { %v699_v45 = vadd.f32 %v678_v2, %v563_v38 }
 0x12a   : > { %v1965_v5 = vpop.f32.mrf.mxu1 }
 0x12b   : > { %v702_v53 = vadd.f32 %v1965_v5, %v566_v41 }
 0x12c   : > { %v688_v8 = vpop.f32.mrf.mxu1 }
 0x12d   : > { %v701_v56 = vadd.f32 %v688_v8, %v565_v44 }
 0x139   : > { %v2000_v6 = vpop.f32.mrf.mxu0 }
 0x13a   : > { %v2041_v9 = vpop.f32.mrf.mxu1  ;;  %v834_v46 = vadd.f32 %v2000_v6, %v698_v40 }
 0x13b   : > { %v804_v10 = vpop.f32.mrf.mxu0 }
 0x13c   : > { %v940_v11 = vpop.f32.mrf.mxu1  ;;  %v833_v49 = vadd.f32 %v804_v10, %v697_v43  ;;  %v970_v18 = vadd.f32 %v2041_v9, %v834_v46 }
 0x13e   : > { %v969_v19 = vadd.f32 %v940_v11, %v833_v49 }
 0x13f   : > { %v2003_v12 = vpop.f32.mrf.mxu0 }
 0x140   : > { %v836_v47 = vadd.f32 %v2003_v12, %v700_v42 }
 0x141   : > { %v814_v14 = vpop.f32.mrf.mxu0 }
 0x142   : > { %v835_v55 = vadd.f32 %v814_v14, %v699_v45 }
 0x144   : > { %v2006_v16 = vpop.f32.mrf.mxu0 }
 0x145   : > { %v838_v58 = vadd.f32 %v2006_v16, %v702_v53 }
 0x146   : > { %v824_v21 = vpop.f32.mrf.mxu0 }
 0x147   : > { %v837_v59 = vadd.f32 %v824_v21, %v701_v56 }
 0x14b   : > { %v2044_v13 = vpop.f32.mrf.mxu1 }
 0x14c   : > { %v972_v24 = vadd.f32 %v2044_v13, %v836_v47 }
 0x14d   : > { %v950_v15 = vpop.f32.mrf.mxu1 }
 0x14e   : > { %v971_v61 = vadd.f32 %v950_v15, %v835_v55 }
 0x150   : > { %v2047_v20 = vpop.f32.mrf.mxu1 }
 0x151   : > { %v974_v2 = vadd.f32 %v2047_v20, %v838_v58 }
 0x152   : > { %v960_v27 = vpop.f32.mrf.mxu1 }
 0x153   : > { %v973_v12 = vadd.f32 %v960_v27, %v837_v59 }
 0x15f   : > { %v2082_v28 = vpop.f32.mrf.mxu0 }
 0x160   : > { %v2123_v30 = vpop.f32.mrf.mxu1  ;;  %v1106_v63 = vadd.f32 %v2082_v28, %v970_v18 }
 0x161   : > { %v1076_v48 = vpop.f32.mrf.mxu0 }
 0x162   : > { %v1212_v36 = vpop.f32.mrf.mxu1  ;;  %v1105_v0 = vadd.f32 %v1076_v48, %v969_v19  ;;  %v1242_v17 = vadd.f32 %v2123_v30, %v1106_v63 }
 0x164   : > { %v1241_v9 = vadd.f32 %v1212_v36, %v1105_v0 }
 0x165   : > { %v2085_v39 = vpop.f32.mrf.mxu0 }
 0x166   : > { %v1108_v60 = vadd.f32 %v2085_v39, %v972_v24 }
 0x167   : > { %v1086_v50 = vpop.f32.mrf.mxu0 }
 0x168   : > { %v1107_v3 = vadd.f32 %v1086_v50, %v971_v61 }
 0x16a   : > { %v2088_v25 = vpop.f32.mrf.mxu0 }
 0x16b   : > { %v1110_v5 = vadd.f32 %v2088_v25, %v974_v2 }
 0x16c   : > { %v1096_v6 = vpop.f32.mrf.mxu0 }
 0x16d   : > { %v1109_v11 = vadd.f32 %v1096_v6, %v973_v12 }
 0x171   : > { %v2126_v4 = vpop.f32.mrf.mxu1 }
 0x172   : > { %v1244_v8 = vadd.f32 %v2126_v4, %v1108_v60 }
 0x173   : > { %v1222_v52 = vpop.f32.mrf.mxu1 }
 0x174   : > { %v1243_v16 = vadd.f32 %v1222_v52, %v1107_v3 }
 0x176   : > { %v2129_v35 = vpop.f32.mrf.mxu1 }
 0x177   : > { %v1246_v26 = vadd.f32 %v2129_v35, %v1110_v5 }
 0x178   : > { %v1232_v10 = vpop.f32.mrf.mxu1 }
 0x179   : > { %v1245_v29 = vadd.f32 %v1232_v10, %v1109_v11 }
 0x185   : > { %v2164_v14 = vpop.f32.mrf.mxu0 }
 0x186   : > { %v2167_v13 = vpop.f32.mrf.mxu1  ;;  %v1378_v22 = vadd.f32 %v2164_v14, %v1242_v17 }
 0x187   : > { %v1380_v21 = vadd.f32 %v2167_v13, %v1244_v8  ;;  %v1348_v15 = vpop.f32.mrf.mxu0 }
 0x188   : > { %v1358_v23 = vpop.f32.mrf.mxu1  ;;  %1384 = vst [vmem:[#allocation2 + $0x10] sm:$0xff] %v1378_v22  ;;  %v1377_v20 = vadd.f32 %v1348_v15, %v1241_v9 }
 0x189   : > { %1386 = vst [vmem:[#allocation2] sm:$0xff] %v1380_v21  ;;  %v1379_v28 = vadd.f32 %v1358_v23, %v1243_v16 }
 0x18a   : > { %v2170_v27 = vpop.f32.mrf.mxu1  ;;  %1383 = vst [vmem:[#allocation2 + $0x28] sm:$0xff] %v1377_v20 }
 0x18b   : > { %1385 = vst [vmem:[#allocation2 + $0x8] sm:$0xff] %v1379_v28  ;;  %v1382_v30 = vadd.f32 %v2170_v27, %v1246_v26 }
 0x18c   : > { %v1368_v31 = vpop.f32.mrf.mxu1 }
 0x18d   : > { %1388 = vst [vmem:[#allocation2 + $0x20] sm:$0xff] %v1382_v30  ;;  %v1381_v32 = vadd.f32 %v1368_v31, %v1245_v29 }
 0x18f   : > { %1387 = vst [vmem:[#allocation2 + $0x18] sm:$0xff] %v1381_v32  ;;  %v1391_v33 = vld [vmem:[#allocation2 + $0x10] sm:$0x3f] }
 0x190   : > { %v1397_v34 = vld [vmem:[#allocation2] sm:$0x3f]  ;;  %1597 = vst [vmem:[%s170_s19 + $0x8] sm:$0x3f] %v1391_v33 }
 0x191   : > { %1599 = vst [vmem:[%s170_s19 + $0x18] sm:$0x3f] %v1397_v34  ;;  %v1389_v48 = vld [vmem:[#allocation2 + $0x28] sm:$0x3f] }
 0x192   : > { %v1394_v51 = vld [vmem:[#allocation2 + $0x8] sm:$0x3f]  ;;  %1390 = vst [vmem:[%s170_s19] sm:$0x3f] %v1389_v48 }
 0x193   : > { %1598 = vst [vmem:[%s170_s19 + $0x10] sm:$0x3f] %v1394_v51 }
 0x194   : > { %v1403_v62 = vld [vmem:[#allocation2 + $0x20] sm:$0x3f] }
 0x195   : > { %1601 = vst [vmem:[%s170_s19 + $0x28] sm:$0x3f] %v1403_v62 }
 0x196   : > { %v1400_v1 = vld [vmem:[#allocation2 + $0x18] sm:$0x3f] }
 0x197   : > { %1600 = vst [vmem:[%s170_s19 + $0x20] sm:$0x3f] %v1400_v1 }
 0x198 PF: > { %s13_s12 = sadd.s32 1, %s2219_s12  }
 0x199   : > { %p10_p4 = scmp.ge.s32.totalorder %s13_s12, 4  }
 0x19b   :  { %12 = sbr.rel (!%p10_p4) target bundleno = 1 (0x1), region = 75 }

// kernel: preconv_forward.12
= control target key start
LH: loop header
LB: loop body
LE: loop exit
PB: predicated region body
PF: predicated region fallthrough
CT: control target
= control target key end

     0   :  { %s1592_s12 = smov 0   ;;  %s2510_s0 = inlined_call_operand.vmem [shape: f32[2,40,128], index: 0, kind: input, shape index: {}]   ;;  %s2511_s1 = inlined_call_operand.vmem [shape: f32[9,128,256], index: 1, kind: input, shape index: {}]   ;;  %s2512_s2 = inlined_call_operand.vmem [shape: f32[1,256], index: 2, kind: input, shape index: {}]   ;;  %s2513_s3 = inlined_call_operand.vmem [shape: f32[2,2,2,256], index: 3, kind: output, shape index: {}]  }
   0x1 LB: > { %s1281_s13 = sadd.s32 4294967295, %s1568_s12   ;;  %p1285_p0 = scmp.ge.s32.totalorder %s1568_s12, 1  ;;  %s1568_s12 = sphi %s1592_s12, %s13_s12  }
   0x2   : > { %p137_p1 = scmp.lt.s32.totalorder %s1568_s12, 3 }
   0x4   : > { %p138_p2 = pnand %p1285_p0, %p137_p1 }
   0x5   : > { %p1703_p3 = scmp.lt.s32.totalorder (!%p138_p2), %s1281_s13, 1 }
   0x6   : > { %141 = sbr.rel (%p138_p2) target bundleno = 390 (0x186), region = 32 }
   0xb   : > { %v203_v0 = vld [vmem:[%s2511_s1 + $0xf8] sm:$0xff]  ;;  %v202_v1 = vld [vmem:[%s2511_s1 + $0xf0] sm:$0xff]  ;;  %v201_v2 = vld [vmem:[%s2511_s1 + $0xe8] sm:$0xff]  ;;  %v1570_v4 = vmov 0.0   ;;  %s2516_s13 = smov (!%p1703_p3, %s1281_s13), 1  ;;  %vm1212_vm0 = vcmask 1040384  }
   0xc   : > { %216 = vmatprep.subr.mxu0 %v203_v0  ;;  %v200_v3 = vld [vmem:[%s2511_s1 + $0xe0] sm:$0xff]  ;;  %280 = vmatprep.mubr.f32.mxu0 %v1570_v4  ;;  %v199_v5 = vld [vmem:[%s2511_s1 + $0xd8] sm:$0xff]  ;;  %v198_v6 = vld [vmem:[%s2511_s1 + $0xd0] sm:$0xff]  ;;  %s1551_s9 = smul.u32 40, %s2516_s13  ;;  %vm1213_vm1 = vcmask 1042434   ;;  %vm1215_vm3 = vcmask 1044484  }
   0xd   : > { %217 = vmatpush1.msra.mxu0 %v202_v1  ;;  %389 = vmatprep.mubr.f32.mxu1 %v1570_v4  ;;  %v1320_v7 = vld [vmem:[%s2511_s1 + $0x1f8] sm:$0xff]  ;;  %v197_v8 = vld [vmem:[%s2511_s1 + $0xc8] sm:$0xff]  ;;  %v1319_v9 = vld [vmem:[%s2511_s1 + $0x1f0] sm:$0xff]  ;;  %vm1217_vm5 = vcmask 1046534  }
   0xe   : > { %218 = vmatprep.subr.mxu0 %v201_v2  ;;  %325 = vmatprep.subr.mxu1 %v1320_v7  ;;  %v196_v10 = vld [vmem:[%s2511_s1 + $0xc0] sm:$0xff]  ;;  %v1318_v11 = vld [vmem:[%s2511_s1 + $0x1e8] sm:$0xff]  ;;  %v195_v13 = vld [vmem:[%s2511_s1 + $0xb8] sm:$0xff]  ;;  %s1786_s30 = scalar_lea.vmem %s2510_s0, %s1551_s9 }
   0xf   : > { %219 = vmatpush1.msra.mxu0 %v200_v3  ;;  %326 = vmatpush1.msra.mxu1 %v1319_v9  ;;  %v1317_v12 = vld [vmem:[%s2511_s1 + $0x1e0] sm:$0xff]  ;;  %v1316_v14 = vld [vmem:[%s2511_s1 + $0x1d8] sm:$0xff]  ;;  %v194_v15 = vld [vmem:[%s2511_s1 + $0xb0] sm:$0xff] }
  0x10   : > { %220 = vmatprep.subr.mxu0 %v199_v5  ;;  %327 = vmatprep.subr.mxu1 %v1318_v11  ;;  %v1315_v16 = vld [vmem:[%s2511_s1 + $0x1d0] sm:$0xff]  ;;  %v1314_v17 = vld [vmem:[%s2511_s1 + $0x1c8] sm:$0xff]  ;;  %v1313_v19 = vld [vmem:[%s2511_s1 + $0x1c0] sm:$0xff] }
  0x11   : > { %221 = vmatpush1.msra.mxu0 %v198_v6  ;;  %328 = vmatpush1.msra.mxu1 %v1317_v12  ;;  %v193_v18 = vld [vmem:[%s2511_s1 + $0xa8] sm:$0xff]  ;;  %v192_v20 = vld [vmem:[%s2511_s1 + $0xa0] sm:$0xff]  ;;  %v1312_v21 = vld [vmem:[%s2511_s1 + $0x1b8] sm:$0xff] }
  0x12   : > { %222 = vmatprep.subr.mxu0 %v197_v8  ;;  %329 = vmatprep.subr.mxu1 %v1316_v14  ;;  %v191_v22 = vld [vmem:[%s2511_s1 + $0x98] sm:$0xff]  ;;  %v1311_v23 = vld [vmem:[%s2511_s1 + $0x1b0] sm:$0xff]  ;;  %v1310_v25 = vld [vmem:[%s2511_s1 + $0x1a8] sm:$0xff] }
  0x13   : > { %223 = vmatpush1.msra.mxu0 %v196_v10  ;;  %330 = vmatpush1.msra.mxu1 %v1315_v16  ;;  %v190_v24 = vld [vmem:[%s2511_s1 + $0x90] sm:$0xff]  ;;  %v189_v26 = vld [vmem:[%s2511_s1 + $0x88] sm:$0xff]  ;;  %v1309_v27 = vld [vmem:[%s2511_s1 + $0x1a0] sm:$0xff] }
  0x14   : > { %224 = vmatprep.subr.mxu0 %v195_v13  ;;  %331 = vmatprep.subr.mxu1 %v1314_v17  ;;  %v188_v28 = vld [vmem:[%s2511_s1 + $0x80] sm:$0xff]  ;;  %v1308_v29 = vld [vmem:[%s2511_s1 + $0x198] sm:$0xff]  ;;  %v1307_v31 = vld [vmem:[%s2511_s1 + $0x190] sm:$0xff] }
  0x15   : > { %225 = vmatpush1.msra.mxu0 %v194_v15  ;;  %332 = vmatpush1.msra.mxu1 %v1313_v19  ;;  %v187_v30 = vld [vmem:[%s2511_s1 + $0x78] sm:$0xff]  ;;  %v186_v32 = vld [vmem:[%s2511_s1 + $0x70] sm:$0xff]  ;;  %v1306_v33 = vld [vmem:[%s2511_s1 + $0x188] sm:$0xff] }
  0x16   : > { %226 = vmatprep.subr.mxu0 %v193_v18  ;;  %333 = vmatprep.subr.mxu1 %v1312_v21  ;;  %v185_v34 = vld [vmem:[%s2511_s1 + $0x68] sm:$0xff]  ;;  %v1305_v35 = vld [vmem:[%s2511_s1 + $0x180] sm:$0xff]  ;;  %v1304_v37 = vld [vmem:[%s2511_s1 + $0x178] sm:$0xff] }
  0x17   : > { %227 = vmatpush1.msra.mxu0 %v192_v20  ;;  %334 = vmatpush1.msra.mxu1 %v1311_v23  ;;  %v184_v36 = vld [vmem:[%s2511_s1 + $0x60] sm:$0xff]  ;;  %v183_v38 = vld [vmem:[%s2511_s1 + $0x58] sm:$0xff]  ;;  %v1303_v39 = vld [vmem:[%s2511_s1 + $0x170] sm:$0xff] }
  0x18   : > { %228 = vmatprep.subr.mxu0 %v191_v22  ;;  %335 = vmatprep.subr.mxu1 %v1310_v25  ;;  %v182_v40 = vld [vmem:[%s2511_s1 + $0x50] sm:$0xff]  ;;  %v1302_v41 = vld [vmem:[%s2511_s1 + $0x168] sm:$0xff]  ;;  %v1301_v43 = vld [vmem:[%s2511_s1 + $0x160] sm:$0xff] }
  0x19   : > { %229 = vmatpush1.msra.mxu0 %v190_v24  ;;  %336 = vmatpush1.msra.mxu1 %v1309_v27  ;;  %v181_v42 = vld [vmem:[%s2511_s1 + $0x48] sm:$0xff]  ;;  %v180_v44 = vld [vmem:[%s2511_s1 + $0x40] sm:$0xff]  ;;  %v1300_v45 = vld [vmem:[%s2511_s1 + $0x158] sm:$0xff] }
  0x1a   : > { %230 = vmatprep.subr.mxu0 %v189_v26  ;;  %337 = vmatprep.subr.mxu1 %v1308_v29  ;;  %v179_v46 = vld [vmem:[%s2511_s1 + $0x38] sm:$0xff]  ;;  %v1299_v47 = vld [vmem:[%s2511_s1 + $0x150] sm:$0xff]  ;;  %v1298_v49 = vld [vmem:[%s2511_s1 + $0x148] sm:$0xff] }
  0x1b   : > { %231 = vmatpush1.msra.mxu0 %v188_v28  ;;  %338 = vmatpush1.msra.mxu1 %v1307_v31  ;;  %v178_v48 = vld [vmem:[%s2511_s1 + $0x30] sm:$0xff]  ;;  %v177_v50 = vld [vmem:[%s2511_s1 + $0x28] sm:$0xff]  ;;  %v1297_v51 = vld [vmem:[%s2511_s1 + $0x140] sm:$0xff] }
  0x1c   : > { %232 = vmatprep.subr.mxu0 %v187_v30  ;;  %339 = vmatprep.subr.mxu1 %v1306_v33  ;;  %v176_v52 = vld [vmem:[%s2511_s1 + $0x20] sm:$0xff]  ;;  %v1296_v53 = vld [vmem:[%s2511_s1 + $0x138] sm:$0xff]  ;;  %v1295_v55 = vld [vmem:[%s2511_s1 + $0x130] sm:$0xff] }
  0x1d   : > { %233 = vmatpush1.msra.mxu0 %v186_v32  ;;  %340 = vmatpush1.msra.mxu1 %v1305_v35  ;;  %v175_v54 = vld [vmem:[%s2511_s1 + $0x18] sm:$0xff]  ;;  %v174_v56 = vld [vmem:[%s2511_s1 + $0x10] sm:$0xff]  ;;  %v1294_v57 = vld [vmem:[%s2511_s1 + $0x128] sm:$0xff] }
  0x1e   : > { %234 = vmatprep.subr.mxu0 %v185_v34  ;;  %341 = vmatprep.subr.mxu1 %v1304_v37  ;;  %v173_v58 = vld [vmem:[%s2511_s1 + $0x8] sm:$0xff]  ;;  %v1293_v59 = vld [vmem:[%s2511_s1 + $0x120] sm:$0xff]  ;;  %v1292_v61 = vld [vmem:[%s2511_s1 + $0x118] sm:$0xff] }
  0x1f   : > { %235 = vmatpush1.msra.mxu0 %v184_v36  ;;  %342 = vmatpush1.msra.mxu1 %v1303_v39  ;;  %v172_v60 = vld [vmem:[%s2511_s1] sm:$0xff]  ;;  %v1352_v63 = vld [vmem:[%s2511_s1 + $0x2f8] sm:$0xff]  ;;  %v1351_v0 = vld [vmem:[%s2511_s1 + $0x2f0] sm:$0xff] }
  0x20   : > { %236 = vmatprep.subr.mxu0 %v183_v38  ;;  %343 = vmatprep.subr.mxu1 %v1302_v41  ;;  %v171_v62 = vld [vmem:[%s1786_s30] sm:$0xff]  ;;  %v1291_v1 = vld [vmem:[%s2511_s1 + $0x110] sm:$0xff]  ;;  %v1350_v2 = vld [vmem:[%s2511_s1 + $0x2e8] sm:$0xff] }
  0x21   : > { %237 = vmatpush1.msra.mxu0 %v182_v40  ;;  %344 = vmatpush1.msra.mxu1 %v1301_v43  ;;  %v1290_v3 = vld [vmem:[%s2511_s1 + $0x108] sm:$0xff]  ;;  %v1349_v5 = vld [vmem:[%s2511_s1 + $0x2e0] sm:$0xff]  ;;  %v1348_v7 = vld [vmem:[%s2511_s1 + $0x2d8] sm:$0xff] }
  0x22   : > { %238 = vmatprep.subr.mxu0 %v181_v42  ;;  %345 = vmatprep.subr.mxu1 %v1300_v45  ;;  %v1289_v6 = vld [vmem:[%s2511_s1 + $0x100] sm:$0xff]  ;;  %v291_v8 = vld [vmem:[%s1786_s30 + $0x9] sm:$0xff]  ;;  %v1384_v10 = vld [vmem:[%s2511_s1 + $0x3f8] sm:$0xff] }
  0x23   : > { %239 = vmatpush1.msra.mxu0 %v180_v44  ;;  %346 = vmatpush1.msra.mxu1 %v1299_v47  ;;  %v1347_v9 = vld [vmem:[%s2511_s1 + $0x2d0] sm:$0xff]  ;;  %v1346_v11 = vld [vmem:[%s2511_s1 + $0x2c8] sm:$0xff]  ;;  %v1345_v13 = vld [vmem:[%s2511_s1 + $0x2c0] sm:$0xff] }
  0x24   : > { %240 = vmatprep.subr.mxu0 %v179_v46  ;;  %347 = vmatprep.subr.mxu1 %v1298_v49  ;;  %v1383_v12 = vld [vmem:[%s2511_s1 + $0x3f0] sm:$0xff]  ;;  %v1382_v14 = vld [vmem:[%s2511_s1 + $0x3e8] sm:$0xff]  ;;  %v1344_v15 = vld [vmem:[%s2511_s1 + $0x2b8] sm:$0xff] }
  0x25   : > { %241 = vmatpush1.msra.mxu0 %v178_v48  ;;  %348 = vmatpush1.msra.mxu1 %v1297_v51  ;;  %v1381_v16 = vld [vmem:[%s2511_s1 + $0x3e0] sm:$0xff]  ;;  %v1343_v17 = vld [vmem:[%s2511_s1 + $0x2b0] sm:$0xff]  ;;  %v1380_v18 = vld [vmem:[%s2511_s1 + $0x3d8] sm:$0xff] }
  0x26   : > { %242 = vmatprep.subr.mxu0 %v177_v50  ;;  %349 = vmatprep.subr.mxu1 %v1296_v53  ;;  %v1342_v19 = vld [vmem:[%s2511_s1 + $0x2a8] sm:$0xff]  ;;  %v1379_v20 = vld [vmem:[%s2511_s1 + $0x3d0] sm:$0xff]  ;;  %v1341_v21 = vld [vmem:[%s2511_s1 + $0x2a0] sm:$0xff] }
  0x27   : > { %243 = vmatpush1.msra.mxu0 %v176_v52  ;;  %350 = vmatpush1.msra.mxu1 %v1295_v55  ;;  %v1378_v22 = vld [vmem:[%s2511_s1 + $0x3c8] sm:$0xff]  ;;  %v1340_v23 = vld [vmem:[%s2511_s1 + $0x298] sm:$0xff]  ;;  %v1377_v24 = vld [vmem:[%s2511_s1 + $0x3c0] sm:$0xff] }
  0x28   : > { %244 = vmatprep.subr.mxu0 %v175_v54  ;;  %351 = vmatprep.subr.mxu1 %v1294_v57  ;;  %v1339_v25 = vld [vmem:[%s2511_s1 + $0x290] sm:$0xff]  ;;  %v1376_v26 = vld [vmem:[%s2511_s1 + $0x3b8] sm:$0xff]  ;;  %v1338_v27 = vld [vmem:[%s2511_s1 + $0x288] sm:$0xff] }
  0x29   : > { %245 = vmatpush1.msra.mxu0 %v174_v56  ;;  %352 = vmatpush1.msra.mxu1 %v1293_v59  ;;  %v1375_v28 = vld [vmem:[%s2511_s1 + $0x3b0] sm:$0xff]  ;;  %v1337_v29 = vld [vmem:[%s2511_s1 + $0x280] sm:$0xff]  ;;  %v1374_v30 = vld [vmem:[%s2511_s1 + $0x3a8] sm:$0xff] }
  0x2a   : > { %246 = vmatprep.subr.mxu0 %v173_v58  ;;  %353 = vmatprep.subr.mxu1 %v1292_v61  ;;  %v1336_v31 = vld [vmem:[%s2511_s1 + $0x278] sm:$0xff]  ;;  %v1373_v32 = vld [vmem:[%s2511_s1 + $0x3a0] sm:$0xff]  ;;  %v1335_v33 = vld [vmem:[%s2511_s1 + $0x270] sm:$0xff] }
  0x2b   : > { %247 = vmatpush1.msra.mxu0 %v172_v60  ;;  %354 = vmatpush1.msra.mxu1 %v1291_v1  ;;  %v1372_v34 = vld [vmem:[%s2511_s1 + $0x398] sm:$0xff]  ;;  %v1334_v35 = vld [vmem:[%s2511_s1 + $0x268] sm:$0xff]  ;;  %v1371_v36 = vld [vmem:[%s2511_s1 + $0x390] sm:$0xff] }
  0x2c   : > { %281 = vmatmul.mubr.f32.vlgmr.msra.gmra.mxu0 %v171_v62  ;;  %436 = vmatprep.subr.mxu0 %v1352_v63  ;;  %v1333_v37 = vld [vmem:[%s2511_s1 + $0x260] sm:$0xff]  ;;  %v1370_v38 = vld [vmem:[%s2511_s1 + $0x388] sm:$0xff]  ;;  %v1332_v39 = vld [vmem:[%s2511_s1 + $0x258] sm:$0xff] }
  0x2d   : > { %437 = vmatpush1.msra.mxu0 %v1351_v0  ;;  %355 = vmatprep.subr.mxu1 %v1290_v3  ;;  %v1369_v40 = vld [vmem:[%s2511_s1 + $0x380] sm:$0xff]  ;;  %v1331_v41 = vld [vmem:[%s2511_s1 + $0x250] sm:$0xff]  ;;  %v1368_v42 = vld [vmem:[%s2511_s1 + $0x378] sm:$0xff] }
  0x2e   : > { %438 = vmatprep.subr.mxu0 %v1350_v2  ;;  %356 = vmatpush1.msra.mxu1 %v1289_v6  ;;  %v1330_v43 = vld [vmem:[%s2511_s1 + $0x248] sm:$0xff]  ;;  %v1367_v44 = vld [vmem:[%s2511_s1 + $0x370] sm:$0xff]  ;;  %v1329_v45 = vld [vmem:[%s2511_s1 + $0x240] sm:$0xff] }
  0x2f   : > { %439 = vmatpush1.msra.mxu0 %v1349_v5  ;;  %390 = vmatmul.mubr.f32.vlgmr.msra.gmra.mxu1 %v291_v8  ;;  %v1366_v46 = vld [vmem:[%s2511_s1 + $0x368] sm:$0xff]  ;;  %v1328_v47 = vld [vmem:[%s2511_s1 + $0x238] sm:$0xff]  ;;  %v1365_v48 = vld [vmem:[%s2511_s1 + $0x360] sm:$0xff] }
  0x30   : > { %440 = vmatprep.subr.mxu0 %v1348_v7  ;;  %547 = vmatprep.subr.mxu1 %v1384_v10  ;;  %v1327_v49 = vld [vmem:[%s2511_s1 + $0x230] sm:$0xff]  ;;  %v1364_v50 = vld [vmem:[%s2511_s1 + $0x358] sm:$0xff]  ;;  %v1326_v51 = vld [vmem:[%s2511_s1 + $0x228] sm:$0xff] }
  0x31   : > { %441 = vmatpush1.msra.mxu0 %v1347_v9  ;;  %548 = vmatpush1.msra.mxu1 %v1383_v12  ;;  %v1325_v52 = vld [vmem:[%s2511_s1 + $0x220] sm:$0xff]  ;;  %v1363_v53 = vld [vmem:[%s2511_s1 + $0x350] sm:$0xff]  ;;  %v1324_v54 = vld [vmem:[%s2511_s1 + $0x218] sm:$0xff] }
  0x32   : > { %442 = vmatprep.subr.mxu0 %v1346_v11  ;;  %549 = vmatprep.subr.mxu1 %v1382_v14  ;;  %v1362_v55 = vld [vmem:[%s2511_s1 + $0x348] sm:$0xff]  ;;  %v1323_v56 = vld [vmem:[%s2511_s1 + $0x210] sm:$0xff]  ;;  %v1361_v57 = vld [vmem:[%s2511_s1 + $0x340] sm:$0xff] }
  0x33   : > { %443 = vmatpush1.msra.mxu0 %v1345_v13  ;;  %550 = vmatpush1.msra.mxu1 %v1381_v16  ;;  %v1322_v58 = vld [vmem:[%s2511_s1 + $0x208] sm:$0xff]  ;;  %v1360_v59 = vld [vmem:[%s2511_s1 + $0x338] sm:$0xff]  ;;  %v1321_v60 = vld [vmem:[%s2511_s1 + $0x200] sm:$0xff] }
  0x34   : > { %444 = vmatprep.subr.mxu0 %v1344_v15  ;;  %551 = vmatprep.subr.mxu1 %v1380_v18  ;;  %v1359_v61 = vld [vmem:[%s2511_s1 + $0x330] sm:$0xff]  ;;  %v402_v62 = vld [vmem:[%s1786_s30 + $0x1] sm:$0xff]  ;;  %v1416_v63 = vld [vmem:[%s2511_s1 + $0x4f8] sm:$0xff] }
  0x35   : > { %445 = vmatpush1.msra.mxu0 %v1343_v17  ;;  %552 = vmatpush1.msra.mxu1 %v1379_v20  ;;  %v1415_v0 = vld [vmem:[%s2511_s1 + $0x4f0] sm:$0xff]  ;;  %v1358_v1 = vld [vmem:[%s2511_s1 + $0x328] sm:$0xff]  ;;  %v1357_v3 = vld [vmem:[%s2511_s1 + $0x320] sm:$0xff] }
  0x36   : > { %446 = vmatprep.subr.mxu0 %v1342_v19  ;;  %553 = vmatprep.subr.mxu1 %v1378_v22  ;;  %v1414_v2 = vld [vmem:[%s2511_s1 + $0x4e8] sm:$0xff]  ;;  %v1413_v5 = vld [vmem:[%s2511_s1 + $0x4e0] sm:$0xff]  ;;  %v1356_v6 = vld [vmem:[%s2511_s1 + $0x318] sm:$0xff] }
  0x37   : > { %447 = vmatpush1.msra.mxu0 %v1341_v21  ;;  %554 = vmatpush1.msra.mxu1 %v1377_v24  ;;  %v1412_v7 = vld [vmem:[%s2511_s1 + $0x4d8] sm:$0xff]  ;;  %v1355_v8 = vld [vmem:[%s2511_s1 + $0x310] sm:$0xff]  ;;  %v1354_v10 = vld [vmem:[%s2511_s1 + $0x308] sm:$0xff] }
  0x38   : > { %448 = vmatprep.subr.mxu0 %v1340_v23  ;;  %555 = vmatprep.subr.mxu1 %v1376_v26  ;;  %v1411_v9 = vld [vmem:[%s2511_s1 + $0x4d0] sm:$0xff]  ;;  %v1410_v11 = vld [vmem:[%s2511_s1 + $0x4c8] sm:$0xff]  ;;  %v1353_v12 = vld [vmem:[%s2511_s1 + $0x300] sm:$0xff] }
  0x39   : > { %449 = vmatpush1.msra.mxu0 %v1339_v25  ;;  %556 = vmatpush1.msra.mxu1 %v1375_v28  ;;  %v1409_v13 = vld [vmem:[%s2511_s1 + $0x4c0] sm:$0xff]  ;;  %v1408_v14 = vld [vmem:[%s2511_s1 + $0x4b8] sm:$0xff]  ;;  %v1407_v16 = vld [vmem:[%s2511_s1 + $0x4b0] sm:$0xff] }
  0x3a   : > { %450 = vmatprep.subr.mxu0 %v1338_v27  ;;  %557 = vmatprep.subr.mxu1 %v1374_v30  ;;  %v513_v15 = vld [vmem:[%s1786_s30 + $0x12] sm:$0xff]  ;;  %v1406_v18 = vld [vmem:[%s2511_s1 + $0x4a8] sm:$0xff]  ;;  %v1405_v20 = vld [vmem:[%s2511_s1 + $0x4a0] sm:$0xff] }
  0x3b   : > { %451 = vmatpush1.msra.mxu0 %v1337_v29  ;;  %558 = vmatpush1.msra.mxu1 %v1373_v32  ;;  %v1448_v17 = vld [vmem:[%s2511_s1 + $0x5f8] sm:$0xff]  ;;  %v1447_v19 = vld [vmem:[%s2511_s1 + $0x5f0] sm:$0xff]  ;;  %v1446_v21 = vld [vmem:[%s2511_s1 + $0x5e8] sm:$0xff] }
  0x3c   : > { %452 = vmatprep.subr.mxu0 %v1336_v31  ;;  %559 = vmatprep.subr.mxu1 %v1372_v34  ;;  %v1404_v22 = vld [vmem:[%s2511_s1 + $0x498] sm:$0xff]  ;;  %v1445_v23 = vld [vmem:[%s2511_s1 + $0x5e0] sm:$0xff]  ;;  %v1403_v24 = vld [vmem:[%s2511_s1 + $0x490] sm:$0xff] }
  0x3d   : > { %453 = vmatpush1.msra.mxu0 %v1335_v33  ;;  %560 = vmatpush1.msra.mxu1 %v1371_v36  ;;  %v1444_v25 = vld [vmem:[%s2511_s1 + $0x5d8] sm:$0xff]  ;;  %v1402_v26 = vld [vmem:[%s2511_s1 + $0x488] sm:$0xff]  ;;  %v1443_v27 = vld [vmem:[%s2511_s1 + $0x5d0] sm:$0xff] }
  0x3e   : > { %454 = vmatprep.subr.mxu0 %v1334_v35  ;;  %561 = vmatprep.subr.mxu1 %v1370_v38  ;;  %v1401_v28 = vld [vmem:[%s2511_s1 + $0x480] sm:$0xff]  ;;  %v1442_v29 = vld [vmem:[%s2511_s1 + $0x5c8] sm:$0xff]  ;;  %v1400_v30 = vld [vmem:[%s2511_s1 + $0x478] sm:$0xff] }
  0x3f   : > { %455 = vmatpush1.msra.mxu0 %v1333_v37  ;;  %562 = vmatpush1.msra.mxu1 %v1369_v40  ;;  %v1441_v31 = vld [vmem:[%s2511_s1 + $0x5c0] sm:$0xff]  ;;  %v1399_v32 = vld [vmem:[%s2511_s1 + $0x470] sm:$0xff]  ;;  %v1440_v33 = vld [vmem:[%s2511_s1 + $0x5b8] sm:$0xff] }
  0x40   : > { %456 = vmatprep.subr.mxu0 %v1332_v39  ;;  %563 = vmatprep.subr.mxu1 %v1368_v42  ;;  %v1398_v34 = vld [vmem:[%s2511_s1 + $0x468] sm:$0xff]  ;;  %v1439_v35 = vld [vmem:[%s2511_s1 + $0x5b0] sm:$0xff]  ;;  %v1397_v36 = vld [vmem:[%s2511_s1 + $0x460] sm:$0xff] }
  0x41   : > { %457 = vmatpush1.msra.mxu0 %v1331_v41  ;;  %564 = vmatpush1.msra.mxu1 %v1367_v44  ;;  %v1438_v37 = vld [vmem:[%s2511_s1 + $0x5a8] sm:$0xff]  ;;  %v1396_v38 = vld [vmem:[%s2511_s1 + $0x458] sm:$0xff]  ;;  %v1437_v39 = vld [vmem:[%s2511_s1 + $0x5a0] sm:$0xff] }
  0x42   : > { %458 = vmatprep.subr.mxu0 %v1330_v43  ;;  %565 = vmatprep.subr.mxu1 %v1366_v46  ;;  %v1395_v40 = vld [vmem:[%s2511_s1 + $0x450] sm:$0xff]  ;;  %v1436_v41 = vld [vmem:[%s2511_s1 + $0x598] sm:$0xff]  ;;  %v1394_v42 = vld [vmem:[%s2511_s1 + $0x448] sm:$0xff] }
  0x43   : > { %459 = vmatpush1.msra.mxu0 %v1329_v45  ;;  %566 = vmatpush1.msra.mxu1 %v1365_v48  ;;  %v1435_v43 = vld [vmem:[%s2511_s1 + $0x590] sm:$0xff]  ;;  %v1393_v44 = vld [vmem:[%s2511_s1 + $0x440] sm:$0xff]  ;;  %v1434_v45 = vld [vmem:[%s2511_s1 + $0x588] sm:$0xff] }
  0x44   : > { %460 = vmatprep.subr.mxu0 %v1328_v47  ;;  %567 = vmatprep.subr.mxu1 %v1364_v50  ;;  %v1392_v46 = vld [vmem:[%s2511_s1 + $0x438] sm:$0xff]  ;;  %v1433_v47 = vld [vmem:[%s2511_s1 + $0x580] sm:$0xff]  ;;  %v1391_v48 = vld [vmem:[%s2511_s1 + $0x430] sm:$0xff] }
  0x45   : > { %461 = vmatpush1.msra.mxu0 %v1327_v49  ;;  %500 = vmatprep.mubr.f32.mxu0 %v1570_v4  ;;  %v1432_v49 = vld [vmem:[%s2511_s1 + $0x578] sm:$0xff]  ;;  %v1390_v50 = vld [vmem:[%s2511_s1 + $0x428] sm:$0xff]  ;;  %vm1214_vm2 = vmor %vm1212_vm0, %vm1213_vm1 }
  0x46   : > { %462 = vmatprep.subr.mxu0 %v1326_v51  ;;  %568 = vmatpush1.msra.mxu1 %v1363_v53  ;;  %v1431_v51 = vld [vmem:[%s2511_s1 + $0x570] sm:$0xff]  ;;  %v1430_v53 = vld [vmem:[%s2511_s1 + $0x568] sm:$0xff]  ;;  %vm1216_vm4 = vmor %vm1214_vm2, %vm1215_vm3 }
  0x47   : > { %463 = vmatpush1.msra.mxu0 %v1325_v52  ;;  %569 = vmatprep.subr.mxu1 %v1362_v55  ;;  %v1389_v52 = vld [vmem:[%s2511_s1 + $0x420] sm:$0xff]  ;;  %vm1218_vm6 = vmor %vm1216_vm4, %vm1217_vm5 }
  0x48   : > { %464 = vmatprep.subr.mxu0 %v1324_v54  ;;  %570 = vmatpush1.msra.mxu1 %v1361_v57  ;;  %v1388_v54 = vld [vmem:[%s2511_s1 + $0x418] sm:$0xff]  ;;  %v1429_v55 = vld [vmem:[%s2511_s1 + $0x560] sm:$0xff] }
  0x49   : > { %465 = vmatpush1.msra.mxu0 %v1323_v56  ;;  %571 = vmatprep.subr.mxu1 %v1360_v59  ;;  %v1387_v56 = vld [vmem:[%s2511_s1 + $0x410] sm:$0xff]  ;;  %v1428_v57 = vld [vmem:[%s2511_s1 + $0x558] sm:$0xff]  ;;  %v1385_v59 = vld [vmem:[%s2511_s1 + $0x400] sm:$0xff] }
  0x4a   : > { %466 = vmatprep.subr.mxu0 %v1322_v58  ;;  %572 = vmatpush1.msra.mxu1 %v1359_v61  ;;  %v1386_v58 = vld [vmem:[%s2511_s1 + $0x408] sm:$0xff]  ;;  %v624_v61 = vld [vmem:[%s1786_s30 + $0x1b] sm:$0xff] }
  0x4b   : > { %467 = vmatpush1.msra.mxu0 %v1321_v60  ;;  %573 = vmatprep.subr.mxu1 %v1358_v1  ;;  %v1427_v60 = vld [vmem:[%s2511_s1 + $0x550] sm:$0xff] }
  0x4c   : > { %501 = vmatmul.mubr.f32.vlgmr.msra.gmra.mxu0 %v402_v62  ;;  %658 = vmatprep.subr.mxu0 %v1416_v63  ;;  %v1426_v62 = vld [vmem:[%s2511_s1 + $0x548] sm:$0xff]  ;;  %v1480_v63 = vld [vmem:[%s2511_s1 + $0x6f8] sm:$0xff]  ;;  %v1479_v1 = vld [vmem:[%s2511_s1 + $0x6f0] sm:$0xff] }
  0x4d   : > { %659 = vmatpush1.msra.mxu0 %v1415_v0  ;;  %574 = vmatpush1.msra.mxu1 %v1357_v3  ;;  %v1425_v0 = vld [vmem:[%s2511_s1 + $0x540] sm:$0xff]  ;;  %v1478_v3 = vld [vmem:[%s2511_s1 + $0x6e8] sm:$0xff] }
  0x4e   : > { %660 = vmatprep.subr.mxu0 %v1414_v2  ;;  %575 = vmatprep.subr.mxu1 %v1356_v6  ;;  %v1424_v2 = vld [vmem:[%s2511_s1 + $0x538] sm:$0xff]  ;;  %v1477_v6 = vld [vmem:[%s2511_s1 + $0x6e0] sm:$0xff] }
  0x4f   : > { %661 = vmatpush1.msra.mxu0 %v1413_v5  ;;  %576 = vmatpush1.msra.mxu1 %v1355_v8  ;;  %v1423_v5 = vld [vmem:[%s2511_s1 + $0x530] sm:$0xff]  ;;  %v1476_v8 = vld [vmem:[%s2511_s1 + $0x6d8] sm:$0xff] }
  0x50   : > { %662 = vmatprep.subr.mxu0 %v1412_v7  ;;  %577 = vmatprep.subr.mxu1 %v1354_v10  ;;  %v1422_v7 = vld [vmem:[%s2511_s1 + $0x528] sm:$0xff]  ;;  %v1475_v10 = vld [vmem:[%s2511_s1 + $0x6d0] sm:$0xff] }
  0x51   : > { %663 = vmatpush1.msra.mxu0 %v1411_v9  ;;  %578 = vmatpush1.msra.mxu1 %v1353_v12  ;;  %v1421_v9 = vld [vmem:[%s2511_s1 + $0x520] sm:$0xff]  ;;  %v1474_v12 = vld [vmem:[%s2511_s1 + $0x6c8] sm:$0xff] }
  0x52   : > { %664 = vmatprep.subr.mxu0 %v1410_v11  ;;  %611 = vmatprep.mubr.f32.mxu1 %v1570_v4  ;;  %v1420_v11 = vld [vmem:[%s2511_s1 + $0x518] sm:$0xff] }
  0x53   : > { %665 = vmatpush1.msra.mxu0 %v1409_v13  ;;  %612 = vmatmul.mubr.f32.vlgmr.msra.gmra.mxu1 %v513_v15  ;;  %v1419_v13 = vld [vmem:[%s2511_s1 + $0x510] sm:$0xff]  ;;  %v1418_v15 = vld [vmem:[%s2511_s1 + $0x508] sm:$0xff] }
  0x54   : > { %666 = vmatprep.subr.mxu0 %v1408_v14  ;;  %769 = vmatprep.subr.mxu1 %v1448_v17  ;;  %v1473_v14 = vld [vmem:[%s2511_s1 + $0x6c0] sm:$0xff] }
  0x55   : > { %667 = vmatpush1.msra.mxu0 %v1407_v16  ;;  %770 = vmatpush1.msra.mxu1 %v1447_v19  ;;  %v1472_v16 = vld [vmem:[%s2511_s1 + $0x6b8] sm:$0xff]  ;;  %v1417_v17 = vld [vmem:[%s2511_s1 + $0x500] sm:$0xff] }
  0x56   : > { %668 = vmatprep.subr.mxu0 %v1406_v18  ;;  %771 = vmatprep.subr.mxu1 %v1446_v21  ;;  %v1471_v18 = vld [vmem:[%s2511_s1 + $0x6b0] sm:$0xff]  ;;  %v1512_v21 = vld [vmem:[%s2511_s1 + $0x7f8] sm:$0xff] }
  0x57   : > { %669 = vmatpush1.msra.mxu0 %v1405_v20  ;;  %772 = vmatpush1.msra.mxu1 %v1445_v23  ;;  %v735_v19 = vld [vmem:[%s1786_s30 + $0x13] sm:$0xff]  ;;  %v1470_v20 = vld [vmem:[%s2511_s1 + $0x6a8] sm:$0xff] }
  0x58   : > { %670 = vmatprep.subr.mxu0 %v1404_v22  ;;  %773 = vmatprep.subr.mxu1 %v1444_v25  ;;  %v1469_v22 = vld [vmem:[%s2511_s1 + $0x6a0] sm:$0xff]  ;;  %v1511_v23 = vld [vmem:[%s2511_s1 + $0x7f0] sm:$0xff]  ;;  %v1510_v25 = vld [vmem:[%s2511_s1 + $0x7e8] sm:$0xff] }
  0x59   : > { %671 = vmatpush1.msra.mxu0 %v1403_v24  ;;  %774 = vmatpush1.msra.mxu1 %v1443_v27  ;;  %v1468_v24 = vld [vmem:[%s2511_s1 + $0x698] sm:$0xff]  ;;  %v1509_v27 = vld [vmem:[%s2511_s1 + $0x7e0] sm:$0xff] }
  0x5a   : > { %672 = vmatprep.subr.mxu0 %v1402_v26  ;;  %775 = vmatprep.subr.mxu1 %v1442_v29  ;;  %v1467_v26 = vld [vmem:[%s2511_s1 + $0x690] sm:$0xff]  ;;  %v1508_v29 = vld [vmem:[%s2511_s1 + $0x7d8] sm:$0xff] }
  0x5b   : > { %673 = vmatpush1.msra.mxu0 %v1401_v28  ;;  %776 = vmatpush1.msra.mxu1 %v1441_v31  ;;  %v1466_v28 = vld [vmem:[%s2511_s1 + $0x688] sm:$0xff]  ;;  %v1507_v31 = vld [vmem:[%s2511_s1 + $0x7d0] sm:$0xff] }
  0x5c   : > { %674 = vmatprep.subr.mxu0 %v1400_v30  ;;  %777 = vmatprep.subr.mxu1 %v1440_v33  ;;  %v1465_v30 = vld [vmem:[%s2511_s1 + $0x680] sm:$0xff]  ;;  %v1506_v33 = vld [vmem:[%s2511_s1 + $0x7c8] sm:$0xff] }
  0x5d   : > { %675 = vmatpush1.msra.mxu0 %v1399_v32  ;;  %778 = vmatpush1.msra.mxu1 %v1439_v35  ;;  %v1464_v32 = vld [vmem:[%s2511_s1 + $0x678] sm:$0xff]  ;;  %v1505_v35 = vld [vmem:[%s2511_s1 + $0x7c0] sm:$0xff] }
  0x5e   : > { %676 = vmatprep.subr.mxu0 %v1398_v34  ;;  %779 = vmatprep.subr.mxu1 %v1438_v37  ;;  %v1463_v34 = vld [vmem:[%s2511_s1 + $0x670] sm:$0xff]  ;;  %v1504_v37 = vld [vmem:[%s2511_s1 + $0x7b8] sm:$0xff] }
  0x5f   : > { %677 = vmatpush1.msra.mxu0 %v1397_v36  ;;  %780 = vmatpush1.msra.mxu1 %v1437_v39  ;;  %v1462_v36 = vld [vmem:[%s2511_s1 + $0x668] sm:$0xff]  ;;  %v1503_v39 = vld [vmem:[%s2511_s1 + $0x7b0] sm:$0xff] }
  0x60   : > { %678 = vmatprep.subr.mxu0 %v1396_v38  ;;  %781 = vmatprep.subr.mxu1 %v1436_v41  ;;  %v1461_v38 = vld [vmem:[%s2511_s1 + $0x660] sm:$0xff]  ;;  %v1502_v41 = vld [vmem:[%s2511_s1 + $0x7a8] sm:$0xff] }
  0x61   : > { %679 = vmatpush1.msra.mxu0 %v1395_v40  ;;  %782 = vmatpush1.msra.mxu1 %v1435_v43  ;;  %v1460_v40 = vld [vmem:[%s2511_s1 + $0x658] sm:$0xff]  ;;  %v1501_v43 = vld [vmem:[%s2511_s1 + $0x7a0] sm:$0xff] }
  0x62   : > { %680 = vmatprep.subr.mxu0 %v1394_v42  ;;  %783 = vmatprep.subr.mxu1 %v1434_v45  ;;  %v1459_v42 = vld [vmem:[%s2511_s1 + $0x650] sm:$0xff]  ;;  %v1500_v45 = vld [vmem:[%s2511_s1 + $0x798] sm:$0xff] }
  0x63   : > { %681 = vmatpush1.msra.mxu0 %v1393_v44  ;;  %784 = vmatpush1.msra.mxu1 %v1433_v47  ;;  %v1458_v44 = vld [vmem:[%s2511_s1 + $0x648] sm:$0xff]  ;;  %v1499_v47 = vld [vmem:[%s2511_s1 + $0x790] sm:$0xff] }
  0x64   : > { %682 = vmatprep.subr.mxu0 %v1392_v46  ;;  %785 = vmatprep.subr.mxu1 %v1432_v49  ;;  %v1457_v46 = vld [vmem:[%s2511_s1 + $0x640] sm:$0xff]  ;;  %v1498_v49 = vld [vmem:[%s2511_s1 + $0x788] sm:$0xff] }
  0x65   : > { %683 = vmatpush1.msra.mxu0 %v1391_v48  ;;  %786 = vmatpush1.msra.mxu1 %v1431_v51  ;;  %v1456_v48 = vld [vmem:[%s2511_s1 + $0x638] sm:$0xff]  ;;  %v1497_v51 = vld [vmem:[%s2511_s1 + $0x780] sm:$0xff] }
  0x66   : > { %684 = vmatprep.subr.mxu0 %v1390_v50  ;;  %787 = vmatprep.subr.mxu1 %v1430_v53  ;;  %v1455_v50 = vld [vmem:[%s2511_s1 + $0x630] sm:$0xff]  ;;  %v1496_v53 = vld [vmem:[%s2511_s1 + $0x778] sm:$0xff] }
  0x67   : > { %685 = vmatpush1.msra.mxu0 %v1389_v52  ;;  %788 = vmatpush1.msra.mxu1 %v1429_v55  ;;  %v1454_v52 = vld [vmem:[%s2511_s1 + $0x628] sm:$0xff]  ;;  %v1495_v55 = vld [vmem:[%s2511_s1 + $0x770] sm:$0xff] }
  0x68   : > { %686 = vmatprep.subr.mxu0 %v1388_v54  ;;  %789 = vmatprep.subr.mxu1 %v1428_v57  ;;  %v1453_v54 = vld [vmem:[%s2511_s1 + $0x620] sm:$0xff]  ;;  %v1494_v57 = vld [vmem:[%s2511_s1 + $0x768] sm:$0xff] }
  0x69   : > { %687 = vmatpush1.msra.mxu0 %v1387_v56  ;;  %722 = vmatprep.mubr.f32.mxu0 %v1570_v4  ;;  %v1452_v56 = vld [vmem:[%s2511_s1 + $0x618] sm:$0xff] }
  0x6a   : > { %688 = vmatprep.subr.mxu0 %v1386_v58  ;;  %790 = vmatpush1.msra.mxu1 %v1427_v60  ;;  %v1451_v58 = vld [vmem:[%s2511_s1 + $0x610] sm:$0xff]  ;;  %v1450_v60 = vld [vmem:[%s2511_s1 + $0x608] sm:$0xff] }
  0x6b   : > { %689 = vmatpush1.msra.mxu0 %v1385_v59  ;;  %791 = vmatprep.subr.mxu1 %v1426_v62  ;;  %v1493_v59 = vld [vmem:[%s2511_s1 + $0x760] sm:$0xff] }
  0x6c   : > { %723 = vmatmul.mubr.f32.vlgmr.msra.gmra.mxu0 %v624_v61  ;;  %880 = vmatprep.subr.mxu0 %v1480_v63  ;;  %v1492_v61 = vld [vmem:[%s2511_s1 + $0x758] sm:$0xff]  ;;  %v1449_v62 = vld [vmem:[%s2511_s1 + $0x600] sm:$0xff]  ;;  %v1491_v63 = vld [vmem:[%s2511_s1 + $0x750] sm:$0xff] }
  0x6d   : > { %792 = vmatpush1.msra.mxu1 %v1425_v0  ;;  %881 = vmatpush1.msra.mxu0 %v1479_v1  ;;  %v846_v0 = vld [vmem:[%s1786_s30 + $0x3] sm:$0xff] }
  0x6e   : > { %793 = vmatprep.subr.mxu1 %v1424_v2  ;;  %882 = vmatprep.subr.mxu0 %v1478_v3  ;;  %v1490_v1 = vld [vmem:[%s2511_s1 + $0x748] sm:$0xff]  ;;  %v1544_v2 = vld [vmem:[%s2511_s1 + $0x8f8] sm:$0xff]  ;;  %v1489_v3 = vld [vmem:[%s2511_s1 + $0x740] sm:$0xff] }
  0x6f   : > { %794 = vmatpush1.msra.mxu1 %v1423_v5  ;;  %883 = vmatpush1.msra.mxu0 %v1477_v6  ;;  %v1543_v5 = vld [vmem:[%s2511_s1 + $0x8f0] sm:$0xff]  ;;  %v1488_v6 = vld [vmem:[%s2511_s1 + $0x738] sm:$0xff] }
  0x70   : > { %795 = vmatprep.subr.mxu1 %v1422_v7  ;;  %884 = vmatprep.subr.mxu0 %v1476_v8  ;;  %v1542_v7 = vld [vmem:[%s2511_s1 + $0x8e8] sm:$0xff]  ;;  %v1487_v8 = vld [vmem:[%s2511_s1 + $0x730] sm:$0xff] }
  0x71   : > { %796 = vmatpush1.msra.mxu1 %v1421_v9  ;;  %885 = vmatpush1.msra.mxu0 %v1475_v10  ;;  %v1541_v9 = vld [vmem:[%s2511_s1 + $0x8e0] sm:$0xff]  ;;  %v1486_v10 = vld [vmem:[%s2511_s1 + $0x728] sm:$0xff] }
  0x72   : > { %797 = vmatprep.subr.mxu1 %v1420_v11  ;;  %886 = vmatprep.subr.mxu0 %v1474_v12  ;;  %v1540_v11 = vld [vmem:[%s2511_s1 + $0x8d8] sm:$0xff]  ;;  %v1485_v12 = vld [vmem:[%s2511_s1 + $0x720] sm:$0xff] }
  0x73   : > { %798 = vmatpush1.msra.mxu1 %v1419_v13  ;;  %887 = vmatpush1.msra.mxu0 %v1473_v14  ;;  %v1539_v13 = vld [vmem:[%s2511_s1 + $0x8d0] sm:$0xff]  ;;  %v1484_v14 = vld [vmem:[%s2511_s1 + $0x718] sm:$0xff] }
  0x74   : > { %799 = vmatprep.subr.mxu1 %v1418_v15  ;;  %888 = vmatprep.subr.mxu0 %v1472_v16  ;;  %v1538_v15 = vld [vmem:[%s2511_s1 + $0x8c8] sm:$0xff]  ;;  %v1483_v16 = vld [vmem:[%s2511_s1 + $0x710] sm:$0xff] }
  0x75   : > { %800 = vmatpush1.msra.mxu1 %v1417_v17  ;;  %833 = vmatprep.mubr.f32.mxu1 %v1570_v4  ;;  %v1537_v17 = vld [vmem:[%s2511_s1 + $0x8c0] sm:$0xff] }
  0x76   : > { %889 = vmatpush1.msra.mxu0 %v1471_v18  ;;  %834 = vmatmul.mubr.f32.vlgmr.msra.gmra.mxu1 %v735_v19  ;;  %v1482_v18 = vld [vmem:[%s2511_s1 + $0x708] sm:$0xff]  ;;  %v1536_v19 = vld [vmem:[%s2511_s1 + $0x8b8] sm:$0xff] }
  0x77   : > { %890 = vmatprep.subr.mxu0 %v1470_v20  ;;  %991 = vmatprep.subr.mxu1 %v1512_v21  ;;  %v1481_v20 = vld [vmem:[%s2511_s1 + $0x700] sm:$0xff]  ;;  %v1535_v21 = vld [vmem:[%s2511_s1 + $0x8b0] sm:$0xff] }
  0x78   : > { %891 = vmatpush1.msra.mxu0 %v1469_v22  ;;  %992 = vmatpush1.msra.mxu1 %v1511_v23  ;;  %v957_v22 = vld [vmem:[%s1786_s30 + $0xc] sm:$0xff] }
  0x79   : > { %892 = vmatprep.subr.mxu0 %v1468_v24  ;;  %993 = vmatprep.subr.mxu1 %v1510_v25  ;;  %v1534_v23 = vld [vmem:[%s2511_s1 + $0x8a8] sm:$0xff]  ;;  %v1533_v24 = vld [vmem:[%s2511_s1 + $0x8a0] sm:$0xff]  ;;  %v1532_v25 = vld [vmem:[%s2511_s1 + $0x898] sm:$0xff] }
  0x7a   : > { %893 = vmatpush1.msra.mxu0 %v1467_v26  ;;  %994 = vmatpush1.msra.mxu1 %v1509_v27  ;;  %v1531_v26 = vld [vmem:[%s2511_s1 + $0x890] sm:$0xff]  ;;  %v1530_v27 = vld [vmem:[%s2511_s1 + $0x888] sm:$0xff] }
  0x7b   : > { %894 = vmatprep.subr.mxu0 %v1466_v28  ;;  %995 = vmatprep.subr.mxu1 %v1508_v29  ;;  %v1529_v28 = vld [vmem:[%s2511_s1 + $0x880] sm:$0xff]  ;;  %v1528_v29 = vld [vmem:[%s2511_s1 + $0x878] sm:$0xff] }
  0x7c   : > { %895 = vmatpush1.msra.mxu0 %v1465_v30  ;;  %996 = vmatpush1.msra.mxu1 %v1507_v31  ;;  %v1527_v30 = vld [vmem:[%s2511_s1 + $0x870] sm:$0xff]  ;;  %v1525_v31 = vld [vmem:[%s2511_s1 + $0x860] sm:$0xff] }
  0x7d   : > { %896 = vmatprep.subr.mxu0 %v1464_v32  ;;  %997 = vmatprep.subr.mxu1 %v1506_v33  ;;  %v1524_v32 = vld [vmem:[%s2511_s1 + $0x858] sm:$0xff]  ;;  %v1523_v33 = vld [vmem:[%s2511_s1 + $0x850] sm:$0xff] }
  0x7e   : > { %897 = vmatpush1.msra.mxu0 %v1463_v34  ;;  %998 = vmatpush1.msra.mxu1 %v1505_v35  ;;  %v1522_v34 = vld [vmem:[%s2511_s1 + $0x848] sm:$0xff]  ;;  %v1521_v35 = vld [vmem:[%s2511_s1 + $0x840] sm:$0xff] }
  0x7f   : > { %898 = vmatprep.subr.mxu0 %v1462_v36  ;;  %999 = vmatprep.subr.mxu1 %v1504_v37  ;;  %v1520_v36 = vld [vmem:[%s2511_s1 + $0x838] sm:$0xff]  ;;  %v1519_v37 = vld [vmem:[%s2511_s1 + $0x830] sm:$0xff] }
  0x80   : > { %899 = vmatpush1.msra.mxu0 %v1461_v38  ;;  %1000 = vmatpush1.msra.mxu1 %v1503_v39  ;;  %v1518_v38 = vld [vmem:[%s2511_s1 + $0x828] sm:$0xff]  ;;  %v1517_v39 = vld [vmem:[%s2511_s1 + $0x820] sm:$0xff] }
  0x81   : > { %900 = vmatprep.subr.mxu0 %v1460_v40  ;;  %1001 = vmatprep.subr.mxu1 %v1502_v41  ;;  %v1516_v40 = vld [vmem:[%s2511_s1 + $0x818] sm:$0xff]  ;;  %v1515_v41 = vld [vmem:[%s2511_s1 + $0x810] sm:$0xff] }
  0x82   : > { %901 = vmatpush1.msra.mxu0 %v1459_v42  ;;  %1002 = vmatpush1.msra.mxu1 %v1501_v43  ;;  %v1514_v42 = vld [vmem:[%s2511_s1 + $0x808] sm:$0xff]  ;;  %v1513_v43 = vld [vmem:[%s2511_s1 + $0x800] sm:$0xff] }
  0x83   : > { %902 = vmatprep.subr.mxu0 %v1458_v44  ;;  %1003 = vmatprep.subr.mxu1 %v1500_v45  ;;  %v1068_v44 = vld [vmem:[%s1786_s30 + $0x4] sm:$0xff]  ;;  %v206_v45 = vlaneseq  ;;  %s1550_s30 = sshll.u32 %s2516_s13, 3 }
  0x84   : > { %903 = vmatpush1.msra.mxu0 %v1457_v46  ;;  %1004 = vmatpush1.msra.mxu1 %v1499_v47  ;;  %s170_s18 = scalar_lea.vmem %s2513_s3, %s1550_s30 }
  0x85   : > { %904 = vmatprep.subr.mxu0 %v1456_v48  ;;  %1005 = vmatprep.subr.mxu1 %v1498_v49  ;;  %v207_v46 = vshrl.u32 %v206_v45, 7  ;;  %v204_v48 = vld [vmem:[%s2512_s2] sm:$0x3] }
  0x86   : > { %905 = vmatpush1.msra.mxu0 %v1455_v50  ;;  %1006 = vmatpush1.msra.mxu1 %v1497_v51 }
  0x87   : > { %906 = vmatprep.subr.mxu0 %v1454_v52  ;;  %1007 = vmatprep.subr.mxu1 %v1496_v53  ;;  %v208_v47 = vsub.s32 0, %v207_v46  ;;  %v212_v49 = vsub.s32 1, %v207_v46 }
  0x88   : > { %907 = vmatpush1.msra.mxu0 %v1453_v54  ;;  %1008 = vmatpush1.msra.mxu1 %v1495_v55 }
  0x89   : > { %908 = vmatprep.subr.mxu0 %v1452_v56  ;;  %1009 = vmatprep.subr.mxu1 %v1494_v57  ;;  %v209_v51 = vrot.slane %v204_v48, %v208_v47  ;;  %v213_v52 = vrot.slane %v204_v48, %v212_v49 }
  0x8a   : > { %909 = vmatpush1.msra.mxu0 %v1451_v58  ;;  %1010 = vmatpush1.msra.mxu1 %v1493_v59 }
  0x8b   : > { %910 = vmatprep.subr.mxu0 %v1450_v60  ;;  %1011 = vmatprep.subr.mxu1 %v1492_v61 }
  0x8c   : > { %911 = vmatpush1.msra.mxu0 %v1449_v62  ;;  %944 = vmatprep.mubr.f32.mxu0 %v1570_v4 }
  0x8d   : > { %1012 = vmatpush1.msra.mxu1 %v1491_v63  ;;  %945 = vmatmul.mubr.f32.vlgmr.msra.gmra.mxu0 %v846_v0 }
  0x8e   : > { %1013 = vmatprep.subr.mxu1 %v1490_v1  ;;  %1102 = vmatprep.subr.mxu0 %v1544_v2 }
  0x8f   : > { %1014 = vmatpush1.msra.mxu1 %v1489_v3  ;;  %1103 = vmatpush1.msra.mxu0 %v1543_v5 }
  0x90   : > { %1015 = vmatprep.subr.mxu1 %v1488_v6  ;;  %1104 = vmatprep.subr.mxu0 %v1542_v7 }
  0x91   : > { %1016 = vmatpush1.msra.mxu1 %v1487_v8  ;;  %1105 = vmatpush1.msra.mxu0 %v1541_v9 }
  0x92   : > { %1017 = vmatprep.subr.mxu1 %v1486_v10  ;;  %1106 = vmatprep.subr.mxu0 %v1540_v11 }
  0x93   : > { %1018 = vmatpush1.msra.mxu1 %v1485_v12  ;;  %1107 = vmatpush1.msra.mxu0 %v1539_v13 }
  0x94   : > { %1019 = vmatprep.subr.mxu1 %v1484_v14  ;;  %1108 = vmatprep.subr.mxu0 %v1538_v15 }
  0x95   : > { %1020 = vmatpush1.msra.mxu1 %v1483_v16  ;;  %1109 = vmatpush1.msra.mxu0 %v1537_v17 }
  0x96   : > { %1021 = vmatprep.subr.mxu1 %v1482_v18  ;;  %1110 = vmatprep.subr.mxu0 %v1536_v19 }
  0x97   : > { %1022 = vmatpush1.msra.mxu1 %v1481_v20  ;;  %1055 = vmatprep.mubr.f32.mxu1 %v1570_v4 }
  0x98   : > { %1111 = vmatpush1.msra.mxu0 %v1535_v21  ;;  %1056 = vmatmul.mubr.f32.vlgmr.msra.gmra.mxu1 %v957_v22 }
  0x99   : > { %1112 = vmatprep.subr.mxu0 %v1534_v23  ;;  %1166 = vmatprep.mubr.f32.mxu0 %v1570_v4  ;;  %v1526_v4 = vld [vmem:[%s2511_s1 + $0x868] sm:$0xff] }
  0x9a   : > { %1113 = vmatpush1.msra.mxu0 %v1533_v24  ;;  %v1571_v24 = vmov 1983009808  }
  0x9b   : > { %1114 = vmatprep.subr.mxu0 %v1532_v25  ;;  %v1198_v25 = vunpack.c.l.s4 %v1571_v24 }
  0x9c   : > { %1115 = vmatpush1.msra.mxu0 %v1531_v26 }
  0x9d   : > { %1116 = vmatprep.subr.mxu0 %v1530_v27  ;;  %v1199_v27 = vunpack.c.0.s8 %v1198_v25 }
  0x9e   : > { %1117 = vmatpush1.msra.mxu0 %v1529_v28 }
  0x9f   : > { %1118 = vmatprep.subr.mxu0 %v1528_v29  ;;  %v1202_v28 = vsub.s32 %v1199_v27, %v207_v46 }
  0xa0   : > { %1119 = vmatpush1.msra.mxu0 %v1527_v30 }
  0xa1   : > { %1120 = vmatprep.subr.mxu0 %v1526_v4 }
  0xa2   : > { %1121 = vmatpush1.msra.mxu0 %v1525_v31 }
  0xa3   : > { %1122 = vmatprep.subr.mxu0 %v1524_v32 }
  0xa4   : > { %1123 = vmatpush1.msra.mxu0 %v1523_v33 }
  0xa5   : > { %1124 = vmatprep.subr.mxu0 %v1522_v34 }
  0xa6   : > { %1125 = vmatpush1.msra.mxu0 %v1521_v35 }
  0xa7   : > { %1126 = vmatprep.subr.mxu0 %v1520_v36 }
  0xa8   : > { %1127 = vmatpush1.msra.mxu0 %v1519_v37 }
  0xa9   : > { %1128 = vmatprep.subr.mxu0 %v1518_v38 }
  0xaa   : > { %1129 = vmatpush1.msra.mxu0 %v1517_v39 }
  0xab   : > { %1130 = vmatprep.subr.mxu0 %v1516_v40 }
  0xac   : > { %1131 = vmatpush1.msra.mxu0 %v1515_v41 }
  0xad   : > { %1132 = vmatprep.subr.mxu0 %v1514_v42 }
  0xae   : > { %1133 = vmatpush1.msra.mxu0 %v1513_v43 }
  0xaf   : > { %1167 = vmatmul.mubr.f32.vlgmr.msra.gmra.mxu0 %v1068_v44 }
  0xec   : > { %v282_v50 = vpop.f32.mrf.mxu0 }
  0xed   : > { %v283_v55 = vadd.f32 %v282_v50, %v209_v51 }
  0xee   : > { %v284_v53 = vpop.f32.mrf.mxu0 }
  0xef   : > { %v391_v54 = vpop.f32.mrf.mxu1  ;;  %v285_v57 = vadd.f32 %v284_v53, %v213_v52 }
  0xf0   : > { %v396_v59 = vadd.f32 %v391_v54, %v283_v55 }
  0xf1   : > { %v393_v58 = vpop.f32.mrf.mxu1 }
  0xf2   : > { %v397_v62 = vadd.f32 %v393_v58, %v285_v57 }
 0x10c   : > { %v502_v56 = vpop.f32.mrf.mxu0 }
 0x10d   : > { %v507_v63 = vadd.f32 %v502_v56, %v396_v59 }
 0x10e   : > { %v504_v60 = vpop.f32.mrf.mxu0 }
 0x10f   : > { %v508_v1 = vadd.f32 %v504_v60, %v397_v62 }
 0x113   : > { %v613_v61 = vpop.f32.mrf.mxu1 }
 0x114   : > { %v618_v3 = vadd.f32 %v613_v61, %v507_v63 }
 0x115   : > { %v615_v2 = vpop.f32.mrf.mxu1 }
 0x116   : > { %v619_v7 = vadd.f32 %v615_v2, %v508_v1 }
 0x12c   : > { %v724_v0 = vpop.f32.mrf.mxu0 }
 0x12d   : > { %v729_v8 = vadd.f32 %v724_v0, %v618_v3 }
 0x12e   : > { %v726_v5 = vpop.f32.mrf.mxu0 }
 0x12f   : > { %v730_v10 = vadd.f32 %v726_v5, %v619_v7 }
 0x136   : > { %v835_v6 = vpop.f32.mrf.mxu1 }
 0x137   : > { %v840_v12 = vadd.f32 %v835_v6, %v729_v8 }
 0x138   : > { %v837_v11 = vpop.f32.mrf.mxu1 }
 0x139   : > { %v841_v15 = vadd.f32 %v837_v11, %v730_v10 }
 0x14d   : > { %v946_v9 = vpop.f32.mrf.mxu0 }
 0x14e   : > { %v951_v16 = vadd.f32 %v946_v9, %v840_v12 }
 0x14f   : > { %v948_v13 = vpop.f32.mrf.mxu0 }
 0x150   : > { %v952_v17 = vadd.f32 %v948_v13, %v841_v15 }
 0x158   : > { %v1057_v14 = vpop.f32.mrf.mxu1 }
 0x159   : > { %v1062_v19 = vadd.f32 %v1057_v14, %v951_v16 }
 0x15a   : > { %v1059_v18 = vpop.f32.mrf.mxu1 }
 0x15b   : > { %v1063_v21 = vadd.f32 %v1059_v18, %v952_v17 }
 0x16f   : > { %v1168_v20 = vpop.f32.mrf.mxu0 }
 0x170   : > { %v1173_v22 = vadd.f32 %v1168_v20, %v1062_v19 }
 0x171   : > { %v1170_v23 = vpop.f32.mrf.mxu0 }
 0x172   : > { %1175 = vst [vmem:[#allocation2] sm:$0xff] %v1173_v22  ;;  %v1174_v26 = vadd.f32 %v1170_v23, %v1063_v21 }
 0x174   : > { %1176 = vst [vmem:[#allocation2 + $0x8] sm:$0xff] %v1174_v26 }
 0x179   : > { %v1177_v29 = vld [vmem:[#allocation2] sm:$0x3]  ;;  %v1191_v30 = vld [vmem:[#allocation2] sm:$0x18] }
 0x17b   : > { %v1178_v4 = vld [vmem:[#allocation2 + $0x8] sm:$0x3]  ;;  %v1192_v31 = vld [vmem:[#allocation2 + $0x8] sm:$0x18] }
 0x17c   : > { %v1181_v32 = vcombine.low %v1177_v29, %v1178_v4  ;;  %v1195_v33 = vcombine.low %v1191_v30, %v1192_v31  ;;  %v1196_v34 = vcombine.high %v1191_v30, %v1192_v31 }
 0x17e   : > { %1545 = vst.sshfl [vmem:[%s170_s18] sm:$0x33 pattern:$0x76325410] %v1181_v32  ;;  %v1203_v35 = vrot.slane %v1195_v33, %v1202_v28  ;;  %v1210_v36 = vrot.slane %v1196_v34, %v1202_v28 }
 0x180   : > { %v1211_v37 = vcombine.high %v1203_v35, %v1203_v35  ;;  %v1221_v39 = vrot.slane %v1210_v36, 7 }
 0x182   : > { %v1546_v38 = vrot.slane %v1211_v37, 9 }
 0x184   : > { %v1222_v40 = vsel %vm1218_vm6, %v1546_v38, %v1221_v39 }
 0x185   : > { %1547 = vst [vmem:[%s170_s18 + $0x4] sm:$0xf] %v1222_v40 }
 0x186 PF: > { %s13_s12 = sadd.s32 1, %s1568_s12  }
 0x187   : > { %p10_p4 = scmp.ge.s32.totalorder %s13_s12, 4  }
 0x189   :  { %12 = sbr.rel (!%p10_p4) target bundleno = 1 (0x1), region = 71 }

// kernel: preconv_forward.13
= control target key start
LH: loop header
LB: loop body
LE: loop exit
PB: predicated region body
PF: predicated region fallthrough
CT: control target
= control target key end

     0   :  { %s3765_s12 = smov 0   ;;  %s6481_s0 = inlined_call_operand.vmem [shape: f32[2,24,256], index: 0, kind: input, shape index: {}]   ;;  %s6482_s1 = inlined_call_operand.vmem [shape: f32[9,256,384], index: 1, kind: input, shape index: {}]   ;;  %s6483_s2 = inlined_call_operand.vmem [shape: f32[1,384], index: 2, kind: input, shape index: {}]   ;;  %s6484_s3 = inlined_call_operand.vmem [shape: f32[2,2,2,384], index: 3, kind: output, shape index: {}]  }
   0x1 LB: > { %s2630_s13 = sadd.s32 4294967295, %s3742_s12   ;;  %p2634_p0 = scmp.ge.s32.totalorder %s3742_s12, 1  ;;  %s3742_s12 = sphi %s3765_s12, %s13_s12  }
   0x2   : > { %p137_p1 = scmp.lt.s32.totalorder %s3742_s12, 3 }
   0x4   : > { %p138_p2 = pnand %p2634_p0, %p137_p1 }
   0x5   : > { %p3883_p3 = scmp.lt.s32.totalorder (!%p138_p2), %s2630_s13, 1 }
   0x6   : > { %141 = sbr.rel (%p138_p2) target bundleno = 688 (0x2b0), region = 32 }
   0xb   : > { %v219_v0 = vld [vmem:[%s6482_s1 + $0x170] sm:$0xff]  ;;  %v268_v1 = vld [vmem:[%s6482_s1 + $0x2f8] sm:$0xff]  ;;  %v218_v2 = vld [vmem:[%s6482_s1 + $0x168] sm:$0xff]  ;;  %s6487_s13 = smov (!%p3883_p3, %s2630_s13), 1  ;;  %vm538_vm0 = vcmask 1046528   ;;  %vm802_vm1 = vcmask 1045504  }
   0xc   : > { %286 = vmatprep.subr.mxu0 %v219_v0  ;;  %3409 = vmatprep.subr.mxu1 %v268_v1  ;;  %v220_v3 = vld [vmem:[%s6482_s1 + $0x178] sm:$0xff]  ;;  %v265_v5 = vld [vmem:[%s6482_s1 + $0x2e0] sm:$0xff]  ;;  %v215_v6 = vld [vmem:[%s6482_s1 + $0x150] sm:$0xff]  ;;  %s3724_s19 = smul.u32 48, %s6487_s13  ;;  %vm1066_vm2 = vcmask 1043456   ;;  %vm1330_vm3 = vcmask 1042432  }
   0xd   : > { %v216_v4 = vld [vmem:[%s6482_s1 + $0x158] sm:$0xff]  ;;  %287 = vmatpush1.msra.mxu0 %v218_v2  ;;  %3410 = vmatpush3.msra.mxu1 %v220_v3  ;;  %v217_v7 = vld [vmem:[%s6482_s1 + $0x160] sm:$0xff]  ;;  %v262_v9 = vld [vmem:[%s6482_s1 + $0x2c8] sm:$0xff]  ;;  %vm1594_vm4 = vcmask 1041408   ;;  %s3725_s9 = smul.u32 12, %s6487_s13 }
   0xe   : > { %v213_v8 = vld [vmem:[%s6482_s1 + $0x140] sm:$0xff]  ;;  %288 = vmatprep.subr.mxu0 %v216_v4  ;;  %3411 = vmatprep.subr.mxu1 %v265_v5  ;;  %v212_v10 = vld [vmem:[%s6482_s1 + $0x138] sm:$0xff]  ;;  %v214_v11 = vld [vmem:[%s6482_s1 + $0x148] sm:$0xff]  ;;  %s3969_s11 = scalar_lea.vmem %s6481_s0, %s3724_s19 }
   0xf   : > { %289 = vmatpush1.msra.mxu0 %v215_v6  ;;  %3412 = vmatpush3.msra.mxu1 %v217_v7  ;;  %v210_v12 = vld [vmem:[%s6482_s1 + $0x128] sm:$0xff]  ;;  %v259_v13 = vld [vmem:[%s6482_s1 + $0x2b0] sm:$0xff]  ;;  %v209_v14 = vld [vmem:[%s6482_s1 + $0x120] sm:$0xff]  ;;  %s170_s15 = scalar_lea.vmem %s6484_s3, %s3725_s9 }
  0x10   : > { %290 = vmatprep.subr.mxu0 %v213_v8  ;;  %3413 = vmatprep.subr.mxu1 %v262_v9  ;;  %v211_v15 = vld [vmem:[%s6482_s1 + $0x130] sm:$0xff]  ;;  %v256_v17 = vld [vmem:[%s6482_s1 + $0x298] sm:$0xff]  ;;  %v206_v18 = vld [vmem:[%s6482_s1 + $0x108] sm:$0xff] }
  0x11   : > { %291 = vmatpush1.msra.mxu0 %v212_v10  ;;  %3414 = vmatpush3.msra.mxu1 %v214_v11  ;;  %v207_v16 = vld [vmem:[%s6482_s1 + $0x110] sm:$0xff]  ;;  %v208_v19 = vld [vmem:[%s6482_s1 + $0x118] sm:$0xff]  ;;  %v253_v21 = vld [vmem:[%s6482_s1 + $0x280] sm:$0xff] }
  0x12   : > { %292 = vmatprep.subr.mxu0 %v210_v12  ;;  %3415 = vmatprep.subr.mxu1 %v259_v13  ;;  %v204_v20 = vld [vmem:[%s6482_s1 + $0xf8] sm:$0xff]  ;;  %v203_v22 = vld [vmem:[%s6482_s1 + $0xf0] sm:$0xff]  ;;  %v205_v23 = vld [vmem:[%s6482_s1 + $0x100] sm:$0xff] }
  0x13   : > { %293 = vmatpush1.msra.mxu0 %v209_v14  ;;  %3416 = vmatpush3.msra.mxu1 %v211_v15  ;;  %v201_v24 = vld [vmem:[%s6482_s1 + $0xe0] sm:$0xff]  ;;  %v250_v25 = vld [vmem:[%s6482_s1 + $0x268] sm:$0xff]  ;;  %v200_v26 = vld [vmem:[%s6482_s1 + $0xd8] sm:$0xff] }
  0x14   : > { %294 = vmatprep.subr.mxu0 %v207_v16  ;;  %3417 = vmatprep.subr.mxu1 %v256_v17  ;;  %v202_v27 = vld [vmem:[%s6482_s1 + $0xe8] sm:$0xff]  ;;  %v247_v29 = vld [vmem:[%s6482_s1 + $0x250] sm:$0xff]  ;;  %v197_v30 = vld [vmem:[%s6482_s1 + $0xc0] sm:$0xff] }
  0x15   : > { %295 = vmatpush1.msra.mxu0 %v206_v18  ;;  %3418 = vmatpush3.msra.mxu1 %v208_v19  ;;  %v198_v28 = vld [vmem:[%s6482_s1 + $0xc8] sm:$0xff]  ;;  %v199_v31 = vld [vmem:[%s6482_s1 + $0xd0] sm:$0xff]  ;;  %v244_v33 = vld [vmem:[%s6482_s1 + $0x238] sm:$0xff] }
  0x16   : > { %296 = vmatprep.subr.mxu0 %v204_v20  ;;  %3419 = vmatprep.subr.mxu1 %v253_v21  ;;  %v195_v32 = vld [vmem:[%s6482_s1 + $0xb0] sm:$0xff]  ;;  %v194_v34 = vld [vmem:[%s6482_s1 + $0xa8] sm:$0xff]  ;;  %v196_v35 = vld [vmem:[%s6482_s1 + $0xb8] sm:$0xff] }
  0x17   : > { %297 = vmatpush1.msra.mxu0 %v203_v22  ;;  %3420 = vmatpush3.msra.mxu1 %v205_v23  ;;  %v192_v36 = vld [vmem:[%s6482_s1 + $0x98] sm:$0xff]  ;;  %v241_v37 = vld [vmem:[%s6482_s1 + $0x220] sm:$0xff]  ;;  %v191_v38 = vld [vmem:[%s6482_s1 + $0x90] sm:$0xff] }
  0x18   : > { %298 = vmatprep.subr.mxu0 %v201_v24  ;;  %3421 = vmatprep.subr.mxu1 %v250_v25  ;;  %v193_v39 = vld [vmem:[%s6482_s1 + $0xa0] sm:$0xff]  ;;  %v238_v41 = vld [vmem:[%s6482_s1 + $0x208] sm:$0xff]  ;;  %v188_v42 = vld [vmem:[%s6482_s1 + $0x78] sm:$0xff] }
  0x19   : > { %299 = vmatpush1.msra.mxu0 %v200_v26  ;;  %3422 = vmatpush3.msra.mxu1 %v202_v27  ;;  %v189_v40 = vld [vmem:[%s6482_s1 + $0x80] sm:$0xff]  ;;  %v190_v43 = vld [vmem:[%s6482_s1 + $0x88] sm:$0xff]  ;;  %v235_v45 = vld [vmem:[%s6482_s1 + $0x1f0] sm:$0xff] }
  0x1a   : > { %300 = vmatprep.subr.mxu0 %v198_v28  ;;  %3423 = vmatprep.subr.mxu1 %v247_v29  ;;  %v186_v44 = vld [vmem:[%s6482_s1 + $0x68] sm:$0xff]  ;;  %v185_v46 = vld [vmem:[%s6482_s1 + $0x60] sm:$0xff]  ;;  %v187_v47 = vld [vmem:[%s6482_s1 + $0x70] sm:$0xff] }
  0x1b   : > { %301 = vmatpush1.msra.mxu0 %v197_v30  ;;  %3424 = vmatpush3.msra.mxu1 %v199_v31  ;;  %v183_v48 = vld [vmem:[%s6482_s1 + $0x50] sm:$0xff]  ;;  %v232_v49 = vld [vmem:[%s6482_s1 + $0x1d8] sm:$0xff]  ;;  %v182_v50 = vld [vmem:[%s6482_s1 + $0x48] sm:$0xff] }
  0x1c   : > { %302 = vmatprep.subr.mxu0 %v195_v32  ;;  %3425 = vmatprep.subr.mxu1 %v244_v33  ;;  %v184_v51 = vld [vmem:[%s6482_s1 + $0x58] sm:$0xff]  ;;  %v229_v53 = vld [vmem:[%s6482_s1 + $0x1c0] sm:$0xff]  ;;  %v179_v54 = vld [vmem:[%s6482_s1 + $0x30] sm:$0xff] }
  0x1d   : > { %303 = vmatpush1.msra.mxu0 %v194_v34  ;;  %3426 = vmatpush3.msra.mxu1 %v196_v35  ;;  %v180_v52 = vld [vmem:[%s6482_s1 + $0x38] sm:$0xff]  ;;  %v181_v55 = vld [vmem:[%s6482_s1 + $0x40] sm:$0xff]  ;;  %v226_v57 = vld [vmem:[%s6482_s1 + $0x1a8] sm:$0xff] }
  0x1e   : > { %304 = vmatprep.subr.mxu0 %v192_v36  ;;  %3427 = vmatprep.subr.mxu1 %v241_v37  ;;  %v177_v56 = vld [vmem:[%s6482_s1 + $0x20] sm:$0xff]  ;;  %v176_v58 = vld [vmem:[%s6482_s1 + $0x18] sm:$0xff]  ;;  %v178_v59 = vld [vmem:[%s6482_s1 + $0x28] sm:$0xff] }
  0x1f   : > { %305 = vmatpush1.msra.mxu0 %v191_v38  ;;  %3428 = vmatpush3.msra.mxu1 %v193_v39  ;;  %v174_v60 = vld [vmem:[%s6482_s1 + $0x8] sm:$0xff]  ;;  %v223_v61 = vld [vmem:[%s6482_s1 + $0x190] sm:$0xff]  ;;  %v173_v62 = vld [vmem:[%s6482_s1] sm:$0xff] }
  0x20   : > { %306 = vmatprep.subr.mxu0 %v189_v40  ;;  %3429 = vmatprep.subr.mxu1 %v238_v41  ;;  %v175_v63 = vld [vmem:[%s6482_s1 + $0x10] sm:$0xff]  ;;  %v3987_v1 = vld [vmem:[%s3969_s11 + $0x8] sm:$0xff]  ;;  %v3996_v4 = vld [vmem:[%s3969_s11] sm:$0xff] }
  0x21   : > { %307 = vmatpush1.msra.mxu0 %v188_v42  ;;  %3430 = vmatpush3.msra.mxu1 %v190_v43  ;;  %v267_v0 = vld [vmem:[%s6482_s1 + $0x2f0] sm:$0xff]  ;;  %v266_v3 = vld [vmem:[%s6482_s1 + $0x2e8] sm:$0xff]  ;;  %v264_v5 = vld [vmem:[%s6482_s1 + $0x2d8] sm:$0xff] }
  0x22   : > { %308 = vmatprep.subr.mxu0 %v186_v44  ;;  %3431 = vmatprep.subr.mxu1 %v235_v45  ;;  %v2683_v2 = vld [vmem:[%s6482_s1 + $0x470] sm:$0xff]  ;;  %v2682_v6 = vld [vmem:[%s6482_s1 + $0x468] sm:$0xff]  ;;  %v2680_v8 = vld [vmem:[%s6482_s1 + $0x458] sm:$0xff] }
  0x23   : > { %309 = vmatpush1.msra.mxu0 %v185_v46  ;;  %3432 = vmatpush3.msra.mxu1 %v187_v47  ;;  %v263_v7 = vld [vmem:[%s6482_s1 + $0x2d0] sm:$0xff]  ;;  %v261_v9 = vld [vmem:[%s6482_s1 + $0x2c0] sm:$0xff]  ;;  %v260_v11 = vld [vmem:[%s6482_s1 + $0x2b8] sm:$0xff] }
  0x24   : > { %310 = vmatprep.subr.mxu0 %v183_v48  ;;  %3433 = vmatprep.subr.mxu1 %v232_v49  ;;  %v2679_v10 = vld [vmem:[%s6482_s1 + $0x450] sm:$0xff]  ;;  %v2677_v12 = vld [vmem:[%s6482_s1 + $0x440] sm:$0xff]  ;;  %v258_v13 = vld [vmem:[%s6482_s1 + $0x2a8] sm:$0xff] }
  0x25   : > { %311 = vmatpush1.msra.mxu0 %v182_v50  ;;  %3434 = vmatpush3.msra.mxu1 %v184_v51  ;;  %v2676_v14 = vld [vmem:[%s6482_s1 + $0x438] sm:$0xff]  ;;  %v257_v15 = vld [vmem:[%s6482_s1 + $0x2a0] sm:$0xff]  ;;  %v2674_v16 = vld [vmem:[%s6482_s1 + $0x428] sm:$0xff] }
  0x26   : > { %312 = vmatprep.subr.mxu0 %v180_v52  ;;  %3435 = vmatprep.subr.mxu1 %v229_v53  ;;  %v255_v17 = vld [vmem:[%s6482_s1 + $0x290] sm:$0xff]  ;;  %v2673_v18 = vld [vmem:[%s6482_s1 + $0x420] sm:$0xff]  ;;  %v254_v19 = vld [vmem:[%s6482_s1 + $0x288] sm:$0xff] }
  0x27   : > { %313 = vmatpush1.msra.mxu0 %v179_v54  ;;  %3436 = vmatpush3.msra.mxu1 %v181_v55  ;;  %v2671_v20 = vld [vmem:[%s6482_s1 + $0x410] sm:$0xff]  ;;  %v252_v21 = vld [vmem:[%s6482_s1 + $0x278] sm:$0xff]  ;;  %v2670_v22 = vld [vmem:[%s6482_s1 + $0x408] sm:$0xff] }
  0x28   : > { %314 = vmatprep.subr.mxu0 %v177_v56  ;;  %3437 = vmatprep.subr.mxu1 %v226_v57  ;;  %v251_v23 = vld [vmem:[%s6482_s1 + $0x270] sm:$0xff]  ;;  %v2668_v24 = vld [vmem:[%s6482_s1 + $0x3f8] sm:$0xff]  ;;  %v249_v25 = vld [vmem:[%s6482_s1 + $0x260] sm:$0xff] }
  0x29   : > { %315 = vmatpush1.msra.mxu0 %v176_v58  ;;  %3438 = vmatpush3.msra.mxu1 %v178_v59  ;;  %v2667_v26 = vld [vmem:[%s6482_s1 + $0x3f0] sm:$0xff]  ;;  %v248_v27 = vld [vmem:[%s6482_s1 + $0x258] sm:$0xff]  ;;  %v2665_v28 = vld [vmem:[%s6482_s1 + $0x3e0] sm:$0xff] }
  0x2a   : > { %316 = vmatprep.subr.mxu0 %v174_v60  ;;  %3439 = vmatprep.subr.mxu1 %v223_v61  ;;  %v246_v29 = vld [vmem:[%s6482_s1 + $0x248] sm:$0xff]  ;;  %v2664_v30 = vld [vmem:[%s6482_s1 + $0x3d8] sm:$0xff]  ;;  %v245_v31 = vld [vmem:[%s6482_s1 + $0x240] sm:$0xff] }
  0x2b   : > { %317 = vmatpush1.msra.mxu0 %v173_v62  ;;  %3440 = vmatpush3.msra.mxu1 %v175_v63  ;;  %v2662_v32 = vld [vmem:[%s6482_s1 + $0x3c8] sm:$0xff]  ;;  %v243_v33 = vld [vmem:[%s6482_s1 + $0x230] sm:$0xff]  ;;  %v2661_v34 = vld [vmem:[%s6482_s1 + $0x3c0] sm:$0xff] }
  0x2c   : > { %318 = vmatprep.subr.mxu0 %v267_v0  ;;  %421 = vmatprep.mubr.f32.mxu1 %v3987_v1  ;;  %v242_v35 = vld [vmem:[%s6482_s1 + $0x228] sm:$0xff]  ;;  %v2659_v36 = vld [vmem:[%s6482_s1 + $0x3b0] sm:$0xff]  ;;  %v240_v37 = vld [vmem:[%s6482_s1 + $0x218] sm:$0xff] }
  0x2d   : > { %547 = vmatprep.subr.mxu1 %v2683_v2  ;;  %319 = vmatpush2.msra.mxu0 %v266_v3  ;;  %v2658_v38 = vld [vmem:[%s6482_s1 + $0x3a8] sm:$0xff]  ;;  %v239_v39 = vld [vmem:[%s6482_s1 + $0x210] sm:$0xff]  ;;  %v2656_v40 = vld [vmem:[%s6482_s1 + $0x398] sm:$0xff] }
  0x2e   : > { %422 = vmatmul.mubr.f32.vlgmr.msra.gmra.mxu1 %v3996_v4  ;;  %320 = vmatprep.subr.mxu0 %v264_v5  ;;  %v237_v41 = vld [vmem:[%s6482_s1 + $0x200] sm:$0xff]  ;;  %v2655_v42 = vld [vmem:[%s6482_s1 + $0x390] sm:$0xff]  ;;  %v236_v43 = vld [vmem:[%s6482_s1 + $0x1f8] sm:$0xff] }
  0x2f   : > { %548 = vmatpush1.msra.mxu1 %v2682_v6  ;;  %321 = vmatpush2.msra.mxu0 %v263_v7  ;;  %v2653_v44 = vld [vmem:[%s6482_s1 + $0x380] sm:$0xff]  ;;  %v234_v45 = vld [vmem:[%s6482_s1 + $0x1e8] sm:$0xff]  ;;  %v2652_v46 = vld [vmem:[%s6482_s1 + $0x378] sm:$0xff] }
  0x30   : > { %549 = vmatprep.subr.mxu1 %v2680_v8  ;;  %322 = vmatprep.subr.mxu0 %v261_v9  ;;  %v233_v47 = vld [vmem:[%s6482_s1 + $0x1e0] sm:$0xff]  ;;  %v2650_v48 = vld [vmem:[%s6482_s1 + $0x368] sm:$0xff]  ;;  %v231_v49 = vld [vmem:[%s6482_s1 + $0x1d0] sm:$0xff] }
  0x31   : > { %550 = vmatpush1.msra.mxu1 %v2679_v10  ;;  %323 = vmatpush2.msra.mxu0 %v260_v11  ;;  %v2649_v50 = vld [vmem:[%s6482_s1 + $0x360] sm:$0xff]  ;;  %v230_v51 = vld [vmem:[%s6482_s1 + $0x1c8] sm:$0xff]  ;;  %v2647_v52 = vld [vmem:[%s6482_s1 + $0x350] sm:$0xff] }
  0x32   : > { %551 = vmatprep.subr.mxu1 %v2677_v12  ;;  %324 = vmatprep.subr.mxu0 %v258_v13  ;;  %v228_v53 = vld [vmem:[%s6482_s1 + $0x1b8] sm:$0xff]  ;;  %v2646_v54 = vld [vmem:[%s6482_s1 + $0x348] sm:$0xff]  ;;  %v227_v55 = vld [vmem:[%s6482_s1 + $0x1b0] sm:$0xff] }
  0x33   : > { %552 = vmatpush1.msra.mxu1 %v2676_v14  ;;  %325 = vmatpush2.msra.mxu0 %v257_v15  ;;  %v2644_v56 = vld [vmem:[%s6482_s1 + $0x338] sm:$0xff]  ;;  %v225_v57 = vld [vmem:[%s6482_s1 + $0x1a0] sm:$0xff]  ;;  %v2643_v58 = vld [vmem:[%s6482_s1 + $0x330] sm:$0xff] }
  0x34   : > { %553 = vmatprep.subr.mxu1 %v2674_v16  ;;  %326 = vmatprep.subr.mxu0 %v255_v17  ;;  %v224_v59 = vld [vmem:[%s6482_s1 + $0x198] sm:$0xff]  ;;  %v2641_v60 = vld [vmem:[%s6482_s1 + $0x320] sm:$0xff]  ;;  %v222_v61 = vld [vmem:[%s6482_s1 + $0x188] sm:$0xff] }
  0x35   : > { %554 = vmatpush1.msra.mxu1 %v2673_v18  ;;  %327 = vmatpush2.msra.mxu0 %v254_v19  ;;  %v2640_v62 = vld [vmem:[%s6482_s1 + $0x318] sm:$0xff]  ;;  %v221_v63 = vld [vmem:[%s6482_s1 + $0x180] sm:$0xff]  ;;  %v2638_v0 = vld [vmem:[%s6482_s1 + $0x308] sm:$0xff] }
  0x36   : > { %555 = vmatprep.subr.mxu1 %v2671_v20  ;;  %328 = vmatprep.subr.mxu0 %v252_v21  ;;  %v2637_v2 = vld [vmem:[%s6482_s1 + $0x300] sm:$0xff]  ;;  %v2731_v3 = vld [vmem:[%s6482_s1 + $0x5f0] sm:$0xff]  ;;  %v2732_v5 = vld [vmem:[%s6482_s1 + $0x5f8] sm:$0xff] }
  0x37   : > { %556 = vmatpush1.msra.mxu1 %v2670_v22  ;;  %329 = vmatpush2.msra.mxu0 %v251_v23  ;;  %v2730_v6 = vld [vmem:[%s6482_s1 + $0x5e8] sm:$0xff]  ;;  %v2684_v7 = vld [vmem:[%s6482_s1 + $0x478] sm:$0xff]  ;;  %v2729_v9 = vld [vmem:[%s6482_s1 + $0x5e0] sm:$0xff] }
  0x38   : > { %557 = vmatprep.subr.mxu1 %v2668_v24  ;;  %330 = vmatprep.subr.mxu0 %v249_v25  ;;  %v2728_v8 = vld [vmem:[%s6482_s1 + $0x5d8] sm:$0xff]  ;;  %v2681_v10 = vld [vmem:[%s6482_s1 + $0x460] sm:$0xff]  ;;  %v2726_v11 = vld [vmem:[%s6482_s1 + $0x5c8] sm:$0xff] }
  0x39   : > { %558 = vmatpush1.msra.mxu1 %v2667_v26  ;;  %331 = vmatpush2.msra.mxu0 %v248_v27  ;;  %v2724_v12 = vld [vmem:[%s6482_s1 + $0x5b8] sm:$0xff]  ;;  %v2678_v13 = vld [vmem:[%s6482_s1 + $0x448] sm:$0xff]  ;;  %v2723_v15 = vld [vmem:[%s6482_s1 + $0x5b0] sm:$0xff] }
  0x3a   : > { %559 = vmatprep.subr.mxu1 %v2665_v28  ;;  %332 = vmatprep.subr.mxu0 %v246_v29  ;;  %v2722_v14 = vld [vmem:[%s6482_s1 + $0x5a8] sm:$0xff]  ;;  %v2721_v16 = vld [vmem:[%s6482_s1 + $0x5a0] sm:$0xff]  ;;  %v2675_v17 = vld [vmem:[%s6482_s1 + $0x430] sm:$0xff] }
  0x3b   : > { %560 = vmatpush1.msra.mxu1 %v2664_v30  ;;  %333 = vmatpush2.msra.mxu0 %v245_v31  ;;  %v2719_v18 = vld [vmem:[%s6482_s1 + $0x590] sm:$0xff]  ;;  %v2720_v19 = vld [vmem:[%s6482_s1 + $0x598] sm:$0xff]  ;;  %v2718_v20 = vld [vmem:[%s6482_s1 + $0x588] sm:$0xff] }
  0x3c   : > { %561 = vmatprep.subr.mxu1 %v2662_v32  ;;  %334 = vmatprep.subr.mxu0 %v243_v33  ;;  %v2672_v21 = vld [vmem:[%s6482_s1 + $0x418] sm:$0xff]  ;;  %v2717_v23 = vld [vmem:[%s6482_s1 + $0x580] sm:$0xff]  ;;  %v2715_v24 = vld [vmem:[%s6482_s1 + $0x570] sm:$0xff] }
  0x3d   : > { %562 = vmatpush1.msra.mxu1 %v2661_v34  ;;  %335 = vmatpush2.msra.mxu0 %v242_v35  ;;  %v2716_v22 = vld [vmem:[%s6482_s1 + $0x578] sm:$0xff]  ;;  %v2669_v25 = vld [vmem:[%s6482_s1 + $0x400] sm:$0xff]  ;;  %v2714_v27 = vld [vmem:[%s6482_s1 + $0x568] sm:$0xff] }
  0x3e   : > { %563 = vmatprep.subr.mxu1 %v2659_v36  ;;  %336 = vmatprep.subr.mxu0 %v240_v37  ;;  %v2713_v26 = vld [vmem:[%s6482_s1 + $0x560] sm:$0xff]  ;;  %v2712_v28 = vld [vmem:[%s6482_s1 + $0x558] sm:$0xff]  ;;  %v2666_v29 = vld [vmem:[%s6482_s1 + $0x3e8] sm:$0xff] }
  0x3f   : > { %564 = vmatpush1.msra.mxu1 %v2658_v38  ;;  %337 = vmatpush2.msra.mxu0 %v239_v39  ;;  %v2710_v30 = vld [vmem:[%s6482_s1 + $0x548] sm:$0xff]  ;;  %v2711_v31 = vld [vmem:[%s6482_s1 + $0x550] sm:$0xff]  ;;  %v2709_v32 = vld [vmem:[%s6482_s1 + $0x540] sm:$0xff] }
  0x40   : > { %565 = vmatprep.subr.mxu1 %v2656_v40  ;;  %338 = vmatprep.subr.mxu0 %v237_v41  ;;  %v2663_v33 = vld [vmem:[%s6482_s1 + $0x3d0] sm:$0xff]  ;;  %v2708_v35 = vld [vmem:[%s6482_s1 + $0x538] sm:$0xff]  ;;  %v2706_v36 = vld [vmem:[%s6482_s1 + $0x528] sm:$0xff] }
  0x41   : > { %566 = vmatpush1.msra.mxu1 %v2655_v42  ;;  %339 = vmatpush2.msra.mxu0 %v236_v43  ;;  %v2707_v34 = vld [vmem:[%s6482_s1 + $0x530] sm:$0xff]  ;;  %v2660_v37 = vld [vmem:[%s6482_s1 + $0x3b8] sm:$0xff]  ;;  %v2705_v39 = vld [vmem:[%s6482_s1 + $0x520] sm:$0xff] }
  0x42   : > { %567 = vmatprep.subr.mxu1 %v2653_v44  ;;  %340 = vmatprep.subr.mxu0 %v234_v45  ;;  %v2704_v38 = vld [vmem:[%s6482_s1 + $0x518] sm:$0xff]  ;;  %v2703_v40 = vld [vmem:[%s6482_s1 + $0x510] sm:$0xff]  ;;  %v2657_v41 = vld [vmem:[%s6482_s1 + $0x3a0] sm:$0xff] }
  0x43   : > { %568 = vmatpush1.msra.mxu1 %v2652_v46  ;;  %341 = vmatpush2.msra.mxu0 %v233_v47  ;;  %v2701_v42 = vld [vmem:[%s6482_s1 + $0x500] sm:$0xff]  ;;  %v2702_v43 = vld [vmem:[%s6482_s1 + $0x508] sm:$0xff]  ;;  %v2700_v44 = vld [vmem:[%s6482_s1 + $0x4f8] sm:$0xff] }
  0x44   : > { %569 = vmatprep.subr.mxu1 %v2650_v48  ;;  %342 = vmatprep.subr.mxu0 %v231_v49  ;;  %v2654_v45 = vld [vmem:[%s6482_s1 + $0x388] sm:$0xff]  ;;  %v2699_v47 = vld [vmem:[%s6482_s1 + $0x4f0] sm:$0xff]  ;;  %v2697_v48 = vld [vmem:[%s6482_s1 + $0x4e0] sm:$0xff] }
  0x45   : > { %570 = vmatpush1.msra.mxu1 %v2649_v50  ;;  %343 = vmatpush2.msra.mxu0 %v230_v51  ;;  %v2698_v46 = vld [vmem:[%s6482_s1 + $0x4e8] sm:$0xff]  ;;  %v2651_v49 = vld [vmem:[%s6482_s1 + $0x370] sm:$0xff]  ;;  %v2696_v51 = vld [vmem:[%s6482_s1 + $0x4d8] sm:$0xff] }
  0x46   : > { %571 = vmatprep.subr.mxu1 %v2647_v52  ;;  %344 = vmatprep.subr.mxu0 %v228_v53  ;;  %v2695_v50 = vld [vmem:[%s6482_s1 + $0x4d0] sm:$0xff]  ;;  %v434_v52 = vld [vmem:[%s3969_s11 + $0x8] sm:$0xfe]  ;;  %v436_v53 = vld [vmem:[%s3969_s11 + $0x18] sm:$0x1] }
  0x47   : > { %572 = vmatpush1.msra.mxu1 %v2646_v54  ;;  %345 = vmatpush2.msra.mxu0 %v227_v55  ;;  %v2694_v54 = vld [vmem:[%s6482_s1 + $0x4c8] sm:$0xff]  ;;  %v2648_v55 = vld [vmem:[%s6482_s1 + $0x358] sm:$0xff] }
  0x48   : > { %573 = vmatprep.subr.mxu1 %v2644_v56  ;;  %346 = vmatprep.subr.mxu0 %v225_v57  ;;  %v2692_v56 = vld [vmem:[%s6482_s1 + $0x4b8] sm:$0xff]  ;;  %v2693_v57 = vld [vmem:[%s6482_s1 + $0x4c0] sm:$0xff] }
  0x49   : > { %574 = vmatpush1.msra.mxu1 %v2643_v58  ;;  %347 = vmatpush2.msra.mxu0 %v224_v59  ;;  %v433_v58 = vld [vmem:[%s3969_s11] sm:$0xfe]  ;;  %v435_v59 = vld [vmem:[%s3969_s11 + $0x10] sm:$0x1] }
  0x4a   : > { %575 = vmatprep.subr.mxu1 %v2641_v60  ;;  %348 = vmatprep.subr.mxu0 %v222_v61  ;;  %v2691_v60 = vld [vmem:[%s6482_s1 + $0x4b0] sm:$0xff]  ;;  %v2645_v61 = vld [vmem:[%s6482_s1 + $0x340] sm:$0xff] }
  0x4b   : > { %576 = vmatpush1.msra.mxu1 %v2640_v62  ;;  %349 = vmatpush2.msra.mxu0 %v221_v63  ;;  %v542_v62 = vrot.slane %v434_v52, 1  ;;  %v543_v63 = vrot.slane %v436_v53, 1  ;;  %v2749_v52 = vld [vmem:[%s6482_s1 + $0x680] sm:$0xff]  ;;  %v2798_v53 = vld [vmem:[%s6482_s1 + $0x808] sm:$0xff] }
  0x4c   : > { %577 = vmatprep.subr.mxu1 %v2638_v0  ;;  %350 = vmatprep.mubr.f32.mxu0 %v3987_v1  ;;  %v2727_v1 = vld [vmem:[%s6482_s1 + $0x5d0] sm:$0xff]  ;;  %v2689_v0 = vld [vmem:[%s6482_s1 + $0x4a0] sm:$0xff] }
  0x4d   : > { %578 = vmatpush1.msra.mxu1 %v2637_v2  ;;  %351 = vmatmul.mubr.f32.vlgmr.msra.gmra.mxu0 %v3996_v4  ;;  %v2725_v4 = vld [vmem:[%s6482_s1 + $0x5c0] sm:$0xff]  ;;  %v2690_v2 = vld [vmem:[%s6482_s1 + $0x4a8] sm:$0xff] }
  0x4e   : > { %579 = vmatprep.subr.mxu1 %v2731_v3  ;;  %3444 = vmatprep.subr.mxu0 %v2732_v5  ;;  %v2688_v3 = vld [vmem:[%s6482_s1 + $0x498] sm:$0xff]  ;;  %v2642_v5 = vld [vmem:[%s6482_s1 + $0x328] sm:$0xff] }
  0x4f   : > { %580 = vmatpush2.msra.mxu1 %v2730_v6  ;;  %3445 = vmatpush3.msra.mxu0 %v2684_v7  ;;  %v539_v6 = vrot.slane %v433_v58, 1  ;;  %v540_v7 = vrot.slane %v435_v59, 1  ;;  %v2745_v58 = vld [vmem:[%s6482_s1 + $0x660] sm:$0xff]  ;;  %v2747_v59 = vld [vmem:[%s6482_s1 + $0x670] sm:$0xff] }
  0x50   : > { %581 = vmatprep.subr.mxu1 %v2728_v8  ;;  %3446 = vmatprep.subr.mxu0 %v2729_v9  ;;  %v2686_v8 = vld [vmem:[%s6482_s1 + $0x488] sm:$0xff]  ;;  %v2687_v9 = vld [vmem:[%s6482_s1 + $0x490] sm:$0xff] }
  0x51   : > { %582 = vmatpush2.msra.mxu1 %v2727_v1  ;;  %3447 = vmatpush3.msra.mxu0 %v2681_v10  ;;  %v2685_v1 = vld [vmem:[%s6482_s1 + $0x480] sm:$0xff]  ;;  %v544_v10 = vsel %vm538_vm0, %v542_v62, %v543_v63  ;;  %v2742_v62 = vld [vmem:[%s6482_s1 + $0x648] sm:$0xff]  ;;  %v2744_v63 = vld [vmem:[%s6482_s1 + $0x658] sm:$0xff] }
  0x52   : > { %583 = vmatprep.subr.mxu1 %v2725_v4  ;;  %3448 = vmatprep.subr.mxu0 %v2726_v11  ;;  %v2639_v4 = vld [vmem:[%s6482_s1 + $0x310] sm:$0xff]  ;;  %v541_v11 = vsel %vm538_vm0, %v539_v6, %v540_v7  ;;  %v697_v6 = vld [vmem:[%s3969_s11] sm:$0xfc] }
  0x53   : > { %584 = vmatpush2.msra.mxu1 %v2724_v12  ;;  %3449 = vmatpush3.msra.mxu0 %v2678_v13  ;;  %v2779_v12 = vld [vmem:[%s6482_s1 + $0x770] sm:$0xff]  ;;  %v2828_v13 = vld [vmem:[%s6482_s1 + $0x8f8] sm:$0xff] }
  0x54   : > { %585 = vmatprep.subr.mxu1 %v2722_v14  ;;  %3450 = vmatprep.subr.mxu0 %v2723_v15  ;;  %v2778_v14 = vld [vmem:[%s6482_s1 + $0x768] sm:$0xff]  ;;  %v2780_v15 = vld [vmem:[%s6482_s1 + $0x778] sm:$0xff]  ;;  %v699_v7 = vld [vmem:[%s3969_s11 + $0x10] sm:$0x3] }
  0x55   : > { %586 = vmatpush2.msra.mxu1 %v2721_v16  ;;  %3451 = vmatpush3.msra.mxu0 %v2675_v17  ;;  %v2776_v16 = vld [vmem:[%s6482_s1 + $0x758] sm:$0xff]  ;;  %v2825_v17 = vld [vmem:[%s6482_s1 + $0x8e0] sm:$0xff] }
  0x56   : > { %587 = vmatprep.subr.mxu1 %v2719_v18  ;;  %3452 = vmatprep.subr.mxu0 %v2720_v19  ;;  %v2775_v18 = vld [vmem:[%s6482_s1 + $0x750] sm:$0xff]  ;;  %v2777_v19 = vld [vmem:[%s6482_s1 + $0x760] sm:$0xff] }
  0x57   : > { %588 = vmatpush2.msra.mxu1 %v2718_v20  ;;  %3453 = vmatpush3.msra.mxu0 %v2672_v21  ;;  %v2773_v20 = vld [vmem:[%s6482_s1 + $0x740] sm:$0xff]  ;;  %v2822_v21 = vld [vmem:[%s6482_s1 + $0x8c8] sm:$0xff] }
  0x58   : > { %589 = vmatprep.subr.mxu1 %v2716_v22  ;;  %3454 = vmatprep.subr.mxu0 %v2717_v23  ;;  %v2772_v22 = vld [vmem:[%s6482_s1 + $0x738] sm:$0xff]  ;;  %v2774_v23 = vld [vmem:[%s6482_s1 + $0x748] sm:$0xff] }
  0x59   : > { %590 = vmatpush2.msra.mxu1 %v2715_v24  ;;  %3455 = vmatpush3.msra.mxu0 %v2669_v25  ;;  %v2770_v24 = vld [vmem:[%s6482_s1 + $0x728] sm:$0xff]  ;;  %v2819_v25 = vld [vmem:[%s6482_s1 + $0x8b0] sm:$0xff] }
  0x5a   : > { %591 = vmatprep.subr.mxu1 %v2713_v26  ;;  %3456 = vmatprep.subr.mxu0 %v2714_v27  ;;  %v2769_v26 = vld [vmem:[%s6482_s1 + $0x720] sm:$0xff]  ;;  %v2771_v27 = vld [vmem:[%s6482_s1 + $0x730] sm:$0xff] }
  0x5b   : > { %592 = vmatpush2.msra.mxu1 %v2712_v28  ;;  %3457 = vmatpush3.msra.mxu0 %v2666_v29  ;;  %v2767_v28 = vld [vmem:[%s6482_s1 + $0x710] sm:$0xff]  ;;  %v2816_v29 = vld [vmem:[%s6482_s1 + $0x898] sm:$0xff] }
  0x5c   : > { %593 = vmatprep.subr.mxu1 %v2710_v30  ;;  %3458 = vmatprep.subr.mxu0 %v2711_v31  ;;  %v2766_v30 = vld [vmem:[%s6482_s1 + $0x708] sm:$0xff]  ;;  %v2768_v31 = vld [vmem:[%s6482_s1 + $0x718] sm:$0xff] }
  0x5d   : > { %594 = vmatpush2.msra.mxu1 %v2709_v32  ;;  %3459 = vmatpush3.msra.mxu0 %v2663_v33  ;;  %v2764_v32 = vld [vmem:[%s6482_s1 + $0x6f8] sm:$0xff]  ;;  %v2813_v33 = vld [vmem:[%s6482_s1 + $0x880] sm:$0xff] }
  0x5e   : > { %595 = vmatprep.subr.mxu1 %v2707_v34  ;;  %3460 = vmatprep.subr.mxu0 %v2708_v35  ;;  %v2763_v34 = vld [vmem:[%s6482_s1 + $0x6f0] sm:$0xff]  ;;  %v2765_v35 = vld [vmem:[%s6482_s1 + $0x700] sm:$0xff] }
  0x5f   : > { %596 = vmatpush2.msra.mxu1 %v2706_v36  ;;  %3461 = vmatpush3.msra.mxu0 %v2660_v37  ;;  %v2761_v36 = vld [vmem:[%s6482_s1 + $0x6e0] sm:$0xff]  ;;  %v2810_v37 = vld [vmem:[%s6482_s1 + $0x868] sm:$0xff] }
  0x60   : > { %597 = vmatprep.subr.mxu1 %v2704_v38  ;;  %3462 = vmatprep.subr.mxu0 %v2705_v39  ;;  %v2760_v38 = vld [vmem:[%s6482_s1 + $0x6d8] sm:$0xff]  ;;  %v2762_v39 = vld [vmem:[%s6482_s1 + $0x6e8] sm:$0xff] }
  0x61   : > { %598 = vmatpush2.msra.mxu1 %v2703_v40  ;;  %3463 = vmatpush3.msra.mxu0 %v2657_v41  ;;  %v2758_v40 = vld [vmem:[%s6482_s1 + $0x6c8] sm:$0xff]  ;;  %v2807_v41 = vld [vmem:[%s6482_s1 + $0x850] sm:$0xff] }
  0x62   : > { %599 = vmatprep.subr.mxu1 %v2701_v42  ;;  %3464 = vmatprep.subr.mxu0 %v2702_v43  ;;  %v2757_v42 = vld [vmem:[%s6482_s1 + $0x6c0] sm:$0xff]  ;;  %v2759_v43 = vld [vmem:[%s6482_s1 + $0x6d0] sm:$0xff] }
  0x63   : > { %600 = vmatpush2.msra.mxu1 %v2700_v44  ;;  %3465 = vmatpush3.msra.mxu0 %v2654_v45  ;;  %v2755_v44 = vld [vmem:[%s6482_s1 + $0x6b0] sm:$0xff]  ;;  %v2804_v45 = vld [vmem:[%s6482_s1 + $0x838] sm:$0xff] }
  0x64   : > { %601 = vmatprep.subr.mxu1 %v2698_v46  ;;  %3466 = vmatprep.subr.mxu0 %v2699_v47  ;;  %v2754_v46 = vld [vmem:[%s6482_s1 + $0x6a8] sm:$0xff]  ;;  %v2756_v47 = vld [vmem:[%s6482_s1 + $0x6b8] sm:$0xff] }
  0x65   : > { %602 = vmatpush2.msra.mxu1 %v2697_v48  ;;  %3467 = vmatpush3.msra.mxu0 %v2651_v49  ;;  %v2752_v48 = vld [vmem:[%s6482_s1 + $0x698] sm:$0xff]  ;;  %v2801_v49 = vld [vmem:[%s6482_s1 + $0x820] sm:$0xff] }
  0x66   : > { %603 = vmatprep.subr.mxu1 %v2695_v50  ;;  %3468 = vmatprep.subr.mxu0 %v2696_v51  ;;  %v2751_v50 = vld [vmem:[%s6482_s1 + $0x690] sm:$0xff]  ;;  %v2753_v51 = vld [vmem:[%s6482_s1 + $0x6a0] sm:$0xff] }
  0x67   : > { %604 = vmatpush2.msra.mxu1 %v2694_v54  ;;  %3469 = vmatpush3.msra.mxu0 %v2648_v55  ;;  %v2748_v54 = vld [vmem:[%s6482_s1 + $0x678] sm:$0xff]  ;;  %v2750_v55 = vld [vmem:[%s6482_s1 + $0x688] sm:$0xff] }
  0x68   : > { %605 = vmatprep.subr.mxu1 %v2692_v56  ;;  %3470 = vmatprep.subr.mxu0 %v2693_v57  ;;  %v2746_v56 = vld [vmem:[%s6482_s1 + $0x668] sm:$0xff]  ;;  %v2795_v57 = vld [vmem:[%s6482_s1 + $0x7f0] sm:$0xff] }
  0x69   : > { %606 = vmatpush2.msra.mxu1 %v2691_v60  ;;  %3471 = vmatpush3.msra.mxu0 %v2645_v61  ;;  %v2743_v60 = vld [vmem:[%s6482_s1 + $0x650] sm:$0xff]  ;;  %v2792_v61 = vld [vmem:[%s6482_s1 + $0x7d8] sm:$0xff] }
  0x6a   : > { %607 = vmatprep.subr.mxu1 %v2689_v0  ;;  %3472 = vmatprep.subr.mxu0 %v2690_v2  ;;  %v2740_v0 = vld [vmem:[%s6482_s1 + $0x638] sm:$0xff]  ;;  %v698_v2 = vld [vmem:[%s3969_s11 + $0x8] sm:$0xfc] }
  0x6b   : > { %608 = vmatpush2.msra.mxu1 %v2688_v3  ;;  %3473 = vmatpush3.msra.mxu0 %v2642_v5  ;;  %v700_v3 = vld [vmem:[%s3969_s11 + $0x18] sm:$0x3]  ;;  %v2789_v5 = vld [vmem:[%s6482_s1 + $0x7c0] sm:$0xff] }
  0x6c   : > { %609 = vmatprep.subr.mxu1 %v2686_v8  ;;  %3474 = vmatprep.subr.mxu0 %v2687_v9  ;;  %v2739_v8 = vld [vmem:[%s6482_s1 + $0x630] sm:$0xff]  ;;  %v2741_v9 = vld [vmem:[%s6482_s1 + $0x640] sm:$0xff] }
  0x6d   : > { %610 = vmatpush2.msra.mxu1 %v2685_v1  ;;  %611 = vmatprep.mubr.f32.mxu1 %v544_v10  ;;  %v2737_v1 = vld [vmem:[%s6482_s1 + $0x620] sm:$0xff] }
  0x6e   : > { %3475 = vmatpush3.msra.mxu0 %v2639_v4  ;;  %682 = vmatprep.mubr.f32.mxu0 %v544_v10  ;;  %v2786_v10 = vld [vmem:[%s6482_s1 + $0x7a8] sm:$0xff]  ;;  %v806_v4 = vrot.slane %v698_v2, 2  ;;  %v2844_v2 = vld [vmem:[%s6482_s1 + $0x978] sm:$0xff] }
  0x6f   : > { %612 = vmatmul.mubr.f32.vlgmr.msra.gmra.mxu1 %v541_v11  ;;  %683 = vmatmul.mubr.f32.vlgmr.msra.gmra.mxu0 %v541_v11  ;;  %v807_v11 = vrot.slane %v700_v3, 2  ;;  %v2794_v3 = vld [vmem:[%s6482_s1 + $0x7e8] sm:$0xff] }
  0x70   : > { %811 = vmatprep.subr.mxu0 %v2779_v12  ;;  %3479 = vmatprep.subr.mxu1 %v2828_v13  ;;  %v2736_v12 = vld [vmem:[%s6482_s1 + $0x618] sm:$0xff]  ;;  %v2738_v13 = vld [vmem:[%s6482_s1 + $0x628] sm:$0xff] }
  0x71   : > { %812 = vmatpush1.msra.mxu0 %v2778_v14  ;;  %3480 = vmatpush3.msra.mxu1 %v2780_v15  ;;  %v803_v14 = vrot.slane %v697_v6, 2  ;;  %v804_v15 = vrot.slane %v699_v7, 2  ;;  %v2793_v6 = vld [vmem:[%s6482_s1 + $0x7e0] sm:$0xff] }
  0x72   : > { %813 = vmatprep.subr.mxu0 %v2776_v16  ;;  %3481 = vmatprep.subr.mxu1 %v2825_v17  ;;  %v2734_v16 = vld [vmem:[%s6482_s1 + $0x608] sm:$0xff]  ;;  %v2783_v17 = vld [vmem:[%s6482_s1 + $0x790] sm:$0xff]  ;;  %v2841_v7 = vld [vmem:[%s6482_s1 + $0x960] sm:$0xff] }
  0x73   : > { %814 = vmatpush1.msra.mxu0 %v2775_v18  ;;  %3482 = vmatpush3.msra.mxu1 %v2777_v19  ;;  %v2733_v18 = vld [vmem:[%s6482_s1 + $0x600] sm:$0xff]  ;;  %v2735_v19 = vld [vmem:[%s6482_s1 + $0x610] sm:$0xff] }
  0x74   : > { %815 = vmatprep.subr.mxu0 %v2773_v20  ;;  %3483 = vmatprep.subr.mxu1 %v2822_v21  ;;  %v4580_v20 = vsel %vm802_vm1, %v806_v4, %v807_v11  ;;  %v2827_v21 = vld [vmem:[%s6482_s1 + $0x8f0] sm:$0xff]  ;;  %v2788_v4 = vld [vmem:[%s6482_s1 + $0x7b8] sm:$0xff] }
  0x75   : > { %816 = vmatpush1.msra.mxu0 %v2772_v22  ;;  %3484 = vmatpush3.msra.mxu1 %v2774_v23  ;;  %v4586_v22 = vsel %vm802_vm1, %v803_v14, %v804_v15  ;;  %v2875_v23 = vld [vmem:[%s6482_s1 + $0xa70] sm:$0xff]  ;;  %v2836_v11 = vld [vmem:[%s6482_s1 + $0x938] sm:$0xff]  ;;  %v2785_v14 = vld [vmem:[%s6482_s1 + $0x7a0] sm:$0xff] }
  0x76   : > { %817 = vmatprep.subr.mxu0 %v2770_v24  ;;  %3485 = vmatprep.subr.mxu1 %v2819_v25  ;;  %v2826_v24 = vld [vmem:[%s6482_s1 + $0x8e8] sm:$0xff]  ;;  %v2833_v15 = vld [vmem:[%s6482_s1 + $0x920] sm:$0xff] }
  0x77   : > { %818 = vmatpush1.msra.mxu0 %v2769_v26  ;;  %3486 = vmatpush3.msra.mxu1 %v2771_v27  ;;  %v2874_v25 = vld [vmem:[%s6482_s1 + $0xa68] sm:$0xff]  ;;  %v2824_v26 = vld [vmem:[%s6482_s1 + $0x8d8] sm:$0xff] }
  0x78   : > { %819 = vmatprep.subr.mxu0 %v2767_v28  ;;  %3487 = vmatprep.subr.mxu1 %v2816_v29  ;;  %v2872_v27 = vld [vmem:[%s6482_s1 + $0xa58] sm:$0xff]  ;;  %v2823_v28 = vld [vmem:[%s6482_s1 + $0x8d0] sm:$0xff] }
  0x79   : > { %820 = vmatpush1.msra.mxu0 %v2766_v30  ;;  %3488 = vmatpush3.msra.mxu1 %v2768_v31  ;;  %v2871_v29 = vld [vmem:[%s6482_s1 + $0xa50] sm:$0xff]  ;;  %v2821_v30 = vld [vmem:[%s6482_s1 + $0x8c0] sm:$0xff] }
  0x7a   : > { %821 = vmatprep.subr.mxu0 %v2764_v32  ;;  %3489 = vmatprep.subr.mxu1 %v2813_v33  ;;  %v2869_v31 = vld [vmem:[%s6482_s1 + $0xa40] sm:$0xff]  ;;  %v2820_v32 = vld [vmem:[%s6482_s1 + $0x8b8] sm:$0xff] }
  0x7b   : > { %822 = vmatpush1.msra.mxu0 %v2763_v34  ;;  %3490 = vmatpush3.msra.mxu1 %v2765_v35  ;;  %v2868_v33 = vld [vmem:[%s6482_s1 + $0xa38] sm:$0xff]  ;;  %v2818_v34 = vld [vmem:[%s6482_s1 + $0x8a8] sm:$0xff] }
  0x7c   : > { %823 = vmatprep.subr.mxu0 %v2761_v36  ;;  %3491 = vmatprep.subr.mxu1 %v2810_v37  ;;  %v2866_v35 = vld [vmem:[%s6482_s1 + $0xa28] sm:$0xff]  ;;  %v2817_v36 = vld [vmem:[%s6482_s1 + $0x8a0] sm:$0xff] }
  0x7d   : > { %824 = vmatpush1.msra.mxu0 %v2760_v38  ;;  %3492 = vmatpush3.msra.mxu1 %v2762_v39  ;;  %v2865_v37 = vld [vmem:[%s6482_s1 + $0xa20] sm:$0xff]  ;;  %v2815_v38 = vld [vmem:[%s6482_s1 + $0x890] sm:$0xff] }
  0x7e   : > { %825 = vmatprep.subr.mxu0 %v2758_v40  ;;  %3493 = vmatprep.subr.mxu1 %v2807_v41  ;;  %v2863_v39 = vld [vmem:[%s6482_s1 + $0xa10] sm:$0xff]  ;;  %v2814_v40 = vld [vmem:[%s6482_s1 + $0x888] sm:$0xff] }
  0x7f   : > { %826 = vmatpush1.msra.mxu0 %v2757_v42  ;;  %3494 = vmatpush3.msra.mxu1 %v2759_v43  ;;  %v2862_v41 = vld [vmem:[%s6482_s1 + $0xa08] sm:$0xff]  ;;  %v2812_v42 = vld [vmem:[%s6482_s1 + $0x878] sm:$0xff] }
  0x80   : > { %827 = vmatprep.subr.mxu0 %v2755_v44  ;;  %3495 = vmatprep.subr.mxu1 %v2804_v45  ;;  %v2860_v43 = vld [vmem:[%s6482_s1 + $0x9f8] sm:$0xff]  ;;  %v2811_v44 = vld [vmem:[%s6482_s1 + $0x870] sm:$0xff] }
  0x81   : > { %828 = vmatpush1.msra.mxu0 %v2754_v46  ;;  %3496 = vmatpush3.msra.mxu1 %v2756_v47  ;;  %v2859_v45 = vld [vmem:[%s6482_s1 + $0x9f0] sm:$0xff]  ;;  %v2809_v46 = vld [vmem:[%s6482_s1 + $0x860] sm:$0xff] }
  0x82   : > { %829 = vmatprep.subr.mxu0 %v2752_v48  ;;  %3497 = vmatprep.subr.mxu1 %v2801_v49  ;;  %v2857_v47 = vld [vmem:[%s6482_s1 + $0x9e0] sm:$0xff]  ;;  %v2808_v48 = vld [vmem:[%s6482_s1 + $0x858] sm:$0xff] }
  0x83   : > { %830 = vmatpush1.msra.mxu0 %v2751_v50  ;;  %3498 = vmatpush3.msra.mxu1 %v2753_v51  ;;  %v2856_v49 = vld [vmem:[%s6482_s1 + $0x9d8] sm:$0xff]  ;;  %v2806_v50 = vld [vmem:[%s6482_s1 + $0x848] sm:$0xff] }
  0x84   : > { %831 = vmatprep.subr.mxu0 %v2749_v52  ;;  %3499 = vmatprep.subr.mxu1 %v2798_v53  ;;  %v2854_v51 = vld [vmem:[%s6482_s1 + $0x9c8] sm:$0xff]  ;;  %v2805_v52 = vld [vmem:[%s6482_s1 + $0x840] sm:$0xff] }
  0x85   : > { %832 = vmatpush1.msra.mxu0 %v2748_v54  ;;  %3500 = vmatpush3.msra.mxu1 %v2750_v55  ;;  %v2853_v53 = vld [vmem:[%s6482_s1 + $0x9c0] sm:$0xff]  ;;  %v2803_v54 = vld [vmem:[%s6482_s1 + $0x830] sm:$0xff] }
  0x86   : > { %833 = vmatprep.subr.mxu0 %v2746_v56  ;;  %3501 = vmatprep.subr.mxu1 %v2795_v57  ;;  %v2851_v55 = vld [vmem:[%s6482_s1 + $0x9b0] sm:$0xff]  ;;  %v2802_v56 = vld [vmem:[%s6482_s1 + $0x828] sm:$0xff] }
  0x87   : > { %834 = vmatpush1.msra.mxu0 %v2745_v58  ;;  %3502 = vmatpush3.msra.mxu1 %v2747_v59  ;;  %v2850_v57 = vld [vmem:[%s6482_s1 + $0x9a8] sm:$0xff]  ;;  %v2800_v58 = vld [vmem:[%s6482_s1 + $0x818] sm:$0xff] }
  0x88   : > { %835 = vmatprep.subr.mxu0 %v2743_v60  ;;  %3503 = vmatprep.subr.mxu1 %v2792_v61  ;;  %v2848_v59 = vld [vmem:[%s6482_s1 + $0x998] sm:$0xff]  ;;  %v2799_v60 = vld [vmem:[%s6482_s1 + $0x810] sm:$0xff] }
  0x89   : > { %836 = vmatpush1.msra.mxu0 %v2742_v62  ;;  %3504 = vmatpush3.msra.mxu1 %v2744_v63  ;;  %v2847_v61 = vld [vmem:[%s6482_s1 + $0x990] sm:$0xff]  ;;  %v2797_v62 = vld [vmem:[%s6482_s1 + $0x800] sm:$0xff] }
  0x8a   : > { %837 = vmatprep.subr.mxu0 %v2740_v0  ;;  %3505 = vmatprep.subr.mxu1 %v2789_v5  ;;  %v2845_v63 = vld [vmem:[%s6482_s1 + $0x980] sm:$0xff]  ;;  %v2796_v0 = vld [vmem:[%s6482_s1 + $0x7f8] sm:$0xff]  ;;  %v2842_v5 = vld [vmem:[%s6482_s1 + $0x968] sm:$0xff] }
  0x8b   : > { %838 = vmatpush1.msra.mxu0 %v2739_v8  ;;  %3506 = vmatpush3.msra.mxu1 %v2741_v9  ;;  %v2791_v8 = vld [vmem:[%s6482_s1 + $0x7d0] sm:$0xff] }
  0x8c   : > { %839 = vmatprep.subr.mxu0 %v2737_v1  ;;  %3507 = vmatprep.subr.mxu1 %v2786_v10  ;;  %v2839_v9 = vld [vmem:[%s6482_s1 + $0x950] sm:$0xff]  ;;  %v2790_v1 = vld [vmem:[%s6482_s1 + $0x7c8] sm:$0xff] }
  0x8d   : > { %840 = vmatpush1.msra.mxu0 %v2736_v12  ;;  %3508 = vmatpush3.msra.mxu1 %v2738_v13  ;;  %v2838_v10 = vld [vmem:[%s6482_s1 + $0x948] sm:$0xff]  ;;  %v2787_v12 = vld [vmem:[%s6482_s1 + $0x7b0] sm:$0xff] }
  0x8e   : > { %841 = vmatprep.subr.mxu0 %v2734_v16  ;;  %3509 = vmatprep.subr.mxu1 %v2783_v17  ;;  %v2835_v13 = vld [vmem:[%s6482_s1 + $0x930] sm:$0xff]  ;;  %v2784_v16 = vld [vmem:[%s6482_s1 + $0x798] sm:$0xff] }
  0x8f   : > { %842 = vmatpush1.msra.mxu0 %v2733_v18  ;;  %3510 = vmatpush3.msra.mxu1 %v2735_v19  ;;  %v2832_v17 = vld [vmem:[%s6482_s1 + $0x918] sm:$0xff]  ;;  %v2782_v18 = vld [vmem:[%s6482_s1 + $0x788] sm:$0xff] }
  0x90   : > { %946 = vmatprep.mubr.f32.mxu1 %v4580_v20  ;;  %843 = vmatprep.subr.mxu0 %v2827_v21  ;;  %v2830_v19 = vld [vmem:[%s6482_s1 + $0x908] sm:$0xff]  ;;  %v2781_v21 = vld [vmem:[%s6482_s1 + $0x780] sm:$0xff] }
  0x91   : > { %947 = vmatmul.mubr.f32.vlgmr.msra.gmra.mxu1 %v4586_v22  ;;  %1075 = vmatprep.subr.mxu1 %v2875_v23  ;;  %v2829_v23 = vld [vmem:[%s6482_s1 + $0x900] sm:$0xff] }
  0x92   : > { %844 = vmatpush2.msra.mxu0 %v2826_v24  ;;  %1076 = vmatpush1.msra.mxu1 %v2874_v25  ;;  %v2923_v24 = vld [vmem:[%s6482_s1 + $0xbf0] sm:$0xff]  ;;  %v2924_v25 = vld [vmem:[%s6482_s1 + $0xbf8] sm:$0xff] }
  0x93   : > { %845 = vmatprep.subr.mxu0 %v2824_v26  ;;  %1077 = vmatprep.subr.mxu1 %v2872_v27  ;;  %v2922_v26 = vld [vmem:[%s6482_s1 + $0xbe8] sm:$0xff]  ;;  %v2876_v27 = vld [vmem:[%s6482_s1 + $0xa78] sm:$0xff] }
  0x94   : > { %846 = vmatpush2.msra.mxu0 %v2823_v28  ;;  %1078 = vmatpush1.msra.mxu1 %v2871_v29  ;;  %v2920_v28 = vld [vmem:[%s6482_s1 + $0xbd8] sm:$0xff]  ;;  %v2921_v29 = vld [vmem:[%s6482_s1 + $0xbe0] sm:$0xff] }
  0x95   : > { %847 = vmatprep.subr.mxu0 %v2821_v30  ;;  %1079 = vmatprep.subr.mxu1 %v2869_v31  ;;  %v2873_v30 = vld [vmem:[%s6482_s1 + $0xa60] sm:$0xff]  ;;  %v2918_v31 = vld [vmem:[%s6482_s1 + $0xbc8] sm:$0xff] }
  0x96   : > { %848 = vmatpush2.msra.mxu0 %v2820_v32  ;;  %1080 = vmatpush1.msra.mxu1 %v2868_v33  ;;  %v2916_v32 = vld [vmem:[%s6482_s1 + $0xbb8] sm:$0xff]  ;;  %v2870_v33 = vld [vmem:[%s6482_s1 + $0xa48] sm:$0xff] }
  0x97   : > { %849 = vmatprep.subr.mxu0 %v2818_v34  ;;  %1081 = vmatprep.subr.mxu1 %v2866_v35  ;;  %v2914_v34 = vld [vmem:[%s6482_s1 + $0xba8] sm:$0xff]  ;;  %v2915_v35 = vld [vmem:[%s6482_s1 + $0xbb0] sm:$0xff] }
  0x98   : > { %850 = vmatpush2.msra.mxu0 %v2817_v36  ;;  %1082 = vmatpush1.msra.mxu1 %v2865_v37  ;;  %v2913_v36 = vld [vmem:[%s6482_s1 + $0xba0] sm:$0xff]  ;;  %v2867_v37 = vld [vmem:[%s6482_s1 + $0xa30] sm:$0xff] }
  0x99   : > { %851 = vmatprep.subr.mxu0 %v2815_v38  ;;  %1083 = vmatprep.subr.mxu1 %v2863_v39  ;;  %v2911_v38 = vld [vmem:[%s6482_s1 + $0xb90] sm:$0xff]  ;;  %v2912_v39 = vld [vmem:[%s6482_s1 + $0xb98] sm:$0xff] }
  0x9a   : > { %852 = vmatpush2.msra.mxu0 %v2814_v40  ;;  %1084 = vmatpush1.msra.mxu1 %v2862_v41  ;;  %v2910_v40 = vld [vmem:[%s6482_s1 + $0xb88] sm:$0xff]  ;;  %v2864_v41 = vld [vmem:[%s6482_s1 + $0xa18] sm:$0xff] }
  0x9b   : > { %853 = vmatprep.subr.mxu0 %v2812_v42  ;;  %1085 = vmatprep.subr.mxu1 %v2860_v43  ;;  %v2908_v42 = vld [vmem:[%s6482_s1 + $0xb78] sm:$0xff]  ;;  %v2909_v43 = vld [vmem:[%s6482_s1 + $0xb80] sm:$0xff] }
  0x9c   : > { %854 = vmatpush2.msra.mxu0 %v2811_v44  ;;  %1086 = vmatpush1.msra.mxu1 %v2859_v45  ;;  %v2907_v44 = vld [vmem:[%s6482_s1 + $0xb70] sm:$0xff]  ;;  %v2861_v45 = vld [vmem:[%s6482_s1 + $0xa00] sm:$0xff] }
  0x9d   : > { %855 = vmatprep.subr.mxu0 %v2809_v46  ;;  %1087 = vmatprep.subr.mxu1 %v2857_v47  ;;  %v2905_v46 = vld [vmem:[%s6482_s1 + $0xb60] sm:$0xff]  ;;  %v2906_v47 = vld [vmem:[%s6482_s1 + $0xb68] sm:$0xff] }
  0x9e   : > { %856 = vmatpush2.msra.mxu0 %v2808_v48  ;;  %1088 = vmatpush1.msra.mxu1 %v2856_v49  ;;  %v2904_v48 = vld [vmem:[%s6482_s1 + $0xb58] sm:$0xff]  ;;  %v2858_v49 = vld [vmem:[%s6482_s1 + $0x9e8] sm:$0xff] }
  0x9f   : > { %857 = vmatprep.subr.mxu0 %v2806_v50  ;;  %1089 = vmatprep.subr.mxu1 %v2854_v51  ;;  %v2902_v50 = vld [vmem:[%s6482_s1 + $0xb48] sm:$0xff]  ;;  %v2903_v51 = vld [vmem:[%s6482_s1 + $0xb50] sm:$0xff] }
  0xa0   : > { %858 = vmatpush2.msra.mxu0 %v2805_v52  ;;  %1090 = vmatpush1.msra.mxu1 %v2853_v53  ;;  %v2901_v52 = vld [vmem:[%s6482_s1 + $0xb40] sm:$0xff]  ;;  %v2855_v53 = vld [vmem:[%s6482_s1 + $0x9d0] sm:$0xff] }
  0xa1   : > { %859 = vmatprep.subr.mxu0 %v2803_v54  ;;  %1091 = vmatprep.subr.mxu1 %v2851_v55  ;;  %v2899_v54 = vld [vmem:[%s6482_s1 + $0xb30] sm:$0xff]  ;;  %v2900_v55 = vld [vmem:[%s6482_s1 + $0xb38] sm:$0xff] }
  0xa2   : > { %860 = vmatpush2.msra.mxu0 %v2802_v56  ;;  %1092 = vmatpush1.msra.mxu1 %v2850_v57  ;;  %v2898_v56 = vld [vmem:[%s6482_s1 + $0xb28] sm:$0xff]  ;;  %v2852_v57 = vld [vmem:[%s6482_s1 + $0x9b8] sm:$0xff] }
  0xa3   : > { %861 = vmatprep.subr.mxu0 %v2800_v58  ;;  %1093 = vmatprep.subr.mxu1 %v2848_v59  ;;  %v2896_v58 = vld [vmem:[%s6482_s1 + $0xb18] sm:$0xff]  ;;  %v2897_v59 = vld [vmem:[%s6482_s1 + $0xb20] sm:$0xff] }
  0xa4   : > { %862 = vmatpush2.msra.mxu0 %v2799_v60  ;;  %1094 = vmatpush1.msra.mxu1 %v2847_v61  ;;  %v2895_v60 = vld [vmem:[%s6482_s1 + $0xb10] sm:$0xff]  ;;  %v2849_v61 = vld [vmem:[%s6482_s1 + $0x9a0] sm:$0xff] }
  0xa5   : > { %863 = vmatprep.subr.mxu0 %v2797_v62  ;;  %1095 = vmatprep.subr.mxu1 %v2845_v63  ;;  %v2893_v62 = vld [vmem:[%s6482_s1 + $0xb00] sm:$0xff]  ;;  %v2894_v63 = vld [vmem:[%s6482_s1 + $0xb08] sm:$0xff] }
  0xa6   : > { %864 = vmatpush2.msra.mxu0 %v2796_v0  ;;  %1096 = vmatpush1.msra.mxu1 %v2844_v2  ;;  %v2892_v0 = vld [vmem:[%s6482_s1 + $0xaf8] sm:$0xff]  ;;  %v2846_v2 = vld [vmem:[%s6482_s1 + $0x988] sm:$0xff] }
  0xa7   : > { %865 = vmatprep.subr.mxu0 %v2794_v3  ;;  %1097 = vmatprep.subr.mxu1 %v2842_v5  ;;  %v2890_v3 = vld [vmem:[%s6482_s1 + $0xae8] sm:$0xff]  ;;  %v2891_v5 = vld [vmem:[%s6482_s1 + $0xaf0] sm:$0xff] }
  0xa8   : > { %866 = vmatpush2.msra.mxu0 %v2793_v6  ;;  %1098 = vmatpush1.msra.mxu1 %v2841_v7  ;;  %v2889_v6 = vld [vmem:[%s6482_s1 + $0xae0] sm:$0xff]  ;;  %v2843_v7 = vld [vmem:[%s6482_s1 + $0x970] sm:$0xff] }
  0xa9   : > { %867 = vmatprep.subr.mxu0 %v2791_v8  ;;  %1099 = vmatprep.subr.mxu1 %v2839_v9  ;;  %v2887_v8 = vld [vmem:[%s6482_s1 + $0xad0] sm:$0xff]  ;;  %v2888_v9 = vld [vmem:[%s6482_s1 + $0xad8] sm:$0xff] }
  0xaa   : > { %868 = vmatpush2.msra.mxu0 %v2790_v1  ;;  %1100 = vmatpush1.msra.mxu1 %v2838_v10  ;;  %v962_v1 = vld [vmem:[%s3969_s11 + $0x8] sm:$0xf0]  ;;  %v964_v10 = vld [vmem:[%s3969_s11 + $0x18] sm:$0xf] }
  0xab   : > { %869 = vmatprep.subr.mxu0 %v2788_v4  ;;  %1101 = vmatprep.subr.mxu1 %v2836_v11  ;;  %v2886_v4 = vld [vmem:[%s6482_s1 + $0xac8] sm:$0xff]  ;;  %v2840_v11 = vld [vmem:[%s6482_s1 + $0x958] sm:$0xff] }
  0xac   : > { %870 = vmatpush2.msra.mxu0 %v2787_v12  ;;  %1102 = vmatpush1.msra.mxu1 %v2835_v13  ;;  %v2884_v12 = vld [vmem:[%s6482_s1 + $0xab8] sm:$0xff]  ;;  %v2885_v13 = vld [vmem:[%s6482_s1 + $0xac0] sm:$0xff] }
  0xad   : > { %871 = vmatprep.subr.mxu0 %v2785_v14  ;;  %1103 = vmatprep.subr.mxu1 %v2833_v15  ;;  %v961_v14 = vld [vmem:[%s3969_s11] sm:$0xf0]  ;;  %v963_v15 = vld [vmem:[%s3969_s11 + $0x10] sm:$0xf] }
  0xae   : > { %872 = vmatpush2.msra.mxu0 %v2784_v16  ;;  %1104 = vmatpush1.msra.mxu1 %v2832_v17  ;;  %v2883_v16 = vld [vmem:[%s6482_s1 + $0xab0] sm:$0xff]  ;;  %v2837_v17 = vld [vmem:[%s6482_s1 + $0x940] sm:$0xff] }
  0xaf   : > { %873 = vmatprep.subr.mxu0 %v2782_v18  ;;  %1105 = vmatprep.subr.mxu1 %v2830_v19  ;;  %v1070_v18 = vrot.slane %v962_v1, 4  ;;  %v1071_v19 = vrot.slane %v964_v10, 4  ;;  %v2941_v1 = vld [vmem:[%s6482_s1 + $0xc80] sm:$0xff]  ;;  %v2990_v10 = vld [vmem:[%s6482_s1 + $0xe08] sm:$0xff] }
  0xb0   : > { %874 = vmatpush2.msra.mxu0 %v2781_v21  ;;  %875 = vmatprep.mubr.f32.mxu0 %v4580_v20  ;;  %v2919_v20 = vld [vmem:[%s6482_s1 + $0xbd0] sm:$0xff]  ;;  %v2881_v21 = vld [vmem:[%s6482_s1 + $0xaa0] sm:$0xff] }
  0xb1   : > { %1106 = vmatpush1.msra.mxu1 %v2829_v23  ;;  %876 = vmatmul.mubr.f32.vlgmr.msra.gmra.mxu0 %v4586_v22  ;;  %v2917_v22 = vld [vmem:[%s6482_s1 + $0xbc0] sm:$0xff]  ;;  %v2882_v23 = vld [vmem:[%s6482_s1 + $0xaa8] sm:$0xff] }
  0xb2   : > { %1107 = vmatprep.subr.mxu1 %v2923_v24  ;;  %3514 = vmatprep.subr.mxu0 %v2924_v25  ;;  %v2880_v24 = vld [vmem:[%s6482_s1 + $0xa98] sm:$0xff]  ;;  %v2834_v25 = vld [vmem:[%s6482_s1 + $0x928] sm:$0xff] }
  0xb3   : > { %1108 = vmatpush2.msra.mxu1 %v2922_v26  ;;  %3515 = vmatpush3.msra.mxu0 %v2876_v27  ;;  %v1067_v26 = vrot.slane %v961_v14, 4  ;;  %v1068_v27 = vrot.slane %v963_v15, 4  ;;  %v2937_v14 = vld [vmem:[%s6482_s1 + $0xc60] sm:$0xff]  ;;  %v2939_v15 = vld [vmem:[%s6482_s1 + $0xc70] sm:$0xff] }
  0xb4   : > { %1109 = vmatprep.subr.mxu1 %v2920_v28  ;;  %3516 = vmatprep.subr.mxu0 %v2921_v29  ;;  %v2878_v28 = vld [vmem:[%s6482_s1 + $0xa88] sm:$0xff]  ;;  %v2879_v29 = vld [vmem:[%s6482_s1 + $0xa90] sm:$0xff] }
  0xb5   : > { %1110 = vmatpush2.msra.mxu1 %v2919_v20  ;;  %3517 = vmatpush3.msra.mxu0 %v2873_v30  ;;  %v2877_v20 = vld [vmem:[%s6482_s1 + $0xa80] sm:$0xff]  ;;  %v1072_v30 = vsel %vm1066_vm2, %v1070_v18, %v1071_v19  ;;  %v2934_v18 = vld [vmem:[%s6482_s1 + $0xc48] sm:$0xff]  ;;  %v2936_v19 = vld [vmem:[%s6482_s1 + $0xc58] sm:$0xff] }
  0xb6   : > { %1111 = vmatprep.subr.mxu1 %v2917_v22  ;;  %3518 = vmatprep.subr.mxu0 %v2918_v31  ;;  %v2831_v22 = vld [vmem:[%s6482_s1 + $0x910] sm:$0xff]  ;;  %v1069_v31 = vsel %vm1066_vm2, %v1067_v26, %v1068_v27  ;;  %v1225_v26 = vld [vmem:[%s3969_s11] sm:$0xe0] }
  0xb7   : > { %1112 = vmatpush2.msra.mxu1 %v2916_v32  ;;  %3519 = vmatpush3.msra.mxu0 %v2870_v33  ;;  %v2971_v32 = vld [vmem:[%s6482_s1 + $0xd70] sm:$0xff]  ;;  %v3020_v33 = vld [vmem:[%s6482_s1 + $0xef8] sm:$0xff] }
  0xb8   : > { %1113 = vmatprep.subr.mxu1 %v2914_v34  ;;  %3520 = vmatprep.subr.mxu0 %v2915_v35  ;;  %v2970_v34 = vld [vmem:[%s6482_s1 + $0xd68] sm:$0xff]  ;;  %v2972_v35 = vld [vmem:[%s6482_s1 + $0xd78] sm:$0xff]  ;;  %v1227_v27 = vld [vmem:[%s3969_s11 + $0x10] sm:$0x1f] }
  0xb9   : > { %1114 = vmatpush2.msra.mxu1 %v2913_v36  ;;  %3521 = vmatpush3.msra.mxu0 %v2867_v37  ;;  %v2968_v36 = vld [vmem:[%s6482_s1 + $0xd58] sm:$0xff]  ;;  %v3017_v37 = vld [vmem:[%s6482_s1 + $0xee0] sm:$0xff] }
  0xba   : > { %1115 = vmatprep.subr.mxu1 %v2911_v38  ;;  %3522 = vmatprep.subr.mxu0 %v2912_v39  ;;  %v2967_v38 = vld [vmem:[%s6482_s1 + $0xd50] sm:$0xff]  ;;  %v2969_v39 = vld [vmem:[%s6482_s1 + $0xd60] sm:$0xff] }
  0xbb   : > { %1116 = vmatpush2.msra.mxu1 %v2910_v40  ;;  %3523 = vmatpush3.msra.mxu0 %v2864_v41  ;;  %v2965_v40 = vld [vmem:[%s6482_s1 + $0xd40] sm:$0xff]  ;;  %v3014_v41 = vld [vmem:[%s6482_s1 + $0xec8] sm:$0xff] }
  0xbc   : > { %1117 = vmatprep.subr.mxu1 %v2908_v42  ;;  %3524 = vmatprep.subr.mxu0 %v2909_v43  ;;  %v2964_v42 = vld [vmem:[%s6482_s1 + $0xd38] sm:$0xff]  ;;  %v2966_v43 = vld [vmem:[%s6482_s1 + $0xd48] sm:$0xff] }
  0xbd   : > { %1118 = vmatpush2.msra.mxu1 %v2907_v44  ;;  %3525 = vmatpush3.msra.mxu0 %v2861_v45  ;;  %v2962_v44 = vld [vmem:[%s6482_s1 + $0xd28] sm:$0xff]  ;;  %v3011_v45 = vld [vmem:[%s6482_s1 + $0xeb0] sm:$0xff] }
  0xbe   : > { %1119 = vmatprep.subr.mxu1 %v2905_v46  ;;  %3526 = vmatprep.subr.mxu0 %v2906_v47  ;;  %v2961_v46 = vld [vmem:[%s6482_s1 + $0xd20] sm:$0xff]  ;;  %v2963_v47 = vld [vmem:[%s6482_s1 + $0xd30] sm:$0xff] }
  0xbf   : > { %1120 = vmatpush2.msra.mxu1 %v2904_v48  ;;  %3527 = vmatpush3.msra.mxu0 %v2858_v49  ;;  %v2959_v48 = vld [vmem:[%s6482_s1 + $0xd10] sm:$0xff]  ;;  %v3008_v49 = vld [vmem:[%s6482_s1 + $0xe98] sm:$0xff] }
  0xc0   : > { %1121 = vmatprep.subr.mxu1 %v2902_v50  ;;  %3528 = vmatprep.subr.mxu0 %v2903_v51  ;;  %v2958_v50 = vld [vmem:[%s6482_s1 + $0xd08] sm:$0xff]  ;;  %v2960_v51 = vld [vmem:[%s6482_s1 + $0xd18] sm:$0xff] }
  0xc1   : > { %1122 = vmatpush2.msra.mxu1 %v2901_v52  ;;  %3529 = vmatpush3.msra.mxu0 %v2855_v53  ;;  %v2956_v52 = vld [vmem:[%s6482_s1 + $0xcf8] sm:$0xff]  ;;  %v3005_v53 = vld [vmem:[%s6482_s1 + $0xe80] sm:$0xff] }
  0xc2   : > { %1123 = vmatprep.subr.mxu1 %v2899_v54  ;;  %3530 = vmatprep.subr.mxu0 %v2900_v55  ;;  %v2955_v54 = vld [vmem:[%s6482_s1 + $0xcf0] sm:$0xff]  ;;  %v2957_v55 = vld [vmem:[%s6482_s1 + $0xd00] sm:$0xff] }
  0xc3   : > { %1124 = vmatpush2.msra.mxu1 %v2898_v56  ;;  %3531 = vmatpush3.msra.mxu0 %v2852_v57  ;;  %v2953_v56 = vld [vmem:[%s6482_s1 + $0xce0] sm:$0xff]  ;;  %v3002_v57 = vld [vmem:[%s6482_s1 + $0xe68] sm:$0xff] }
  0xc4   : > { %1125 = vmatprep.subr.mxu1 %v2896_v58  ;;  %3532 = vmatprep.subr.mxu0 %v2897_v59  ;;  %v2952_v58 = vld [vmem:[%s6482_s1 + $0xcd8] sm:$0xff]  ;;  %v2954_v59 = vld [vmem:[%s6482_s1 + $0xce8] sm:$0xff] }
  0xc5   : > { %1126 = vmatpush2.msra.mxu1 %v2895_v60  ;;  %3533 = vmatpush3.msra.mxu0 %v2849_v61  ;;  %v2950_v60 = vld [vmem:[%s6482_s1 + $0xcc8] sm:$0xff]  ;;  %v2999_v61 = vld [vmem:[%s6482_s1 + $0xe50] sm:$0xff] }
  0xc6   : > { %1127 = vmatprep.subr.mxu1 %v2893_v62  ;;  %3534 = vmatprep.subr.mxu0 %v2894_v63  ;;  %v2949_v62 = vld [vmem:[%s6482_s1 + $0xcc0] sm:$0xff]  ;;  %v2951_v63 = vld [vmem:[%s6482_s1 + $0xcd0] sm:$0xff] }
  0xc7   : > { %1128 = vmatpush2.msra.mxu1 %v2892_v0  ;;  %3535 = vmatpush3.msra.mxu0 %v2846_v2  ;;  %v2947_v0 = vld [vmem:[%s6482_s1 + $0xcb0] sm:$0xff]  ;;  %v2996_v2 = vld [vmem:[%s6482_s1 + $0xe38] sm:$0xff] }
  0xc8   : > { %1129 = vmatprep.subr.mxu1 %v2890_v3  ;;  %3536 = vmatprep.subr.mxu0 %v2891_v5  ;;  %v2946_v3 = vld [vmem:[%s6482_s1 + $0xca8] sm:$0xff]  ;;  %v2948_v5 = vld [vmem:[%s6482_s1 + $0xcb8] sm:$0xff] }
  0xc9   : > { %1130 = vmatpush2.msra.mxu1 %v2889_v6  ;;  %3537 = vmatpush3.msra.mxu0 %v2843_v7  ;;  %v2944_v6 = vld [vmem:[%s6482_s1 + $0xc98] sm:$0xff]  ;;  %v2993_v7 = vld [vmem:[%s6482_s1 + $0xe20] sm:$0xff] }
  0xca   : > { %1131 = vmatprep.subr.mxu1 %v2887_v8  ;;  %3538 = vmatprep.subr.mxu0 %v2888_v9  ;;  %v2943_v8 = vld [vmem:[%s6482_s1 + $0xc90] sm:$0xff]  ;;  %v2945_v9 = vld [vmem:[%s6482_s1 + $0xca0] sm:$0xff] }
  0xcb   : > { %1132 = vmatpush2.msra.mxu1 %v2886_v4  ;;  %3539 = vmatpush3.msra.mxu0 %v2840_v11  ;;  %v2940_v4 = vld [vmem:[%s6482_s1 + $0xc78] sm:$0xff]  ;;  %v2942_v11 = vld [vmem:[%s6482_s1 + $0xc88] sm:$0xff] }
  0xcc   : > { %1133 = vmatprep.subr.mxu1 %v2884_v12  ;;  %3540 = vmatprep.subr.mxu0 %v2885_v13  ;;  %v2938_v12 = vld [vmem:[%s6482_s1 + $0xc68] sm:$0xff]  ;;  %v2987_v13 = vld [vmem:[%s6482_s1 + $0xdf0] sm:$0xff] }
  0xcd   : > { %1134 = vmatpush2.msra.mxu1 %v2883_v16  ;;  %3541 = vmatpush3.msra.mxu0 %v2837_v17  ;;  %v2935_v16 = vld [vmem:[%s6482_s1 + $0xc50] sm:$0xff]  ;;  %v2984_v17 = vld [vmem:[%s6482_s1 + $0xdd8] sm:$0xff] }
  0xce   : > { %1135 = vmatprep.subr.mxu1 %v2881_v21  ;;  %3542 = vmatprep.subr.mxu0 %v2882_v23  ;;  %v2932_v21 = vld [vmem:[%s6482_s1 + $0xc38] sm:$0xff]  ;;  %v1226_v23 = vld [vmem:[%s3969_s11 + $0x8] sm:$0xe0] }
  0xcf   : > { %1136 = vmatpush2.msra.mxu1 %v2880_v24  ;;  %3543 = vmatpush3.msra.mxu0 %v2834_v25  ;;  %v1228_v24 = vld [vmem:[%s3969_s11 + $0x18] sm:$0x1f]  ;;  %v2981_v25 = vld [vmem:[%s6482_s1 + $0xdc0] sm:$0xff] }
  0xd0   : > { %1137 = vmatprep.subr.mxu1 %v2878_v28  ;;  %3544 = vmatprep.subr.mxu0 %v2879_v29  ;;  %v2931_v28 = vld [vmem:[%s6482_s1 + $0xc30] sm:$0xff]  ;;  %v2933_v29 = vld [vmem:[%s6482_s1 + $0xc40] sm:$0xff] }
  0xd1   : > { %1138 = vmatpush2.msra.mxu1 %v2877_v20  ;;  %1139 = vmatprep.mubr.f32.mxu1 %v1072_v30  ;;  %v2929_v20 = vld [vmem:[%s6482_s1 + $0xc20] sm:$0xff] }
  0xd2   : > { %3545 = vmatpush3.msra.mxu0 %v2831_v22  ;;  %1210 = vmatprep.mubr.f32.mxu0 %v1072_v30  ;;  %v2978_v30 = vld [vmem:[%s6482_s1 + $0xda8] sm:$0xff]  ;;  %v1334_v22 = vrot.slane %v1226_v23, 5  ;;  %v3036_v23 = vld [vmem:[%s6482_s1 + $0xf78] sm:$0xff] }
  0xd3   : > { %1140 = vmatmul.mubr.f32.vlgmr.msra.gmra.mxu1 %v1069_v31  ;;  %1211 = vmatmul.mubr.f32.vlgmr.msra.gmra.mxu0 %v1069_v31  ;;  %v1335_v31 = vrot.slane %v1228_v24, 5  ;;  %v2986_v24 = vld [vmem:[%s6482_s1 + $0xde8] sm:$0xff] }
  0xd4   : > { %1339 = vmatprep.subr.mxu0 %v2971_v32  ;;  %3549 = vmatprep.subr.mxu1 %v3020_v33  ;;  %v2928_v32 = vld [vmem:[%s6482_s1 + $0xc18] sm:$0xff]  ;;  %v2930_v33 = vld [vmem:[%s6482_s1 + $0xc28] sm:$0xff] }
  0xd5   : > { %1340 = vmatpush1.msra.mxu0 %v2970_v34  ;;  %3550 = vmatpush3.msra.mxu1 %v2972_v35  ;;  %v1331_v34 = vrot.slane %v1225_v26, 5  ;;  %v1332_v35 = vrot.slane %v1227_v27, 5  ;;  %v2985_v26 = vld [vmem:[%s6482_s1 + $0xde0] sm:$0xff] }
  0xd6   : > { %1341 = vmatprep.subr.mxu0 %v2968_v36  ;;  %3551 = vmatprep.subr.mxu1 %v3017_v37  ;;  %v2926_v36 = vld [vmem:[%s6482_s1 + $0xc08] sm:$0xff]  ;;  %v2975_v37 = vld [vmem:[%s6482_s1 + $0xd90] sm:$0xff]  ;;  %v3033_v27 = vld [vmem:[%s6482_s1 + $0xf60] sm:$0xff] }
  0xd7   : > { %1342 = vmatpush1.msra.mxu0 %v2967_v38  ;;  %3552 = vmatpush3.msra.mxu1 %v2969_v39  ;;  %v2925_v38 = vld [vmem:[%s6482_s1 + $0xc00] sm:$0xff]  ;;  %v2927_v39 = vld [vmem:[%s6482_s1 + $0xc10] sm:$0xff] }
  0xd8   : > { %1343 = vmatprep.subr.mxu0 %v2965_v40  ;;  %3553 = vmatprep.subr.mxu1 %v3014_v41  ;;  %v5176_v40 = vsel %vm1330_vm3, %v1334_v22, %v1335_v31  ;;  %v3019_v41 = vld [vmem:[%s6482_s1 + $0xef0] sm:$0xff]  ;;  %v2980_v22 = vld [vmem:[%s6482_s1 + $0xdb8] sm:$0xff] }
  0xd9   : > { %1344 = vmatpush1.msra.mxu0 %v2964_v42  ;;  %3554 = vmatpush3.msra.mxu1 %v2966_v43  ;;  %v5182_v42 = vsel %vm1330_vm3, %v1331_v34, %v1332_v35  ;;  %v3067_v43 = vld [vmem:[%s6482_s1 + $0x1070] sm:$0xff]  ;;  %v3028_v31 = vld [vmem:[%s6482_s1 + $0xf38] sm:$0xff]  ;;  %v2977_v34 = vld [vmem:[%s6482_s1 + $0xda0] sm:$0xff] }
  0xda   : > { %1345 = vmatprep.subr.mxu0 %v2962_v44  ;;  %3555 = vmatprep.subr.mxu1 %v3011_v45  ;;  %v3018_v44 = vld [vmem:[%s6482_s1 + $0xee8] sm:$0xff]  ;;  %v3025_v35 = vld [vmem:[%s6482_s1 + $0xf20] sm:$0xff] }
  0xdb   : > { %1346 = vmatpush1.msra.mxu0 %v2961_v46  ;;  %3556 = vmatpush3.msra.mxu1 %v2963_v47  ;;  %v3066_v45 = vld [vmem:[%s6482_s1 + $0x1068] sm:$0xff]  ;;  %v3016_v46 = vld [vmem:[%s6482_s1 + $0xed8] sm:$0xff] }
  0xdc   : > { %1347 = vmatprep.subr.mxu0 %v2959_v48  ;;  %3557 = vmatprep.subr.mxu1 %v3008_v49  ;;  %v3064_v47 = vld [vmem:[%s6482_s1 + $0x1058] sm:$0xff]  ;;  %v3015_v48 = vld [vmem:[%s6482_s1 + $0xed0] sm:$0xff] }
  0xdd   : > { %1348 = vmatpush1.msra.mxu0 %v2958_v50  ;;  %3558 = vmatpush3.msra.mxu1 %v2960_v51  ;;  %v3063_v49 = vld [vmem:[%s6482_s1 + $0x1050] sm:$0xff]  ;;  %v3013_v50 = vld [vmem:[%s6482_s1 + $0xec0] sm:$0xff] }
  0xde   : > { %1349 = vmatprep.subr.mxu0 %v2956_v52  ;;  %3559 = vmatprep.subr.mxu1 %v3005_v53  ;;  %v3061_v51 = vld [vmem:[%s6482_s1 + $0x1040] sm:$0xff]  ;;  %v3012_v52 = vld [vmem:[%s6482_s1 + $0xeb8] sm:$0xff] }
  0xdf   : > { %1350 = vmatpush1.msra.mxu0 %v2955_v54  ;;  %3560 = vmatpush3.msra.mxu1 %v2957_v55  ;;  %v3060_v53 = vld [vmem:[%s6482_s1 + $0x1038] sm:$0xff]  ;;  %v3010_v54 = vld [vmem:[%s6482_s1 + $0xea8] sm:$0xff] }
  0xe0   : > { %1351 = vmatprep.subr.mxu0 %v2953_v56  ;;  %3561 = vmatprep.subr.mxu1 %v3002_v57  ;;  %v3058_v55 = vld [vmem:[%s6482_s1 + $0x1028] sm:$0xff]  ;;  %v3009_v56 = vld [vmem:[%s6482_s1 + $0xea0] sm:$0xff] }
  0xe1   : > { %1352 = vmatpush1.msra.mxu0 %v2952_v58  ;;  %3562 = vmatpush3.msra.mxu1 %v2954_v59  ;;  %v3057_v57 = vld [vmem:[%s6482_s1 + $0x1020] sm:$0xff]  ;;  %v3007_v58 = vld [vmem:[%s6482_s1 + $0xe90] sm:$0xff] }
  0xe2   : > { %1353 = vmatprep.subr.mxu0 %v2950_v60  ;;  %3563 = vmatprep.subr.mxu1 %v2999_v61  ;;  %v3055_v59 = vld [vmem:[%s6482_s1 + $0x1010] sm:$0xff]  ;;  %v3006_v60 = vld [vmem:[%s6482_s1 + $0xe88] sm:$0xff] }
  0xe3   : > { %1354 = vmatpush1.msra.mxu0 %v2949_v62  ;;  %3564 = vmatpush3.msra.mxu1 %v2951_v63  ;;  %v3054_v61 = vld [vmem:[%s6482_s1 + $0x1008] sm:$0xff]  ;;  %v3004_v62 = vld [vmem:[%s6482_s1 + $0xe78] sm:$0xff] }
  0xe4   : > { %1355 = vmatprep.subr.mxu0 %v2947_v0  ;;  %3565 = vmatprep.subr.mxu1 %v2996_v2  ;;  %v3052_v63 = vld [vmem:[%s6482_s1 + $0xff8] sm:$0xff]  ;;  %v3003_v0 = vld [vmem:[%s6482_s1 + $0xe70] sm:$0xff] }
  0xe5   : > { %1356 = vmatpush1.msra.mxu0 %v2946_v3  ;;  %3566 = vmatpush3.msra.mxu1 %v2948_v5  ;;  %v3051_v2 = vld [vmem:[%s6482_s1 + $0xff0] sm:$0xff]  ;;  %v3001_v3 = vld [vmem:[%s6482_s1 + $0xe60] sm:$0xff] }
  0xe6   : > { %1357 = vmatprep.subr.mxu0 %v2944_v6  ;;  %3567 = vmatprep.subr.mxu1 %v2993_v7  ;;  %v3049_v5 = vld [vmem:[%s6482_s1 + $0xfe0] sm:$0xff]  ;;  %v3000_v6 = vld [vmem:[%s6482_s1 + $0xe58] sm:$0xff] }
  0xe7   : > { %1358 = vmatpush1.msra.mxu0 %v2943_v8  ;;  %3568 = vmatpush3.msra.mxu1 %v2945_v9  ;;  %v3048_v7 = vld [vmem:[%s6482_s1 + $0xfd8] sm:$0xff]  ;;  %v2998_v8 = vld [vmem:[%s6482_s1 + $0xe48] sm:$0xff] }
  0xe8   : > { %1359 = vmatprep.subr.mxu0 %v2941_v1  ;;  %3569 = vmatprep.subr.mxu1 %v2990_v10  ;;  %v3046_v9 = vld [vmem:[%s6482_s1 + $0xfc8] sm:$0xff]  ;;  %v2997_v1 = vld [vmem:[%s6482_s1 + $0xe40] sm:$0xff] }
  0xe9   : > { %1360 = vmatpush1.msra.mxu0 %v2940_v4  ;;  %3570 = vmatpush3.msra.mxu1 %v2942_v11  ;;  %v3045_v10 = vld [vmem:[%s6482_s1 + $0xfc0] sm:$0xff]  ;;  %v2995_v4 = vld [vmem:[%s6482_s1 + $0xe30] sm:$0xff] }
  0xea   : > { %1361 = vmatprep.subr.mxu0 %v2938_v12  ;;  %3571 = vmatprep.subr.mxu1 %v2987_v13  ;;  %v3043_v11 = vld [vmem:[%s6482_s1 + $0xfb0] sm:$0xff]  ;;  %v2994_v12 = vld [vmem:[%s6482_s1 + $0xe28] sm:$0xff] }
  0xeb   : > { %1362 = vmatpush1.msra.mxu0 %v2937_v14  ;;  %3572 = vmatpush3.msra.mxu1 %v2939_v15  ;;  %v3042_v13 = vld [vmem:[%s6482_s1 + $0xfa8] sm:$0xff]  ;;  %v2992_v14 = vld [vmem:[%s6482_s1 + $0xe18] sm:$0xff] }
  0xec   : > { %1363 = vmatprep.subr.mxu0 %v2935_v16  ;;  %3573 = vmatprep.subr.mxu1 %v2984_v17  ;;  %v3040_v15 = vld [vmem:[%s6482_s1 + $0xf98] sm:$0xff]  ;;  %v2991_v16 = vld [vmem:[%s6482_s1 + $0xe10] sm:$0xff] }
  0xed   : > { %1364 = vmatpush1.msra.mxu0 %v2934_v18  ;;  %3574 = vmatpush3.msra.mxu1 %v2936_v19  ;;  %v3039_v17 = vld [vmem:[%s6482_s1 + $0xf90] sm:$0xff]  ;;  %v2989_v18 = vld [vmem:[%s6482_s1 + $0xe00] sm:$0xff] }
  0xee   : > { %1365 = vmatprep.subr.mxu0 %v2932_v21  ;;  %3575 = vmatprep.subr.mxu1 %v2981_v25  ;;  %v3037_v19 = vld [vmem:[%s6482_s1 + $0xf80] sm:$0xff]  ;;  %v2988_v21 = vld [vmem:[%s6482_s1 + $0xdf8] sm:$0xff]  ;;  %v3034_v25 = vld [vmem:[%s6482_s1 + $0xf68] sm:$0xff] }
  0xef   : > { %1366 = vmatpush1.msra.mxu0 %v2931_v28  ;;  %3576 = vmatpush3.msra.mxu1 %v2933_v29  ;;  %v2983_v28 = vld [vmem:[%s6482_s1 + $0xdd0] sm:$0xff] }
  0xf0   : > { %1367 = vmatprep.subr.mxu0 %v2929_v20  ;;  %3577 = vmatprep.subr.mxu1 %v2978_v30  ;;  %v3031_v29 = vld [vmem:[%s6482_s1 + $0xf50] sm:$0xff]  ;;  %v2982_v20 = vld [vmem:[%s6482_s1 + $0xdc8] sm:$0xff] }
  0xf1   : > { %1368 = vmatpush1.msra.mxu0 %v2928_v32  ;;  %3578 = vmatpush3.msra.mxu1 %v2930_v33  ;;  %v3030_v30 = vld [vmem:[%s6482_s1 + $0xf48] sm:$0xff]  ;;  %v2979_v32 = vld [vmem:[%s6482_s1 + $0xdb0] sm:$0xff] }
  0xf2   : > { %1369 = vmatprep.subr.mxu0 %v2926_v36  ;;  %3579 = vmatprep.subr.mxu1 %v2975_v37  ;;  %v3027_v33 = vld [vmem:[%s6482_s1 + $0xf30] sm:$0xff]  ;;  %v2976_v36 = vld [vmem:[%s6482_s1 + $0xd98] sm:$0xff] }
  0xf3   : > { %1370 = vmatpush1.msra.mxu0 %v2925_v38  ;;  %3580 = vmatpush3.msra.mxu1 %v2927_v39  ;;  %v3024_v37 = vld [vmem:[%s6482_s1 + $0xf18] sm:$0xff]  ;;  %v2974_v38 = vld [vmem:[%s6482_s1 + $0xd88] sm:$0xff] }
  0xf4   : > { %1474 = vmatprep.mubr.f32.mxu1 %v5176_v40  ;;  %1371 = vmatprep.subr.mxu0 %v3019_v41  ;;  %v3022_v39 = vld [vmem:[%s6482_s1 + $0xf08] sm:$0xff]  ;;  %v2973_v41 = vld [vmem:[%s6482_s1 + $0xd80] sm:$0xff] }
  0xf5   : > { %1475 = vmatmul.mubr.f32.vlgmr.msra.gmra.mxu1 %v5182_v42  ;;  %1603 = vmatprep.subr.mxu1 %v3067_v43  ;;  %v3021_v43 = vld [vmem:[%s6482_s1 + $0xf00] sm:$0xff] }
  0xf6   : > { %1372 = vmatpush2.msra.mxu0 %v3018_v44  ;;  %1604 = vmatpush1.msra.mxu1 %v3066_v45  ;;  %v3115_v44 = vld [vmem:[%s6482_s1 + $0x11f0] sm:$0xff]  ;;  %v3116_v45 = vld [vmem:[%s6482_s1 + $0x11f8] sm:$0xff] }
  0xf7   : > { %1373 = vmatprep.subr.mxu0 %v3016_v46  ;;  %1605 = vmatprep.subr.mxu1 %v3064_v47  ;;  %v3114_v46 = vld [vmem:[%s6482_s1 + $0x11e8] sm:$0xff]  ;;  %v3068_v47 = vld [vmem:[%s6482_s1 + $0x1078] sm:$0xff] }
  0xf8   : > { %1374 = vmatpush2.msra.mxu0 %v3015_v48  ;;  %1606 = vmatpush1.msra.mxu1 %v3063_v49  ;;  %v3112_v48 = vld [vmem:[%s6482_s1 + $0x11d8] sm:$0xff]  ;;  %v3113_v49 = vld [vmem:[%s6482_s1 + $0x11e0] sm:$0xff] }
  0xf9   : > { %1375 = vmatprep.subr.mxu0 %v3013_v50  ;;  %1607 = vmatprep.subr.mxu1 %v3061_v51  ;;  %v3065_v50 = vld [vmem:[%s6482_s1 + $0x1060] sm:$0xff]  ;;  %v3110_v51 = vld [vmem:[%s6482_s1 + $0x11c8] sm:$0xff] }
  0xfa   : > { %1376 = vmatpush2.msra.mxu0 %v3012_v52  ;;  %1608 = vmatpush1.msra.mxu1 %v3060_v53  ;;  %v3108_v52 = vld [vmem:[%s6482_s1 + $0x11b8] sm:$0xff]  ;;  %v3062_v53 = vld [vmem:[%s6482_s1 + $0x1048] sm:$0xff] }
  0xfb   : > { %1377 = vmatprep.subr.mxu0 %v3010_v54  ;;  %1609 = vmatprep.subr.mxu1 %v3058_v55  ;;  %v3106_v54 = vld [vmem:[%s6482_s1 + $0x11a8] sm:$0xff]  ;;  %v3107_v55 = vld [vmem:[%s6482_s1 + $0x11b0] sm:$0xff] }
  0xfc   : > { %1378 = vmatpush2.msra.mxu0 %v3009_v56  ;;  %1610 = vmatpush1.msra.mxu1 %v3057_v57  ;;  %v3105_v56 = vld [vmem:[%s6482_s1 + $0x11a0] sm:$0xff]  ;;  %v3059_v57 = vld [vmem:[%s6482_s1 + $0x1030] sm:$0xff] }
  0xfd   : > { %1379 = vmatprep.subr.mxu0 %v3007_v58  ;;  %1611 = vmatprep.subr.mxu1 %v3055_v59  ;;  %v3103_v58 = vld [vmem:[%s6482_s1 + $0x1190] sm:$0xff]  ;;  %v3104_v59 = vld [vmem:[%s6482_s1 + $0x1198] sm:$0xff] }
  0xfe   : > { %1380 = vmatpush2.msra.mxu0 %v3006_v60  ;;  %1612 = vmatpush1.msra.mxu1 %v3054_v61  ;;  %v3102_v60 = vld [vmem:[%s6482_s1 + $0x1188] sm:$0xff]  ;;  %v3056_v61 = vld [vmem:[%s6482_s1 + $0x1018] sm:$0xff] }
  0xff   : > { %1381 = vmatprep.subr.mxu0 %v3004_v62  ;;  %1613 = vmatprep.subr.mxu1 %v3052_v63  ;;  %v3100_v62 = vld [vmem:[%s6482_s1 + $0x1178] sm:$0xff]  ;;  %v3101_v63 = vld [vmem:[%s6482_s1 + $0x1180] sm:$0xff] }
 0x100   : > { %1382 = vmatpush2.msra.mxu0 %v3003_v0  ;;  %1614 = vmatpush1.msra.mxu1 %v3051_v2  ;;  %v3099_v0 = vld [vmem:[%s6482_s1 + $0x1170] sm:$0xff]  ;;  %v3053_v2 = vld [vmem:[%s6482_s1 + $0x1000] sm:$0xff] }
 0x101   : > { %1383 = vmatprep.subr.mxu0 %v3001_v3  ;;  %1615 = vmatprep.subr.mxu1 %v3049_v5  ;;  %v3097_v3 = vld [vmem:[%s6482_s1 + $0x1160] sm:$0xff]  ;;  %v3098_v5 = vld [vmem:[%s6482_s1 + $0x1168] sm:$0xff] }
 0x102   : > { %1384 = vmatpush2.msra.mxu0 %v3000_v6  ;;  %1616 = vmatpush1.msra.mxu1 %v3048_v7  ;;  %v3096_v6 = vld [vmem:[%s6482_s1 + $0x1158] sm:$0xff]  ;;  %v3050_v7 = vld [vmem:[%s6482_s1 + $0xfe8] sm:$0xff] }
 0x103   : > { %1385 = vmatprep.subr.mxu0 %v2998_v8  ;;  %1617 = vmatprep.subr.mxu1 %v3046_v9  ;;  %v3094_v8 = vld [vmem:[%s6482_s1 + $0x1148] sm:$0xff]  ;;  %v3095_v9 = vld [vmem:[%s6482_s1 + $0x1150] sm:$0xff] }
 0x104   : > { %1386 = vmatpush2.msra.mxu0 %v2997_v1  ;;  %1618 = vmatpush1.msra.mxu1 %v3045_v10  ;;  %v3093_v1 = vld [vmem:[%s6482_s1 + $0x1140] sm:$0xff]  ;;  %v3047_v10 = vld [vmem:[%s6482_s1 + $0xfd0] sm:$0xff] }
 0x105   : > { %1387 = vmatprep.subr.mxu0 %v2995_v4  ;;  %1619 = vmatprep.subr.mxu1 %v3043_v11  ;;  %v3091_v4 = vld [vmem:[%s6482_s1 + $0x1130] sm:$0xff]  ;;  %v3092_v11 = vld [vmem:[%s6482_s1 + $0x1138] sm:$0xff] }
 0x106   : > { %1388 = vmatpush2.msra.mxu0 %v2994_v12  ;;  %1620 = vmatpush1.msra.mxu1 %v3042_v13  ;;  %v3090_v12 = vld [vmem:[%s6482_s1 + $0x1128] sm:$0xff]  ;;  %v3044_v13 = vld [vmem:[%s6482_s1 + $0xfb8] sm:$0xff] }
 0x107   : > { %1389 = vmatprep.subr.mxu0 %v2992_v14  ;;  %1621 = vmatprep.subr.mxu1 %v3040_v15  ;;  %v3088_v14 = vld [vmem:[%s6482_s1 + $0x1118] sm:$0xff]  ;;  %v3089_v15 = vld [vmem:[%s6482_s1 + $0x1120] sm:$0xff] }
 0x108   : > { %1390 = vmatpush2.msra.mxu0 %v2991_v16  ;;  %1622 = vmatpush1.msra.mxu1 %v3039_v17  ;;  %v3087_v16 = vld [vmem:[%s6482_s1 + $0x1110] sm:$0xff]  ;;  %v3041_v17 = vld [vmem:[%s6482_s1 + $0xfa0] sm:$0xff] }
 0x109   : > { %1391 = vmatprep.subr.mxu0 %v2989_v18  ;;  %1623 = vmatprep.subr.mxu1 %v3037_v19  ;;  %v3085_v18 = vld [vmem:[%s6482_s1 + $0x1100] sm:$0xff]  ;;  %v3086_v19 = vld [vmem:[%s6482_s1 + $0x1108] sm:$0xff] }
 0x10a   : > { %1392 = vmatpush2.msra.mxu0 %v2988_v21  ;;  %1624 = vmatpush1.msra.mxu1 %v3036_v23  ;;  %v3084_v21 = vld [vmem:[%s6482_s1 + $0x10f8] sm:$0xff]  ;;  %v3038_v23 = vld [vmem:[%s6482_s1 + $0xf88] sm:$0xff] }
 0x10b   : > { %1393 = vmatprep.subr.mxu0 %v2986_v24  ;;  %1625 = vmatprep.subr.mxu1 %v3034_v25  ;;  %v3082_v24 = vld [vmem:[%s6482_s1 + $0x10e8] sm:$0xff]  ;;  %v3083_v25 = vld [vmem:[%s6482_s1 + $0x10f0] sm:$0xff] }
 0x10c   : > { %1394 = vmatpush2.msra.mxu0 %v2985_v26  ;;  %1626 = vmatpush1.msra.mxu1 %v3033_v27  ;;  %v3081_v26 = vld [vmem:[%s6482_s1 + $0x10e0] sm:$0xff]  ;;  %v3035_v27 = vld [vmem:[%s6482_s1 + $0xf70] sm:$0xff] }
 0x10d   : > { %1395 = vmatprep.subr.mxu0 %v2983_v28  ;;  %1627 = vmatprep.subr.mxu1 %v3031_v29  ;;  %v3079_v28 = vld [vmem:[%s6482_s1 + $0x10d0] sm:$0xff]  ;;  %v3080_v29 = vld [vmem:[%s6482_s1 + $0x10d8] sm:$0xff] }
 0x10e   : > { %1396 = vmatpush2.msra.mxu0 %v2982_v20  ;;  %1628 = vmatpush1.msra.mxu1 %v3030_v30  ;;  %v1490_v20 = vld [vmem:[%s3969_s11 + $0x8] sm:$0xc0]  ;;  %v1492_v30 = vld [vmem:[%s3969_s11 + $0x18] sm:$0x3f] }
 0x10f   : > { %1397 = vmatprep.subr.mxu0 %v2980_v22  ;;  %1629 = vmatprep.subr.mxu1 %v3028_v31  ;;  %v3078_v22 = vld [vmem:[%s6482_s1 + $0x10c8] sm:$0xff]  ;;  %v3032_v31 = vld [vmem:[%s6482_s1 + $0xf58] sm:$0xff] }
 0x110   : > { %1398 = vmatpush2.msra.mxu0 %v2979_v32  ;;  %1630 = vmatpush1.msra.mxu1 %v3027_v33  ;;  %v3076_v32 = vld [vmem:[%s6482_s1 + $0x10b8] sm:$0xff]  ;;  %v3077_v33 = vld [vmem:[%s6482_s1 + $0x10c0] sm:$0xff] }
 0x111   : > { %1399 = vmatprep.subr.mxu0 %v2977_v34  ;;  %1631 = vmatprep.subr.mxu1 %v3025_v35  ;;  %v1489_v34 = vld [vmem:[%s3969_s11] sm:$0xc0]  ;;  %v1491_v35 = vld [vmem:[%s3969_s11 + $0x10] sm:$0x3f] }
 0x112   : > { %1400 = vmatpush2.msra.mxu0 %v2976_v36  ;;  %1632 = vmatpush1.msra.mxu1 %v3024_v37  ;;  %v3075_v36 = vld [vmem:[%s6482_s1 + $0x10b0] sm:$0xff]  ;;  %v3029_v37 = vld [vmem:[%s6482_s1 + $0xf40] sm:$0xff] }
 0x113   : > { %1401 = vmatprep.subr.mxu0 %v2974_v38  ;;  %1633 = vmatprep.subr.mxu1 %v3022_v39  ;;  %v1598_v38 = vrot.slane %v1490_v20, 6  ;;  %v1599_v39 = vrot.slane %v1492_v30, 6  ;;  %v3133_v20 = vld [vmem:[%s6482_s1 + $0x1280] sm:$0xff]  ;;  %v3182_v30 = vld [vmem:[%s6482_s1 + $0x1408] sm:$0xff] }
 0x114   : > { %1402 = vmatpush2.msra.mxu0 %v2973_v41  ;;  %1403 = vmatprep.mubr.f32.mxu0 %v5176_v40  ;;  %v3111_v40 = vld [vmem:[%s6482_s1 + $0x11d0] sm:$0xff]  ;;  %v3073_v41 = vld [vmem:[%s6482_s1 + $0x10a0] sm:$0xff] }
 0x115   : > { %1634 = vmatpush1.msra.mxu1 %v3021_v43  ;;  %1404 = vmatmul.mubr.f32.vlgmr.msra.gmra.mxu0 %v5182_v42  ;;  %v3109_v42 = vld [vmem:[%s6482_s1 + $0x11c0] sm:$0xff]  ;;  %v3074_v43 = vld [vmem:[%s6482_s1 + $0x10a8] sm:$0xff] }
 0x116   : > { %1635 = vmatprep.subr.mxu1 %v3115_v44  ;;  %3584 = vmatprep.subr.mxu0 %v3116_v45  ;;  %v3072_v44 = vld [vmem:[%s6482_s1 + $0x1098] sm:$0xff]  ;;  %v3026_v45 = vld [vmem:[%s6482_s1 + $0xf28] sm:$0xff] }
 0x117   : > { %1636 = vmatpush2.msra.mxu1 %v3114_v46  ;;  %3585 = vmatpush3.msra.mxu0 %v3068_v47  ;;  %v1595_v46 = vrot.slane %v1489_v34, 6  ;;  %v1596_v47 = vrot.slane %v1491_v35, 6  ;;  %v3129_v34 = vld [vmem:[%s6482_s1 + $0x1260] sm:$0xff]  ;;  %v3131_v35 = vld [vmem:[%s6482_s1 + $0x1270] sm:$0xff] }
 0x118   : > { %1637 = vmatprep.subr.mxu1 %v3112_v48  ;;  %3586 = vmatprep.subr.mxu0 %v3113_v49  ;;  %v3070_v48 = vld [vmem:[%s6482_s1 + $0x1088] sm:$0xff]  ;;  %v3071_v49 = vld [vmem:[%s6482_s1 + $0x1090] sm:$0xff] }
 0x119   : > { %1638 = vmatpush2.msra.mxu1 %v3111_v40  ;;  %3587 = vmatpush3.msra.mxu0 %v3065_v50  ;;  %v3069_v40 = vld [vmem:[%s6482_s1 + $0x1080] sm:$0xff]  ;;  %v1600_v50 = vsel %vm1594_vm4, %v1598_v38, %v1599_v39  ;;  %v3126_v38 = vld [vmem:[%s6482_s1 + $0x1248] sm:$0xff]  ;;  %v3128_v39 = vld [vmem:[%s6482_s1 + $0x1258] sm:$0xff] }
 0x11a   : > { %1639 = vmatprep.subr.mxu1 %v3109_v42  ;;  %3588 = vmatprep.subr.mxu0 %v3110_v51  ;;  %v3023_v42 = vld [vmem:[%s6482_s1 + $0xf10] sm:$0xff]  ;;  %v1597_v51 = vsel %vm1594_vm4, %v1595_v46, %v1596_v47  ;;  %v3121_v46 = vld [vmem:[%s6482_s1 + $0x1220] sm:$0xff]  ;;  %v3170_v47 = vld [vmem:[%s6482_s1 + $0x13a8] sm:$0xff] }
 0x11b   : > { %1640 = vmatpush2.msra.mxu1 %v3108_v52  ;;  %3589 = vmatpush3.msra.mxu0 %v3062_v53  ;;  %v3163_v52 = vld [vmem:[%s6482_s1 + $0x1370] sm:$0xff]  ;;  %v3212_v53 = vld [vmem:[%s6482_s1 + $0x14f8] sm:$0xff] }
 0x11c   : > { %1641 = vmatprep.subr.mxu1 %v3106_v54  ;;  %3590 = vmatprep.subr.mxu0 %v3107_v55  ;;  %v3162_v54 = vld [vmem:[%s6482_s1 + $0x1368] sm:$0xff]  ;;  %v3164_v55 = vld [vmem:[%s6482_s1 + $0x1378] sm:$0xff] }
 0x11d   : > { %1642 = vmatpush2.msra.mxu1 %v3105_v56  ;;  %3591 = vmatpush3.msra.mxu0 %v3059_v57  ;;  %v3160_v56 = vld [vmem:[%s6482_s1 + $0x1358] sm:$0xff]  ;;  %v3209_v57 = vld [vmem:[%s6482_s1 + $0x14e0] sm:$0xff] }
 0x11e   : > { %1643 = vmatprep.subr.mxu1 %v3103_v58  ;;  %3592 = vmatprep.subr.mxu0 %v3104_v59  ;;  %v3159_v58 = vld [vmem:[%s6482_s1 + $0x1350] sm:$0xff]  ;;  %v3161_v59 = vld [vmem:[%s6482_s1 + $0x1360] sm:$0xff] }
 0x11f   : > { %1644 = vmatpush2.msra.mxu1 %v3102_v60  ;;  %3593 = vmatpush3.msra.mxu0 %v3056_v61  ;;  %v3157_v60 = vld [vmem:[%s6482_s1 + $0x1340] sm:$0xff]  ;;  %v3206_v61 = vld [vmem:[%s6482_s1 + $0x14c8] sm:$0xff] }
 0x120   : > { %1645 = vmatprep.subr.mxu1 %v3100_v62  ;;  %3594 = vmatprep.subr.mxu0 %v3101_v63  ;;  %v3156_v62 = vld [vmem:[%s6482_s1 + $0x1338] sm:$0xff]  ;;  %v3158_v63 = vld [vmem:[%s6482_s1 + $0x1348] sm:$0xff] }
 0x121   : > { %1646 = vmatpush2.msra.mxu1 %v3099_v0  ;;  %3595 = vmatpush3.msra.mxu0 %v3053_v2  ;;  %v3154_v0 = vld [vmem:[%s6482_s1 + $0x1328] sm:$0xff]  ;;  %v3203_v2 = vld [vmem:[%s6482_s1 + $0x14b0] sm:$0xff] }
 0x122   : > { %1647 = vmatprep.subr.mxu1 %v3097_v3  ;;  %3596 = vmatprep.subr.mxu0 %v3098_v5  ;;  %v3153_v3 = vld [vmem:[%s6482_s1 + $0x1320] sm:$0xff]  ;;  %v3155_v5 = vld [vmem:[%s6482_s1 + $0x1330] sm:$0xff] }
 0x123   : > { %1648 = vmatpush2.msra.mxu1 %v3096_v6  ;;  %3597 = vmatpush3.msra.mxu0 %v3050_v7  ;;  %v3151_v6 = vld [vmem:[%s6482_s1 + $0x1310] sm:$0xff]  ;;  %v3200_v7 = vld [vmem:[%s6482_s1 + $0x1498] sm:$0xff] }
 0x124   : > { %1649 = vmatprep.subr.mxu1 %v3094_v8  ;;  %3598 = vmatprep.subr.mxu0 %v3095_v9  ;;  %v3150_v8 = vld [vmem:[%s6482_s1 + $0x1308] sm:$0xff]  ;;  %v3152_v9 = vld [vmem:[%s6482_s1 + $0x1318] sm:$0xff] }
 0x125   : > { %1650 = vmatpush2.msra.mxu1 %v3093_v1  ;;  %3599 = vmatpush3.msra.mxu0 %v3047_v10  ;;  %v3148_v1 = vld [vmem:[%s6482_s1 + $0x12f8] sm:$0xff]  ;;  %v3197_v10 = vld [vmem:[%s6482_s1 + $0x1480] sm:$0xff] }
 0x126   : > { %1651 = vmatprep.subr.mxu1 %v3091_v4  ;;  %3600 = vmatprep.subr.mxu0 %v3092_v11  ;;  %v3147_v4 = vld [vmem:[%s6482_s1 + $0x12f0] sm:$0xff]  ;;  %v3149_v11 = vld [vmem:[%s6482_s1 + $0x1300] sm:$0xff] }
 0x127   : > { %1652 = vmatpush2.msra.mxu1 %v3090_v12  ;;  %3601 = vmatpush3.msra.mxu0 %v3044_v13  ;;  %v3145_v12 = vld [vmem:[%s6482_s1 + $0x12e0] sm:$0xff]  ;;  %v3194_v13 = vld [vmem:[%s6482_s1 + $0x1468] sm:$0xff] }
 0x128   : > { %1653 = vmatprep.subr.mxu1 %v3088_v14  ;;  %3602 = vmatprep.subr.mxu0 %v3089_v15  ;;  %v3144_v14 = vld [vmem:[%s6482_s1 + $0x12d8] sm:$0xff]  ;;  %v3146_v15 = vld [vmem:[%s6482_s1 + $0x12e8] sm:$0xff] }
 0x129   : > { %1654 = vmatpush2.msra.mxu1 %v3087_v16  ;;  %3603 = vmatpush3.msra.mxu0 %v3041_v17  ;;  %v3142_v16 = vld [vmem:[%s6482_s1 + $0x12c8] sm:$0xff]  ;;  %v3191_v17 = vld [vmem:[%s6482_s1 + $0x1450] sm:$0xff] }
 0x12a   : > { %1655 = vmatprep.subr.mxu1 %v3085_v18  ;;  %3604 = vmatprep.subr.mxu0 %v3086_v19  ;;  %v3141_v18 = vld [vmem:[%s6482_s1 + $0x12c0] sm:$0xff]  ;;  %v3143_v19 = vld [vmem:[%s6482_s1 + $0x12d0] sm:$0xff] }
 0x12b   : > { %1656 = vmatpush2.msra.mxu1 %v3084_v21  ;;  %3605 = vmatpush3.msra.mxu0 %v3038_v23  ;;  %v3139_v21 = vld [vmem:[%s6482_s1 + $0x12b0] sm:$0xff]  ;;  %v3188_v23 = vld [vmem:[%s6482_s1 + $0x1438] sm:$0xff] }
 0x12c   : > { %1657 = vmatprep.subr.mxu1 %v3082_v24  ;;  %3606 = vmatprep.subr.mxu0 %v3083_v25  ;;  %v3138_v24 = vld [vmem:[%s6482_s1 + $0x12a8] sm:$0xff]  ;;  %v3140_v25 = vld [vmem:[%s6482_s1 + $0x12b8] sm:$0xff] }
 0x12d   : > { %1658 = vmatpush2.msra.mxu1 %v3081_v26  ;;  %3607 = vmatpush3.msra.mxu0 %v3035_v27  ;;  %v3136_v26 = vld [vmem:[%s6482_s1 + $0x1298] sm:$0xff]  ;;  %v3185_v27 = vld [vmem:[%s6482_s1 + $0x1420] sm:$0xff] }
 0x12e   : > { %1659 = vmatprep.subr.mxu1 %v3079_v28  ;;  %3608 = vmatprep.subr.mxu0 %v3080_v29  ;;  %v3135_v28 = vld [vmem:[%s6482_s1 + $0x1290] sm:$0xff]  ;;  %v3137_v29 = vld [vmem:[%s6482_s1 + $0x12a0] sm:$0xff] }
 0x12f   : > { %1660 = vmatpush2.msra.mxu1 %v3078_v22  ;;  %3609 = vmatpush3.msra.mxu0 %v3032_v31  ;;  %v3132_v22 = vld [vmem:[%s6482_s1 + $0x1278] sm:$0xff]  ;;  %v3134_v31 = vld [vmem:[%s6482_s1 + $0x1288] sm:$0xff] }
 0x130   : > { %1661 = vmatprep.subr.mxu1 %v3076_v32  ;;  %3610 = vmatprep.subr.mxu0 %v3077_v33  ;;  %v3130_v32 = vld [vmem:[%s6482_s1 + $0x1268] sm:$0xff]  ;;  %v3179_v33 = vld [vmem:[%s6482_s1 + $0x13f0] sm:$0xff] }
 0x131   : > { %1662 = vmatpush2.msra.mxu1 %v3075_v36  ;;  %3611 = vmatpush3.msra.mxu0 %v3029_v37  ;;  %v3127_v36 = vld [vmem:[%s6482_s1 + $0x1250] sm:$0xff]  ;;  %v3176_v37 = vld [vmem:[%s6482_s1 + $0x13d8] sm:$0xff] }
 0x132   : > { %1663 = vmatprep.subr.mxu1 %v3073_v41  ;;  %3612 = vmatprep.subr.mxu0 %v3074_v43  ;;  %v3124_v41 = vld [vmem:[%s6482_s1 + $0x1238] sm:$0xff]  ;;  %v3173_v43 = vld [vmem:[%s6482_s1 + $0x13c0] sm:$0xff] }
 0x133   : > { %1664 = vmatpush2.msra.mxu1 %v3072_v44  ;;  %3613 = vmatpush3.msra.mxu0 %v3026_v45  ;;  %v3123_v44 = vld [vmem:[%s6482_s1 + $0x1230] sm:$0xff]  ;;  %v3125_v45 = vld [vmem:[%s6482_s1 + $0x1240] sm:$0xff] }
 0x134   : > { %1665 = vmatprep.subr.mxu1 %v3070_v48  ;;  %3614 = vmatprep.subr.mxu0 %v3071_v49  ;;  %v3120_v48 = vld [vmem:[%s6482_s1 + $0x1218] sm:$0xff]  ;;  %v3122_v49 = vld [vmem:[%s6482_s1 + $0x1228] sm:$0xff] }
 0x135   : > { %1666 = vmatpush2.msra.mxu1 %v3069_v40  ;;  %1667 = vmatprep.mubr.f32.mxu1 %v1600_v50  ;;  %v3118_v40 = vld [vmem:[%s6482_s1 + $0x1208] sm:$0xff] }
 0x136   : > { %3615 = vmatpush3.msra.mxu0 %v3023_v42  ;;  %1738 = vmatprep.mubr.f32.mxu0 %v1600_v50  ;;  %v3167_v50 = vld [vmem:[%s6482_s1 + $0x1390] sm:$0xff]  ;;  %v3117_v42 = vld [vmem:[%s6482_s1 + $0x1200] sm:$0xff] }
 0x137   : > { %1668 = vmatmul.mubr.f32.vlgmr.msra.gmra.mxu1 %v1597_v51  ;;  %1739 = vmatmul.mubr.f32.vlgmr.msra.gmra.mxu0 %v1597_v51  ;;  %v3119_v51 = vld [vmem:[%s6482_s1 + $0x1210] sm:$0xff] }
 0x138   : > { %1852 = vmatprep.subr.mxu0 %v3163_v52  ;;  %3619 = vmatprep.subr.mxu1 %v3212_v53  ;;  %v5768_v52 = vld [vmem:[%s3969_s11 + $0x18] sm:$0xff]  ;;  %v3211_v53 = vld [vmem:[%s6482_s1 + $0x14f0] sm:$0xff] }
 0x139   : > { %1853 = vmatpush1.msra.mxu0 %v3162_v54  ;;  %3620 = vmatpush3.msra.mxu1 %v3164_v55  ;;  %v5774_v54 = vld [vmem:[%s3969_s11 + $0x10] sm:$0xff] }
 0x13a   : > { %1854 = vmatprep.subr.mxu0 %v3160_v56  ;;  %3621 = vmatprep.subr.mxu1 %v3209_v57  ;;  %v3259_v55 = vld [vmem:[%s6482_s1 + $0x1670] sm:$0xff]  ;;  %v3210_v56 = vld [vmem:[%s6482_s1 + $0x14e8] sm:$0xff] }
 0x13b   : > { %1855 = vmatpush1.msra.mxu0 %v3159_v58  ;;  %3622 = vmatpush3.msra.mxu1 %v3161_v59  ;;  %v3258_v57 = vld [vmem:[%s6482_s1 + $0x1668] sm:$0xff]  ;;  %v3208_v58 = vld [vmem:[%s6482_s1 + $0x14d8] sm:$0xff] }
 0x13c   : > { %1856 = vmatprep.subr.mxu0 %v3157_v60  ;;  %3623 = vmatprep.subr.mxu1 %v3206_v61  ;;  %v3256_v59 = vld [vmem:[%s6482_s1 + $0x1658] sm:$0xff]  ;;  %v3207_v60 = vld [vmem:[%s6482_s1 + $0x14d0] sm:$0xff] }
 0x13d   : > { %1857 = vmatpush1.msra.mxu0 %v3156_v62  ;;  %3624 = vmatpush3.msra.mxu1 %v3158_v63  ;;  %v3255_v61 = vld [vmem:[%s6482_s1 + $0x1650] sm:$0xff]  ;;  %v3205_v62 = vld [vmem:[%s6482_s1 + $0x14c0] sm:$0xff] }
 0x13e   : > { %1858 = vmatprep.subr.mxu0 %v3154_v0  ;;  %3625 = vmatprep.subr.mxu1 %v3203_v2  ;;  %v3253_v63 = vld [vmem:[%s6482_s1 + $0x1640] sm:$0xff]  ;;  %v3204_v0 = vld [vmem:[%s6482_s1 + $0x14b8] sm:$0xff] }
 0x13f   : > { %1859 = vmatpush1.msra.mxu0 %v3153_v3  ;;  %3626 = vmatpush3.msra.mxu1 %v3155_v5  ;;  %v3252_v2 = vld [vmem:[%s6482_s1 + $0x1638] sm:$0xff]  ;;  %v3202_v3 = vld [vmem:[%s6482_s1 + $0x14a8] sm:$0xff] }
 0x140   : > { %1860 = vmatprep.subr.mxu0 %v3151_v6  ;;  %3627 = vmatprep.subr.mxu1 %v3200_v7  ;;  %v3250_v5 = vld [vmem:[%s6482_s1 + $0x1628] sm:$0xff]  ;;  %v3201_v6 = vld [vmem:[%s6482_s1 + $0x14a0] sm:$0xff] }
 0x141   : > { %1861 = vmatpush1.msra.mxu0 %v3150_v8  ;;  %3628 = vmatpush3.msra.mxu1 %v3152_v9  ;;  %v3249_v7 = vld [vmem:[%s6482_s1 + $0x1620] sm:$0xff]  ;;  %v3199_v8 = vld [vmem:[%s6482_s1 + $0x1490] sm:$0xff] }
 0x142   : > { %1862 = vmatprep.subr.mxu0 %v3148_v1  ;;  %3629 = vmatprep.subr.mxu1 %v3197_v10  ;;  %v3247_v9 = vld [vmem:[%s6482_s1 + $0x1610] sm:$0xff]  ;;  %v3198_v1 = vld [vmem:[%s6482_s1 + $0x1488] sm:$0xff] }
 0x143   : > { %1863 = vmatpush1.msra.mxu0 %v3147_v4  ;;  %3630 = vmatpush3.msra.mxu1 %v3149_v11  ;;  %v3246_v10 = vld [vmem:[%s6482_s1 + $0x1608] sm:$0xff]  ;;  %v3196_v4 = vld [vmem:[%s6482_s1 + $0x1478] sm:$0xff] }
 0x144   : > { %1864 = vmatprep.subr.mxu0 %v3145_v12  ;;  %3631 = vmatprep.subr.mxu1 %v3194_v13  ;;  %v3244_v11 = vld [vmem:[%s6482_s1 + $0x15f8] sm:$0xff]  ;;  %v3195_v12 = vld [vmem:[%s6482_s1 + $0x1470] sm:$0xff] }
 0x145   : > { %1865 = vmatpush1.msra.mxu0 %v3144_v14  ;;  %3632 = vmatpush3.msra.mxu1 %v3146_v15  ;;  %v3243_v13 = vld [vmem:[%s6482_s1 + $0x15f0] sm:$0xff]  ;;  %v3193_v14 = vld [vmem:[%s6482_s1 + $0x1460] sm:$0xff] }
 0x146   : > { %1866 = vmatprep.subr.mxu0 %v3142_v16  ;;  %3633 = vmatprep.subr.mxu1 %v3191_v17  ;;  %v3241_v15 = vld [vmem:[%s6482_s1 + $0x15e0] sm:$0xff]  ;;  %v3192_v16 = vld [vmem:[%s6482_s1 + $0x1458] sm:$0xff] }
 0x147   : > { %1867 = vmatpush1.msra.mxu0 %v3141_v18  ;;  %3634 = vmatpush3.msra.mxu1 %v3143_v19  ;;  %v3240_v17 = vld [vmem:[%s6482_s1 + $0x15d8] sm:$0xff]  ;;  %v3190_v18 = vld [vmem:[%s6482_s1 + $0x1448] sm:$0xff] }
 0x148   : > { %1868 = vmatprep.subr.mxu0 %v3139_v21  ;;  %3635 = vmatprep.subr.mxu1 %v3188_v23  ;;  %v3238_v19 = vld [vmem:[%s6482_s1 + $0x15c8] sm:$0xff]  ;;  %v3189_v21 = vld [vmem:[%s6482_s1 + $0x1440] sm:$0xff] }
 0x149   : > { %1869 = vmatpush1.msra.mxu0 %v3138_v24  ;;  %3636 = vmatpush3.msra.mxu1 %v3140_v25  ;;  %v3237_v23 = vld [vmem:[%s6482_s1 + $0x15c0] sm:$0xff]  ;;  %v3187_v24 = vld [vmem:[%s6482_s1 + $0x1430] sm:$0xff] }
 0x14a   : > { %1870 = vmatprep.subr.mxu0 %v3136_v26  ;;  %3637 = vmatprep.subr.mxu1 %v3185_v27  ;;  %v3235_v25 = vld [vmem:[%s6482_s1 + $0x15b0] sm:$0xff]  ;;  %v3186_v26 = vld [vmem:[%s6482_s1 + $0x1428] sm:$0xff] }
 0x14b   : > { %1871 = vmatpush1.msra.mxu0 %v3135_v28  ;;  %3638 = vmatpush3.msra.mxu1 %v3137_v29  ;;  %v3234_v27 = vld [vmem:[%s6482_s1 + $0x15a8] sm:$0xff]  ;;  %v3184_v28 = vld [vmem:[%s6482_s1 + $0x1418] sm:$0xff] }
 0x14c   : > { %1872 = vmatprep.subr.mxu0 %v3133_v20  ;;  %3639 = vmatprep.subr.mxu1 %v3182_v30  ;;  %v3232_v29 = vld [vmem:[%s6482_s1 + $0x1598] sm:$0xff]  ;;  %v3183_v20 = vld [vmem:[%s6482_s1 + $0x1410] sm:$0xff] }
 0x14d   : > { %1873 = vmatpush1.msra.mxu0 %v3132_v22  ;;  %3640 = vmatpush3.msra.mxu1 %v3134_v31  ;;  %v3231_v30 = vld [vmem:[%s6482_s1 + $0x1590] sm:$0xff]  ;;  %v3181_v22 = vld [vmem:[%s6482_s1 + $0x1400] sm:$0xff] }
 0x14e   : > { %1874 = vmatprep.subr.mxu0 %v3130_v32  ;;  %3641 = vmatprep.subr.mxu1 %v3179_v33  ;;  %v3229_v31 = vld [vmem:[%s6482_s1 + $0x1580] sm:$0xff]  ;;  %v3180_v32 = vld [vmem:[%s6482_s1 + $0x13f8] sm:$0xff] }
 0x14f   : > { %1875 = vmatpush1.msra.mxu0 %v3129_v34  ;;  %3642 = vmatpush3.msra.mxu1 %v3131_v35  ;;  %v3228_v33 = vld [vmem:[%s6482_s1 + $0x1578] sm:$0xff]  ;;  %v3178_v34 = vld [vmem:[%s6482_s1 + $0x13e8] sm:$0xff] }
 0x150   : > { %1876 = vmatprep.subr.mxu0 %v3127_v36  ;;  %3643 = vmatprep.subr.mxu1 %v3176_v37  ;;  %v3226_v35 = vld [vmem:[%s6482_s1 + $0x1568] sm:$0xff]  ;;  %v3177_v36 = vld [vmem:[%s6482_s1 + $0x13e0] sm:$0xff] }
 0x151   : > { %1877 = vmatpush1.msra.mxu0 %v3126_v38  ;;  %3644 = vmatpush3.msra.mxu1 %v3128_v39  ;;  %v3225_v37 = vld [vmem:[%s6482_s1 + $0x1560] sm:$0xff]  ;;  %v3175_v38 = vld [vmem:[%s6482_s1 + $0x13d0] sm:$0xff] }
 0x152   : > { %1878 = vmatprep.subr.mxu0 %v3124_v41  ;;  %3645 = vmatprep.subr.mxu1 %v3173_v43  ;;  %v3223_v39 = vld [vmem:[%s6482_s1 + $0x1550] sm:$0xff]  ;;  %v3174_v41 = vld [vmem:[%s6482_s1 + $0x13c8] sm:$0xff] }
 0x153   : > { %1879 = vmatpush1.msra.mxu0 %v3123_v44  ;;  %3646 = vmatpush3.msra.mxu1 %v3125_v45  ;;  %v3222_v43 = vld [vmem:[%s6482_s1 + $0x1548] sm:$0xff]  ;;  %v3172_v44 = vld [vmem:[%s6482_s1 + $0x13b8] sm:$0xff] }
 0x154   : > { %1880 = vmatprep.subr.mxu0 %v3121_v46  ;;  %3647 = vmatprep.subr.mxu1 %v3170_v47  ;;  %v3220_v45 = vld [vmem:[%s6482_s1 + $0x1538] sm:$0xff]  ;;  %v3171_v46 = vld [vmem:[%s6482_s1 + $0x13b0] sm:$0xff] }
 0x155   : > { %1881 = vmatpush1.msra.mxu0 %v3120_v48  ;;  %3648 = vmatpush3.msra.mxu1 %v3122_v49  ;;  %v3219_v47 = vld [vmem:[%s6482_s1 + $0x1530] sm:$0xff]  ;;  %v3169_v48 = vld [vmem:[%s6482_s1 + $0x13a0] sm:$0xff] }
 0x156   : > { %1882 = vmatprep.subr.mxu0 %v3118_v40  ;;  %3649 = vmatprep.subr.mxu1 %v3167_v50  ;;  %v3217_v49 = vld [vmem:[%s6482_s1 + $0x1520] sm:$0xff]  ;;  %v3168_v40 = vld [vmem:[%s6482_s1 + $0x1398] sm:$0xff] }
 0x157   : > { %1883 = vmatpush1.msra.mxu0 %v3117_v42  ;;  %3650 = vmatpush3.msra.mxu1 %v3119_v51  ;;  %v3216_v50 = vld [vmem:[%s6482_s1 + $0x1518] sm:$0xff]  ;;  %v3166_v42 = vld [vmem:[%s6482_s1 + $0x1388] sm:$0xff] }
 0x158   : > { %1987 = vmatprep.mubr.f32.mxu1 %v5768_v52  ;;  %1884 = vmatprep.subr.mxu0 %v3211_v53  ;;  %v3214_v51 = vld [vmem:[%s6482_s1 + $0x1508] sm:$0xff]  ;;  %v3165_v53 = vld [vmem:[%s6482_s1 + $0x1380] sm:$0xff] }
 0x159   : > { %1988 = vmatmul.mubr.f32.vlgmr.msra.gmra.mxu1 %v5774_v54  ;;  %2115 = vmatprep.subr.mxu1 %v3259_v55  ;;  %v3213_v55 = vld [vmem:[%s6482_s1 + $0x1500] sm:$0xff] }
 0x15a   : > { %1885 = vmatpush2.msra.mxu0 %v3210_v56  ;;  %2116 = vmatpush1.msra.mxu1 %v3258_v57  ;;  %v3307_v56 = vld [vmem:[%s6482_s1 + $0x17f0] sm:$0xff]  ;;  %v3308_v57 = vld [vmem:[%s6482_s1 + $0x17f8] sm:$0xff] }
 0x15b   : > { %1886 = vmatprep.subr.mxu0 %v3208_v58  ;;  %2117 = vmatprep.subr.mxu1 %v3256_v59  ;;  %v3306_v58 = vld [vmem:[%s6482_s1 + $0x17e8] sm:$0xff]  ;;  %v3260_v59 = vld [vmem:[%s6482_s1 + $0x1678] sm:$0xff] }
 0x15c   : > { %1887 = vmatpush2.msra.mxu0 %v3207_v60  ;;  %2118 = vmatpush1.msra.mxu1 %v3255_v61  ;;  %v3304_v60 = vld [vmem:[%s6482_s1 + $0x17d8] sm:$0xff]  ;;  %v3305_v61 = vld [vmem:[%s6482_s1 + $0x17e0] sm:$0xff] }
 0x15d   : > { %1888 = vmatprep.subr.mxu0 %v3205_v62  ;;  %2119 = vmatprep.subr.mxu1 %v3253_v63  ;;  %v3257_v62 = vld [vmem:[%s6482_s1 + $0x1660] sm:$0xff]  ;;  %v3302_v63 = vld [vmem:[%s6482_s1 + $0x17c8] sm:$0xff] }
 0x15e   : > { %1889 = vmatpush2.msra.mxu0 %v3204_v0  ;;  %2120 = vmatpush1.msra.mxu1 %v3252_v2  ;;  %v3300_v0 = vld [vmem:[%s6482_s1 + $0x17b8] sm:$0xff]  ;;  %v3254_v2 = vld [vmem:[%s6482_s1 + $0x1648] sm:$0xff] }
 0x15f   : > { %1890 = vmatprep.subr.mxu0 %v3202_v3  ;;  %2121 = vmatprep.subr.mxu1 %v3250_v5  ;;  %v3298_v3 = vld [vmem:[%s6482_s1 + $0x17a8] sm:$0xff]  ;;  %v3299_v5 = vld [vmem:[%s6482_s1 + $0x17b0] sm:$0xff] }
 0x160   : > { %1891 = vmatpush2.msra.mxu0 %v3201_v6  ;;  %2122 = vmatpush1.msra.mxu1 %v3249_v7  ;;  %v3297_v6 = vld [vmem:[%s6482_s1 + $0x17a0] sm:$0xff]  ;;  %v3251_v7 = vld [vmem:[%s6482_s1 + $0x1630] sm:$0xff] }
 0x161   : > { %1892 = vmatprep.subr.mxu0 %v3199_v8  ;;  %2123 = vmatprep.subr.mxu1 %v3247_v9  ;;  %v3295_v8 = vld [vmem:[%s6482_s1 + $0x1790] sm:$0xff]  ;;  %v3296_v9 = vld [vmem:[%s6482_s1 + $0x1798] sm:$0xff] }
 0x162   : > { %1893 = vmatpush2.msra.mxu0 %v3198_v1  ;;  %2124 = vmatpush1.msra.mxu1 %v3246_v10  ;;  %v3294_v1 = vld [vmem:[%s6482_s1 + $0x1788] sm:$0xff]  ;;  %v3248_v10 = vld [vmem:[%s6482_s1 + $0x1618] sm:$0xff] }
 0x163   : > { %1894 = vmatprep.subr.mxu0 %v3196_v4  ;;  %2125 = vmatprep.subr.mxu1 %v3244_v11  ;;  %v3292_v4 = vld [vmem:[%s6482_s1 + $0x1778] sm:$0xff]  ;;  %v3293_v11 = vld [vmem:[%s6482_s1 + $0x1780] sm:$0xff] }
 0x164   : > { %1895 = vmatpush2.msra.mxu0 %v3195_v12  ;;  %2126 = vmatpush1.msra.mxu1 %v3243_v13  ;;  %v3291_v12 = vld [vmem:[%s6482_s1 + $0x1770] sm:$0xff]  ;;  %v3245_v13 = vld [vmem:[%s6482_s1 + $0x1600] sm:$0xff] }
 0x165   : > { %1896 = vmatprep.subr.mxu0 %v3193_v14  ;;  %2127 = vmatprep.subr.mxu1 %v3241_v15  ;;  %v3289_v14 = vld [vmem:[%s6482_s1 + $0x1760] sm:$0xff]  ;;  %v3290_v15 = vld [vmem:[%s6482_s1 + $0x1768] sm:$0xff] }
 0x166   : > { %1897 = vmatpush2.msra.mxu0 %v3192_v16  ;;  %2128 = vmatpush1.msra.mxu1 %v3240_v17  ;;  %v3288_v16 = vld [vmem:[%s6482_s1 + $0x1758] sm:$0xff]  ;;  %v3242_v17 = vld [vmem:[%s6482_s1 + $0x15e8] sm:$0xff] }
 0x167   : > { %1898 = vmatprep.subr.mxu0 %v3190_v18  ;;  %2129 = vmatprep.subr.mxu1 %v3238_v19  ;;  %v3286_v18 = vld [vmem:[%s6482_s1 + $0x1748] sm:$0xff]  ;;  %v3287_v19 = vld [vmem:[%s6482_s1 + $0x1750] sm:$0xff] }
 0x168   : > { %1899 = vmatpush2.msra.mxu0 %v3189_v21  ;;  %2130 = vmatpush1.msra.mxu1 %v3237_v23  ;;  %v3285_v21 = vld [vmem:[%s6482_s1 + $0x1740] sm:$0xff]  ;;  %v3239_v23 = vld [vmem:[%s6482_s1 + $0x15d0] sm:$0xff] }
 0x169   : > { %1900 = vmatprep.subr.mxu0 %v3187_v24  ;;  %2131 = vmatprep.subr.mxu1 %v3235_v25  ;;  %v3283_v24 = vld [vmem:[%s6482_s1 + $0x1730] sm:$0xff]  ;;  %v3284_v25 = vld [vmem:[%s6482_s1 + $0x1738] sm:$0xff] }
 0x16a   : > { %1901 = vmatpush2.msra.mxu0 %v3186_v26  ;;  %2132 = vmatpush1.msra.mxu1 %v3234_v27  ;;  %v3282_v26 = vld [vmem:[%s6482_s1 + $0x1728] sm:$0xff]  ;;  %v3236_v27 = vld [vmem:[%s6482_s1 + $0x15b8] sm:$0xff] }
 0x16b   : > { %1902 = vmatprep.subr.mxu0 %v3184_v28  ;;  %2133 = vmatprep.subr.mxu1 %v3232_v29  ;;  %v3280_v28 = vld [vmem:[%s6482_s1 + $0x1718] sm:$0xff]  ;;  %v3281_v29 = vld [vmem:[%s6482_s1 + $0x1720] sm:$0xff] }
 0x16c   : > { %1903 = vmatpush2.msra.mxu0 %v3183_v20  ;;  %2134 = vmatpush1.msra.mxu1 %v3231_v30  ;;  %v3279_v20 = vld [vmem:[%s6482_s1 + $0x1710] sm:$0xff]  ;;  %v3233_v30 = vld [vmem:[%s6482_s1 + $0x15a0] sm:$0xff] }
 0x16d   : > { %1904 = vmatprep.subr.mxu0 %v3181_v22  ;;  %2135 = vmatprep.subr.mxu1 %v3229_v31  ;;  %v3277_v22 = vld [vmem:[%s6482_s1 + $0x1700] sm:$0xff]  ;;  %v3278_v31 = vld [vmem:[%s6482_s1 + $0x1708] sm:$0xff] }
 0x16e   : > { %1905 = vmatpush2.msra.mxu0 %v3180_v32  ;;  %2136 = vmatpush1.msra.mxu1 %v3228_v33  ;;  %v3276_v32 = vld [vmem:[%s6482_s1 + $0x16f8] sm:$0xff]  ;;  %v3230_v33 = vld [vmem:[%s6482_s1 + $0x1588] sm:$0xff] }
 0x16f   : > { %1906 = vmatprep.subr.mxu0 %v3178_v34  ;;  %2137 = vmatprep.subr.mxu1 %v3226_v35  ;;  %v3274_v34 = vld [vmem:[%s6482_s1 + $0x16e8] sm:$0xff]  ;;  %v3275_v35 = vld [vmem:[%s6482_s1 + $0x16f0] sm:$0xff] }
 0x170   : > { %1907 = vmatpush2.msra.mxu0 %v3177_v36  ;;  %2138 = vmatpush1.msra.mxu1 %v3225_v37  ;;  %v3273_v36 = vld [vmem:[%s6482_s1 + $0x16e0] sm:$0xff]  ;;  %v3227_v37 = vld [vmem:[%s6482_s1 + $0x1570] sm:$0xff] }
 0x171   : > { %1908 = vmatprep.subr.mxu0 %v3175_v38  ;;  %2139 = vmatprep.subr.mxu1 %v3223_v39  ;;  %v3271_v38 = vld [vmem:[%s6482_s1 + $0x16d0] sm:$0xff]  ;;  %v3272_v39 = vld [vmem:[%s6482_s1 + $0x16d8] sm:$0xff] }
 0x172   : > { %1909 = vmatpush2.msra.mxu0 %v3174_v41  ;;  %2140 = vmatpush1.msra.mxu1 %v3222_v43  ;;  %v2003_v41 = vld [vmem:[%s3969_s11 + $0x18] sm:$0xfe]  ;;  %v2005_v43 = vld [vmem:[%s3969_s11 + $0x28] sm:$0x1] }
 0x173   : > { %1910 = vmatprep.subr.mxu0 %v3172_v44  ;;  %2141 = vmatprep.subr.mxu1 %v3220_v45  ;;  %v3270_v44 = vld [vmem:[%s6482_s1 + $0x16c8] sm:$0xff]  ;;  %v3224_v45 = vld [vmem:[%s6482_s1 + $0x1558] sm:$0xff] }
 0x174   : > { %1911 = vmatpush2.msra.mxu0 %v3171_v46  ;;  %2142 = vmatpush1.msra.mxu1 %v3219_v47  ;;  %v3268_v46 = vld [vmem:[%s6482_s1 + $0x16b8] sm:$0xff]  ;;  %v3269_v47 = vld [vmem:[%s6482_s1 + $0x16c0] sm:$0xff] }
 0x175   : > { %1912 = vmatprep.subr.mxu0 %v3169_v48  ;;  %2143 = vmatprep.subr.mxu1 %v3217_v49  ;;  %v2002_v48 = vld [vmem:[%s3969_s11 + $0x10] sm:$0xfe]  ;;  %v2004_v49 = vld [vmem:[%s3969_s11 + $0x20] sm:$0x1] }
 0x176   : > { %1913 = vmatpush2.msra.mxu0 %v3168_v40  ;;  %2144 = vmatpush1.msra.mxu1 %v3216_v50  ;;  %v3267_v40 = vld [vmem:[%s6482_s1 + $0x16b0] sm:$0xff]  ;;  %v3221_v50 = vld [vmem:[%s6482_s1 + $0x1540] sm:$0xff] }
 0x177   : > { %1914 = vmatprep.subr.mxu0 %v3166_v42  ;;  %2145 = vmatprep.subr.mxu1 %v3214_v51  ;;  %v2110_v42 = vrot.slane %v2003_v41, 1  ;;  %v2111_v51 = vrot.slane %v2005_v43, 1  ;;  %v3325_v41 = vld [vmem:[%s6482_s1 + $0x1880] sm:$0xff]  ;;  %v3374_v43 = vld [vmem:[%s6482_s1 + $0x1a08] sm:$0xff] }
 0x178   : > { %1915 = vmatpush2.msra.mxu0 %v3165_v53  ;;  %1916 = vmatprep.mubr.f32.mxu0 %v5768_v52  ;;  %v3303_v52 = vld [vmem:[%s6482_s1 + $0x17d0] sm:$0xff]  ;;  %v3265_v53 = vld [vmem:[%s6482_s1 + $0x16a0] sm:$0xff] }
 0x179   : > { %2146 = vmatpush1.msra.mxu1 %v3213_v55  ;;  %1917 = vmatmul.mubr.f32.vlgmr.msra.gmra.mxu0 %v5774_v54  ;;  %v3301_v54 = vld [vmem:[%s6482_s1 + $0x17c0] sm:$0xff]  ;;  %v3266_v55 = vld [vmem:[%s6482_s1 + $0x16a8] sm:$0xff] }
 0x17a   : > { %2147 = vmatprep.subr.mxu1 %v3307_v56  ;;  %3654 = vmatprep.subr.mxu0 %v3308_v57  ;;  %v3264_v56 = vld [vmem:[%s6482_s1 + $0x1698] sm:$0xff]  ;;  %v3218_v57 = vld [vmem:[%s6482_s1 + $0x1528] sm:$0xff] }
 0x17b   : > { %2148 = vmatpush2.msra.mxu1 %v3306_v58  ;;  %3655 = vmatpush3.msra.mxu0 %v3260_v59  ;;  %v2107_v58 = vrot.slane %v2002_v48, 1  ;;  %v2108_v59 = vrot.slane %v2004_v49, 1  ;;  %v3321_v48 = vld [vmem:[%s6482_s1 + $0x1860] sm:$0xff]  ;;  %v3323_v49 = vld [vmem:[%s6482_s1 + $0x1870] sm:$0xff] }
 0x17c   : > { %2149 = vmatprep.subr.mxu1 %v3304_v60  ;;  %3656 = vmatprep.subr.mxu0 %v3305_v61  ;;  %v3262_v60 = vld [vmem:[%s6482_s1 + $0x1688] sm:$0xff]  ;;  %v3263_v61 = vld [vmem:[%s6482_s1 + $0x1690] sm:$0xff] }
 0x17d   : > { %2150 = vmatpush2.msra.mxu1 %v3303_v52  ;;  %3657 = vmatpush3.msra.mxu0 %v3257_v62  ;;  %v3261_v52 = vld [vmem:[%s6482_s1 + $0x1680] sm:$0xff]  ;;  %v2112_v62 = vsel %vm538_vm0, %v2110_v42, %v2111_v51  ;;  %v3318_v42 = vld [vmem:[%s6482_s1 + $0x1848] sm:$0xff]  ;;  %v3320_v51 = vld [vmem:[%s6482_s1 + $0x1858] sm:$0xff] }
 0x17e   : > { %2151 = vmatprep.subr.mxu1 %v3301_v54  ;;  %3658 = vmatprep.subr.mxu0 %v3302_v63  ;;  %v3215_v54 = vld [vmem:[%s6482_s1 + $0x1510] sm:$0xff]  ;;  %v2109_v63 = vsel %vm538_vm0, %v2107_v58, %v2108_v59  ;;  %v2267_v59 = vld [vmem:[%s3969_s11 + $0x20] sm:$0x3] }
 0x17f   : > { %2152 = vmatpush2.msra.mxu1 %v3300_v0  ;;  %3659 = vmatpush3.msra.mxu0 %v3254_v2  ;;  %v3355_v0 = vld [vmem:[%s6482_s1 + $0x1970] sm:$0xff]  ;;  %v3404_v2 = vld [vmem:[%s6482_s1 + $0x1af8] sm:$0xff] }
 0x180   : > { %2153 = vmatprep.subr.mxu1 %v3298_v3  ;;  %3660 = vmatprep.subr.mxu0 %v3299_v5  ;;  %v3354_v3 = vld [vmem:[%s6482_s1 + $0x1968] sm:$0xff]  ;;  %v3356_v5 = vld [vmem:[%s6482_s1 + $0x1978] sm:$0xff]  ;;  %v2265_v58 = vld [vmem:[%s3969_s11 + $0x10] sm:$0xfc] }
 0x181   : > { %2154 = vmatpush2.msra.mxu1 %v3297_v6  ;;  %3661 = vmatpush3.msra.mxu0 %v3251_v7  ;;  %v3352_v6 = vld [vmem:[%s6482_s1 + $0x1958] sm:$0xff]  ;;  %v3401_v7 = vld [vmem:[%s6482_s1 + $0x1ae0] sm:$0xff] }
 0x182   : > { %2155 = vmatprep.subr.mxu1 %v3295_v8  ;;  %3662 = vmatprep.subr.mxu0 %v3296_v9  ;;  %v3351_v8 = vld [vmem:[%s6482_s1 + $0x1950] sm:$0xff]  ;;  %v3353_v9 = vld [vmem:[%s6482_s1 + $0x1960] sm:$0xff] }
 0x183   : > { %2156 = vmatpush2.msra.mxu1 %v3294_v1  ;;  %3663 = vmatpush3.msra.mxu0 %v3248_v10  ;;  %v3349_v1 = vld [vmem:[%s6482_s1 + $0x1940] sm:$0xff]  ;;  %v3398_v10 = vld [vmem:[%s6482_s1 + $0x1ac8] sm:$0xff] }
 0x184   : > { %2157 = vmatprep.subr.mxu1 %v3292_v4  ;;  %3664 = vmatprep.subr.mxu0 %v3293_v11  ;;  %v3348_v4 = vld [vmem:[%s6482_s1 + $0x1938] sm:$0xff]  ;;  %v3350_v11 = vld [vmem:[%s6482_s1 + $0x1948] sm:$0xff] }
 0x185   : > { %2158 = vmatpush2.msra.mxu1 %v3291_v12  ;;  %3665 = vmatpush3.msra.mxu0 %v3245_v13  ;;  %v3346_v12 = vld [vmem:[%s6482_s1 + $0x1928] sm:$0xff]  ;;  %v3395_v13 = vld [vmem:[%s6482_s1 + $0x1ab0] sm:$0xff] }
 0x186   : > { %2159 = vmatprep.subr.mxu1 %v3289_v14  ;;  %3666 = vmatprep.subr.mxu0 %v3290_v15  ;;  %v3345_v14 = vld [vmem:[%s6482_s1 + $0x1920] sm:$0xff]  ;;  %v3347_v15 = vld [vmem:[%s6482_s1 + $0x1930] sm:$0xff] }
 0x187   : > { %2160 = vmatpush2.msra.mxu1 %v3288_v16  ;;  %3667 = vmatpush3.msra.mxu0 %v3242_v17  ;;  %v3343_v16 = vld [vmem:[%s6482_s1 + $0x1910] sm:$0xff]  ;;  %v3392_v17 = vld [vmem:[%s6482_s1 + $0x1a98] sm:$0xff] }
 0x188   : > { %2161 = vmatprep.subr.mxu1 %v3286_v18  ;;  %3668 = vmatprep.subr.mxu0 %v3287_v19  ;;  %v3342_v18 = vld [vmem:[%s6482_s1 + $0x1908] sm:$0xff]  ;;  %v3344_v19 = vld [vmem:[%s6482_s1 + $0x1918] sm:$0xff] }
 0x189   : > { %2162 = vmatpush2.msra.mxu1 %v3285_v21  ;;  %3669 = vmatpush3.msra.mxu0 %v3239_v23  ;;  %v3340_v21 = vld [vmem:[%s6482_s1 + $0x18f8] sm:$0xff]  ;;  %v3389_v23 = vld [vmem:[%s6482_s1 + $0x1a80] sm:$0xff] }
 0x18a   : > { %2163 = vmatprep.subr.mxu1 %v3283_v24  ;;  %3670 = vmatprep.subr.mxu0 %v3284_v25  ;;  %v3339_v24 = vld [vmem:[%s6482_s1 + $0x18f0] sm:$0xff]  ;;  %v3341_v25 = vld [vmem:[%s6482_s1 + $0x1900] sm:$0xff] }
 0x18b   : > { %2164 = vmatpush2.msra.mxu1 %v3282_v26  ;;  %3671 = vmatpush3.msra.mxu0 %v3236_v27  ;;  %v3337_v26 = vld [vmem:[%s6482_s1 + $0x18e0] sm:$0xff]  ;;  %v3386_v27 = vld [vmem:[%s6482_s1 + $0x1a68] sm:$0xff] }
 0x18c   : > { %2165 = vmatprep.subr.mxu1 %v3280_v28  ;;  %3672 = vmatprep.subr.mxu0 %v3281_v29  ;;  %v3336_v28 = vld [vmem:[%s6482_s1 + $0x18d8] sm:$0xff]  ;;  %v3338_v29 = vld [vmem:[%s6482_s1 + $0x18e8] sm:$0xff] }
 0x18d   : > { %2166 = vmatpush2.msra.mxu1 %v3279_v20  ;;  %3673 = vmatpush3.msra.mxu0 %v3233_v30  ;;  %v3334_v20 = vld [vmem:[%s6482_s1 + $0x18c8] sm:$0xff]  ;;  %v3383_v30 = vld [vmem:[%s6482_s1 + $0x1a50] sm:$0xff] }
 0x18e   : > { %2167 = vmatprep.subr.mxu1 %v3277_v22  ;;  %3674 = vmatprep.subr.mxu0 %v3278_v31  ;;  %v3333_v22 = vld [vmem:[%s6482_s1 + $0x18c0] sm:$0xff]  ;;  %v3335_v31 = vld [vmem:[%s6482_s1 + $0x18d0] sm:$0xff] }
 0x18f   : > { %2168 = vmatpush2.msra.mxu1 %v3276_v32  ;;  %3675 = vmatpush3.msra.mxu0 %v3230_v33  ;;  %v3331_v32 = vld [vmem:[%s6482_s1 + $0x18b0] sm:$0xff]  ;;  %v3380_v33 = vld [vmem:[%s6482_s1 + $0x1a38] sm:$0xff] }
 0x190   : > { %2169 = vmatprep.subr.mxu1 %v3274_v34  ;;  %3676 = vmatprep.subr.mxu0 %v3275_v35  ;;  %v3330_v34 = vld [vmem:[%s6482_s1 + $0x18a8] sm:$0xff]  ;;  %v3332_v35 = vld [vmem:[%s6482_s1 + $0x18b8] sm:$0xff] }
 0x191   : > { %2170 = vmatpush2.msra.mxu1 %v3273_v36  ;;  %3677 = vmatpush3.msra.mxu0 %v3227_v37  ;;  %v3328_v36 = vld [vmem:[%s6482_s1 + $0x1898] sm:$0xff]  ;;  %v3377_v37 = vld [vmem:[%s6482_s1 + $0x1a20] sm:$0xff] }
 0x192   : > { %2171 = vmatprep.subr.mxu1 %v3271_v38  ;;  %3678 = vmatprep.subr.mxu0 %v3272_v39  ;;  %v3327_v38 = vld [vmem:[%s6482_s1 + $0x1890] sm:$0xff]  ;;  %v3329_v39 = vld [vmem:[%s6482_s1 + $0x18a0] sm:$0xff] }
 0x193   : > { %2172 = vmatpush2.msra.mxu1 %v3270_v44  ;;  %3679 = vmatpush3.msra.mxu0 %v3224_v45  ;;  %v3324_v44 = vld [vmem:[%s6482_s1 + $0x1878] sm:$0xff]  ;;  %v3326_v45 = vld [vmem:[%s6482_s1 + $0x1888] sm:$0xff] }
 0x194   : > { %2173 = vmatprep.subr.mxu1 %v3268_v46  ;;  %3680 = vmatprep.subr.mxu0 %v3269_v47  ;;  %v3322_v46 = vld [vmem:[%s6482_s1 + $0x1868] sm:$0xff]  ;;  %v3371_v47 = vld [vmem:[%s6482_s1 + $0x19f0] sm:$0xff] }
 0x195   : > { %2174 = vmatpush2.msra.mxu1 %v3267_v40  ;;  %3681 = vmatpush3.msra.mxu0 %v3221_v50  ;;  %v3319_v40 = vld [vmem:[%s6482_s1 + $0x1850] sm:$0xff]  ;;  %v3368_v50 = vld [vmem:[%s6482_s1 + $0x19d8] sm:$0xff] }
 0x196   : > { %2175 = vmatprep.subr.mxu1 %v3265_v53  ;;  %3682 = vmatprep.subr.mxu0 %v3266_v55  ;;  %v3316_v53 = vld [vmem:[%s6482_s1 + $0x1838] sm:$0xff] }
 0x197   : > { %2176 = vmatpush2.msra.mxu1 %v3264_v56  ;;  %3683 = vmatpush3.msra.mxu0 %v3218_v57  ;;  %v2266_v55 = vld [vmem:[%s3969_s11 + $0x18] sm:$0xfc]  ;;  %v2268_v56 = vld [vmem:[%s3969_s11 + $0x28] sm:$0x3]  ;;  %v3365_v57 = vld [vmem:[%s6482_s1 + $0x19c0] sm:$0xff] }
 0x198   : > { %2177 = vmatprep.subr.mxu1 %v3262_v60  ;;  %3684 = vmatprep.subr.mxu0 %v3263_v61  ;;  %v3315_v60 = vld [vmem:[%s6482_s1 + $0x1830] sm:$0xff]  ;;  %v3317_v61 = vld [vmem:[%s6482_s1 + $0x1840] sm:$0xff] }
 0x199   : > { %2178 = vmatpush2.msra.mxu1 %v3261_v52  ;;  %2179 = vmatprep.mubr.f32.mxu1 %v2112_v62  ;;  %v3313_v52 = vld [vmem:[%s6482_s1 + $0x1820] sm:$0xff] }
 0x19a   : > { %3685 = vmatpush3.msra.mxu0 %v3215_v54  ;;  %2250 = vmatprep.mubr.f32.mxu0 %v2112_v62  ;;  %v3362_v62 = vld [vmem:[%s6482_s1 + $0x19a8] sm:$0xff]  ;;  %v2373_v54 = vrot.slane %v2266_v55, 2 }
 0x19b   : > { %2180 = vmatmul.mubr.f32.vlgmr.msra.gmra.mxu1 %v2109_v63  ;;  %2251 = vmatmul.mubr.f32.vlgmr.msra.gmra.mxu0 %v2109_v63  ;;  %v2374_v63 = vrot.slane %v2268_v56, 2 }
 0x19c   : > { %2378 = vmatprep.subr.mxu0 %v3355_v0  ;;  %3689 = vmatprep.subr.mxu1 %v3404_v2  ;;  %v3312_v0 = vld [vmem:[%s6482_s1 + $0x1818] sm:$0xff]  ;;  %v3314_v2 = vld [vmem:[%s6482_s1 + $0x1828] sm:$0xff] }
 0x19d   : > { %2379 = vmatpush1.msra.mxu0 %v3354_v3  ;;  %3690 = vmatpush3.msra.mxu1 %v3356_v5  ;;  %v2370_v3 = vrot.slane %v2265_v58, 2  ;;  %v2371_v5 = vrot.slane %v2267_v59, 2  ;;  %v271_v59 = vlaneseq }
 0x19e   : > { %2380 = vmatprep.subr.mxu0 %v3352_v6  ;;  %3691 = vmatprep.subr.mxu1 %v3401_v7  ;;  %v3310_v6 = vld [vmem:[%s6482_s1 + $0x1808] sm:$0xff]  ;;  %v3359_v7 = vld [vmem:[%s6482_s1 + $0x1990] sm:$0xff] }
 0x19f   : > { %2381 = vmatpush1.msra.mxu0 %v3351_v8  ;;  %3692 = vmatpush3.msra.mxu1 %v3353_v9  ;;  %v3309_v8 = vld [vmem:[%s6482_s1 + $0x1800] sm:$0xff]  ;;  %v3311_v9 = vld [vmem:[%s6482_s1 + $0x1810] sm:$0xff] }
 0x1a0   : > { %2382 = vmatprep.subr.mxu0 %v3349_v1  ;;  %3693 = vmatprep.subr.mxu1 %v3398_v10  ;;  %v2375_v1 = vsel %vm802_vm1, %v2373_v54, %v2374_v63  ;;  %v3403_v10 = vld [vmem:[%s6482_s1 + $0x1af0] sm:$0xff] }
 0x1a1   : > { %2383 = vmatpush1.msra.mxu0 %v3348_v4  ;;  %3694 = vmatpush3.msra.mxu1 %v3350_v11  ;;  %v6368_v4 = vsel %vm802_vm1, %v2370_v3, %v2371_v5  ;;  %v3402_v11 = vld [vmem:[%s6482_s1 + $0x1ae8] sm:$0xff]  ;;  %v269_v3 = vld [vmem:[%s6483_s2] sm:$0x7] }
 0x1a2   : > { %2384 = vmatprep.subr.mxu0 %v3346_v12  ;;  %3695 = vmatprep.subr.mxu1 %v3395_v13  ;;  %v3400_v12 = vld [vmem:[%s6482_s1 + $0x1ad8] sm:$0xff]  ;;  %v3399_v13 = vld [vmem:[%s6482_s1 + $0x1ad0] sm:$0xff] }
 0x1a3   : > { %2385 = vmatpush1.msra.mxu0 %v3345_v14  ;;  %3696 = vmatpush3.msra.mxu1 %v3347_v15  ;;  %v3397_v14 = vld [vmem:[%s6482_s1 + $0x1ac0] sm:$0xff]  ;;  %v3396_v15 = vld [vmem:[%s6482_s1 + $0x1ab8] sm:$0xff] }
 0x1a4   : > { %2386 = vmatprep.subr.mxu0 %v3343_v16  ;;  %3697 = vmatprep.subr.mxu1 %v3392_v17  ;;  %v3394_v16 = vld [vmem:[%s6482_s1 + $0x1aa8] sm:$0xff]  ;;  %v3393_v17 = vld [vmem:[%s6482_s1 + $0x1aa0] sm:$0xff] }
 0x1a5   : > { %2387 = vmatpush1.msra.mxu0 %v3342_v18  ;;  %3698 = vmatpush3.msra.mxu1 %v3344_v19  ;;  %v3391_v18 = vld [vmem:[%s6482_s1 + $0x1a90] sm:$0xff]  ;;  %v3390_v19 = vld [vmem:[%s6482_s1 + $0x1a88] sm:$0xff] }
 0x1a6   : > { %2388 = vmatprep.subr.mxu0 %v3340_v21  ;;  %3699 = vmatprep.subr.mxu1 %v3389_v23  ;;  %v3388_v21 = vld [vmem:[%s6482_s1 + $0x1a78] sm:$0xff]  ;;  %v3387_v23 = vld [vmem:[%s6482_s1 + $0x1a70] sm:$0xff] }
 0x1a7   : > { %2389 = vmatpush1.msra.mxu0 %v3339_v24  ;;  %3700 = vmatpush3.msra.mxu1 %v3341_v25  ;;  %v3385_v24 = vld [vmem:[%s6482_s1 + $0x1a60] sm:$0xff]  ;;  %v3384_v25 = vld [vmem:[%s6482_s1 + $0x1a58] sm:$0xff] }
 0x1a8   : > { %2390 = vmatprep.subr.mxu0 %v3337_v26  ;;  %3701 = vmatprep.subr.mxu1 %v3386_v27  ;;  %v3382_v26 = vld [vmem:[%s6482_s1 + $0x1a48] sm:$0xff]  ;;  %v3381_v27 = vld [vmem:[%s6482_s1 + $0x1a40] sm:$0xff] }
 0x1a9   : > { %2391 = vmatpush1.msra.mxu0 %v3336_v28  ;;  %3702 = vmatpush3.msra.mxu1 %v3338_v29  ;;  %v3379_v28 = vld [vmem:[%s6482_s1 + $0x1a30] sm:$0xff]  ;;  %v3378_v29 = vld [vmem:[%s6482_s1 + $0x1a28] sm:$0xff] }
 0x1aa   : > { %2392 = vmatprep.subr.mxu0 %v3334_v20  ;;  %3703 = vmatprep.subr.mxu1 %v3383_v30  ;;  %v3376_v20 = vld [vmem:[%s6482_s1 + $0x1a18] sm:$0xff]  ;;  %v3375_v30 = vld [vmem:[%s6482_s1 + $0x1a10] sm:$0xff] }
 0x1ab   : > { %2393 = vmatpush1.msra.mxu0 %v3333_v22  ;;  %3704 = vmatpush3.msra.mxu1 %v3335_v31  ;;  %v3373_v22 = vld [vmem:[%s6482_s1 + $0x1a00] sm:$0xff]  ;;  %v3372_v31 = vld [vmem:[%s6482_s1 + $0x19f8] sm:$0xff] }
 0x1ac   : > { %2394 = vmatprep.subr.mxu0 %v3331_v32  ;;  %3705 = vmatprep.subr.mxu1 %v3380_v33  ;;  %v3370_v32 = vld [vmem:[%s6482_s1 + $0x19e8] sm:$0xff]  ;;  %v3369_v33 = vld [vmem:[%s6482_s1 + $0x19e0] sm:$0xff] }
 0x1ad   : > { %2395 = vmatpush1.msra.mxu0 %v3330_v34  ;;  %3706 = vmatpush3.msra.mxu1 %v3332_v35  ;;  %v3367_v34 = vld [vmem:[%s6482_s1 + $0x19d0] sm:$0xff]  ;;  %v3366_v35 = vld [vmem:[%s6482_s1 + $0x19c8] sm:$0xff] }
 0x1ae   : > { %2396 = vmatprep.subr.mxu0 %v3328_v36  ;;  %3707 = vmatprep.subr.mxu1 %v3377_v37  ;;  %v3364_v36 = vld [vmem:[%s6482_s1 + $0x19b8] sm:$0xff]  ;;  %v3363_v37 = vld [vmem:[%s6482_s1 + $0x19b0] sm:$0xff] }
 0x1af   : > { %2397 = vmatpush1.msra.mxu0 %v3327_v38  ;;  %3708 = vmatpush3.msra.mxu1 %v3329_v39  ;;  %v3361_v38 = vld [vmem:[%s6482_s1 + $0x19a0] sm:$0xff]  ;;  %v3360_v39 = vld [vmem:[%s6482_s1 + $0x1998] sm:$0xff] }
 0x1b0   : > { %2398 = vmatprep.subr.mxu0 %v3325_v41  ;;  %3709 = vmatprep.subr.mxu1 %v3374_v43  ;;  %v3358_v41 = vld [vmem:[%s6482_s1 + $0x1988] sm:$0xff]  ;;  %v3357_v43 = vld [vmem:[%s6482_s1 + $0x1980] sm:$0xff] }
 0x1b1   : > { %2399 = vmatpush1.msra.mxu0 %v3324_v44  ;;  %3710 = vmatpush3.msra.mxu1 %v3326_v45  ;;  %v352_v44 = vpop.f32.mrf.mxu0  ;;  %v3441_v45 = vpop.f32.mrf.mxu1 }
 0x1b2   : > { %2400 = vmatprep.subr.mxu0 %v3322_v46  ;;  %3711 = vmatprep.subr.mxu1 %v3371_v47 }
 0x1b3   : > { %2401 = vmatpush1.msra.mxu0 %v3321_v48  ;;  %3712 = vmatpush3.msra.mxu1 %v3323_v49  ;;  %v354_v46 = vpop.f32.mrf.mxu0  ;;  %v3442_v47 = vpop.f32.mrf.mxu1 }
 0x1b4   : > { %2402 = vmatprep.subr.mxu0 %v3319_v40  ;;  %3713 = vmatprep.subr.mxu1 %v3368_v50 }
 0x1b5   : > { %2403 = vmatpush1.msra.mxu0 %v3318_v42  ;;  %3714 = vmatpush3.msra.mxu1 %v3320_v51  ;;  %v3476_v48 = vpop.f32.mrf.mxu0  ;;  %v613_v49 = vpop.f32.mrf.mxu1 }
 0x1b6   : > { %2404 = vmatprep.subr.mxu0 %v3316_v53  ;;  %3715 = vmatprep.subr.mxu1 %v3365_v57 }
 0x1b7   : > { %2405 = vmatpush1.msra.mxu0 %v3315_v60  ;;  %3716 = vmatpush3.msra.mxu1 %v3317_v61  ;;  %v3477_v40 = vpop.f32.mrf.mxu0  ;;  %v615_v50 = vpop.f32.mrf.mxu1 }
 0x1b8   : > { %2406 = vmatprep.subr.mxu0 %v3313_v52  ;;  %3717 = vmatprep.subr.mxu1 %v3362_v62  ;;  %v6465_v62 = vshrl.u32 %v271_v59, 7 }
 0x1b9   : > { %2407 = vmatpush1.msra.mxu0 %v3312_v0  ;;  %3718 = vmatpush3.msra.mxu1 %v3314_v2  ;;  %v877_v42 = vpop.f32.mrf.mxu0  ;;  %v3511_v51 = vpop.f32.mrf.mxu1 }
 0x1ba   : > { %2408 = vmatprep.subr.mxu0 %v3310_v6  ;;  %3719 = vmatprep.subr.mxu1 %v3359_v7  ;;  %v281_v2 = vsub.s32 2, %v6465_v62 }
 0x1bb   : > { %2409 = vmatpush1.msra.mxu0 %v3309_v8  ;;  %3720 = vmatpush3.msra.mxu1 %v3311_v9  ;;  %v879_v53 = vpop.f32.mrf.mxu0  ;;  %v3512_v55 = vpop.f32.mrf.mxu1  ;;  %v3443_v8 = vadd.f32 %v3442_v47, %v3441_v45 }
 0x1bc   : > { %2513 = vmatprep.mubr.f32.mxu1 %v2375_v1  ;;  %2410 = vmatprep.subr.mxu0 %v3403_v10  ;;  %v282_v7 = vrot.slane %v269_v3, %v281_v2  ;;  %v3478_v10 = vadd.f32 %v3477_v40, %v3476_v48 }
 0x1bd   : > { %2514 = vmatmul.mubr.f32.vlgmr.msra.gmra.mxu1 %v6368_v4  ;;  %2411 = vmatpush2.msra.mxu0 %v3402_v11  ;;  %v3546_v56 = vpop.f32.mrf.mxu0  ;;  %v1141_v57 = vpop.f32.mrf.mxu1 }
 0x1be   : > { %2412 = vmatprep.subr.mxu0 %v3400_v12  ;;  %2442 = vmatprep.mubr.f32.mxu0 %v2375_v1  ;;  %v424_v11 = vadd.f32 %v3443_v8, %v282_v7  ;;  %v3513_v12 = vadd.f32 %v3512_v55, %v3511_v51 }
 0x1bf   : > { %2413 = vmatpush2.msra.mxu0 %v3399_v13  ;;  %v3547_v58 = vpop.f32.mrf.mxu0  ;;  %v1143_v60 = vpop.f32.mrf.mxu1 }
 0x1c0   : > { %2414 = vmatprep.subr.mxu0 %v3397_v14  ;;  %v690_v14 = vadd.f32 %v3478_v10, %v424_v11 }
 0x1c1   : > { %2415 = vmatpush2.msra.mxu0 %v3396_v15  ;;  %v3581_v52 = vpop.f32.mrf.mxu1  ;;  %v3548_v15 = vadd.f32 %v3547_v58, %v3546_v56 }
 0x1c2   : > { %2416 = vmatprep.subr.mxu0 %v3394_v16 }
 0x1c3   : > { %2417 = vmatpush2.msra.mxu0 %v3393_v17  ;;  %v3582_v63 = vpop.f32.mrf.mxu1 }
 0x1c4   : > { %2418 = vmatprep.subr.mxu0 %v3391_v18  ;;  %v954_v18 = vadd.f32 %v3513_v12, %v690_v14 }
 0x1c5   : > { %2419 = vmatpush2.msra.mxu0 %v3390_v19  ;;  %v3583_v19 = vadd.f32 %v3582_v63, %v3581_v52 }
 0x1c6   : > { %2420 = vmatprep.subr.mxu0 %v3388_v21 }
 0x1c7   : > { %2421 = vmatpush2.msra.mxu0 %v3387_v23  ;;  %v1218_v23 = vadd.f32 %v3548_v15, %v954_v18 }
 0x1c8   : > { %2422 = vmatprep.subr.mxu0 %v3385_v24 }
 0x1c9   : > { %2423 = vmatpush2.msra.mxu0 %v3384_v25 }
 0x1ca   : > { %2424 = vmatprep.subr.mxu0 %v3382_v26  ;;  %v1482_v26 = vadd.f32 %v3583_v19, %v1218_v23 }
 0x1cb   : > { %2425 = vmatpush2.msra.mxu0 %v3381_v27 }
 0x1cc   : > { %2426 = vmatprep.subr.mxu0 %v3379_v28 }
 0x1cd   : > { %2427 = vmatpush2.msra.mxu0 %v3378_v29 }
 0x1ce   : > { %2428 = vmatprep.subr.mxu0 %v3376_v20 }
 0x1cf   : > { %2429 = vmatpush2.msra.mxu0 %v3375_v30 }
 0x1d0   : > { %2430 = vmatprep.subr.mxu0 %v3373_v22 }
 0x1d1   : > { %2431 = vmatpush2.msra.mxu0 %v3372_v31 }
 0x1d2   : > { %2432 = vmatprep.subr.mxu0 %v3370_v32 }
 0x1d3   : > { %2433 = vmatpush2.msra.mxu0 %v3369_v33 }
 0x1d4   : > { %2434 = vmatprep.subr.mxu0 %v3367_v34 }
 0x1d5   : > { %2435 = vmatpush2.msra.mxu0 %v3366_v35  ;;  %v1405_v61 = vpop.f32.mrf.mxu0  ;;  %v273_v35 = vsub.s32 0, %v6465_v62 }
 0x1d6   : > { %2436 = vmatprep.subr.mxu0 %v3364_v36  ;;  %v277_v36 = vsub.s32 1, %v6465_v62 }
 0x1d7   : > { %2437 = vmatpush2.msra.mxu0 %v3363_v37  ;;  %v1407_v54 = vpop.f32.mrf.mxu0  ;;  %v274_v37 = vrot.slane %v269_v3, %v273_v35 }
 0x1d8   : > { %2438 = vmatprep.subr.mxu0 %v3361_v38  ;;  %v278_v38 = vrot.slane %v269_v3, %v277_v36 }
 0x1d9   : > { %2439 = vmatpush2.msra.mxu0 %v3360_v39  ;;  %v353_v39 = vadd.f32 %v352_v44, %v274_v37  ;;  %v3744_v44 = vmov 1983009808  }
 0x1da   : > { %2440 = vmatprep.subr.mxu0 %v3358_v41  ;;  %v355_v41 = vadd.f32 %v354_v46, %v278_v38  ;;  %v2533_v46 = vunpack.c.l.s4 %v3744_v44 }
 0x1db   : > { %2441 = vmatpush2.msra.mxu0 %v3357_v43  ;;  %v688_v43 = vadd.f32 %v613_v49, %v353_v39 }
 0x1dc   : > { %2443 = vmatmul.mubr.f32.vlgmr.msra.gmra.mxu0 %v6368_v4  ;;  %v689_v45 = vadd.f32 %v615_v50, %v355_v41  ;;  %v2534_v50 = vunpack.c.0.s8 %v2533_v46 }
 0x1dd   : > { %v952_v47 = vadd.f32 %v877_v42, %v688_v43 }
 0x1de   : > { %v953_v48 = vadd.f32 %v879_v53, %v689_v45  ;;  %v2537_v42 = vsub.s32 %v2534_v50, %v6465_v62 }
 0x1df   : > { %v1216_v40 = vadd.f32 %v1141_v57, %v952_v47 }
 0x1e0   : > { %v1217_v51 = vadd.f32 %v1143_v60, %v953_v48 }
 0x1e1   : > { %v1480_v55 = vadd.f32 %v1405_v61, %v1216_v40 }
 0x1e2   : > { %v1481_v56 = vadd.f32 %v1407_v54, %v1217_v51 }
 0x1f7   : > { %v3616_v0 = vpop.f32.mrf.mxu0  ;;  %v1669_v5 = vpop.f32.mrf.mxu1 }
 0x1f8   : > { %v1744_v58 = vadd.f32 %v1669_v5, %v1480_v55 }
 0x1f9   : > { %v3617_v6 = vpop.f32.mrf.mxu0  ;;  %v1671_v9 = vpop.f32.mrf.mxu1 }
 0x1fa   : > { %v3618_v24 = vadd.f32 %v3617_v6, %v3616_v0  ;;  %v1745_v59 = vadd.f32 %v1671_v9, %v1481_v56 }
 0x1fc   : > { %v1746_v29 = vadd.f32 %v3618_v24, %v1482_v26 }
 0x219   : > { %v3651_v4 = vpop.f32.mrf.mxu1 }
 0x21b   : > { %v3652_v16 = vpop.f32.mrf.mxu1 }
 0x21c   : > { %v3653_v27 = vadd.f32 %v3652_v16, %v3651_v4 }
 0x21e   : > { %v1995_v22 = vadd.f32 %v3653_v27, %v1746_v29 }
 0x239   : > { %v1918_v1 = vpop.f32.mrf.mxu0 }
 0x23a   : > { %v1993_v52 = vadd.f32 %v1918_v1, %v1744_v58 }
 0x23b   : > { %v1920_v13 = vpop.f32.mrf.mxu0 }
 0x23c   : > { %v1994_v63 = vadd.f32 %v1920_v13, %v1745_v59 }
 0x25b   : > { %v3686_v17 = vpop.f32.mrf.mxu0  ;;  %v2181_v21 = vpop.f32.mrf.mxu1 }
 0x25c   : > { %v2256_v0 = vadd.f32 %v2181_v21, %v1993_v52 }
 0x25d   : > { %v3687_v25 = vpop.f32.mrf.mxu0  ;;  %v2183_v28 = vpop.f32.mrf.mxu1 }
 0x25e   : > { %v3688_v20 = vadd.f32 %v3687_v25, %v3686_v17  ;;  %v2257_v6 = vadd.f32 %v2183_v28, %v1994_v63 }
 0x260   : > { %v2258_v32 = vadd.f32 %v3688_v20, %v1995_v22 }
 0x27d   : > { %v3721_v30 = vpop.f32.mrf.mxu1 }
 0x27f   : > { %v3722_v31 = vpop.f32.mrf.mxu1 }
 0x280   : > { %v3723_v33 = vadd.f32 %v3722_v31, %v3721_v30 }
 0x282   : > { %v2521_v34 = vadd.f32 %v3723_v33, %v2258_v32 }
 0x284   : > { %2524 = vst [vmem:[#allocation2 + $0x10] sm:$0xff] %v2521_v34 }
 0x28b   : > { %v3735_v53 = vld [vmem:[#allocation2 + $0x14] ss:$0 sps:$4 sm:$0x33]  }
 0x28c   : > { %v2570_v9 = vrot.slane %v3735_v53, %v2537_v42  ;;  %v3405_v4 = vld.sshfl [vmem:[#allocation2 + $0x10] sm:$0x3 pattern:$0x76325410] }
 0x29c   : > { %v2444_v2 = vpop.f32.mrf.mxu0 }
 0x29d   : > { %v2519_v7 = vadd.f32 %v2444_v2, %v2256_v0 }
 0x29e   : > { %v2446_v3 = vpop.f32.mrf.mxu0 }
 0x29f   : > { %2522 = vst [vmem:[#allocation2] sm:$0xff] %v2519_v7  ;;  %v2520_v49 = vadd.f32 %v2446_v3, %v2257_v6 }
 0x2a1   : > { %2523 = vst [vmem:[#allocation2 + $0x8] sm:$0xff] %v2520_v49 }
 0x2a6   : > { %v2525_v57 = vld [vmem:[#allocation2] sm:$0x3]  ;;  %v2549_v60 = vld [vmem:[#allocation2] sm:$0x30] }
 0x2a8   : > { %v2526_v61 = vld [vmem:[#allocation2 + $0x8] sm:$0x3]  ;;  %v2550_v54 = vld [vmem:[#allocation2 + $0x8] sm:$0x30] }
 0x2a9   : > { %v2531_v5 = vcombine.low %v2525_v57, %v2526_v61  ;;  %v2555_v8 = vcombine.high %v2549_v60, %v2550_v54 }
 0x2ab   : > { %v2538_v1 = vrot.slane %v2531_v5, %v2537_v42  ;;  %v2563_v10 = vrot.slane %v2555_v8, %v2537_v42 }
 0x2ad   : > { %v2546_v11 = vcombine.low %v2538_v1, %v3405_v4  ;;  %v2571_v12 = vcombine.low %v2563_v10, %v2570_v9 }
 0x2af   : > { %2548 = vst [vmem:[%s170_s15] sm:$0x3f] %v2546_v11  ;;  %3406 = vst [vmem:[%s170_s15 + $0x6] sm:$0x3f] %v2571_v12 }
 0x2b0 PF: > { %s13_s12 = sadd.s32 1, %s3742_s12  }
 0x2b1   : > { %p10_p4 = scmp.ge.s32.totalorder %s13_s12, 4  }
 0x2b3   :  { %12 = sbr.rel (!%p10_p4) target bundleno = 1 (0x1), region = 71 }

</bundles_post_ra>
